<compile_context>
chip_gen: v6e
topology: v6e:2x2x1
jax: 0.10.0
libtpu: 0.0.40
codegen_flags: <defaults>
</compile_context>

<pallas_src>
import functools
import math

import jax
import jax.numpy as jnp
from jax import lax
from jax.experimental import pallas as pl
from jax.experimental.pallas import tpu as pltpu

_INV_SQRT2 = 0.7071067811865476


# ----------------------------------------------------------------------------
# In-kernel helpers
# ----------------------------------------------------------------------------
def _gelu_exact(x):
    """erf-based GELU (PyTorch nn.GELU default). erf via Abramowitz-Stegun
    7.1.26 polynomial (|err| < 1.5e-7) so it lowers with exp/mul/add only."""
    z = x * _INV_SQRT2
    az = jnp.abs(z)
    t = 1.0 / (1.0 + 0.3275911 * az)
    poly = ((((1.061405429 * t - 1.453152027) * t + 1.421413741) * t
             - 0.284496736) * t + 0.254829592) * t
    erf_abs = 1.0 - poly * jnp.exp(-az * az)
    erf = jnp.where(z < 0.0, -erf_abs, erf_abs)
    return 0.5 * x * (1.0 + erf)


def _as_bf16(x):
    return x if x.dtype == jnp.bfloat16 else x.astype(jnp.bfloat16)


# ----------------------------------------------------------------------------
# Pallas kernels
# ----------------------------------------------------------------------------
def _mm_bias_act_kernel(x_ref, w_ref, b_ref, o_ref, *, act):
    """y = act(x @ w + b); bf16 MXU operands, f32 accumulation/epilogue."""
    y = jnp.dot(_as_bf16(x_ref[...]), w_ref[...],
                preferred_element_type=jnp.float32) + b_ref[...]
    if act == "relu":
        y = jnp.maximum(y, 0.0)
    elif act == "gelu":
        y = _gelu_exact(y)
    o_ref[...] = y.astype(o_ref.dtype)


def _mm_add_ln_kernel(x_ref, w_ref, b_ref, r_ref, g_ref, be_ref, o_ref, *, eps):
    """h = x @ w + b + res; LayerNorm(h) over the last dim (PyTorch semantics)."""
    h = jnp.dot(_as_bf16(x_ref[...]), w_ref[...],
                preferred_element_type=jnp.float32) + b_ref[...] + r_ref[...]
    mean = jnp.mean(h, axis=-1, keepdims=True)
    var = jnp.mean((h - mean) ** 2, axis=-1, keepdims=True)
    hn = (h - mean) * lax.rsqrt(var + eps) * g_ref[...] + be_ref[...]
    o_ref[...] = hn.astype(o_ref.dtype)


def _mm_add_ln_ffn1_kernel(x_ref, wo_ref, bo_ref, r_ref, g_ref, be_ref,
                           w1_ref, b1_ref, hn_ref, f_ref, *, eps):
    """Attention out-proj + residual add + LayerNorm, with FFN-1 (Linear+GELU)
    fused into the epilogue.  Outputs: hn (f32, reused as FFN-2 residual) and
    f = gelu(hn @ w1 + b1) (bf16)."""
    h = jnp.dot(_as_bf16(x_ref[...]), wo_ref[...],
                preferred_element_type=jnp.float32) + bo_ref[...] + r_ref[...]
    mean = jnp.mean(h, axis=-1, keepdims=True)
    var = jnp.mean((h - mean) ** 2, axis=-1, keepdims=True)
    hn = (h - mean) * lax.rsqrt(var + eps) * g_ref[...] + be_ref[...]
    hn_ref[...] = hn
    f = jnp.dot(hn.astype(jnp.bfloat16), w1_ref[...],
                preferred_element_type=jnp.float32) + b1_ref[...]
    f_ref[...] = _gelu_exact(f).astype(f_ref.dtype)


def _attn_kernel(q_ref, k_ref, v_ref, o_ref):
    """Batched heads: (T, L, D) bf16 blocks; scale already folded into Wq."""
    q, k, v = q_ref[...], k_ref[...], v_ref[...]
    s = jnp.einsum("bqd,bkd->bqk", q, k, preferred_element_type=jnp.float32)
    s = s - jnp.max(s, axis=-1, keepdims=True)
    p = jnp.exp(s)
    p = p * pl.reciprocal(jnp.sum(p, axis=-1, keepdims=True), approx=True)
    o = jnp.einsum("bqk,bkd->bqd", p.astype(jnp.bfloat16), v,
                   preferred_element_type=jnp.float32)
    o_ref[...] = o.astype(o_ref.dtype)


def _conv_gate_kernel(h_ref, s_ref, wm_ref, bm_ref, ws_ref, bs_ref, o_ref, *, C):
    """middle_conv(BN,ReLU) + side_conv(BN,ReLU) + add + sigmoid*tanh gate.
    Single (C_in, 2C) dots; gate/filter split on the f32 accumulator."""
    zm = jnp.dot(h_ref[...], wm_ref[...],
                 preferred_element_type=jnp.float32) + bm_ref[...]
    zs = jnp.dot(s_ref[...], ws_ref[...],
                 preferred_element_type=jnp.float32) + bs_ref[...]
    z = jnp.maximum(zm, 0.0) + jnp.maximum(zs, 0.0)         # (tm, 2C)
    gate, filt = z[:, :C], z[:, C:]
    o_ref[...] = (jax.nn.sigmoid(gate) * jnp.tanh(filt)).astype(o_ref.dtype)


def _out_res_kernel(g_ref, x_ref, w_ref, b_ref, o_ref, *, C):
    """out_conv(BN,ReLU) -> one lane-dense (tm, 2C) slab [res | out];
    res = relu-chunk0 + x/sqrt(2), out = relu-chunk1 (per reference module)."""
    z = jnp.maximum(jnp.dot(g_ref[...], w_ref[...],
                            preferred_element_type=jnp.float32) + b_ref[...], 0.0)
    xr = x_ref[...] * _INV_SQRT2
    o_ref[...] = z + jnp.concatenate([xr, jnp.zeros_like(xr)], axis=-1)


# ----------------------------------------------------------------------------
# pallas_call wrappers
# ----------------------------------------------------------------------------
def _cparams():
    # VMEM footprint at <=512-row tiles and C<=128 is a few MiB (incl. double
    # buffering), far below 32 MiB on every generation (v7x physical = 64 MiB).
    return pltpu.CompilerParams(dimension_semantics=("parallel",),
                                vmem_limit_bytes=32 * 1024 * 1024)


def _row_tile(m, cap=512):
    """One large row tile (amortizes the ~0.35us/step overhead and keeps the
    mem-bound epilogues near the HBM roofline); grid = cdiv handles the ragged
    tail, so no exact-divisor search and no artificial tile halving."""
    return min(m, cap)


def mm_bias_act(x, w, b, act="none", out_dtype=jnp.float32):
    M, K = x.shape
    N = w.shape[1]
    tm = _row_tile(M)
    kern = functools.partial(_mm_bias_act_kernel, act=act)
    return pl.pallas_call(
        kern,
        out_shape=jax.ShapeDtypeStruct((M, N), out_dtype),
        grid=(pl.cdiv(M, tm),),
        in_specs=[pl.BlockSpec((tm, K), lambda i: (i, 0)),
                  pl.BlockSpec((K, N), lambda i: (0, 0)),
                  pl.BlockSpec((1, N), lambda i: (0, 0))],
        out_specs=pl.BlockSpec((tm, N), lambda i: (i, 0)),
        compiler_params=_cparams(),
    )(x, w, b.reshape(1, N))


def mm_bias_add_ln(x, w, b, res, gamma, beta, out_dtype=jnp.float32, eps=1e-5):
    M, K = x.shape
    N = w.shape[1]
    tm = _row_tile(M)
    kern = functools.partial(_mm_add_ln_kernel, eps=eps)
    return pl.pallas_call(
        kern,
        out_shape=jax.ShapeDtypeStruct((M, N), out_dtype),
        grid=(pl.cdiv(M, tm),),
        in_specs=[pl.BlockSpec((tm, K), lambda i: (i, 0)),
                  pl.BlockSpec((K, N), lambda i: (0, 0)),
                  pl.BlockSpec((1, N), lambda i: (0, 0)),
                  pl.BlockSpec((tm, N), lambda i: (i, 0)),
                  pl.BlockSpec((1, N), lambda i: (0, 0)),
                  pl.BlockSpec((1, N), lambda i: (0, 0))],
        out_specs=pl.BlockSpec((tm, N), lambda i: (i, 0)),
        compiler_params=_cparams(),
    )(x, w, b.reshape(1, N), res, gamma.reshape(1, N), beta.reshape(1, N))


def mm_out_ln_ffn1(x, wo, bo, res, gamma, beta, w1, b1, eps=1e-5):
    M, K = x.shape
    N = wo.shape[1]
    F = w1.shape[1]
    tm = _row_tile(M)
    kern = functools.partial(_mm_add_ln_ffn1_kernel, eps=eps)
    return pl.pallas_call(
        kern,
        out_shape=(jax.ShapeDtypeStruct((M, N), jnp.float32),
                   jax.ShapeDtypeStruct((M, F), jnp.bfloat16)),
        grid=(pl.cdiv(M, tm),),
        in_specs=[pl.BlockSpec((tm, K), lambda i: (i, 0)),
                  pl.BlockSpec((K, N), lambda i: (0, 0)),
                  pl.BlockSpec((1, N), lambda i: (0, 0)),
                  pl.BlockSpec((tm, N), lambda i: (i, 0)),
                  pl.BlockSpec((1, N), lambda i: (0, 0)),
                  pl.BlockSpec((1, N), lambda i: (0, 0)),
                  pl.BlockSpec((N, F), lambda i: (0, 0)),
                  pl.BlockSpec((1, F), lambda i: (0, 0))],
        out_specs=(pl.BlockSpec((tm, N), lambda i: (i, 0)),
                   pl.BlockSpec((tm, F), lambda i: (i, 0))),
        compiler_params=_cparams(),
    )(x, wo, bo.reshape(1, N), res, gamma.reshape(1, N), beta.reshape(1, N),
      w1, b1.reshape(1, F))


def attention(q, k, v):
    BH, L, D = q.shape
    # Largest head-batch per step; (tb, L, L) f32 scores stay small in VMEM.
    tb = min(BH, 64)
    spec = pl.BlockSpec((tb, L, D), lambda i: (i, 0, 0))
    return pl.pallas_call(
        _attn_kernel,
        out_shape=jax.ShapeDtypeStruct((BH, L, D), jnp.bfloat16),
        grid=(pl.cdiv(BH, tb),),
        in_specs=[spec, spec, spec],
        out_specs=spec,
        compiler_params=_cparams(),
    )(q, k, v)


def fused_conv_gate(h, side, wm, bm, ws, bs):
    M, C = h.shape
    Sd = side.shape[1]
    N2 = wm.shape[1]                        # 2C
    tm = _row_tile(M, cap=256)              # cap: keep wide f32 epilogue live-set small
    kern = functools.partial(_conv_gate_kernel, C=C)
    return pl.pallas_call(
        kern,
        out_shape=jax.ShapeDtypeStruct((M, C), jnp.bfloat16),
        grid=(pl.cdiv(M, tm),),
        in_specs=[pl.BlockSpec((tm, C), lambda i: (i, 0)),
                  pl.BlockSpec((tm, Sd), lambda i: (i, 0)),
                  pl.BlockSpec((C, N2), lambda i: (0, 0)),
                  pl.BlockSpec((1, N2), lambda i: (0, 0)),
                  pl.BlockSpec((Sd, N2), lambda i: (0, 0)),
                  pl.BlockSpec((1, N2), lambda i: (0, 0))],
        out_specs=pl.BlockSpec((tm, C), lambda i: (i, 0)),
        compiler_params=_cparams(),
    )(h, side, wm, bm.reshape(1, N2), ws, bs.reshape(1, N2))


def fused_out_residual(g, x, w, b):
    M, C = x.shape
    N2 = w.shape[1]                          # 2C
    tm = _row_tile(M, cap=256)
    kern = functools.partial(_out_res_kernel, C=C)
    y = pl.pallas_call(
        kern,
        out_shape=jax.ShapeDtypeStruct((M, N2), jnp.float32),
        grid=(pl.cdiv(M, tm),),
        in_specs=[pl.BlockSpec((tm, C), lambda i: (i, 0)),
                  pl.BlockSpec((tm, C), lambda i: (i, 0)),
                  pl.BlockSpec((C, N2), lambda i: (0, 0)),
                  pl.BlockSpec((1, N2), lambda i: (0, 0))],
        out_specs=pl.BlockSpec((tm, N2), lambda i: (i, 0)),
        compiler_params=_cparams(),
    )(g, x, w, b.reshape(1, N2))
    # Free slices; XLA fuses them with the final NCHW transpose.
    return y[:, :C], y[:, C:]


# ----------------------------------------------------------------------------
# Module building blocks (glue in plain JAX, all hot compute in Pallas)
# ----------------------------------------------------------------------------
def transformer_layer(h, p, num_heads, out_dtype=jnp.float32):
    """h: (B, L, C) -> (B, L, C). Mirrors TransformerLayer (eval mode)."""
    B, L, C = h.shape
    D = C // num_heads
    M = B * L
    h2 = h.reshape(M, C)

    # fused QKV (attention scale folded into the Q columns of w_qkv), bf16 out
    qkv = mm_bias_act(h2, p["w_qkv"], p["b_qkv"], act="none",
                      out_dtype=jnp.bfloat16)                        # (M, 3C)
    qkv = qkv.reshape(B, L, 3, num_heads, D).transpose(2, 0, 3, 1, 4)
    qkv = qkv.reshape(3, B * num_heads, L, D)
    o = attention(qkv[0], qkv[1], qkv[2])                            # (BH,L,D) bf16
    o = o.reshape(B, num_heads, L, D).transpose(0, 2, 1, 3).reshape(M, C)

    # out-proj + residual-add + LayerNorm + FFN-1(GELU), fused in one kernel
    h_mh, f = mm_out_ln_ffn1(o, p["wo"], p["bo"], h2,
                             p["ln1_g"], p["ln1_b"], p["w1"], p["b1"])
    # FFN-2 + residual-add + LayerNorm, fused
    out = mm_bias_add_ln(f, p["w2"], p["b2"], h_mh, p["ln2_g"], p["ln2_b"],
                         out_dtype=out_dtype)
    return out.reshape(B, L, C)


def residual_block(x, diff_emb, side_emb, params, cfg):
    B, C, K, L = x.shape
    s_t, s_f = cfg["temp_strips_blocks"], cfg["feat_strips_lenght"]
    heads = cfg["number_heads"]
    p = params

    # channels-last once at entry (also reused for the final residual)
    x_cl = jnp.transpose(x, (0, 2, 3, 1))                            # (B,K,L,C)

    # diffusion-step embedding projection: tiny (B rows) -> plain XLA glue
    d = diff_emb @ p["diff_w"] + p["diff_b"]                         # (B, C)
    h = x_cl + d[:, None, None, :]

    # --- temporal transformer:  'b c k (s l) -> (b s k) l c'
    l_t = L // s_t
    ht = h.reshape(B, K, s_t, l_t, C).transpose(0, 2, 1, 3, 4)
    ht = ht.reshape(B * s_t * K, l_t, C)
    ht = transformer_layer(ht, p["temporal"], heads, out_dtype=jnp.float32)
    h = ht.reshape(B, s_t, K, l_t, C).transpose(0, 2, 1, 3, 4).reshape(B, K, L, C)

    # --- feature transformer:  'b c k (s l) -> (b l) (k s) c'  (out: '(l s)')
    # output only feeds the conv chain as a bf16 matmul operand -> bf16 out.
    l_f = L // s_f
    hf = h.reshape(B, K, s_f, l_f, C).transpose(0, 3, 1, 2, 4)
    hf = hf.reshape(B * l_f, K * s_f, C)
    hf = transformer_layer(hf, p["feature"], heads, out_dtype=jnp.bfloat16)
    h = hf.reshape(B, l_f, K, s_f, C).transpose(0, 2, 1, 3, 4).reshape(B, K, L, C)

    # --- conv / gate / out-conv / residual chain: channels-last 2-D slabs
    M = B * K * L
    h2 = h.reshape(M, C)                                             # bf16
    side2 = jnp.transpose(side_emb, (0, 2, 3, 1)).reshape(M, -1)
    side2 = side2.astype(jnp.bfloat16)
    x2 = x_cl.reshape(M, C)                                          # f32

    g2 = fused_conv_gate(h2, side2, p["mid_w"], p["mid_b"],
                         p["side_w"], p["side_b"])
    res2, out2 = fused_out_residual(g2, x2, p["out_w"], p["out_b"])

    res = res2.reshape(B, K, L, C).transpose(0, 3, 1, 2)
    out = out2.reshape(B, K, L, C).transpose(0, 3, 1, 2)
    return res, out


# ----------------------------------------------------------------------------
# Deterministic parameter init (synthetic; shapes match __init__) + fusion prep
# ----------------------------------------------------------------------------
def init_params(key, model_dim, emb_dim, side_dim):
    keys = iter(jax.random.split(key, 64))

    def lin(fan_in, fan_out):
        w = jax.random.normal(next(keys), (fan_in, fan_out), jnp.float32)
        w = w * (1.0 / math.sqrt(fan_in))
        b = jax.random.normal(next(keys), (fan_out,), jnp.float32) * 0.01
        return w, b

    def transformer(dim):
        t = {}
        for name in ("q", "k", "v", "o"):
            t["w" + name], t["b" + name] = lin(dim, dim)
        t["ln1_g"] = jnp.ones((dim,), jnp.float32)
        t["ln1_b"] = jnp.zeros((dim,), jnp.float32)
        t["w1"], t["b1"] = lin(dim, dim)              # wide_factor = 1
        t["w2"], t["b2"] = lin(dim, dim)
        t["ln2_g"] = jnp.ones((dim,), jnp.float32)
        t["ln2_b"] = jnp.zeros((dim,), jnp.float32)
        return t

    def bn(cout):  # PyTorch BatchNorm1d defaults (eval-mode running stats)
        return {"gamma": jnp.ones((cout,), jnp.float32),
                "beta": jnp.zeros((cout,), jnp.float32),
                "mean": jnp.zeros((cout,), jnp.float32),
                "var": jnp.ones((cout,), jnp.float32)}

    prm = {}
    prm["diff_w"], prm["diff_b"] = lin(emb_dim, model_dim)
    prm["temporal"] = transformer(model_dim)
    prm["feature"] = transformer(model_dim)
    prm["mid_w"], prm["mid_b"] = lin(model_dim, 2 * model_dim)
    prm["mid_bn"] = bn(2 * model_dim)
    prm["out_w"], prm["out_b"] = lin(model_dim, 2 * model_dim)
    prm["out_bn"] = bn(2 * model_dim)
    prm["side_w"], prm["side_b"] = lin(side_dim, 2 * model_dim)
    prm["side_bn"] = bn(2 * model_dim)
    return prm


def prepare_params(raw, model_dim, heads):
    """Fold attention scale / BatchNorm into weights, concat QKV, keep the
    (C_in, 2C) conv weights un-split (merged dots), cast matmul weights bf16."""
    C = model_dim
    scale = 1.0 / math.sqrt(C / heads)

    def prep_tf(t):
        return {
            "w_qkv": jnp.concatenate([t["wq"] * scale, t["wk"], t["wv"]],
                                     axis=1).astype(jnp.bfloat16),
            "b_qkv": jnp.concatenate([t["bq"] * scale, t["bk"], t["bv"]]),
            "wo": t["wo"].astype(jnp.bfloat16), "bo": t["bo"],
            "w1": t["w1"].astype(jnp.bfloat16), "b1": t["b1"],
            "w2": t["w2"].astype(jnp.bfloat16), "b2": t["b2"],
            "ln1_g": t["ln1_g"], "ln1_b": t["ln1_b"],
            "ln2_g": t["ln2_g"], "ln2_b": t["ln2_b"],
        }

    def fold_bn(w, b, bn):
        s = bn["gamma"] * lax.rsqrt(bn["var"] + 1e-5)
        return w * s[None, :], (b - bn["mean"]) * s + bn["beta"]

    out = {"diff_w": raw["diff_w"], "diff_b": raw["diff_b"],
           "temporal": prep_tf(raw["temporal"]),
           "feature": prep_tf(raw["feature"])}

    wm, bm = fold_bn(raw["mid_w"], raw["mid_b"], raw["mid_bn"])
    ws, bs = fold_bn(raw["side_w"], raw["side_b"], raw["side_bn"])
    wo, bo = fold_bn(raw["out_w"], raw["out_b"], raw["out_bn"])
    out.update({
        "mid_w": wm.astype(jnp.bfloat16), "mid_b": bm,
        "side_w": ws.astype(jnp.bfloat16), "side_b": bs,
        "out_w": wo.astype(jnp.bfloat16), "out_b": bo,
    })
    return out


# ----------------------------------------------------------------------------
if __name__ == "__main__":
    # small shapes consistent with the module's forward
    B, MODEL_DIM, K_FEAT, L_TIME = 2, 32, 4, 8
    EMB_DIM, SIDE_DIM = 16, 8
    cfg = {"temp_strips_blocks": 2, "feat_strips_lenght": 2, "number_heads": 4}

    key = jax.random.PRNGKey(0)
    kx, kd, ks, kp = jax.random.split(key, 4)
    x = jax.random.normal(kx, (B, MODEL_DIM, K_FEAT, L_TIME), jnp.float32)
    diff_emb = jax.random.normal(kd, (B, EMB_DIM), jnp.float32)
    side_emb = jax.random.normal(ks, (B, SIDE_DIM, K_FEAT, L_TIME), jnp.float32)

    raw_params = init_params(kp, MODEL_DIM, EMB_DIM, SIDE_DIM)
    params = prepare_params(raw_params, MODEL_DIM, cfg["number_heads"])

    fwd = jax.jit(functools.partial(residual_block, cfg=cfg))
    res, out = fwd(x, diff_emb, side_emb, params)
    jax.block_until_ready((res, out))

    assert res.shape == x.shape and out.shape == x.shape
    assert bool(jnp.all(jnp.isfinite(res))) and bool(jnp.all(jnp.isfinite(out)))
    print("KERNEL_OK")
</pallas_src>

<mosaic_0001>
module attributes {stable_mosaic.version = 11 : i64} {
  func.func @_mm_bias_act_kernel(%arg0: i32, %arg1: memref<64x32xf32, #tpu.memory_space<vmem>>, %arg2: memref<32x96xbf16, #tpu.memory_space<vmem>>, %arg3: memref<1x96xf32, #tpu.memory_space<vmem>>, %arg4: memref<64x96xbf16, #tpu.memory_space<vmem>>) attributes {dimension_semantics = [#tpu.dimension_semantics<parallel>], iteration_bounds = array<i64: 1>, scalar_prefetch = 0 : i64, scratch_operands = 0 : i64, tpu.core_type = #tpu.core_type<tc>, window_params = [{transform_indices = @transform_0, window_bounds = array<i64: 64, 32>}, {pipeline_mode = #tpu.pipeline_mode<synchronous>, transform_indices = @transform_1, window_bounds = array<i64: 32, 96>}, {pipeline_mode = #tpu.pipeline_mode<synchronous>, transform_indices = @transform_2, window_bounds = array<i64: 1, 96>}, {transform_indices = @transform_3, window_bounds = array<i64: 64, 96>}]} {
    %c0 = arith.constant 0 : index
    %c0_0 = arith.constant 0 : index
    %0 = vector.load %arg1[%c0, %c0_0] : memref<64x32xf32, #tpu.memory_space<vmem>>, vector<64x32xf32>
    %1 = arith.truncf %0 : vector<64x32xf32> to vector<64x32xbf16>
    %c0_1 = arith.constant 0 : index
    %c0_2 = arith.constant 0 : index
    %2 = vector.load %arg2[%c0_1, %c0_2] : memref<32x96xbf16, #tpu.memory_space<vmem>>, vector<32x96xbf16>
    %cst = arith.constant dense<0.000000e+00> : vector<64x96xf32>
    %3 = tpu.matmul %1, %2, %cst {dimension_numbers = #tpu.dot_dimension_numbers<[1], [0], [0], [1], [0, 0, 1, 1], [], []>} : vector<64x32xbf16>, vector<32x96xbf16>, vector<64x96xf32> -> vector<64x96xf32>
    %c0_3 = arith.constant 0 : index
    %c0_4 = arith.constant 0 : index
    %4 = vector.load %arg3[%c0_3, %c0_4] : memref<1x96xf32, #tpu.memory_space<vmem>>, vector<1x96xf32>
    %5 = vector.broadcast %4 : vector<1x96xf32> to vector<64x96xf32>
    %6 = arith.addf %3, %5 : vector<64x96xf32>
    %7 = arith.truncf %6 : vector<64x96xf32> to vector<64x96xbf16>
    %c0_5 = arith.constant 0 : index
    %c0_6 = arith.constant 0 : index
    %8 = vector.load %arg4[%c0_5, %c0_6] : memref<64x96xbf16, #tpu.memory_space<vmem>>, vector<64x96xbf16>
    tpu.vector_store %arg4[%c0_5, %c0_6], %7 {strides = array<i32>} : memref<64x96xbf16, #tpu.memory_space<vmem>>, vector<64x96xbf16>,
    return
  }
  func.func @transform_0(%arg0: i32) -> (i32, i32) {
    %c0_i32 = arith.constant 0 : i32
    %c0_i32_0 = arith.constant 0 : i32
    return %arg0, %c0_i32 : i32, i32
  }
  func.func @transform_1(%arg0: i32) -> (i32, i32) {
    %c0_i32 = arith.constant 0 : i32
    %c0_i32_0 = arith.constant 0 : i32
    %c0_i32_1 = arith.constant 0 : i32
    return %c0_i32, %c0_i32_0 : i32, i32
  }
  func.func @transform_2(%arg0: i32) -> (i32, i32) {
    %c0_i32 = arith.constant 0 : i32
    %c0_i32_0 = arith.constant 0 : i32
    %c0_i32_1 = arith.constant 0 : i32
    return %c0_i32, %c0_i32_0 : i32, i32
  }
  func.func @transform_3(%arg0: i32) -> (i32, i32) {
    %c0_i32 = arith.constant 0 : i32
    %c0_i32_0 = arith.constant 0 : i32
    return %arg0, %c0_i32 : i32, i32
  }
}

module attributes {stable_mosaic.version = 11 : i64} {
  func.func @_attn_kernel(%arg0: i32, %arg1: memref<64x4x8xbf16, #tpu.memory_space<vmem>>, %arg2: memref<64x4x8xbf16, #tpu.memory_space<vmem>>, %arg3: memref<64x4x8xbf16, #tpu.memory_space<vmem>>, %arg4: memref<64x4x8xbf16, #tpu.memory_space<vmem>>) attributes {dimension_semantics = [#tpu.dimension_semantics<parallel>], iteration_bounds = array<i64: 1>, scalar_prefetch = 0 : i64, scratch_operands = 0 : i64, tpu.core_type = #tpu.core_type<tc>, window_params = [{transform_indices = @transform_0, window_bounds = array<i64: 64, 4, 8>}, {transform_indices = @transform_1, window_bounds = array<i64: 64, 4, 8>}, {transform_indices = @transform_2, window_bounds = array<i64: 64, 4, 8>}, {transform_indices = @transform_3, window_bounds = array<i64: 64, 4, 8>}]} {
    %c0 = arith.constant 0 : index
    %c0_0 = arith.constant 0 : index
    %c0_1 = arith.constant 0 : index
    %0 = vector.load %arg1[%c0, %c0_0, %c0_1] : memref<64x4x8xbf16, #tpu.memory_space<vmem>>, vector<64x4x8xbf16>
    %c0_2 = arith.constant 0 : index
    %c0_3 = arith.constant 0 : index
    %c0_4 = arith.constant 0 : index
    %1 = vector.load %arg2[%c0_2, %c0_3, %c0_4] : memref<64x4x8xbf16, #tpu.memory_space<vmem>>, vector<64x4x8xbf16>
    %c0_5 = arith.constant 0 : index
    %c0_6 = arith.constant 0 : index
    %c0_7 = arith.constant 0 : index
    %2 = vector.load %arg3[%c0_5, %c0_6, %c0_7] : memref<64x4x8xbf16, #tpu.memory_space<vmem>>, vector<64x4x8xbf16>
    "tpu.trace_start"() <{level = 10 : i32, message = "bqd,bkd->bqk"}> : () -> ()
    %cst = arith.constant dense<0.000000e+00> : vector<64x4x4xf32>
    %3 = tpu.matmul %0, %1, %cst {dimension_numbers = #tpu.dot_dimension_numbers<[2], [2], [1], [1], [0, 0, 0, 1, 1, 1], [0], [0]>} : vector<64x4x8xbf16>, vector<64x4x8xbf16>, vector<64x4x4xf32> -> vector<64x4x4xf32>
    "tpu.trace_stop"() : () -> ()
    %cst_8 = arith.constant dense<0xFF800000> : vector<64x4xf32>
    %4 = vector.multi_reduction <maximumf>, %3, %cst_8 [2] : vector<64x4x4xf32> to vector<64x4xf32>
    %5 = vector.shape_cast %4 : vector<64x4xf32> to vector<64x4x1xf32>
    %6 = vector.broadcast %5 : vector<64x4x1xf32> to vector<64x4x4xf32>
    %7 = arith.subf %3, %6 : vector<64x4x4xf32>
    %8 = math.exp %7 : vector<64x4x4xf32>
    %cst_9 = arith.constant dense<0.000000e+00> : vector<64x4xf32>
    %9 = vector.multi_reduction <add>, %8, %cst_9 [2] : vector<64x4x4xf32> to vector<64x4xf32>
    %10 = vector.shape_cast %9 : vector<64x4xf32> to vector<64x4x1xf32>
    %11 = tpu.reciprocal %10 {approx = true} : vector<64x4x1xf32> -> vector<64x4x1xf32>
    %12 = vector.broadcast %11 : vector<64x4x1xf32> to vector<64x4x4xf32>
    %13 = arith.mulf %8, %12 : vector<64x4x4xf32>
    %14 = arith.truncf %13 : vector<64x4x4xf32> to vector<64x4x4xbf16>
    "tpu.trace_start"() <{level = 10 : i32, message = "bqk,bkd->bqd"}> : () -> ()
    %cst_10 = arith.constant dense<0.000000e+00> : vector<64x4x8xf32>
    %15 = tpu.matmul %14, %2, %cst_10 {dimension_numbers = #tpu.dot_dimension_numbers<[2], [1], [1], [2], [0, 0, 0, 1, 1, 2], [0], [0]>} : vector<64x4x4xbf16>, vector<64x4x8xbf16>, vector<64x4x8xf32> -> vector<64x4x8xf32>
    "tpu.trace_stop"() : () -> ()
    %16 = arith.truncf %15 : vector<64x4x8xf32> to vector<64x4x8xbf16>
    %c0_11 = arith.constant 0 : index
    %c0_12 = arith.constant 0 : index
    %c0_13 = arith.constant 0 : index
    %17 = vector.load %arg4[%c0_11, %c0_12, %c0_13] : memref<64x4x8xbf16, #tpu.memory_space<vmem>>, vector<64x4x8xbf16>
    tpu.vector_store %arg4[%c0_11, %c0_12, %c0_13], %16 {strides = array<i32>} : memref<64x4x8xbf16, #tpu.memory_space<vmem>>, vector<64x4x8xbf16>,
    return
  }
  func.func @transform_0(%arg0: i32) -> (i32, i32, i32) {
    %c0_i32 = arith.constant 0 : i32
    %c0_i32_0 = arith.constant 0 : i32
    %c0_i32_1 = arith.constant 0 : i32
    return %arg0, %c0_i32, %c0_i32_0 : i32, i32, i32
  }
  func.func @transform_1(%arg0: i32) -> (i32, i32, i32) {
    %c0_i32 = arith.constant 0 : i32
    %c0_i32_0 = arith.constant 0 : i32
    %c0_i32_1 = arith.constant 0 : i32
    return %arg0, %c0_i32, %c0_i32_0 : i32, i32, i32
  }
  func.func @transform_2(%arg0: i32) -> (i32, i32, i32) {
    %c0_i32 = arith.constant 0 : i32
    %c0_i32_0 = arith.constant 0 : i32
    %c0_i32_1 = arith.constant 0 : i32
    return %arg0, %c0_i32, %c0_i32_0 : i32, i32, i32
  }
  func.func @transform_3(%arg0: i32) -> (i32, i32, i32) {
    %c0_i32 = arith.constant 0 : i32
    %c0_i32_0 = arith.constant 0 : i32
    %c0_i32_1 = arith.constant 0 : i32
    return %arg0, %c0_i32, %c0_i32_0 : i32, i32, i32
  }
}

module attributes {stable_mosaic.version = 11 : i64} {
  func.func @_mm_add_ln_ffn1_kernel(%arg0: i32, %arg1: memref<64x32xbf16, #tpu.memory_space<vmem>>, %arg2: memref<32x32xbf16, #tpu.memory_space<vmem>>, %arg3: memref<1x32xf32, #tpu.memory_space<vmem>>, %arg4: memref<64x32xf32, #tpu.memory_space<vmem>>, %arg5: memref<1x32xf32, #tpu.memory_space<vmem>>, %arg6: memref<1x32xf32, #tpu.memory_space<vmem>>, %arg7: memref<32x32xbf16, #tpu.memory_space<vmem>>, %arg8: memref<1x32xf32, #tpu.memory_space<vmem>>, %arg9: memref<64x32xf32, #tpu.memory_space<vmem>>, %arg10: memref<64x32xbf16, #tpu.memory_space<vmem>>) attributes {dimension_semantics = [#tpu.dimension_semantics<parallel>], iteration_bounds = array<i64: 1>, scalar_prefetch = 0 : i64, scratch_operands = 0 : i64, tpu.core_type = #tpu.core_type<tc>, window_params = [{transform_indices = @transform_0, window_bounds = array<i64: 64, 32>}, {pipeline_mode = #tpu.pipeline_mode<synchronous>, transform_indices = @transform_1, window_bounds = array<i64: 32, 32>}, {pipeline_mode = #tpu.pipeline_mode<synchronous>, transform_indices = @transform_2, window_bounds = array<i64: 1, 32>}, {transform_indices = @transform_3, window_bounds = array<i64: 64, 32>}, {pipeline_mode = #tpu.pipeline_mode<synchronous>, transform_indices = @transform_4, window_bounds = array<i64: 1, 32>}, {pipeline_mode = #tpu.pipeline_mode<synchronous>, transform_indices = @transform_5, window_bounds = array<i64: 1, 32>}, {pipeline_mode = #tpu.pipeline_mode<synchronous>, transform_indices = @transform_6, window_bounds = array<i64: 32, 32>}, {pipeline_mode = #tpu.pipeline_mode<synchronous>, transform_indices = @transform_7, window_bounds = array<i64: 1, 32>}, {transform_indices = @transform_8, window_bounds = array<i64: 64, 32>}, {transform_indices = @transform_9, window_bounds = array<i64: 64, 32>}]} {
    %c0 = arith.constant 0 : index
    %c0_0 = arith.constant 0 : index
    %0 = vector.load %arg1[%c0, %c0_0] : memref<64x32xbf16, #tpu.memory_space<vmem>>, vector<64x32xbf16>
    %c0_1 = arith.constant 0 : index
    %c0_2 = arith.constant 0 : index
    %1 = vector.load %arg2[%c0_1, %c0_2] : memref<32x32xbf16, #tpu.memory_space<vmem>>, vector<32x32xbf16>
    %cst = arith.constant dense<0.000000e+00> : vector<64x32xf32>
    %2 = tpu.matmul %0, %1, %cst {dimension_numbers = #tpu.dot_dimension_numbers<[1], [0], [0], [1], [0, 0, 1, 1], [], []>} : vector<64x32xbf16>, vector<32x32xbf16>, vector<64x32xf32> -> vector<64x32xf32>
    %c0_3 = arith.constant 0 : index
    %c0_4 = arith.constant 0 : index
    %3 = vector.load %arg3[%c0_3, %c0_4] : memref<1x32xf32, #tpu.memory_space<vmem>>, vector<1x32xf32>
    %4 = vector.broadcast %3 : vector<1x32xf32> to vector<64x32xf32>
    %5 = arith.addf %2, %4 : vector<64x32xf32>
    %c0_5 = arith.constant 0 : index
    %c0_6 = arith.constant 0 : index
    %6 = vector.load %arg4[%c0_5, %c0_6] : memref<64x32xf32, #tpu.memory_space<vmem>>, vector<64x32xf32>
    %7 = arith.addf %5, %6 : vector<64x32xf32>
    %cst_7 = arith.constant dense<0.000000e+00> : vector<64xf32>
    %8 = vector.multi_reduction <add>, %7, %cst_7 [1] : vector<64x32xf32> to vector<64xf32>
    %9 = vector.shape_cast %8 : vector<64xf32> to vector<64x1xf32>
    %cst_8 = arith.constant 3.200000e+01 : f32
    %10 = vector.broadcast %cst_8 : f32 to vector<64x1xf32>
    %11 = arith.divf %9, %10 : vector<64x1xf32>
    %12 = vector.broadcast %11 : vector<64x1xf32> to vector<64x32xf32>
    %13 = arith.subf %7, %12 : vector<64x32xf32>
    %14 = arith.mulf %13, %13 : vector<64x32xf32>
    %cst_9 = arith.constant dense<0.000000e+00> : vector<64xf32>
    %15 = vector.multi_reduction <add>, %14, %cst_9 [1] : vector<64x32xf32> to vector<64xf32>
    %16 = vector.shape_cast %15 : vector<64xf32> to vector<64x1xf32>
    %cst_10 = arith.constant 3.200000e+01 : f32
    %17 = vector.broadcast %cst_10 : f32 to vector<64x1xf32>
    %18 = arith.divf %16, %17 : vector<64x1xf32>
    %19 = vector.broadcast %11 : vector<64x1xf32> to vector<64x32xf32>
    %20 = arith.subf %7, %19 : vector<64x32xf32>
    %cst_11 = arith.constant 9.99999974E-6 : f32
    %21 = vector.broadcast %cst_11 : f32 to vector<64x1xf32>
    %22 = arith.addf %18, %21 : vector<64x1xf32>
    %23 = math.rsqrt %22 : vector<64x1xf32>
    %24 = vector.broadcast %23 : vector<64x1xf32> to vector<64x32xf32>
    %25 = arith.mulf %20, %24 : vector<64x32xf32>
    %c0_12 = arith.constant 0 : index
    %c0_13 = arith.constant 0 : index
    %26 = vector.load %arg5[%c0_12, %c0_13] : memref<1x32xf32, #tpu.memory_space<vmem>>, vector<1x32xf32>
    %27 = vector.broadcast %26 : vector<1x32xf32> to vector<64x32xf32>
    %28 = arith.mulf %25, %27 : vector<64x32xf32>
    %c0_14 = arith.constant 0 : index
    %c0_15 = arith.constant 0 : index
    %29 = vector.load %arg6[%c0_14, %c0_15] : memref<1x32xf32, #tpu.memory_space<vmem>>, vector<1x32xf32>
    %30 = vector.broadcast %29 : vector<1x32xf32> to vector<64x32xf32>
    %31 = arith.addf %28, %30 : vector<64x32xf32>
    %c0_16 = arith.constant 0 : index
    %c0_17 = arith.constant 0 : index
    %32 = vector.load %arg9[%c0_16, %c0_17] : memref<64x32xf32, #tpu.memory_space<vmem>>, vector<64x32xf32>
    tpu.vector_store %arg9[%c0_16, %c0_17], %31 {strides = array<i32>} : memref<64x32xf32, #tpu.memory_space<vmem>>, vector<64x32xf32>,
    %33 = arith.truncf %31 : vector<64x32xf32> to vector<64x32xbf16>
    %c0_18 = arith.constant 0 : index
    %c0_19 = arith.constant 0 : index
    %34 = vector.load %arg7[%c0_18, %c0_19] : memref<32x32xbf16, #tpu.memory_space<vmem>>, vector<32x32xbf16>
    %cst_20 = arith.constant dense<0.000000e+00> : vector<64x32xf32>
    %35 = tpu.matmul %33, %34, %cst_20 {dimension_numbers = #tpu.dot_dimension_numbers<[1], [0], [0], [1], [0, 0, 1, 1], [], []>} : vector<64x32xbf16>, vector<32x32xbf16>, vector<64x32xf32> -> vector<64x32xf32>
    %c0_21 = arith.constant 0 : index
    %c0_22 = arith.constant 0 : index
    %36 = vector.load %arg8[%c0_21, %c0_22] : memref<1x32xf32, #tpu.memory_space<vmem>>, vector<1x32xf32>
    %37 = vector.broadcast %36 : vector<1x32xf32> to vector<64x32xf32>
    %38 = arith.addf %35, %37 : vector<64x32xf32>
    %cst_23 = arith.constant 0.707106769 : f32
    %39 = vector.broadcast %cst_23 : f32 to vector<64x32xf32>
    %40 = arith.mulf %38, %39 : vector<64x32xf32>
    %41 = math.absf %40 : vector<64x32xf32>
    %cst_24 = arith.constant 0.327591091 : f32
    %42 = vector.broadcast %cst_24 : f32 to vector<64x32xf32>
    %43 = arith.mulf %42, %41 : vector<64x32xf32>
    %cst_25 = arith.constant 1.000000e+00 : f32
    %44 = vector.broadcast %cst_25 : f32 to vector<64x32xf32>
    %45 = arith.addf %44, %43 : vector<64x32xf32>
    %cst_26 = arith.constant 1.000000e+00 : f32
    %46 = vector.broadcast %cst_26 : f32 to vector<64x32xf32>
    %47 = arith.divf %46, %45 : vector<64x32xf32>
    %cst_27 = arith.constant 1.06140542 : f32
    %48 = vector.broadcast %cst_27 : f32 to vector<64x32xf32>
    %49 = arith.mulf %48, %47 : vector<64x32xf32>
    %cst_28 = arith.constant 1.45315206 : f32
    %50 = vector.broadcast %cst_28 : f32 to vector<64x32xf32>
    %51 = arith.subf %49, %50 : vector<64x32xf32>
    %52 = arith.mulf %51, %47 : vector<64x32xf32>
    %cst_29 = arith.constant 1.42141378 : f32
    %53 = vector.broadcast %cst_29 : f32 to vector<64x32xf32>
    %54 = arith.addf %52, %53 : vector<64x32xf32>
    %55 = arith.mulf %54, %47 : vector<64x32xf32>
    %cst_30 = arith.constant 0.284496725 : f32
    %56 = vector.broadcast %cst_30 : f32 to vector<64x32xf32>
    %57 = arith.subf %55, %56 : vector<64x32xf32>
    %58 = arith.mulf %57, %47 : vector<64x32xf32>
    %cst_31 = arith.constant 0.254829586 : f32
    %59 = vector.broadcast %cst_31 : f32 to vector<64x32xf32>
    %60 = arith.addf %58, %59 : vector<64x32xf32>
    %61 = arith.mulf %60, %47 : vector<64x32xf32>
    %cst_32 = arith.constant 0.000000e+00 : f32
    %62 = vector.broadcast %cst_32 : f32 to vector<64x32xf32>
    %63 = arith.subf %62, %41 : vector<64x32xf32>
    %64 = arith.mulf %63, %41 : vector<64x32xf32>
    %65 = math.exp %64 : vector<64x32xf32>
    %66 = arith.mulf %61, %65 : vector<64x32xf32>
    %cst_33 = arith.constant 1.000000e+00 : f32
    %67 = vector.broadcast %cst_33 : f32 to vector<64x32xf32>
    %68 = arith.subf %67, %66 : vector<64x32xf32>
    %cst_34 = arith.constant 0.000000e+00 : f32
    %69 = vector.broadcast %cst_34 : f32 to vector<64x32xf32>
    %70 = arith.cmpf olt, %40, %69 : vector<64x32xf32>
    %cst_35 = arith.constant 0.000000e+00 : f32
    %71 = vector.broadcast %cst_35 : f32 to vector<64x32xf32>
    %72 = arith.subf %71, %68 : vector<64x32xf32>
    %73 = arith.select %70, %72, %68 : vector<64x32xi1>, vector<64x32xf32>
    %cst_36 = arith.constant 5.000000e-01 : f32
    %74 = vector.broadcast %cst_36 : f32 to vector<64x32xf32>
    %75 = arith.mulf %74, %38 : vector<64x32xf32>
    %cst_37 = arith.constant 1.000000e+00 : f32
    %76 = vector.broadcast %cst_37 : f32 to vector<64x32xf32>
    %77 = arith.addf %76, %73 : vector<64x32xf32>
    %78 = arith.mulf %75, %77 : vector<64x32xf32>
    %79 = arith.truncf %78 : vector<64x32xf32> to vector<64x32xbf16>
    %c0_38 = arith.constant 0 : index
    %c0_39 = arith.constant 0 : index
    %80 = vector.load %arg10[%c0_38, %c0_39] : memref<64x32xbf16, #tpu.memory_space<vmem>>, vector<64x32xbf16>
    tpu.vector_store %arg10[%c0_38, %c0_39], %79 {strides = array<i32>} : memref<64x32xbf16, #tpu.memory_space<vmem>>, vector<64x32xbf16>,
    return
  }
  func.func @transform_0(%arg0: i32) -> (i32, i32) {
    %c0_i32 = arith.constant 0 : i32
    %c0_i32_0 = arith.constant 0 : i32
    return %arg0, %c0_i32 : i32, i32
  }
  func.func @transform_1(%arg0: i32) -> (i32, i32) {
    %c0_i32 = arith.constant 0 : i32
    %c0_i32_0 = arith.constant 0 : i32
    %c0_i32_1 = arith.constant 0 : i32
    return %c0_i32, %c0_i32_0 : i32, i32
  }
  func.func @transform_2(%arg0: i32) -> (i32, i32) {
    %c0_i32 = arith.constant 0 : i32
    %c0_i32_0 = arith.constant 0 : i32
    %c0_i32_1 = arith.constant 0 : i32
    return %c0_i32, %c0_i32_0 : i32, i32
  }
  func.func @transform_3(%arg0: i32) -> (i32, i32) {
    %c0_i32 = arith.constant 0 : i32
    %c0_i32_0 = arith.constant 0 : i32
    return %arg0, %c0_i32 : i32, i32
  }
  func.func @transform_4(%arg0: i32) -> (i32, i32) {
    %c0_i32 = arith.constant 0 : i32
    %c0_i32_0 = arith.constant 0 : i32
    %c0_i32_1 = arith.constant 0 : i32
    return %c0_i32, %c0_i32_0 : i32, i32
  }
  func.func @transform_5(%arg0: i32) -> (i32, i32) {
    %c0_i32 = arith.constant 0 : i32
    %c0_i32_0 = arith.constant 0 : i32
    %c0_i32_1 = arith.constant 0 : i32
    return %c0_i32, %c0_i32_0 : i32, i32
  }
  func.func @transform_6(%arg0: i32) -> (i32, i32) {
    %c0_i32 = arith.constant 0 : i32
    %c0_i32_0 = arith.constant 0 : i32
    %c0_i32_1 = arith.constant 0 : i32
    return %c0_i32, %c0_i32_0 : i32, i32
  }
  func.func @transform_7(%arg0: i32) -> (i32, i32) {
    %c0_i32 = arith.constant 0 : i32
    %c0_i32_0 = arith.constant 0 : i32
    %c0_i32_1 = arith.constant 0 : i32
    return %c0_i32, %c0_i32_0 : i32, i32
  }
  func.func @transform_8(%arg0: i32) -> (i32, i32) {
    %c0_i32 = arith.constant 0 : i32
    %c0_i32_0 = arith.constant 0 : i32
    return %arg0, %c0_i32 : i32, i32
  }
  func.func @transform_9(%arg0: i32) -> (i32, i32) {
    %c0_i32 = arith.constant 0 : i32
    %c0_i32_0 = arith.constant 0 : i32
    return %arg0, %c0_i32 : i32, i32
  }
}

module attributes {stable_mosaic.version = 11 : i64} {
  func.func @_mm_add_ln_kernel(%arg0: i32, %arg1: memref<64x32xbf16, #tpu.memory_space<vmem>>, %arg2: memref<32x32xbf16, #tpu.memory_space<vmem>>, %arg3: memref<1x32xf32, #tpu.memory_space<vmem>>, %arg4: memref<64x32xf32, #tpu.memory_space<vmem>>, %arg5: memref<1x32xf32, #tpu.memory_space<vmem>>, %arg6: memref<1x32xf32, #tpu.memory_space<vmem>>, %arg7: memref<64x32xf32, #tpu.memory_space<vmem>>) attributes {dimension_semantics = [#tpu.dimension_semantics<parallel>], iteration_bounds = array<i64: 1>, scalar_prefetch = 0 : i64, scratch_operands = 0 : i64, tpu.core_type = #tpu.core_type<tc>, window_params = [{transform_indices = @transform_0, window_bounds = array<i64: 64, 32>}, {pipeline_mode = #tpu.pipeline_mode<synchronous>, transform_indices = @transform_1, window_bounds = array<i64: 32, 32>}, {pipeline_mode = #tpu.pipeline_mode<synchronous>, transform_indices = @transform_2, window_bounds = array<i64: 1, 32>}, {transform_indices = @transform_3, window_bounds = array<i64: 64, 32>}, {pipeline_mode = #tpu.pipeline_mode<synchronous>, transform_indices = @transform_4, window_bounds = array<i64: 1, 32>}, {pipeline_mode = #tpu.pipeline_mode<synchronous>, transform_indices = @transform_5, window_bounds = array<i64: 1, 32>}, {transform_indices = @transform_6, window_bounds = array<i64: 64, 32>}]} {
    %c0 = arith.constant 0 : index
    %c0_0 = arith.constant 0 : index
    %0 = vector.load %arg1[%c0, %c0_0] : memref<64x32xbf16, #tpu.memory_space<vmem>>, vector<64x32xbf16>
    %c0_1 = arith.constant 0 : index
    %c0_2 = arith.constant 0 : index
    %1 = vector.load %arg2[%c0_1, %c0_2] : memref<32x32xbf16, #tpu.memory_space<vmem>>, vector<32x32xbf16>
    %cst = arith.constant dense<0.000000e+00> : vector<64x32xf32>
    %2 = tpu.matmul %0, %1, %cst {dimension_numbers = #tpu.dot_dimension_numbers<[1], [0], [0], [1], [0, 0, 1, 1], [], []>} : vector<64x32xbf16>, vector<32x32xbf16>, vector<64x32xf32> -> vector<64x32xf32>
    %c0_3 = arith.constant 0 : index
    %c0_4 = arith.constant 0 : index
    %3 = vector.load %arg3[%c0_3, %c0_4] : memref<1x32xf32, #tpu.memory_space<vmem>>, vector<1x32xf32>
    %4 = vector.broadcast %3 : vector<1x32xf32> to vector<64x32xf32>
    %5 = arith.addf %2, %4 : vector<64x32xf32>
    %c0_5 = arith.constant 0 : index
    %c0_6 = arith.constant 0 : index
    %6 = vector.load %arg4[%c0_5, %c0_6] : memref<64x32xf32, #tpu.memory_space<vmem>>, vector<64x32xf32>
    %7 = arith.addf %5, %6 : vector<64x32xf32>
    %cst_7 = arith.constant dense<0.000000e+00> : vector<64xf32>
    %8 = vector.multi_reduction <add>, %7, %cst_7 [1] : vector<64x32xf32> to vector<64xf32>
    %9 = vector.shape_cast %8 : vector<64xf32> to vector<64x1xf32>
    %cst_8 = arith.constant 3.200000e+01 : f32
    %10 = vector.broadcast %cst_8 : f32 to vector<64x1xf32>
    %11 = arith.divf %9, %10 : vector<64x1xf32>
    %12 = vector.broadcast %11 : vector<64x1xf32> to vector<64x32xf32>
    %13 = arith.subf %7, %12 : vector<64x32xf32>
    %14 = arith.mulf %13, %13 : vector<64x32xf32>
    %cst_9 = arith.constant dense<0.000000e+00> : vector<64xf32>
    %15 = vector.multi_reduction <add>, %14, %cst_9 [1] : vector<64x32xf32> to vector<64xf32>
    %16 = vector.shape_cast %15 : vector<64xf32> to vector<64x1xf32>
    %cst_10 = arith.constant 3.200000e+01 : f32
    %17 = vector.broadcast %cst_10 : f32 to vector<64x1xf32>
    %18 = arith.divf %16, %17 : vector<64x1xf32>
    %19 = vector.broadcast %11 : vector<64x1xf32> to vector<64x32xf32>
    %20 = arith.subf %7, %19 : vector<64x32xf32>
    %cst_11 = arith.constant 9.99999974E-6 : f32
    %21 = vector.broadcast %cst_11 : f32 to vector<64x1xf32>
    %22 = arith.addf %18, %21 : vector<64x1xf32>
    %23 = math.rsqrt %22 : vector<64x1xf32>
    %24 = vector.broadcast %23 : vector<64x1xf32> to vector<64x32xf32>
    %25 = arith.mulf %20, %24 : vector<64x32xf32>
    %c0_12 = arith.constant 0 : index
    %c0_13 = arith.constant 0 : index
    %26 = vector.load %arg5[%c0_12, %c0_13] : memref<1x32xf32, #tpu.memory_space<vmem>>, vector<1x32xf32>
    %27 = vector.broadcast %26 : vector<1x32xf32> to vector<64x32xf32>
    %28 = arith.mulf %25, %27 : vector<64x32xf32>
    %c0_14 = arith.constant 0 : index
    %c0_15 = arith.constant 0 : index
    %29 = vector.load %arg6[%c0_14, %c0_15] : memref<1x32xf32, #tpu.memory_space<vmem>>, vector<1x32xf32>
    %30 = vector.broadcast %29 : vector<1x32xf32> to vector<64x32xf32>
    %31 = arith.addf %28, %30 : vector<64x32xf32>
    %c0_16 = arith.constant 0 : index
    %c0_17 = arith.constant 0 : index
    %32 = vector.load %arg7[%c0_16, %c0_17] : memref<64x32xf32, #tpu.memory_space<vmem>>, vector<64x32xf32>
    tpu.vector_store %arg7[%c0_16, %c0_17], %31 {strides = array<i32>} : memref<64x32xf32, #tpu.memory_space<vmem>>, vector<64x32xf32>,
    return
  }
  func.func @transform_0(%arg0: i32) -> (i32, i32) {
    %c0_i32 = arith.constant 0 : i32
    %c0_i32_0 = arith.constant 0 : i32
    return %arg0, %c0_i32 : i32, i32
  }
  func.func @transform_1(%arg0: i32) -> (i32, i32) {
    %c0_i32 = arith.constant 0 : i32
    %c0_i32_0 = arith.constant 0 : i32
    %c0_i32_1 = arith.constant 0 : i32
    return %c0_i32, %c0_i32_0 : i32, i32
  }
  func.func @transform_2(%arg0: i32) -> (i32, i32) {
    %c0_i32 = arith.constant 0 : i32
    %c0_i32_0 = arith.constant 0 : i32
    %c0_i32_1 = arith.constant 0 : i32
    return %c0_i32, %c0_i32_0 : i32, i32
  }
  func.func @transform_3(%arg0: i32) -> (i32, i32) {
    %c0_i32 = arith.constant 0 : i32
    %c0_i32_0 = arith.constant 0 : i32
    return %arg0, %c0_i32 : i32, i32
  }
  func.func @transform_4(%arg0: i32) -> (i32, i32) {
    %c0_i32 = arith.constant 0 : i32
    %c0_i32_0 = arith.constant 0 : i32
    %c0_i32_1 = arith.constant 0 : i32
    return %c0_i32, %c0_i32_0 : i32, i32
  }
  func.func @transform_5(%arg0: i32) -> (i32, i32) {
    %c0_i32 = arith.constant 0 : i32
    %c0_i32_0 = arith.constant 0 : i32
    %c0_i32_1 = arith.constant 0 : i32
    return %c0_i32, %c0_i32_0 : i32, i32
  }
  func.func @transform_6(%arg0: i32) -> (i32, i32) {
    %c0_i32 = arith.constant 0 : i32
    %c0_i32_0 = arith.constant 0 : i32
    return %arg0, %c0_i32 : i32, i32
  }
}

module attributes {stable_mosaic.version = 11 : i64} {
  func.func @_attn_kernel(%arg0: i32, %arg1: memref<32x8x8xbf16, #tpu.memory_space<vmem>>, %arg2: memref<32x8x8xbf16, #tpu.memory_space<vmem>>, %arg3: memref<32x8x8xbf16, #tpu.memory_space<vmem>>, %arg4: memref<32x8x8xbf16, #tpu.memory_space<vmem>>) attributes {dimension_semantics = [#tpu.dimension_semantics<parallel>], iteration_bounds = array<i64: 1>, scalar_prefetch = 0 : i64, scratch_operands = 0 : i64, tpu.core_type = #tpu.core_type<tc>, window_params = [{transform_indices = @transform_0, window_bounds = array<i64: 32, 8, 8>}, {transform_indices = @transform_1, window_bounds = array<i64: 32, 8, 8>}, {transform_indices = @transform_2, window_bounds = array<i64: 32, 8, 8>}, {transform_indices = @transform_3, window_bounds = array<i64: 32, 8, 8>}]} {
    %c0 = arith.constant 0 : index
    %c0_0 = arith.constant 0 : index
    %c0_1 = arith.constant 0 : index
    %0 = vector.load %arg1[%c0, %c0_0, %c0_1] : memref<32x8x8xbf16, #tpu.memory_space<vmem>>, vector<32x8x8xbf16>
    %c0_2 = arith.constant 0 : index
    %c0_3 = arith.constant 0 : index
    %c0_4 = arith.constant 0 : index
    %1 = vector.load %arg2[%c0_2, %c0_3, %c0_4] : memref<32x8x8xbf16, #tpu.memory_space<vmem>>, vector<32x8x8xbf16>
    %c0_5 = arith.constant 0 : index
    %c0_6 = arith.constant 0 : index
    %c0_7 = arith.constant 0 : index
    %2 = vector.load %arg3[%c0_5, %c0_6, %c0_7] : memref<32x8x8xbf16, #tpu.memory_space<vmem>>, vector<32x8x8xbf16>
    "tpu.trace_start"() <{level = 10 : i32, message = "bqd,bkd->bqk"}> : () -> ()
    %cst = arith.constant dense<0.000000e+00> : vector<32x8x8xf32>
    %3 = tpu.matmul %0, %1, %cst {dimension_numbers = #tpu.dot_dimension_numbers<[2], [2], [1], [1], [0, 0, 0, 1, 1, 1], [0], [0]>} : vector<32x8x8xbf16>, vector<32x8x8xbf16>, vector<32x8x8xf32> -> vector<32x8x8xf32>
    "tpu.trace_stop"() : () -> ()
    %cst_8 = arith.constant dense<0xFF800000> : vector<32x8xf32>
    %4 = vector.multi_reduction <maximumf>, %3, %cst_8 [2] : vector<32x8x8xf32> to vector<32x8xf32>
    %5 = vector.shape_cast %4 : vector<32x8xf32> to vector<32x8x1xf32>
    %6 = vector.broadcast %5 : vector<32x8x1xf32> to vector<32x8x8xf32>
    %7 = arith.subf %3, %6 : vector<32x8x8xf32>
    %8 = math.exp %7 : vector<32x8x8xf32>
    %cst_9 = arith.constant dense<0.000000e+00> : vector<32x8xf32>
    %9 = vector.multi_reduction <add>, %8, %cst_9 [2] : vector<32x8x8xf32> to vector<32x8xf32>
    %10 = vector.shape_cast %9 : vector<32x8xf32> to vector<32x8x1xf32>
    %11 = tpu.reciprocal %10 {approx = true} : vector<32x8x1xf32> -> vector<32x8x1xf32>
    %12 = vector.broadcast %11 : vector<32x8x1xf32> to vector<32x8x8xf32>
    %13 = arith.mulf %8, %12 : vector<32x8x8xf32>
    %14 = arith.truncf %13 : vector<32x8x8xf32> to vector<32x8x8xbf16>
    "tpu.trace_start"() <{level = 10 : i32, message = "bqk,bkd->bqd"}> : () -> ()
    %cst_10 = arith.constant dense<0.000000e+00> : vector<32x8x8xf32>
    %15 = tpu.matmul %14, %2, %cst_10 {dimension_numbers = #tpu.dot_dimension_numbers<[2], [1], [1], [2], [0, 0, 0, 1, 1, 2], [0], [0]>} : vector<32x8x8xbf16>, vector<32x8x8xbf16>, vector<32x8x8xf32> -> vector<32x8x8xf32>
    "tpu.trace_stop"() : () -> ()
    %16 = arith.truncf %15 : vector<32x8x8xf32> to vector<32x8x8xbf16>
    %c0_11 = arith.constant 0 : index
    %c0_12 = arith.constant 0 : index
    %c0_13 = arith.constant 0 : index
    %17 = vector.load %arg4[%c0_11, %c0_12, %c0_13] : memref<32x8x8xbf16, #tpu.memory_space<vmem>>, vector<32x8x8xbf16>
    tpu.vector_store %arg4[%c0_11, %c0_12, %c0_13], %16 {strides = array<i32>} : memref<32x8x8xbf16, #tpu.memory_space<vmem>>, vector<32x8x8xbf16>,
    return
  }
  func.func @transform_0(%arg0: i32) -> (i32, i32, i32) {
    %c0_i32 = arith.constant 0 : i32
    %c0_i32_0 = arith.constant 0 : i32
    %c0_i32_1 = arith.constant 0 : i32
    return %arg0, %c0_i32, %c0_i32_0 : i32, i32, i32
  }
  func.func @transform_1(%arg0: i32) -> (i32, i32, i32) {
    %c0_i32 = arith.constant 0 : i32
    %c0_i32_0 = arith.constant 0 : i32
    %c0_i32_1 = arith.constant 0 : i32
    return %arg0, %c0_i32, %c0_i32_0 : i32, i32, i32
  }
  func.func @transform_2(%arg0: i32) -> (i32, i32, i32) {
    %c0_i32 = arith.constant 0 : i32
    %c0_i32_0 = arith.constant 0 : i32
    %c0_i32_1 = arith.constant 0 : i32
    return %arg0, %c0_i32, %c0_i32_0 : i32, i32, i32
  }
  func.func @transform_3(%arg0: i32) -> (i32, i32, i32) {
    %c0_i32 = arith.constant 0 : i32
    %c0_i32_0 = arith.constant 0 : i32
    %c0_i32_1 = arith.constant 0 : i32
    return %arg0, %c0_i32, %c0_i32_0 : i32, i32, i32
  }
}

module attributes {stable_mosaic.version = 11 : i64} {
  func.func @_mm_add_ln_kernel(%arg0: i32, %arg1: memref<64x32xbf16, #tpu.memory_space<vmem>>, %arg2: memref<32x32xbf16, #tpu.memory_space<vmem>>, %arg3: memref<1x32xf32, #tpu.memory_space<vmem>>, %arg4: memref<64x32xf32, #tpu.memory_space<vmem>>, %arg5: memref<1x32xf32, #tpu.memory_space<vmem>>, %arg6: memref<1x32xf32, #tpu.memory_space<vmem>>, %arg7: memref<64x32xbf16, #tpu.memory_space<vmem>>) attributes {dimension_semantics = [#tpu.dimension_semantics<parallel>], iteration_bounds = array<i64: 1>, scalar_prefetch = 0 : i64, scratch_operands = 0 : i64, tpu.core_type = #tpu.core_type<tc>, window_params = [{transform_indices = @transform_0, window_bounds = array<i64: 64, 32>}, {pipeline_mode = #tpu.pipeline_mode<synchronous>, transform_indices = @transform_1, window_bounds = array<i64: 32, 32>}, {pipeline_mode = #tpu.pipeline_mode<synchronous>, transform_indices = @transform_2, window_bounds = array<i64: 1, 32>}, {transform_indices = @transform_3, window_bounds = array<i64: 64, 32>}, {pipeline_mode = #tpu.pipeline_mode<synchronous>, transform_indices = @transform_4, window_bounds = array<i64: 1, 32>}, {pipeline_mode = #tpu.pipeline_mode<synchronous>, transform_indices = @transform_5, window_bounds = array<i64: 1, 32>}, {transform_indices = @transform_6, window_bounds = array<i64: 64, 32>}]} {
    %c0 = arith.constant 0 : index
    %c0_0 = arith.constant 0 : index
    %0 = vector.load %arg1[%c0, %c0_0] : memref<64x32xbf16, #tpu.memory_space<vmem>>, vector<64x32xbf16>
    %c0_1 = arith.constant 0 : index
    %c0_2 = arith.constant 0 : index
    %1 = vector.load %arg2[%c0_1, %c0_2] : memref<32x32xbf16, #tpu.memory_space<vmem>>, vector<32x32xbf16>
    %cst = arith.constant dense<0.000000e+00> : vector<64x32xf32>
    %2 = tpu.matmul %0, %1, %cst {dimension_numbers = #tpu.dot_dimension_numbers<[1], [0], [0], [1], [0, 0, 1, 1], [], []>} : vector<64x32xbf16>, vector<32x32xbf16>, vector<64x32xf32> -> vector<64x32xf32>
    %c0_3 = arith.constant 0 : index
    %c0_4 = arith.constant 0 : index
    %3 = vector.load %arg3[%c0_3, %c0_4] : memref<1x32xf32, #tpu.memory_space<vmem>>, vector<1x32xf32>
    %4 = vector.broadcast %3 : vector<1x32xf32> to vector<64x32xf32>
    %5 = arith.addf %2, %4 : vector<64x32xf32>
    %c0_5 = arith.constant 0 : index
    %c0_6 = arith.constant 0 : index
    %6 = vector.load %arg4[%c0_5, %c0_6] : memref<64x32xf32, #tpu.memory_space<vmem>>, vector<64x32xf32>
    %7 = arith.addf %5, %6 : vector<64x32xf32>
    %cst_7 = arith.constant dense<0.000000e+00> : vector<64xf32>
    %8 = vector.multi_reduction <add>, %7, %cst_7 [1] : vector<64x32xf32> to vector<64xf32>
    %9 = vector.shape_cast %8 : vector<64xf32> to vector<64x1xf32>
    %cst_8 = arith.constant 3.200000e+01 : f32
    %10 = vector.broadcast %cst_8 : f32 to vector<64x1xf32>
    %11 = arith.divf %9, %10 : vector<64x1xf32>
    %12 = vector.broadcast %11 : vector<64x1xf32> to vector<64x32xf32>
    %13 = arith.subf %7, %12 : vector<64x32xf32>
    %14 = arith.mulf %13, %13 : vector<64x32xf32>
    %cst_9 = arith.constant dense<0.000000e+00> : vector<64xf32>
    %15 = vector.multi_reduction <add>, %14, %cst_9 [1] : vector<64x32xf32> to vector<64xf32>
    %16 = vector.shape_cast %15 : vector<64xf32> to vector<64x1xf32>
    %cst_10 = arith.constant 3.200000e+01 : f32
    %17 = vector.broadcast %cst_10 : f32 to vector<64x1xf32>
    %18 = arith.divf %16, %17 : vector<64x1xf32>
    %19 = vector.broadcast %11 : vector<64x1xf32> to vector<64x32xf32>
    %20 = arith.subf %7, %19 : vector<64x32xf32>
    %cst_11 = arith.constant 9.99999974E-6 : f32
    %21 = vector.broadcast %cst_11 : f32 to vector<64x1xf32>
    %22 = arith.addf %18, %21 : vector<64x1xf32>
    %23 = math.rsqrt %22 : vector<64x1xf32>
    %24 = vector.broadcast %23 : vector<64x1xf32> to vector<64x32xf32>
    %25 = arith.mulf %20, %24 : vector<64x32xf32>
    %c0_12 = arith.constant 0 : index
    %c0_13 = arith.constant 0 : index
    %26 = vector.load %arg5[%c0_12, %c0_13] : memref<1x32xf32, #tpu.memory_space<vmem>>, vector<1x32xf32>
    %27 = vector.broadcast %26 : vector<1x32xf32> to vector<64x32xf32>
    %28 = arith.mulf %25, %27 : vector<64x32xf32>
    %c0_14 = arith.constant 0 : index
    %c0_15 = arith.constant 0 : index
    %29 = vector.load %arg6[%c0_14, %c0_15] : memref<1x32xf32, #tpu.memory_space<vmem>>, vector<1x32xf32>
    %30 = vector.broadcast %29 : vector<1x32xf32> to vector<64x32xf32>
    %31 = arith.addf %28, %30 : vector<64x32xf32>
    %32 = arith.truncf %31 : vector<64x32xf32> to vector<64x32xbf16>
    %c0_16 = arith.constant 0 : index
    %c0_17 = arith.constant 0 : index
    %33 = vector.load %arg7[%c0_16, %c0_17] : memref<64x32xbf16, #tpu.memory_space<vmem>>, vector<64x32xbf16>
    tpu.vector_store %arg7[%c0_16, %c0_17], %32 {strides = array<i32>} : memref<64x32xbf16, #tpu.memory_space<vmem>>, vector<64x32xbf16>,
    return
  }
  func.func @transform_0(%arg0: i32) -> (i32, i32) {
    %c0_i32 = arith.constant 0 : i32
    %c0_i32_0 = arith.constant 0 : i32
    return %arg0, %c0_i32 : i32, i32
  }
  func.func @transform_1(%arg0: i32) -> (i32, i32) {
    %c0_i32 = arith.constant 0 : i32
    %c0_i32_0 = arith.constant 0 : i32
    %c0_i32_1 = arith.constant 0 : i32
    return %c0_i32, %c0_i32_0 : i32, i32
  }
  func.func @transform_2(%arg0: i32) -> (i32, i32) {
    %c0_i32 = arith.constant 0 : i32
    %c0_i32_0 = arith.constant 0 : i32
    %c0_i32_1 = arith.constant 0 : i32
    return %c0_i32, %c0_i32_0 : i32, i32
  }
  func.func @transform_3(%arg0: i32) -> (i32, i32) {
    %c0_i32 = arith.constant 0 : i32
    %c0_i32_0 = arith.constant 0 : i32
    return %arg0, %c0_i32 : i32, i32
  }
  func.func @transform_4(%arg0: i32) -> (i32, i32) {
    %c0_i32 = arith.constant 0 : i32
    %c0_i32_0 = arith.constant 0 : i32
    %c0_i32_1 = arith.constant 0 : i32
    return %c0_i32, %c0_i32_0 : i32, i32
  }
  func.func @transform_5(%arg0: i32) -> (i32, i32) {
    %c0_i32 = arith.constant 0 : i32
    %c0_i32_0 = arith.constant 0 : i32
    %c0_i32_1 = arith.constant 0 : i32
    return %c0_i32, %c0_i32_0 : i32, i32
  }
  func.func @transform_6(%arg0: i32) -> (i32, i32) {
    %c0_i32 = arith.constant 0 : i32
    %c0_i32_0 = arith.constant 0 : i32
    return %arg0, %c0_i32 : i32, i32
  }
}

module attributes {stable_mosaic.version = 11 : i64} {
  func.func @_conv_gate_kernel(%arg0: i32, %arg1: memref<64x32xbf16, #tpu.memory_space<vmem>>, %arg2: memref<64x8xbf16, #tpu.memory_space<vmem>>, %arg3: memref<32x64xbf16, #tpu.memory_space<vmem>>, %arg4: memref<1x64xf32, #tpu.memory_space<vmem>>, %arg5: memref<8x64xbf16, #tpu.memory_space<vmem>>, %arg6: memref<1x64xf32, #tpu.memory_space<vmem>>, %arg7: memref<64x32xbf16, #tpu.memory_space<vmem>>) attributes {dimension_semantics = [#tpu.dimension_semantics<parallel>], iteration_bounds = array<i64: 1>, scalar_prefetch = 0 : i64, scratch_operands = 0 : i64, tpu.core_type = #tpu.core_type<tc>, window_params = [{transform_indices = @transform_0, window_bounds = array<i64: 64, 32>}, {transform_indices = @transform_1, window_bounds = array<i64: 64, 8>}, {pipeline_mode = #tpu.pipeline_mode<synchronous>, transform_indices = @transform_2, window_bounds = array<i64: 32, 64>}, {pipeline_mode = #tpu.pipeline_mode<synchronous>, transform_indices = @transform_3, window_bounds = array<i64: 1, 64>}, {pipeline_mode = #tpu.pipeline_mode<synchronous>, transform_indices = @transform_4, window_bounds = array<i64: 8, 64>}, {pipeline_mode = #tpu.pipeline_mode<synchronous>, transform_indices = @transform_5, window_bounds = array<i64: 1, 64>}, {transform_indices = @transform_6, window_bounds = array<i64: 64, 32>}]} {
    %c0 = arith.constant 0 : index
    %c0_0 = arith.constant 0 : index
    %0 = vector.load %arg1[%c0, %c0_0] : memref<64x32xbf16, #tpu.memory_space<vmem>>, vector<64x32xbf16>
    %c0_1 = arith.constant 0 : index
    %c0_2 = arith.constant 0 : index
    %1 = vector.load %arg3[%c0_1, %c0_2] : memref<32x64xbf16, #tpu.memory_space<vmem>>, vector<32x64xbf16>
    %cst = arith.constant dense<0.000000e+00> : vector<64x64xf32>
    %2 = tpu.matmul %0, %1, %cst {dimension_numbers = #tpu.dot_dimension_numbers<[1], [0], [0], [1], [0, 0, 1, 1], [], []>} : vector<64x32xbf16>, vector<32x64xbf16>, vector<64x64xf32> -> vector<64x64xf32>
    %c0_3 = arith.constant 0 : index
    %c0_4 = arith.constant 0 : index
    %3 = vector.load %arg4[%c0_3, %c0_4] : memref<1x64xf32, #tpu.memory_space<vmem>>, vector<1x64xf32>
    %4 = vector.broadcast %3 : vector<1x64xf32> to vector<64x64xf32>
    %5 = arith.addf %2, %4 : vector<64x64xf32>
    %c0_5 = arith.constant 0 : index
    %c0_6 = arith.constant 0 : index
    %6 = vector.load %arg2[%c0_5, %c0_6] : memref<64x8xbf16, #tpu.memory_space<vmem>>, vector<64x8xbf16>
    %c0_7 = arith.constant 0 : index
    %c0_8 = arith.constant 0 : index
    %7 = vector.load %arg5[%c0_7, %c0_8] : memref<8x64xbf16, #tpu.memory_space<vmem>>, vector<8x64xbf16>
    %cst_9 = arith.constant dense<0.000000e+00> : vector<64x64xf32>
    %8 = tpu.matmul %6, %7, %cst_9 {dimension_numbers = #tpu.dot_dimension_numbers<[1], [0], [0], [1], [0, 0, 1, 1], [], []>} : vector<64x8xbf16>, vector<8x64xbf16>, vector<64x64xf32> -> vector<64x64xf32>
    %c0_10 = arith.constant 0 : index
    %c0_11 = arith.constant 0 : index
    %9 = vector.load %arg6[%c0_10, %c0_11] : memref<1x64xf32, #tpu.memory_space<vmem>>, vector<1x64xf32>
    %10 = vector.broadcast %9 : vector<1x64xf32> to vector<64x64xf32>
    %11 = arith.addf %8, %10 : vector<64x64xf32>
    %cst_12 = arith.constant 0.000000e+00 : f32
    %12 = vector.broadcast %cst_12 : f32 to vector<64x64xf32>
    %13 = arith.maximumf %5, %12 : vector<64x64xf32>
    %cst_13 = arith.constant 0.000000e+00 : f32
    %14 = vector.broadcast %cst_13 : f32 to vector<64x64xf32>
    %15 = arith.maximumf %11, %14 : vector<64x64xf32>
    %16 = arith.addf %13, %15 : vector<64x64xf32>
    %17 = vector.extract_strided_slice %16 {offsets = [0, 0], sizes = [64, 32], strides = [1, 1]} : vector<64x64xf32> to vector<64x32xf32>
    %18 = vector.extract_strided_slice %16 {offsets = [0, 32], sizes = [64, 32], strides = [1, 1]} : vector<64x64xf32> to vector<64x32xf32>
    %19 = arith.negf %17 : vector<64x32xf32>
    %20 = math.exp %19 : vector<64x32xf32>
    %cst_14 = arith.constant 1.000000e+00 : f32
    %21 = vector.broadcast %cst_14 : f32 to vector<64x32xf32>
    %22 = arith.addf %21, %20 : vector<64x32xf32>
    %23 = arith.divf %21, %22 : vector<64x32xf32>
    %24 = math.tanh %18 : vector<64x32xf32>
    %25 = arith.mulf %23, %24 : vector<64x32xf32>
    %26 = arith.truncf %25 : vector<64x32xf32> to vector<64x32xbf16>
    %c0_15 = arith.constant 0 : index
    %c0_16 = arith.constant 0 : index
    %27 = vector.load %arg7[%c0_15, %c0_16] : memref<64x32xbf16, #tpu.memory_space<vmem>>, vector<64x32xbf16>
    tpu.vector_store %arg7[%c0_15, %c0_16], %26 {strides = array<i32>} : memref<64x32xbf16, #tpu.memory_space<vmem>>, vector<64x32xbf16>,
    return
  }
  func.func @transform_0(%arg0: i32) -> (i32, i32) {
    %c0_i32 = arith.constant 0 : i32
    %c0_i32_0 = arith.constant 0 : i32
    return %arg0, %c0_i32 : i32, i32
  }
  func.func @transform_1(%arg0: i32) -> (i32, i32) {
    %c0_i32 = arith.constant 0 : i32
    %c0_i32_0 = arith.constant 0 : i32
    return %arg0, %c0_i32 : i32, i32
  }
  func.func @transform_2(%arg0: i32) -> (i32, i32) {
    %c0_i32 = arith.constant 0 : i32
    %c0_i32_0 = arith.constant 0 : i32
    %c0_i32_1 = arith.constant 0 : i32
    return %c0_i32, %c0_i32_0 : i32, i32
  }
  func.func @transform_3(%arg0: i32) -> (i32, i32) {
    %c0_i32 = arith.constant 0 : i32
    %c0_i32_0 = arith.constant 0 : i32
    %c0_i32_1 = arith.constant 0 : i32
    return %c0_i32, %c0_i32_0 : i32, i32
  }
  func.func @transform_4(%arg0: i32) -> (i32, i32) {
    %c0_i32 = arith.constant 0 : i32
    %c0_i32_0 = arith.constant 0 : i32
    %c0_i32_1 = arith.constant 0 : i32
    return %c0_i32, %c0_i32_0 : i32, i32
  }
  func.func @transform_5(%arg0: i32) -> (i32, i32) {
    %c0_i32 = arith.constant 0 : i32
    %c0_i32_0 = arith.constant 0 : i32
    %c0_i32_1 = arith.constant 0 : i32
    return %c0_i32, %c0_i32_0 : i32, i32
  }
  func.func @transform_6(%arg0: i32) -> (i32, i32) {
    %c0_i32 = arith.constant 0 : i32
    %c0_i32_0 = arith.constant 0 : i32
    return %arg0, %c0_i32 : i32, i32
  }
}

module attributes {stable_mosaic.version = 11 : i64} {
  func.func @_out_res_kernel(%arg0: i32, %arg1: memref<64x32xbf16, #tpu.memory_space<vmem>>, %arg2: memref<64x32xf32, #tpu.memory_space<vmem>>, %arg3: memref<32x64xbf16, #tpu.memory_space<vmem>>, %arg4: memref<1x64xf32, #tpu.memory_space<vmem>>, %arg5: memref<64x64xf32, #tpu.memory_space<vmem>>) attributes {dimension_semantics = [#tpu.dimension_semantics<parallel>], iteration_bounds = array<i64: 1>, scalar_prefetch = 0 : i64, scratch_operands = 0 : i64, tpu.core_type = #tpu.core_type<tc>, window_params = [{transform_indices = @transform_0, window_bounds = array<i64: 64, 32>}, {transform_indices = @transform_1, window_bounds = array<i64: 64, 32>}, {pipeline_mode = #tpu.pipeline_mode<synchronous>, transform_indices = @transform_2, window_bounds = array<i64: 32, 64>}, {pipeline_mode = #tpu.pipeline_mode<synchronous>, transform_indices = @transform_3, window_bounds = array<i64: 1, 64>}, {transform_indices = @transform_4, window_bounds = array<i64: 64, 64>}]} {
    %c0 = arith.constant 0 : index
    %c0_0 = arith.constant 0 : index
    %0 = vector.load %arg1[%c0, %c0_0] : memref<64x32xbf16, #tpu.memory_space<vmem>>, vector<64x32xbf16>
    %c0_1 = arith.constant 0 : index
    %c0_2 = arith.constant 0 : index
    %1 = vector.load %arg3[%c0_1, %c0_2] : memref<32x64xbf16, #tpu.memory_space<vmem>>, vector<32x64xbf16>
    %cst = arith.constant dense<0.000000e+00> : vector<64x64xf32>
    %2 = tpu.matmul %0, %1, %cst {dimension_numbers = #tpu.dot_dimension_numbers<[1], [0], [0], [1], [0, 0, 1, 1], [], []>} : vector<64x32xbf16>, vector<32x64xbf16>, vector<64x64xf32> -> vector<64x64xf32>
    %c0_3 = arith.constant 0 : index
    %c0_4 = arith.constant 0 : index
    %3 = vector.load %arg4[%c0_3, %c0_4] : memref<1x64xf32, #tpu.memory_space<vmem>>, vector<1x64xf32>
    %4 = vector.broadcast %3 : vector<1x64xf32> to vector<64x64xf32>
    %5 = arith.addf %2, %4 : vector<64x64xf32>
    %cst_5 = arith.constant 0.000000e+00 : f32
    %6 = vector.broadcast %cst_5 : f32 to vector<64x64xf32>
    %7 = arith.maximumf %5, %6 : vector<64x64xf32>
    %c0_6 = arith.constant 0 : index
    %c0_7 = arith.constant 0 : index
    %8 = vector.load %arg2[%c0_6, %c0_7] : memref<64x32xf32, #tpu.memory_space<vmem>>, vector<64x32xf32>
    %cst_8 = arith.constant 0.707106769 : f32
    %9 = vector.broadcast %cst_8 : f32 to vector<64x32xf32>
    %10 = arith.mulf %8, %9 : vector<64x32xf32>
    %cst_9 = arith.constant 0.000000e+00 : f32
    %11 = vector.broadcast %cst_9 : f32 to vector<64x32xf32>
    %12 = tpu.concatenate %10, %11 in 1 : vector<64x32xf32>, vector<64x32xf32> -> vector<64x64xf32>
    %13 = arith.addf %7, %12 : vector<64x64xf32>
    %c0_10 = arith.constant 0 : index
    %c0_11 = arith.constant 0 : index
    %14 = vector.load %arg5[%c0_10, %c0_11] : memref<64x64xf32, #tpu.memory_space<vmem>>, vector<64x64xf32>
    tpu.vector_store %arg5[%c0_10, %c0_11], %13 {strides = array<i32>} : memref<64x64xf32, #tpu.memory_space<vmem>>, vector<64x64xf32>,
    return
  }
  func.func @transform_0(%arg0: i32) -> (i32, i32) {
    %c0_i32 = arith.constant 0 : i32
    %c0_i32_0 = arith.constant 0 : i32
    return %arg0, %c0_i32 : i32, i32
  }
  func.func @transform_1(%arg0: i32) -> (i32, i32) {
    %c0_i32 = arith.constant 0 : i32
    %c0_i32_0 = arith.constant 0 : i32
    return %arg0, %c0_i32 : i32, i32
  }
  func.func @transform_2(%arg0: i32) -> (i32, i32) {
    %c0_i32 = arith.constant 0 : i32
    %c0_i32_0 = arith.constant 0 : i32
    %c0_i32_1 = arith.constant 0 : i32
    return %c0_i32, %c0_i32_0 : i32, i32
  }
  func.func @transform_3(%arg0: i32) -> (i32, i32) {
    %c0_i32 = arith.constant 0 : i32
    %c0_i32_0 = arith.constant 0 : i32
    %c0_i32_1 = arith.constant 0 : i32
    return %c0_i32, %c0_i32_0 : i32, i32
  }
  func.func @transform_4(%arg0: i32) -> (i32, i32) {
    %c0_i32 = arith.constant 0 : i32
    %c0_i32_0 = arith.constant 0 : i32
    return %arg0, %c0_i32 : i32, i32
  }
}

</mosaic_0001>

<bundles_post_ra>
// kernel: residual_block.10
= control target key start
LH: loop header
LB: loop body
LE: loop exit
PB: predicated region body
PF: predicated region fallthrough
CT: control target
= control target key end

     0   :  { %vm50_vm0 = vcmask 261120   ;;  %vm160_vm1 = vcmask 781312   ;;  %s309_s1 = inlined_call_operand.vmem [shape: bf16[32,96], index: 1, kind: input, shape index: {}]   ;;  %s310_s0 = inlined_call_operand.vmem [shape: f32[64,32], index: 0, kind: input, shape index: {}]   ;;  %s311_s2 = inlined_call_operand.vmem [shape: f32[1,96], index: 2, kind: input, shape index: {}]   ;;  %s312_s3 = inlined_call_operand.vmem [shape: bf16[64,96], index: 3, kind: output, shape index: {}]  }
   0x1   :  { %v218_v0 = vld [vmem:[%s309_s1 + $0x8] sm:$0xff]   ;;  %v219_v1 = vld [vmem:[%s309_s1] sm:$0xff]   ;;  %v17_v7 = vld [vmem:[%s310_s0 + $0x10] sm:$0xff] }
   0x2   :  { %202 = vmatprep.subr.bf16.mxu0 %v218_v0  ;;  %214 = vmatprep.subr.bf16.mxu1 %v218_v0  ;;  %v15_v2 = vld [vmem:[%s310_s0] sm:$0xff]  ;;  %v16_v3 = vld [vmem:[%s310_s0 + $0x8] sm:$0xff]  ;;  %v18_v8 = vld [vmem:[%s310_s0 + $0x18] sm:$0xff] }
   0x3   :  { %v19_v4 = vld [vmem:[%s310_s0 + $0x20] sm:$0xff]  ;;  %203 = vmatpush3.bf16.msra.mxu0 %v218_v0  ;;  %216 = vmatpush3.bf16.msra.mxu1 %v218_v0  ;;  %v23_v5 = vpack.c.bf16 %v16_v3, %v15_v2  ;;  %v20_v6 = vld [vmem:[%s310_s0 + $0x28] sm:$0xff]  ;;  %v21_v10 = vld [vmem:[%s310_s0 + $0x30] sm:$0xff]  ;;  %v24_v12 = vpack.c.bf16 %v18_v8, %v17_v7 }
   0x4   :  { %204 = vmatprep.subr.bf16.mxu0 %v219_v1  ;;  %215 = vmatprep.subr.bf16.mxu1 %v219_v1  ;;  %v25_v9 = vpack.c.bf16 %v20_v6, %v19_v4  ;;  %v22_v11 = vld [vmem:[%s310_s0 + $0x38] sm:$0xff]  ;;  %v173_v14 = vld [vmem:[%s311_s2] ss:$0 sm:$0xff] }
   0x5   :  { %206 = vmatprep.mubr.msk.bf16.mxu0 %vm50_vm0, %v23_v5  ;;  %v26_v13 = vpack.c.bf16 %v22_v11, %v21_v10 }
   0x6   :  { %210 = vmatprep.mubr.msk.bf16.mxu1 %vm50_vm0, %v25_v9 }
   0x7   :  { %205 = vmatpush3.bf16.msra.mxu0 %v219_v1  ;;  %217 = vmatpush3.bf16.msra.mxu1 %v219_v1 }
   0xa   :  { %207 = vmatmul.mubr.msk.bf16.vlgmr.msra.gmra.mxu0 %vm50_vm0, %v24_v12  ;;  %211 = vmatmul.mubr.msk.bf16.vlgmr.msra.gmra.mxu1 %vm50_vm0, %v26_v13 }
  0xca   :  { %v208_v15 = vpop.f32.mrf.mxu0  ;;  %v212_v16 = vpop.f32.mrf.mxu1 }
  0xcb   :  { %v106_v17 = vadd.f32 %v208_v15, %v173_v14  ;;  %v122_v18 = vadd.f32 %v212_v16, %v173_v14 }
  0xcc   :  { %v97_v19 = vpop.f32.mrf.mxu0  ;;  %v113_v20 = vpop.f32.mrf.mxu1 }
  0xcd   :  { %v190_v21 = vpack.c.bf16 %v106_v17, %v106_v17  ;;  %v194_v22 = vpack.c.bf16 %v122_v18, %v122_v18  ;;  %v98_v23 = vadd.f32 %v173_v14, %v97_v19  ;;  %v114_v24 = vadd.f32 %v173_v14, %v113_v20 }
  0xce   :  { %v209_v25 = vpop.f32.mrf.mxu0  ;;  %v213_v26 = vpop.f32.mrf.mxu1 }
  0xcf   :  { %163 = vst.msk [vmem:[%s312_s3 + $0x8] sm:$0xf] %vm160_vm1, %v190_v21  ;;  %167 = vst.msk [vmem:[%s312_s3 + $0x18] sm:$0xf] %vm160_vm1, %v194_v22  ;;  %v188_v27 = vpack.c.bf16 %v98_v23, %v98_v23  ;;  %v192_v28 = vpack.c.bf16 %v114_v24, %v114_v24  ;;  %v109_v29 = vadd.f32 %v209_v25, %v173_v14 }
  0xd0   :  { %v125_v30 = vadd.f32 %v213_v26, %v173_v14  ;;  %v100_v31 = vpop.f32.mrf.mxu0  ;;  %v116_v32 = vpop.f32.mrf.mxu1 }
  0xd1   :  { %161 = vst.msk [vmem:[%s312_s3] sm:$0xf] %vm160_vm1, %v188_v27  ;;  %165 = vst.msk [vmem:[%s312_s3 + $0x10] sm:$0xf] %vm160_vm1, %v192_v28  ;;  %v191_v33 = vpack.c.bf16 %v109_v29, %v109_v29  ;;  %v101_v35 = vadd.f32 %v173_v14, %v100_v31  ;;  %v117_v36 = vadd.f32 %v173_v14, %v116_v32 }
  0xd2   :  { %v195_v34 = vpack.c.bf16 %v125_v30, %v125_v30 }
  0xd3   :  { %164 = vst.msk [vmem:[%s312_s3 + $0xc] sm:$0xf] %vm160_vm1, %v191_v33  ;;  %v189_v37 = vpack.c.bf16 %v101_v35, %v101_v35  ;;  %v193_v38 = vpack.c.bf16 %v117_v36, %v117_v36 }
  0xd4   :  { %168 = vst.msk [vmem:[%s312_s3 + $0x1c] sm:$0xf] %vm160_vm1, %v195_v34 }
  0xd5   :  { %162 = vst.msk [vmem:[%s312_s3 + $0x4] sm:$0xf] %vm160_vm1, %v189_v37  ;;  %166 = vst.msk [vmem:[%s312_s3 + $0x14] sm:$0xf] %vm160_vm1, %v193_v38 }

// kernel: residual_block.12
= control target key start
LH: loop header
LB: loop body
LE: loop exit
PB: predicated region body
PF: predicated region fallthrough
CT: control target
= control target key end

     0   :  { %vm83_vm0 = vcmask 261120   ;;  %vm672_vm3 = vcmask 257024   ;;  %s1209_s1 = inlined_call_operand.vmem [shape: bf16[32,32], index: 1, kind: input, shape index: {}]   ;;  %s1210_s0 = inlined_call_operand.vmem [shape: bf16[64,32], index: 0, kind: input, shape index: {}]   ;;  %s1211_s2 = inlined_call_operand.vmem [shape: f32[1,32], index: 2, kind: input, shape index: {}]   ;;  %s1212_s3 = inlined_call_operand.vmem [shape: f32[64,32], index: 3, kind: input, shape index: {}]   ;;  %s1213_s6 = inlined_call_operand.vmem [shape: bf16[32,32], index: 6, kind: input, shape index: {}]   ;;  %s1214_s4 = inlined_call_operand.vmem [shape: f32[1,32], index: 4, kind: input, shape index: {}]   ;;  %s1215_s5 = inlined_call_operand.vmem [shape: f32[1,32], index: 5, kind: input, shape index: {}]   ;;  %s1216_s8 = inlined_call_operand.vmem [shape: f32[64,32], index: 8, kind: output, shape index: {0}]   ;;  %s1217_s7 = inlined_call_operand.vmem [shape: f32[1,32], index: 7, kind: input, shape index: {}]   ;;  %s1218_s9 = inlined_call_operand.vmem [shape: bf16[64,32], index: 9, kind: output, shape index: {1}]  }
   0x1   :  { %v777_v0 = vld [vmem:[%s1209_s1 + $0x8] sm:$0xff]   ;;  %v778_v1 = vld [vmem:[%s1209_s1] sm:$0xff]   ;;  %v781_v4 = vld [vmem:[%s1210_s0 + $0x10] sm:$0xff]  }
   0x2   :  { %753 = vmatprep.subr.bf16.mxu0 %v777_v0  ;;  %v779_v2 = vld [vmem:[%s1210_s0] sm:$0xff]   ;;  %v780_v3 = vld [vmem:[%s1210_s0 + $0x8] sm:$0xff]   ;;  %v782_v5 = vld [vmem:[%s1210_s0 + $0x18] sm:$0xff]  }
   0x3   :  { %754 = vmatpush3.bf16.msra.mxu0 %v777_v0  ;;  %757 = vmatprep.mubr.msk.bf16.mxu0 %vm83_vm0, %v779_v2  ;;  %v689_v6 = vld [vmem:[%s1211_s2] ss:$0 sm:$0xff]  ;;  %v163_v8 = vld [vmem:[%s1212_s3 + $0x10] sm:$0xff]  ;;  %v164_v15 = vld [vmem:[%s1212_s3 + $0x18] sm:$0xff] }
   0x4   :  { %755 = vmatprep.subr.bf16.mxu0 %v778_v1  ;;  %v161_v11 = vld [vmem:[%s1212_s3] sm:$0xff]  ;;  %v162_v20 = vld [vmem:[%s1212_s3 + $0x8] sm:$0xff]  ;;  %v167_v33 = vld [vmem:[%s1212_s3 + $0x30] sm:$0xff] }
   0x5   :  { %v165_v28 = vld [vmem:[%s1212_s3 + $0x20] sm:$0xff]  ;;  %v166_v36 = vld [vmem:[%s1212_s3 + $0x28] sm:$0xff]  ;;  %v168_v41 = vld [vmem:[%s1212_s3 + $0x38] sm:$0xff] }
   0x7   :  { %756 = vmatpush3.bf16.msra.mxu0 %v778_v1 }
   0xa   :  { %758 = vmatmul.mubr.msk.bf16.vlgmr.msra.gmra.mxu0 %vm83_vm0, %v780_v3 }
   0xb   :  { %761 = vmatprep.mubr.msk.bf16.mxu0 %vm83_vm0, %v781_v4 }
  0x12   :  { %762 = vmatmul.mubr.msk.bf16.gmra.mxu0 %vm83_vm0, %v782_v5 }
  0xca   :  { %v759_v7 = vpop.f32.mrf.mxu0 }
  0xcb   :  { %v139_v9 = vadd.f32 %v759_v7, %v689_v6 }
  0xcc   :  { %v130_v10 = vpop.f32.mrf.mxu0 }
  0xcd   :  { %v131_v12 = vadd.f32 %v689_v6, %v130_v10  ;;  %v171_v13 = vadd.f32 %v163_v8, %v139_v9 }
  0xce   :  { %v760_v14 = vpop.f32.mrf.mxu0 }
  0xcf   :  { %v142_v16 = vadd.f32 %v760_v14, %v689_v6  ;;  %v183_v17 = vsel %vm83_vm0, %v171_v13, 0.0  ;;  %v169_v18 = vadd.f32 %v161_v11, %v131_v12 }
  0xd0   :  { %184 = vadd.xlane.f32.xlu1 %v183_v17  ;;  %v133_v19 = vpop.f32.mrf.mxu0 }
  0xd1   :  { %v134_v21 = vadd.f32 %v689_v6, %v133_v19  ;;  %v177_v22 = vsel %vm83_vm0, %v169_v18, 0.0  ;;  %v172_v23 = vadd.f32 %v164_v15, %v142_v16 }
  0xd2   :  { %v763_v24 = vpop.f32.mrf.mxu0  ;;  %178 = vadd.xlane.f32.xlu0 %v177_v22 }
  0xd3   :  { %v186_v25 = vsel %vm83_vm0, %v172_v23, 0.0  ;;  %v170_v26 = vadd.f32 %v162_v20, %v134_v21  ;;  %v155_v29 = vadd.f32 %v763_v24, %v689_v6  ;;  %v784_v24 = vld [vmem:[%s1213_s6] sm:$0xff]  }
  0xd4   :  { %187 = vadd.xlane.f32.xlu1 %v186_v25  ;;  %v146_v27 = vpop.f32.mrf.mxu0 }
  0xd5   :  { %v147_v30 = vadd.f32 %v689_v6, %v146_v27  ;;  %v180_v31 = vsel %vm83_vm0, %v170_v26, 0.0  ;;  %v175_v40 = vadd.f32 %v167_v33, %v155_v29 }
  0xd6   :  { %v764_v32 = vpop.f32.mrf.mxu0  ;;  %181 = vadd.xlane.f32.xlu0 %v180_v31 }
  0xd7   :  { %v173_v34 = vadd.f32 %v165_v28, %v147_v30  ;;  %v158_v37 = vadd.f32 %v764_v32, %v689_v6  ;;  %v195_v44 = vsel %vm83_vm0, %v175_v40, 0.0 }
  0xd8   :  { %v149_v35 = vpop.f32.mrf.mxu0 }
  0xd9   :  { %v150_v38 = vadd.f32 %v689_v6, %v149_v35  ;;  %v189_v39 = vsel %vm83_vm0, %v173_v34, 0.0  ;;  %v176_v45 = vadd.f32 %v168_v41, %v158_v37 }
  0xda   :  { %190 = vadd.xlane.f32.xlu0 %v189_v39 }
  0xdb   :  { %v174_v42 = vadd.f32 %v166_v36, %v150_v38  ;;  %v198_v46 = vsel %vm83_vm0, %v176_v45, 0.0 }
  0xdd   :  { %v192_v43 = vsel %vm83_vm0, %v174_v42, 0.0 }
  0xde   :  { %193 = vadd.xlane.f32.xlu1 %v192_v43  ;;  %196 = vadd.xlane.f32.xlu0 %v195_v44 }
  0xe2   :  { %199 = vadd.xlane.f32.xlu1 %v198_v46 }
 0x159   :  { %v185_v47 = vpop.xlane.xlu1 %184 }
 0x15a   :  { %v204_v48 = vmul.f32 0.03125, %v185_v47 }
 0x15b   :  { %v179_v49 = vpop.xlane.xlu0 %178 }
 0x15c   :  { %v202_v50 = vmul.f32 0.03125, %v179_v49  ;;  %v940_v52 = vsub.f32 %v171_v13, %v204_v48  ;;  %v700_v49 = vld [vmem:[%s1214_s4] ss:$0 sm:$0xff] }
 0x15d   :  { %v188_v51 = vpop.xlane.xlu1 %187 }
 0x15e   :  { %v942_v53 = vsub.f32 %v169_v18, %v202_v50  ;;  %v205_v54 = vmul.f32 0.03125, %v188_v51  ;;  %v220_v61 = vmul.f32 %v940_v52, %v940_v52 }
 0x15f   :  { %v182_v55 = vpop.xlane.xlu0 %181 }
 0x160   :  { %v203_v56 = vmul.f32 0.03125, %v182_v55  ;;  %v218_v57 = vmul.f32 %v942_v53, %v942_v53  ;;  %v946_v58 = vsub.f32 %v172_v23, %v205_v54  ;;  %v232_v2 = vsel %vm83_vm0, %v220_v61, 0.0  ;;  %v783_v23 = vld [vmem:[%s1213_s6 + $0x8] sm:$0xff]   ;;  %v701_v54 = vld [vmem:[%s1215_s5] ss:$0 sm:$0xff] }
 0x161   :  { %765 = vmatprep.subr.bf16.mxu1 %v783_v23 }
 0x162   :  { %v948_v59 = vsub.f32 %v170_v26, %v203_v56  ;;  %v226_v60 = vsel %vm83_vm0, %v218_v57, 0.0  ;;  %v221_v4 = vmul.f32 %v946_v58, %v946_v58  ;;  %766 = vmatpush3.bf16.msra.mxu1 %v783_v23  ;;  %v702_v23 = vld [vmem:[%s1217_s7] ss:$0 sm:$0xff] }
 0x163   :  { %227 = vadd.xlane.f32.xlu0 %v226_v60  ;;  %v191_v62 = vpop.xlane.xlu0 %190  ;;  %767 = vmatprep.subr.bf16.mxu1 %v784_v24 }
 0x164   :  { %v206_v63 = vmul.f32 0.03125, %v191_v62  ;;  %v219_v0 = vmul.f32 %v948_v59, %v948_v59  ;;  %v235_v12 = vsel %vm83_vm0, %v221_v4, 0.0 }
 0x166   :  { %v955_v1 = vsub.f32 %v173_v34, %v206_v63  ;;  %v229_v3 = vsel %vm83_vm0, %v219_v0, 0.0  ;;  %768 = vmatpush3.bf16.msra.mxu1 %v784_v24 }
 0x167   :  { %v194_v5 = vpop.xlane.xlu1 %193  ;;  %233 = vadd.xlane.f32.xlu0 %v232_v2  ;;  %230 = vadd.xlane.f32.xlu1 %v229_v3  ;;  %v197_v6 = vpop.xlane.xlu0 %196 }
 0x168   :  { %v207_v7 = vmul.f32 0.03125, %v194_v5  ;;  %v208_v8 = vmul.f32 0.03125, %v197_v6  ;;  %v222_v9 = vmul.f32 %v955_v1, %v955_v1 }
 0x16a   :  { %v963_v10 = vsub.f32 %v174_v42, %v207_v7  ;;  %v965_v11 = vsub.f32 %v175_v40, %v208_v8  ;;  %v238_v13 = vsel %vm83_vm0, %v222_v9, 0.0 }
 0x16b   :  { %v200_v14 = vpop.xlane.xlu1 %199  ;;  %236 = vadd.xlane.f32.xlu1 %v235_v12  ;;  %239 = vadd.xlane.f32.xlu0 %v238_v13 }
 0x16c   :  { %v209_v15 = vmul.f32 0.03125, %v200_v14  ;;  %v223_v16 = vmul.f32 %v963_v10, %v963_v10  ;;  %v224_v17 = vmul.f32 %v965_v11, %v965_v11 }
 0x16e   :  { %v973_v18 = vsub.f32 %v176_v45, %v209_v15  ;;  %v241_v19 = vsel %vm83_vm0, %v223_v16, 0.0  ;;  %v244_v20 = vsel %vm83_vm0, %v224_v17, 0.0 }
 0x16f   :  { %242 = vadd.xlane.f32.xlu1 %v241_v19  ;;  %245 = vadd.xlane.f32.xlu0 %v244_v20 }
 0x170   :  { %v225_v21 = vmul.f32 %v973_v18, %v973_v18 }
 0x172   :  { %v247_v22 = vsel %vm83_vm0, %v225_v21, 0.0 }
 0x173   :  { %248 = vadd.xlane.f32.xlu1 %v247_v22 }
 0x1ec   :  { %v228_v25 = vpop.xlane.xlu0 %227 }
 0x1ed   :  { %v250_v26 = vmul.f32 0.03125, %v228_v25 }
 0x1ef   :  { %v258_v27 = vadd.f32 1e-05, %v250_v26 }
 0x1f0   :  { %v231_v28 = vpop.xlane.xlu1 %230  ;;  %v234_v29 = vpop.xlane.xlu0 %233 }
 0x1f1   :  { %785 = vrsqrt.f32 %v258_v27  ;;  %v251_v30 = vmul.f32 0.03125, %v231_v28  ;;  %v252_v31 = vmul.f32 0.03125, %v234_v29 }
 0x1f3   :  { %v259_v32 = vadd.f32 1e-05, %v251_v30  ;;  %v260_v33 = vadd.f32 1e-05, %v252_v31 }
 0x1f4   :  { %v237_v34 = vpop.xlane.xlu1 %236  ;;  %v240_v35 = vpop.xlane.xlu0 %239 }
 0x1f5   :  { %787 = vrsqrt.f32 %v259_v32  ;;  %v253_v36 = vmul.f32 0.03125, %v237_v34  ;;  %v254_v37 = vmul.f32 0.03125, %v240_v35 }
 0x1f6   :  { %789 = vrsqrt.f32 %v260_v33 }
 0x1f7   :  { %v261_v38 = vadd.f32 1e-05, %v253_v36  ;;  %v262_v39 = vadd.f32 1e-05, %v254_v37 }
 0x1f8   :  { %v243_v40 = vpop.xlane.xlu1 %242  ;;  %v246_v41 = vpop.xlane.xlu0 %245 }
 0x1f9   :  { %791 = vrsqrt.f32 %v261_v38  ;;  %v255_v42 = vmul.f32 0.03125, %v243_v40  ;;  %v256_v43 = vmul.f32 0.03125, %v246_v41 }
 0x1fa   :  { %793 = vrsqrt.f32 %v262_v39 }
 0x1fb   :  { %v263_v44 = vadd.f32 1e-05, %v255_v42  ;;  %v264_v45 = vadd.f32 1e-05, %v256_v43 }
 0x1fc   :  { %v249_v46 = vpop.xlane.xlu1 %248 }
 0x1fd   :  { %795 = vrsqrt.f32 %v263_v44  ;;  %v257_v47 = vmul.f32 0.03125, %v249_v46 }
 0x1fe   :  { %v786_v48 = vpop.eup %785  ;;  %797 = vrsqrt.f32 %v264_v45 }
 0x1ff   :  { %v265_v50 = vadd.f32 1e-05, %v257_v47  ;;  %v274_v51 = vmul.f32 %v786_v48, %v942_v53 }
 0x201   :  { %799 = vrsqrt.f32 %v265_v50  ;;  %v289_v55 = vmul.f32 %v700_v49, %v274_v51 }
 0x202   :  { %v788_v56 = vpop.eup %787 }
 0x203   :  { %v790_v57 = vpop.eup %789  ;;  %v275_v60 = vmul.f32 %v788_v56, %v948_v59  ;;  %v304_v61 = vadd.f32 %v701_v54, %v289_v55 }
 0x204   :  { %v276_v62 = vmul.f32 %v790_v57, %v940_v52 }
 0x205   :  { %v290_v63 = vmul.f32 %v700_v49, %v275_v60  ;;  %312 = vst.msk [vmem:[%s1216_s8] sm:$0xff] %vm83_vm0, %v304_v61 }
 0x206   :  { %v792_v53 = vpop.eup %791  ;;  %v291_v0 = vmul.f32 %v700_v49, %v276_v62 }
 0x207   :  { %v794_v2 = vpop.eup %793  ;;  %v305_v3 = vadd.f32 %v701_v54, %v290_v63  ;;  %v277_v4 = vmul.f32 %v792_v53, %v946_v58 }
 0x208   :  { %v306_v5 = vadd.f32 %v701_v54, %v291_v0  ;;  %v278_v6 = vmul.f32 %v794_v2, %v955_v1 }
 0x209   :  { %313 = vst.msk [vmem:[%s1216_s8 + $0x8] sm:$0xff] %vm83_vm0, %v305_v3  ;;  %v320_v52 = vpack.c.bf16 %v305_v3, %v304_v61  ;;  %v292_v59 = vmul.f32 %v700_v49, %v277_v4 }
 0x20a   :  { %v796_v7 = vpop.eup %795  ;;  %314 = vst.msk [vmem:[%s1216_s8 + $0x10] sm:$0xff] %vm83_vm0, %v306_v5  ;;  %v293_v8 = vmul.f32 %v700_v49, %v278_v6 }
 0x20b   :  { %v798_v9 = vpop.eup %797  ;;  %769 = vmatprep.mubr.msk.bf16.mxu1 %vm83_vm0, %v320_v52  ;;  %v307_v58 = vadd.f32 %v701_v54, %v292_v59  ;;  %v279_v1 = vmul.f32 %v796_v7, %v963_v10 }
 0x20c   :  { %v308_v12 = vadd.f32 %v701_v54, %v293_v8  ;;  %v280_v13 = vmul.f32 %v798_v9, %v965_v11 }
 0x20d   :  { %315 = vst.msk [vmem:[%s1216_s8 + $0x18] sm:$0xff] %vm83_vm0, %v307_v58  ;;  %v321_v14 = vpack.c.bf16 %v307_v58, %v306_v5  ;;  %v294_v15 = vmul.f32 %v700_v49, %v279_v1 }
 0x20e   :  { %v800_v16 = vpop.eup %799  ;;  %316 = vst.msk [vmem:[%s1216_s8 + $0x20] sm:$0xff] %vm83_vm0, %v308_v12  ;;  %v295_v17 = vmul.f32 %v700_v49, %v280_v13 }
 0x20f   :  { %770 = vmatmul.mubr.msk.bf16.vlgmr.msra.gmra.mxu1 %vm83_vm0, %v321_v14  ;;  %v309_v10 = vadd.f32 %v701_v54, %v294_v15  ;;  %v281_v19 = vmul.f32 %v800_v16, %v973_v18 }
 0x210   :  { %v310_v11 = vadd.f32 %v701_v54, %v295_v17 }
 0x211   :  { %317 = vst.msk [vmem:[%s1216_s8 + $0x28] sm:$0xff] %vm83_vm0, %v309_v10  ;;  %v322_v20 = vpack.c.bf16 %v309_v10, %v308_v12  ;;  %v296_v21 = vmul.f32 %v700_v49, %v281_v19 }
 0x212   :  { %318 = vst.msk [vmem:[%s1216_s8 + $0x30] sm:$0xff] %vm83_vm0, %v310_v11 }
 0x213   :  { %773 = vmatprep.mubr.msk.bf16.mxu1 %vm83_vm0, %v322_v20  ;;  %v311_v22 = vadd.f32 %v701_v54, %v296_v21 }
 0x215   :  { %319 = vst.msk [vmem:[%s1216_s8 + $0x38] sm:$0xff] %vm83_vm0, %v311_v22  ;;  %v323_v18 = vpack.c.bf16 %v311_v22, %v310_v11 }
 0x217   :  { %774 = vmatmul.mubr.msk.bf16.gmra.mxu1 %vm83_vm0, %v323_v18 }
 0x2cf   :  { %v771_v24 = vpop.f32.mrf.mxu1 }
 0x2d0   :  { %v1039_v25 = vadd.f32 %v771_v24, %v702_v23 }
 0x2d1   :  { %v393_v26 = vpop.f32.mrf.mxu1 }
 0x2d2   :  { %v1042_v27 = vmul.f32 0.70710677, %v1039_v25  ;;  %v1044_v28 = vadd.f32 %v702_v23, %v393_v26 }
 0x2d3   :  { %v772_v29 = vpop.f32.mrf.mxu1 }
 0x2d4   :  { %v434_v30 = vand.u32 2147483647, %v1042_v27  ;;  %v1048_v31 = vmul.f32 0.70710677, %v1044_v28  ;;  %v1050_v32 = vadd.f32 %v772_v29, %v702_v23  ;;  %vm594_vm1 = vcmp.lt.f32.partialorder %v1042_v27, 0.0 }
 0x2d5   :  { %v396_v33 = vpop.f32.mrf.mxu1 }
 0x2d6   :  { %v442_v34 = vmul.f32 0.3275911, %v434_v30  ;;  %v432_v35 = vand.u32 2147483647, %v1048_v31  ;;  %v1054_v36 = vmul.f32 0.70710677, %v1050_v32  ;;  %v1056_v37 = vadd.f32 %v702_v23, %v396_v33 }
 0x2d7   :  { %v775_v38 = vpop.f32.mrf.mxu1  ;;  %v546_v54 = vsub.f32 0.0, %v434_v30  ;;  %vm592_vm2 = vcmp.lt.f32.partialorder %v1048_v31, 0.0 }
 0x2d8   :  { %v450_v39 = vadd.f32 1.0, %v442_v34  ;;  %v440_v40 = vmul.f32 0.3275911, %v432_v35  ;;  %v435_v41 = vand.u32 2147483647, %v1054_v36  ;;  %v1063_v47 = vadd.f32 %v775_v38, %v702_v23 }
 0x2d9   :  { %v1060_v42 = vmul.f32 0.70710677, %v1056_v37  ;;  %v409_v43 = vpop.f32.mrf.mxu1  ;;  %v544_v60 = vsub.f32 0.0, %v432_v35  ;;  %v554_v0 = vmul.f32 %v546_v54, %v434_v30  ;;  %vm595_vm4 = vcmp.lt.f32.partialorder %v1054_v36, 0.0 }
 0x2da   :  { %801 = vrcp.f32 %v450_v39  ;;  %v448_v44 = vadd.f32 1.0, %v440_v40  ;;  %v443_v45 = vmul.f32 0.3275911, %v435_v41  ;;  %v1065_v48 = vadd.f32 %v702_v23, %v409_v43 }
 0x2db   :  { %v433_v46 = vand.u32 2147483647, %v1060_v42  ;;  %v776_v51 = vpop.f32.mrf.mxu1  ;;  %v1068_v55 = vmul.f32 0.70710677, %v1063_v47  ;;  %v552_v5 = vmul.f32 %v544_v60, %v432_v35  ;;  %v547_v59 = vsub.f32 0.0, %v435_v41 }
 0x2dc   :  { %803 = vrcp.f32 %v448_v44  ;;  %v451_v49 = vadd.f32 1.0, %v443_v45  ;;  %v1071_v57 = vmul.f32 0.70710677, %v1065_v48  ;;  %v1075_v63 = vadd.f32 %v776_v51, %v702_v23 }
 0x2dd   :  { %v441_v50 = vmul.f32 0.3275911, %v433_v46  ;;  %v438_v61 = vand.u32 2147483647, %v1068_v55  ;;  %v412_v53 = vpop.f32.mrf.mxu1  ;;  %v564_v9 = vmul.f32 1.442695, %v554_v0  ;;  %v555_v17 = vmul.f32 %v547_v59, %v435_v41 }
 0x2de   :  { %805 = vrcp.f32 %v451_v49  ;;  %v436_v62 = vand.u32 2147483647, %v1071_v57  ;;  %v1078_v4 = vmul.f32 0.70710677, %v1075_v63  ;;  %v1080_v52 = vadd.f32 %v702_v23, %v412_v53 }
 0x2df   :  { %v449_v56 = vadd.f32 1.0, %v441_v50  ;;  %v446_v2 = vmul.f32 0.3275911, %v438_v61  ;;  %v545_v12 = vsub.f32 0.0, %v433_v46  ;;  %v560_v15 = vmul.f32 1.442695, %v552_v5 }
 0x2e0   :  { %v444_v3 = vmul.f32 0.3275911, %v436_v62  ;;  %v439_v8 = vand.u32 2147483647, %v1078_v4  ;;  %v1084_v58 = vmul.f32 0.70710677, %v1080_v52 }
 0x2e1   :  { %807 = vrcp.f32 %v449_v56  ;;  %v454_v6 = vadd.f32 1.0, %v446_v2  ;;  %v550_v10 = vsub.f32 0.0, %v438_v61  ;;  %v553_v18 = vmul.f32 %v545_v12, %v433_v46 }
 0x2e2   :  { %v452_v7 = vadd.f32 1.0, %v444_v3  ;;  %v447_v13 = vmul.f32 0.3275911, %v439_v8  ;;  %v437_v16 = vand.u32 2147483647, %v1084_v58  ;;  %v548_v23 = vsub.f32 0.0, %v436_v62 }
 0x2e3   :  { %809 = vrcp.f32 %v454_v6  ;;  %v551_v29 = vsub.f32 0.0, %v439_v8  ;;  %v566_v35 = vmul.f32 1.442695, %v555_v17  ;;  %v558_v38 = vmul.f32 %v550_v10, %v438_v61 }
 0x2e4   :  { %811 = vrcp.f32 %v452_v7  ;;  %v455_v19 = vadd.f32 1.0, %v447_v13  ;;  %v445_v21 = vmul.f32 0.3275911, %v437_v16  ;;  %v1098_v40 = vmul.f32 0.5, %v1039_v25 }
 0x2e5   :  { %813 = vpow2.f32 %v564_v9  ;;  %v1101_v41 = vmul.f32 0.5, %v1044_v28  ;;  %v562_v46 = vmul.f32 1.442695, %v553_v18  ;;  %v556_v49 = vmul.f32 %v548_v23, %v436_v62 }
 0x2e6   :  { %815 = vrcp.f32 %v455_v19  ;;  %v453_v30 = vadd.f32 1.0, %v445_v21  ;;  %v1108_v51 = vmul.f32 0.5, %v1050_v32  ;;  %v559_v25 = vmul.f32 %v551_v29, %v439_v8 }
 0x2e7   :  { %v1086_v1 = vpop.eup %801  ;;  %817 = vpow2.f32 %v560_v15  ;;  %v572_v60 = vmul.f32 1.442695, %v558_v38  ;;  %v1113_v0 = vmul.f32 0.5, %v1056_v37  ;;  %v549_v2 = vsub.f32 0.0, %v437_v16 }
 0x2e8   :  { %v474_v14 = vmul.f32 1.0614054, %v1086_v1  ;;  %819 = vrcp.f32 %v453_v30  ;;  %v568_v5 = vmul.f32 1.442695, %v556_v49  ;;  %v574_v9 = vmul.f32 1.442695, %v559_v25 }
 0x2e9   :  { %v1090_v11 = vpop.eup %803  ;;  %821 = vpow2.f32 %v566_v35  ;;  %v557_v10 = vmul.f32 %v549_v2, %v437_v16  ;;  %vm593_vm5 = vcmp.lt.f32.partialorder %v1060_v42, 0.0  ;;  %vm598_vm6 = vcmp.lt.f32.partialorder %v1068_v55, 0.0 }
 0x2ea   :  { %v711_v20 = vadd.f32 -1.4531521, %v474_v14  ;;  %v472_v22 = vmul.f32 1.0614054, %v1090_v11  ;;  %823 = vpow2.f32 %v562_v46  ;;  %vm596_vm7 = vcmp.lt.f32.partialorder %v1071_v57, 0.0 }
 0x2eb   :  { %v1093_v24 = vpop.eup %805  ;;  %825 = vpow2.f32 %v572_v60  ;;  %vm599_vm8 = vcmp.lt.f32.partialorder %v1078_v4, 0.0  ;;  %vm597_vm9 = vcmp.lt.f32.partialorder %v1084_v58, 0.0 }
 0x2ec   :  { %v490_v26 = vmul.f32 %v1086_v1, %v711_v20  ;;  %v709_v33 = vadd.f32 -1.4531521, %v472_v22  ;;  %v475_v34 = vmul.f32 1.0614054, %v1093_v24  ;;  %827 = vpow2.f32 %v568_v5 }
 0x2ed   :  { %829 = vpow2.f32 %v574_v9 }
 0x2ee   :  { %v498_v39 = vadd.f32 1.4214138, %v490_v26  ;;  %v1103_v43 = vpop.eup %807  ;;  %v488_v44 = vmul.f32 %v1090_v11, %v709_v33  ;;  %v712_v45 = vadd.f32 -1.4531521, %v475_v34 }
 0x2ef   :  { %v473_v54 = vmul.f32 1.0614054, %v1103_v43 }
 0x2f0   :  { %v506_v50 = vmul.f32 %v1086_v1, %v498_v39  ;;  %v496_v56 = vadd.f32 1.4214138, %v488_v44  ;;  %v491_v28 = vmul.f32 %v1093_v24, %v712_v45  ;;  %v1115_v62 = vpop.eup %809  ;;  %v570_v45 = vmul.f32 1.442695, %v557_v10 }
 0x2f1   :  { %v710_v53 = vadd.f32 -1.4531521, %v473_v54  ;;  %v1118_v6 = vpop.eup %811  ;;  %v478_v8 = vmul.f32 1.0614054, %v1115_v62 }
 0x2f2   :  { %v719_v61 = vadd.f32 -0.28449672, %v506_v50  ;;  %v504_v3 = vmul.f32 %v1090_v11, %v496_v56  ;;  %v499_v32 = vadd.f32 1.4214138, %v491_v28  ;;  %v476_v13 = vmul.f32 1.0614054, %v1118_v6  ;;  %v814_v19 = vpop.eup %813 }
 0x2f3   :  { %v489_v7 = vmul.f32 %v1103_v43, %v710_v53  ;;  %v715_v17 = vadd.f32 -1.4531521, %v478_v8  ;;  %v1127_v18 = vpop.eup %815  ;;  %831 = vpow2.f32 %v570_v45 }
 0x2f4   :  { %v522_v59 = vmul.f32 %v1086_v1, %v719_v61  ;;  %v717_v12 = vadd.f32 -0.28449672, %v504_v3  ;;  %v507_v37 = vmul.f32 %v1093_v24, %v499_v32  ;;  %v713_v22 = vadd.f32 -1.4531521, %v476_v13  ;;  %v818_v30 = vpop.eup %817 }
 0x2f5   :  { %v497_v15 = vadd.f32 1.4214138, %v489_v7  ;;  %v494_v29 = vmul.f32 %v1115_v62, %v715_v17  ;;  %v479_v35 = vmul.f32 1.0614054, %v1127_v18 }
 0x2f6   :  { %v530_v14 = vadd.f32 0.2548296, %v522_v59  ;;  %v520_v20 = vmul.f32 %v1090_v11, %v717_v12  ;;  %v720_v21 = vadd.f32 -0.28449672, %v507_v37  ;;  %v492_v34 = vmul.f32 %v1118_v6, %v713_v22 }
 0x2f7   :  { %v505_v26 = vmul.f32 %v1103_v43, %v497_v15  ;;  %v502_v44 = vadd.f32 1.4214138, %v494_v29  ;;  %v716_v54 = vadd.f32 -1.4531521, %v479_v35 }
 0x2f8   :  { %v538_v23 = vmul.f32 %v1086_v1, %v530_v14  ;;  %v528_v33 = vadd.f32 0.2548296, %v520_v20  ;;  %v523_v16 = vmul.f32 %v1093_v24, %v720_v21  ;;  %v1136_v1 = vpop.eup %819  ;;  %v500_v50 = vadd.f32 1.4214138, %v492_v34 }
 0x2f9   :  { %v718_v39 = vadd.f32 -0.28449672, %v505_v26  ;;  %v510_v28 = vmul.f32 %v1115_v62, %v502_v44  ;;  %v477_v60 = vmul.f32 1.0614054, %v1136_v1  ;;  %v822_v3 = vpop.eup %821 }
 0x2fa   :  { %v578_v38 = vmul.f32 %v814_v19, %v538_v23  ;;  %v536_v46 = vmul.f32 %v1090_v11, %v528_v33  ;;  %v531_v49 = vadd.f32 0.2548296, %v523_v16  ;;  %v508_v2 = vmul.f32 %v1118_v6, %v500_v50  ;;  %v824_v37 = vpop.eup %823 }
 0x2fb   :  { %v521_v56 = vmul.f32 %v1103_v43, %v718_v39  ;;  %v495_v11 = vmul.f32 %v1127_v18, %v716_v54  ;;  %v723_v59 = vadd.f32 -0.28449672, %v510_v28  ;;  %v714_v15 = vadd.f32 -1.4531521, %v477_v60  ;;  %v826_v21 = vpop.eup %825 }
 0x2fc   :  { %v586_v25 = vsub.f32 1.0, %v578_v38  ;;  %v576_v61 = vmul.f32 %v818_v30, %v536_v46  ;;  %v539_v53 = vmul.f32 %v1093_v24, %v531_v49  ;;  %v721_v9 = vadd.f32 -0.28449672, %v508_v2  ;;  %v828_v16 = vpop.eup %827 }
 0x2fd   :  { %v529_v5 = vadd.f32 0.2548296, %v521_v56  ;;  %v503_v12 = vadd.f32 1.4214138, %v495_v11  ;;  %v526_v24 = vmul.f32 %v1115_v62, %v723_v59  ;;  %v493_v29 = vmul.f32 %v1136_v1, %v714_v15  ;;  %v830_v44 = vpop.eup %829 }
 0x2fe   :  { %v602_v32 = vsub.f32 0.0, %v586_v25  ;;  %v584_v7 = vsub.f32 1.0, %v576_v61  ;;  %v579_v8 = vmul.f32 %v822_v3, %v539_v53  ;;  %v524_v20 = vmul.f32 %v1118_v6, %v721_v9 }
 0x2ff   :  { %v537_v14 = vmul.f32 %v1103_v43, %v529_v5  ;;  %v534_v23 = vadd.f32 0.2548296, %v526_v24  ;;  %v511_v26 = vmul.f32 %v1127_v18, %v503_v12  ;;  %v501_v50 = vadd.f32 1.4214138, %v493_v29 }
 0x300   :  { %v610_v13 = vsel %vm594_vm1, %v602_v32, %v586_v25  ;;  %v600_v10 = vsub.f32 0.0, %v584_v7  ;;  %v587_v19 = vsub.f32 1.0, %v579_v8  ;;  %v532_v33 = vadd.f32 0.2548296, %v524_v20  ;;  %v832_v32 = vpop.eup %831 }
 0x301   :  { %v626_v17 = vadd.f32 1.0, %v610_v13  ;;  %v577_v22 = vmul.f32 %v824_v37, %v537_v14  ;;  %v542_v38 = vmul.f32 %v1115_v62, %v534_v23  ;;  %v724_v39 = vadd.f32 -0.28449672, %v511_v26 }
 0x302   :  { %v608_v43 = vsel %vm592_vm2, %v600_v10, %v584_v7  ;;  %v603_v30 = vsub.f32 0.0, %v587_v19  ;;  %v540_v49 = vmul.f32 %v1118_v6, %v532_v33  ;;  %v509_v36 = vmul.f32 %v1136_v1, %v501_v50 }
 0x303   :  { %v634_v27 = vmul.f32 %v626_v17, %v1098_v40  ;;  %v624_v34 = vadd.f32 1.0, %v608_v43  ;;  %v585_v35 = vsub.f32 1.0, %v577_v22  ;;  %v582_v25 = vmul.f32 %v826_v21, %v542_v38 }
 0x304   :  { %v611_v46 = vsel %vm595_vm4, %v603_v30, %v587_v19  ;;  %v580_v62 = vmul.f32 %v828_v16, %v540_v49  ;;  %v527_v56 = vmul.f32 %v1127_v18, %v724_v39  ;;  %v722_v11 = vadd.f32 -0.28449672, %v509_v36 }
 0x305   :  { %v735_v45 = vpack.c.bf16 %v634_v27, %v634_v27  ;;  %v632_v40 = vmul.f32 %v624_v34, %v1101_v41  ;;  %v627_v31 = vadd.f32 1.0, %v611_v46  ;;  %v601_v54 = vsub.f32 0.0, %v585_v35 }
 0x306   :  { %v590_v41 = vsub.f32 1.0, %v582_v25  ;;  %v588_v53 = vsub.f32 1.0, %v580_v62  ;;  %v535_v2 = vadd.f32 0.2548296, %v527_v56  ;;  %v525_v7 = vmul.f32 %v1136_v1, %v722_v11 }
 0x307   :  { %675 = vst.msk [vmem:[%s1218_s9 + $0x8] sm:$0xf] %vm672_vm3, %v735_v45  ;;  %v733_v28 = vpack.c.bf16 %v632_v40, %v632_v40  ;;  %v635_v6 = vmul.f32 %v627_v31, %v1108_v51  ;;  %v609_v60 = vsel %vm593_vm5, %v601_v54, %v585_v35  ;;  %v622_v9 = vmul.f32 0.5, %v1063_v47 }
 0x308   :  { %v625_v61 = vadd.f32 1.0, %v609_v60  ;;  %v606_v3 = vsub.f32 0.0, %v590_v41  ;;  %v604_v59 = vsub.f32 0.0, %v588_v53  ;;  %v543_v51 = vmul.f32 %v1127_v18, %v535_v2 }
 0x309   :  { %673 = vst.msk [vmem:[%s1218_s9] sm:$0xf] %vm672_vm3, %v733_v28  ;;  %v736_v42 = vpack.c.bf16 %v635_v6, %v635_v6  ;;  %v533_v18 = vadd.f32 0.2548296, %v525_v7  ;;  %v623_v21 = vmul.f32 0.5, %v1075_v63  ;;  %v621_v27 = vmul.f32 0.5, %v1080_v52 }
 0x30a   :  { %v633_v5 = vmul.f32 %v625_v61, %v1113_v0  ;;  %v614_v8 = vsel %vm598_vm6, %v606_v3, %v590_v41  ;;  %v612_v37 = vsel %vm596_vm7, %v604_v59, %v588_v53  ;;  %v583_v13 = vmul.f32 %v830_v44, %v543_v51 }
 0x30b   :  { %676 = vst.msk [vmem:[%s1218_s9 + $0xc] sm:$0xf] %vm672_vm3, %v736_v42  ;;  %v630_v12 = vadd.f32 1.0, %v614_v8  ;;  %v620_v0 = vmul.f32 0.5, %v1065_v48  ;;  %v628_v14 = vadd.f32 1.0, %v612_v37  ;;  %v541_v47 = vmul.f32 %v1136_v1, %v533_v18 }
 0x30c   :  { %v734_v55 = vpack.c.bf16 %v633_v5, %v633_v5  ;;  %v591_v15 = vsub.f32 1.0, %v583_v13 }
 0x30d   :  { %v638_v24 = vmul.f32 %v630_v12, %v622_v9  ;;  %v636_v17 = vmul.f32 %v628_v14, %v620_v0  ;;  %v581_v20 = vmul.f32 %v832_v32, %v541_v47 }
 0x30e   :  { %674 = vst.msk [vmem:[%s1218_s9 + $0x4] sm:$0xf] %vm672_vm3, %v734_v55  ;;  %v607_v57 = vsub.f32 0.0, %v591_v15 }
 0x30f   :  { %v739_v10 = vpack.c.bf16 %v638_v24, %v638_v24  ;;  %v737_v19 = vpack.c.bf16 %v636_v17, %v636_v17  ;;  %v589_v22 = vsub.f32 1.0, %v581_v20 }
 0x310   :  { %v615_v48 = vsel %vm599_vm8, %v607_v57, %v591_v15 }
 0x311   :  { %679 = vst.msk [vmem:[%s1218_s9 + $0x18] sm:$0xf] %vm672_vm3, %v739_v10  ;;  %677 = vst.msk [vmem:[%s1218_s9 + $0x10] sm:$0xf] %vm672_vm3, %v737_v19  ;;  %v631_v1 = vadd.f32 1.0, %v615_v48  ;;  %v605_v26 = vsub.f32 0.0, %v589_v22 }
 0x313   :  { %v639_v23 = vmul.f32 %v631_v1, %v623_v21  ;;  %v613_v29 = vsel %vm597_vm9, %v605_v26, %v589_v22 }
 0x314   :  { %v629_v43 = vadd.f32 1.0, %v613_v29 }
 0x315   :  { %v740_v4 = vpack.c.bf16 %v639_v23, %v639_v23 }
 0x316   :  { %v637_v30 = vmul.f32 %v629_v43, %v621_v27 }
 0x317   :  { %680 = vst.msk [vmem:[%s1218_s9 + $0x1c] sm:$0xf] %vm672_vm3, %v740_v4 }
 0x318   :  { %v738_v33 = vpack.c.bf16 %v637_v30, %v637_v30 }
 0x31a   :  { %678 = vst.msk [vmem:[%s1218_s9 + $0x14] sm:$0xf] %vm672_vm3, %v738_v33 }

// kernel: residual_block.13
= control target key start
LH: loop header
LB: loop body
LE: loop exit
PB: predicated region body
PF: predicated region fallthrough
CT: control target
= control target key end

     0   :  { %vm75_vm0 = vcmask 261120   ;;  %s551_s1 = inlined_call_operand.vmem [shape: bf16[32,32], index: 1, kind: input, shape index: {}]   ;;  %s552_s0 = inlined_call_operand.vmem [shape: bf16[64,32], index: 0, kind: input, shape index: {}]   ;;  %s553_s2 = inlined_call_operand.vmem [shape: f32[1,32], index: 2, kind: input, shape index: {}]   ;;  %s554_s3 = inlined_call_operand.vmem [shape: f32[64,32], index: 3, kind: input, shape index: {}]   ;;  %s555_s4 = inlined_call_operand.vmem [shape: f32[1,32], index: 4, kind: input, shape index: {}]   ;;  %s556_s5 = inlined_call_operand.vmem [shape: f32[1,32], index: 5, kind: input, shape index: {}]   ;;  %s557_s6 = inlined_call_operand.vmem [shape: f32[64,32], index: 6, kind: output, shape index: {}]  }
   0x1   :  { %v351_v0 = vld [vmem:[%s551_s1 + $0x8] sm:$0xff]   ;;  %v352_v1 = vld [vmem:[%s551_s1] sm:$0xff]   ;;  %v354_v3 = vld [vmem:[%s552_s0 + $0x10] sm:$0xff]  }
   0x2   :  { %335 = vmatprep.subr.bf16.mxu0 %v351_v0  ;;  %347 = vmatprep.subr.bf16.mxu1 %v351_v0  ;;  %v353_v2 = vld [vmem:[%s552_s0] sm:$0xff]   ;;  %v355_v4 = vld [vmem:[%s552_s0 + $0x8] sm:$0xff]   ;;  %v356_v5 = vld [vmem:[%s552_s0 + $0x18] sm:$0xff]  }
   0x3   :  { %336 = vmatpush3.bf16.msra.mxu0 %v351_v0  ;;  %349 = vmatpush3.bf16.msra.mxu1 %v351_v0  ;;  %v316_v6 = vld [vmem:[%s553_s2] ss:$0 sm:$0xff]  ;;  %v155_v9 = vld [vmem:[%s554_s3 + $0x10] sm:$0xff]  ;;  %v156_v20 = vld [vmem:[%s554_s3 + $0x18] sm:$0xff] }
   0x4   :  { %337 = vmatprep.subr.bf16.mxu0 %v352_v1  ;;  %348 = vmatprep.subr.bf16.mxu1 %v352_v1  ;;  %v153_v13 = vld [vmem:[%s554_s3] sm:$0xff]  ;;  %v158_v27 = vld [vmem:[%s554_s3 + $0x28] sm:$0xff]  ;;  %v160_v36 = vld [vmem:[%s554_s3 + $0x38] sm:$0xff] }
   0x5   :  { %339 = vmatprep.mubr.msk.bf16.mxu0 %vm75_vm0, %v353_v2  ;;  %343 = vmatprep.mubr.msk.bf16.mxu1 %vm75_vm0, %v354_v3  ;;  %v157_v17 = vld [vmem:[%s554_s3 + $0x20] sm:$0xff]  ;;  %v154_v32 = vld [vmem:[%s554_s3 + $0x8] sm:$0xff]  ;;  %v159_v40 = vld [vmem:[%s554_s3 + $0x30] sm:$0xff] }
   0x7   :  { %338 = vmatpush3.bf16.msra.mxu0 %v352_v1  ;;  %350 = vmatpush3.bf16.msra.mxu1 %v352_v1 }
   0xa   :  { %340 = vmatmul.mubr.msk.bf16.vlgmr.msra.gmra.mxu0 %vm75_vm0, %v355_v4  ;;  %344 = vmatmul.mubr.msk.bf16.vlgmr.msra.gmra.mxu1 %vm75_vm0, %v356_v5 }
  0xca   :  { %v341_v7 = vpop.f32.mrf.mxu0  ;;  %v345_v8 = vpop.f32.mrf.mxu1 }
  0xcb   :  { %v131_v10 = vadd.f32 %v341_v7, %v316_v6  ;;  %v147_v37 = vadd.f32 %v345_v8, %v316_v6 }
  0xcc   :  { %v122_v11 = vpop.f32.mrf.mxu0  ;;  %v138_v12 = vpop.f32.mrf.mxu1 }
  0xcd   :  { %v123_v14 = vadd.f32 %v316_v6, %v122_v11  ;;  %v139_v15 = vadd.f32 %v316_v6, %v138_v12  ;;  %v163_v16 = vadd.f32 %v155_v9, %v131_v10  ;;  %v167_v44 = vadd.f32 %v159_v40, %v147_v37 }
  0xce   :  { %v342_v18 = vpop.f32.mrf.mxu0  ;;  %v346_v19 = vpop.f32.mrf.mxu1 }
  0xcf   :  { %v134_v21 = vadd.f32 %v342_v18, %v316_v6  ;;  %v175_v22 = vsel %vm75_vm0, %v163_v16, 0.0  ;;  %v161_v23 = vadd.f32 %v153_v13, %v123_v14  ;;  %v165_v26 = vadd.f32 %v157_v17, %v139_v15 }
  0xd0   :  { %v141_v24 = vpop.f32.mrf.mxu1  ;;  %176 = vadd.xlane.f32.xlu1 %v175_v22  ;;  %v125_v25 = vpop.f32.mrf.mxu0  ;;  %v150_v33 = vadd.f32 %v346_v19, %v316_v6  ;;  %v187_v46 = vsel %vm75_vm0, %v167_v44, 0.0 }
  0xd1   :  { %v142_v28 = vadd.f32 %v316_v6, %v141_v24  ;;  %v126_v29 = vadd.f32 %v316_v6, %v125_v25  ;;  %v169_v30 = vsel %vm75_vm0, %v161_v23, 0.0  ;;  %v164_v31 = vadd.f32 %v156_v20, %v134_v21 }
  0xd2   :  { %170 = vadd.xlane.f32.xlu0 %v169_v30  ;;  %v181_v38 = vsel %vm75_vm0, %v165_v26, 0.0  ;;  %v168_v42 = vadd.f32 %v160_v36, %v150_v33 }
  0xd3   :  { %v178_v34 = vsel %vm75_vm0, %v164_v31, 0.0  ;;  %v166_v35 = vadd.f32 %v158_v27, %v142_v28  ;;  %v162_v39 = vadd.f32 %v154_v32, %v126_v29 }
  0xd4   :  { %179 = vadd.xlane.f32.xlu1 %v178_v34  ;;  %v190_v45 = vsel %vm75_vm0, %v168_v42, 0.0 }
  0xd5   :  { %v184_v41 = vsel %vm75_vm0, %v166_v35, 0.0  ;;  %v172_v43 = vsel %vm75_vm0, %v162_v39, 0.0 }
  0xd6   :  { %182 = vadd.xlane.f32.xlu0 %v181_v38 }
  0xd8   :  { %185 = vadd.xlane.f32.xlu1 %v184_v41 }
  0xda   :  { %173 = vadd.xlane.f32.xlu0 %v172_v43 }
  0xdc   :  { %191 = vadd.xlane.f32.xlu1 %v190_v45  ;;  %v327_v45 = vld [vmem:[%s555_s4] ss:$0 sm:$0xff] }
  0xde   :  { %188 = vadd.xlane.f32.xlu0 %v187_v46 }
 0x159   :  { %v177_v47 = vpop.xlane.xlu1 %176 }
 0x15a   :  { %v196_v48 = vmul.f32 0.03125, %v177_v47 }
 0x15b   :  { %v171_v49 = vpop.xlane.xlu0 %170 }
 0x15c   :  { %v465_v50 = vsub.f32 %v163_v16, %v196_v48  ;;  %v194_v51 = vmul.f32 0.03125, %v171_v49  ;;  %v328_v49 = vld [vmem:[%s556_s5] ss:$0 sm:$0xff] }
 0x15d   :  { %v180_v52 = vpop.xlane.xlu1 %179 }
 0x15e   :  { %v467_v53 = vsub.f32 %v161_v23, %v194_v51  ;;  %v197_v54 = vmul.f32 0.03125, %v180_v52  ;;  %v212_v55 = vmul.f32 %v465_v50, %v465_v50 }
 0x15f   :  { %v183_v56 = vpop.xlane.xlu0 %182 }
 0x160   :  { %v471_v57 = vsub.f32 %v164_v31, %v197_v54  ;;  %v198_v58 = vmul.f32 0.03125, %v183_v56  ;;  %v224_v59 = vsel %vm75_vm0, %v212_v55, 0.0  ;;  %v210_v60 = vmul.f32 %v467_v53, %v467_v53 }
 0x161   :  { %v186_v61 = vpop.xlane.xlu1 %185  ;;  %225 = vadd.xlane.f32.xlu0 %v224_v59 }
 0x162   :  { %v476_v62 = vsub.f32 %v165_v26, %v198_v58  ;;  %v199_v63 = vmul.f32 0.03125, %v186_v61  ;;  %v213_v0 = vmul.f32 %v471_v57, %v471_v57  ;;  %v218_v4 = vsel %vm75_vm0, %v210_v60, 0.0 }
 0x163   :  { %v174_v1 = vpop.xlane.xlu0 %173 }
 0x164   :  { %v195_v2 = vmul.f32 0.03125, %v174_v1  ;;  %v227_v3 = vsel %vm75_vm0, %v213_v0, 0.0  ;;  %v214_v5 = vmul.f32 %v476_v62, %v476_v62  ;;  %v484_v7 = vsub.f32 %v166_v35, %v199_v63 }
 0x165   :  { %228 = vadd.xlane.f32.xlu1 %v227_v3  ;;  %v192_v6 = vpop.xlane.xlu1 %191  ;;  %219 = vadd.xlane.f32.xlu0 %v218_v4 }
 0x166   :  { %v486_v8 = vsub.f32 %v162_v39, %v195_v2  ;;  %v201_v9 = vmul.f32 0.03125, %v192_v6  ;;  %v230_v12 = vsel %vm75_vm0, %v214_v5, 0.0  ;;  %v215_v17 = vmul.f32 %v484_v7, %v484_v7 }
 0x167   :  { %v189_v10 = vpop.xlane.xlu0 %188 }
 0x168   :  { %v200_v11 = vmul.f32 0.03125, %v189_v10  ;;  %v211_v13 = vmul.f32 %v486_v8, %v486_v8  ;;  %v491_v14 = vsub.f32 %v168_v42, %v201_v9  ;;  %v233_v19 = vsel %vm75_vm0, %v215_v17, 0.0 }
 0x169   :  { %231 = vadd.xlane.f32.xlu0 %v230_v12 }
 0x16a   :  { %v493_v15 = vsub.f32 %v167_v44, %v200_v11  ;;  %v221_v16 = vsel %vm75_vm0, %v211_v13, 0.0  ;;  %v217_v21 = vmul.f32 %v491_v14, %v491_v14 }
 0x16b   :  { %222 = vadd.xlane.f32.xlu1 %v221_v16 }
 0x16c   :  { %v216_v18 = vmul.f32 %v493_v15, %v493_v15  ;;  %v239_v22 = vsel %vm75_vm0, %v217_v21, 0.0 }
 0x16e   :  { %v236_v20 = vsel %vm75_vm0, %v216_v18, 0.0 }
 0x16f   :  { %234 = vadd.xlane.f32.xlu1 %v233_v19  ;;  %237 = vadd.xlane.f32.xlu0 %v236_v20 }
 0x173   :  { %240 = vadd.xlane.f32.xlu1 %v239_v22 }
 0x1ea   :  { %v226_v23 = vpop.xlane.xlu0 %225 }
 0x1eb   :  { %v244_v24 = vmul.f32 0.03125, %v226_v23 }
 0x1ed   :  { %v252_v25 = vadd.f32 1e-05, %v244_v24 }
 0x1ee   :  { %v229_v26 = vpop.xlane.xlu1 %228  ;;  %v220_v27 = vpop.xlane.xlu0 %219 }
 0x1ef   :  { %357 = vrsqrt.f32 %v252_v25  ;;  %v245_v28 = vmul.f32 0.03125, %v229_v26  ;;  %v242_v29 = vmul.f32 0.03125, %v220_v27 }
 0x1f1   :  { %v253_v30 = vadd.f32 1e-05, %v245_v28  ;;  %v250_v31 = vadd.f32 1e-05, %v242_v29 }
 0x1f2   :  { %v232_v32 = vpop.xlane.xlu0 %231 }
 0x1f3   :  { %359 = vrsqrt.f32 %v253_v30  ;;  %v246_v33 = vmul.f32 0.03125, %v232_v32 }
 0x1f4   :  { %361 = vrsqrt.f32 %v250_v31  ;;  %v223_v34 = vpop.xlane.xlu1 %222 }
 0x1f5   :  { %v254_v35 = vadd.f32 1e-05, %v246_v33  ;;  %v243_v36 = vmul.f32 0.03125, %v223_v34 }
 0x1f7   :  { %363 = vrsqrt.f32 %v254_v35  ;;  %v251_v37 = vadd.f32 1e-05, %v243_v36 }
 0x1f8   :  { %v235_v38 = vpop.xlane.xlu1 %234  ;;  %v238_v39 = vpop.xlane.xlu0 %237 }
 0x1f9   :  { %365 = vrsqrt.f32 %v251_v37  ;;  %v247_v40 = vmul.f32 0.03125, %v235_v38  ;;  %v248_v41 = vmul.f32 0.03125, %v238_v39 }
 0x1fb   :  { %v255_v42 = vadd.f32 1e-05, %v247_v40  ;;  %v256_v43 = vadd.f32 1e-05, %v248_v41 }
 0x1fc   :  { %v358_v44 = vpop.eup %357  ;;  %v241_v46 = vpop.xlane.xlu1 %240 }
 0x1fd   :  { %v268_v47 = vmul.f32 %v358_v44, %v465_v50  ;;  %367 = vrsqrt.f32 %v255_v42  ;;  %v249_v48 = vmul.f32 0.03125, %v241_v46 }
 0x1fe   :  { %369 = vrsqrt.f32 %v256_v43 }
 0x1ff   :  { %v283_v51 = vmul.f32 %v327_v45, %v268_v47  ;;  %v257_v52 = vadd.f32 1e-05, %v249_v48 }
 0x200   :  { %v360_v54 = vpop.eup %359 }
 0x201   :  { %v362_v55 = vpop.eup %361  ;;  %v298_v56 = vadd.f32 %v328_v49, %v283_v51  ;;  %v269_v58 = vmul.f32 %v360_v54, %v471_v57  ;;  %371 = vrsqrt.f32 %v257_v52 }
 0x202   :  { %v266_v59 = vmul.f32 %v362_v55, %v467_v53 }
 0x203   :  { %306 = vst.msk [vmem:[%s557_s6 + $0x10] sm:$0xff] %vm75_vm0, %v298_v56  ;;  %v284_v50 = vmul.f32 %v327_v45, %v269_v58 }
 0x204   :  { %v364_v60 = vpop.eup %363  ;;  %v281_v61 = vmul.f32 %v327_v45, %v266_v59 }
 0x205   :  { %v299_v63 = vadd.f32 %v328_v49, %v284_v50  ;;  %v270_v0 = vmul.f32 %v364_v60, %v476_v62 }
 0x206   :  { %v366_v1 = vpop.eup %365  ;;  %v296_v2 = vadd.f32 %v328_v49, %v281_v61 }
 0x207   :  { %307 = vst.msk [vmem:[%s557_s6 + $0x18] sm:$0xff] %vm75_vm0, %v299_v63  ;;  %v285_v57 = vmul.f32 %v327_v45, %v270_v0  ;;  %v267_v53 = vmul.f32 %v366_v1, %v486_v8 }
 0x208   :  { %304 = vst.msk [vmem:[%s557_s6] sm:$0xff] %vm75_vm0, %v296_v2 }
 0x209   :  { %v300_v3 = vadd.f32 %v328_v49, %v285_v57  ;;  %v282_v4 = vmul.f32 %v327_v45, %v267_v53 }
 0x20a   :  { %v368_v5 = vpop.eup %367 }
 0x20b   :  { %v370_v6 = vpop.eup %369  ;;  %308 = vst.msk [vmem:[%s557_s6 + $0x20] sm:$0xff] %vm75_vm0, %v300_v3  ;;  %v297_v62 = vadd.f32 %v328_v49, %v282_v4  ;;  %v271_v9 = vmul.f32 %v368_v5, %v484_v7 }
 0x20c   :  { %v272_v10 = vmul.f32 %v370_v6, %v493_v15 }
 0x20d   :  { %305 = vst.msk [vmem:[%s557_s6 + $0x8] sm:$0xff] %vm75_vm0, %v297_v62  ;;  %v286_v8 = vmul.f32 %v327_v45, %v271_v9 }
 0x20e   :  { %v372_v11 = vpop.eup %371  ;;  %v287_v12 = vmul.f32 %v327_v45, %v272_v10 }
 0x20f   :  { %v301_v13 = vadd.f32 %v328_v49, %v286_v8  ;;  %v273_v16 = vmul.f32 %v372_v11, %v491_v14 }
 0x210   :  { %v302_v17 = vadd.f32 %v328_v49, %v287_v12 }
 0x211   :  { %309 = vst.msk [vmem:[%s557_s6 + $0x28] sm:$0xff] %vm75_vm0, %v301_v13  ;;  %v288_v7 = vmul.f32 %v327_v45, %v273_v16 }
 0x212   :  { %310 = vst.msk [vmem:[%s557_s6 + $0x30] sm:$0xff] %vm75_vm0, %v302_v17 }
 0x213   :  { %v303_v15 = vadd.f32 %v328_v49, %v288_v7 }
 0x215   :  { %311 = vst.msk [vmem:[%s557_s6 + $0x38] sm:$0xff] %vm75_vm0, %v303_v15 }

// kernel: residual_block.17
= control target key start
LH: loop header
LB: loop body
LE: loop exit
PB: predicated region body
PF: predicated region fallthrough
CT: control target
= control target key end

     0   :  { %vm75_vm0 = vcmask 261120   ;;  %vm336_vm1 = vcmask 257024   ;;  %s600_s1 = inlined_call_operand.vmem [shape: bf16[32,32], index: 1, kind: input, shape index: {}]   ;;  %s601_s0 = inlined_call_operand.vmem [shape: bf16[64,32], index: 0, kind: input, shape index: {}]   ;;  %s602_s2 = inlined_call_operand.vmem [shape: f32[1,32], index: 2, kind: input, shape index: {}]   ;;  %s603_s3 = inlined_call_operand.vmem [shape: f32[64,32], index: 3, kind: input, shape index: {}]   ;;  %s604_s4 = inlined_call_operand.vmem [shape: f32[1,32], index: 4, kind: input, shape index: {}]   ;;  %s605_s5 = inlined_call_operand.vmem [shape: f32[1,32], index: 5, kind: input, shape index: {}]   ;;  %s606_s6 = inlined_call_operand.vmem [shape: bf16[64,32], index: 6, kind: output, shape index: {}]  }
   0x1   :  { %v400_v0 = vld [vmem:[%s600_s1 + $0x8] sm:$0xff]   ;;  %v401_v1 = vld [vmem:[%s600_s1] sm:$0xff]   ;;  %v403_v3 = vld [vmem:[%s601_s0 + $0x10] sm:$0xff]  }
   0x2   :  { %384 = vmatprep.subr.bf16.mxu0 %v400_v0  ;;  %396 = vmatprep.subr.bf16.mxu1 %v400_v0  ;;  %v402_v2 = vld [vmem:[%s601_s0] sm:$0xff]   ;;  %v404_v4 = vld [vmem:[%s601_s0 + $0x8] sm:$0xff]   ;;  %v405_v5 = vld [vmem:[%s601_s0 + $0x18] sm:$0xff]  }
   0x3   :  { %385 = vmatpush3.bf16.msra.mxu0 %v400_v0  ;;  %398 = vmatpush3.bf16.msra.mxu1 %v400_v0  ;;  %v349_v6 = vld [vmem:[%s602_s2] ss:$0 sm:$0xff]  ;;  %v155_v9 = vld [vmem:[%s603_s3 + $0x10] sm:$0xff]  ;;  %v156_v20 = vld [vmem:[%s603_s3 + $0x18] sm:$0xff] }
   0x4   :  { %386 = vmatprep.subr.bf16.mxu0 %v401_v1  ;;  %397 = vmatprep.subr.bf16.mxu1 %v401_v1  ;;  %v153_v13 = vld [vmem:[%s603_s3] sm:$0xff]  ;;  %v158_v27 = vld [vmem:[%s603_s3 + $0x28] sm:$0xff]  ;;  %v160_v36 = vld [vmem:[%s603_s3 + $0x38] sm:$0xff] }
   0x5   :  { %388 = vmatprep.mubr.msk.bf16.mxu0 %vm75_vm0, %v402_v2  ;;  %392 = vmatprep.mubr.msk.bf16.mxu1 %vm75_vm0, %v403_v3  ;;  %v157_v17 = vld [vmem:[%s603_s3 + $0x20] sm:$0xff]  ;;  %v154_v32 = vld [vmem:[%s603_s3 + $0x8] sm:$0xff]  ;;  %v159_v40 = vld [vmem:[%s603_s3 + $0x30] sm:$0xff] }
   0x7   :  { %387 = vmatpush3.bf16.msra.mxu0 %v401_v1  ;;  %399 = vmatpush3.bf16.msra.mxu1 %v401_v1 }
   0xa   :  { %389 = vmatmul.mubr.msk.bf16.vlgmr.msra.gmra.mxu0 %vm75_vm0, %v404_v4  ;;  %393 = vmatmul.mubr.msk.bf16.vlgmr.msra.gmra.mxu1 %vm75_vm0, %v405_v5 }
  0xca   :  { %v390_v7 = vpop.f32.mrf.mxu0  ;;  %v394_v8 = vpop.f32.mrf.mxu1 }
  0xcb   :  { %v131_v10 = vadd.f32 %v390_v7, %v349_v6  ;;  %v147_v37 = vadd.f32 %v394_v8, %v349_v6 }
  0xcc   :  { %v122_v11 = vpop.f32.mrf.mxu0  ;;  %v138_v12 = vpop.f32.mrf.mxu1 }
  0xcd   :  { %v123_v14 = vadd.f32 %v349_v6, %v122_v11  ;;  %v139_v15 = vadd.f32 %v349_v6, %v138_v12  ;;  %v163_v16 = vadd.f32 %v155_v9, %v131_v10  ;;  %v167_v44 = vadd.f32 %v159_v40, %v147_v37 }
  0xce   :  { %v391_v18 = vpop.f32.mrf.mxu0  ;;  %v395_v19 = vpop.f32.mrf.mxu1 }
  0xcf   :  { %v134_v21 = vadd.f32 %v391_v18, %v349_v6  ;;  %v175_v22 = vsel %vm75_vm0, %v163_v16, 0.0  ;;  %v161_v23 = vadd.f32 %v153_v13, %v123_v14  ;;  %v165_v26 = vadd.f32 %v157_v17, %v139_v15 }
  0xd0   :  { %v141_v24 = vpop.f32.mrf.mxu1  ;;  %176 = vadd.xlane.f32.xlu1 %v175_v22  ;;  %v125_v25 = vpop.f32.mrf.mxu0  ;;  %v150_v33 = vadd.f32 %v395_v19, %v349_v6  ;;  %v187_v46 = vsel %vm75_vm0, %v167_v44, 0.0 }
  0xd1   :  { %v142_v28 = vadd.f32 %v349_v6, %v141_v24  ;;  %v126_v29 = vadd.f32 %v349_v6, %v125_v25  ;;  %v169_v30 = vsel %vm75_vm0, %v161_v23, 0.0  ;;  %v164_v31 = vadd.f32 %v156_v20, %v134_v21 }
  0xd2   :  { %170 = vadd.xlane.f32.xlu0 %v169_v30  ;;  %v181_v38 = vsel %vm75_vm0, %v165_v26, 0.0  ;;  %v168_v42 = vadd.f32 %v160_v36, %v150_v33 }
  0xd3   :  { %v178_v34 = vsel %vm75_vm0, %v164_v31, 0.0  ;;  %v166_v35 = vadd.f32 %v158_v27, %v142_v28  ;;  %v162_v39 = vadd.f32 %v154_v32, %v126_v29 }
  0xd4   :  { %179 = vadd.xlane.f32.xlu1 %v178_v34  ;;  %v190_v45 = vsel %vm75_vm0, %v168_v42, 0.0 }
  0xd5   :  { %v184_v41 = vsel %vm75_vm0, %v166_v35, 0.0  ;;  %v172_v43 = vsel %vm75_vm0, %v162_v39, 0.0 }
  0xd6   :  { %182 = vadd.xlane.f32.xlu0 %v181_v38 }
  0xd8   :  { %185 = vadd.xlane.f32.xlu1 %v184_v41 }
  0xda   :  { %173 = vadd.xlane.f32.xlu0 %v172_v43 }
  0xdc   :  { %191 = vadd.xlane.f32.xlu1 %v190_v45  ;;  %v360_v45 = vld [vmem:[%s604_s4] ss:$0 sm:$0xff] }
  0xde   :  { %188 = vadd.xlane.f32.xlu0 %v187_v46 }
 0x159   :  { %v177_v47 = vpop.xlane.xlu1 %176 }
 0x15a   :  { %v196_v48 = vmul.f32 0.03125, %v177_v47 }
 0x15b   :  { %v171_v49 = vpop.xlane.xlu0 %170 }
 0x15c   :  { %v514_v50 = vsub.f32 %v163_v16, %v196_v48  ;;  %v194_v51 = vmul.f32 0.03125, %v171_v49  ;;  %v361_v49 = vld [vmem:[%s605_s5] ss:$0 sm:$0xff] }
 0x15d   :  { %v180_v52 = vpop.xlane.xlu1 %179 }
 0x15e   :  { %v516_v53 = vsub.f32 %v161_v23, %v194_v51  ;;  %v197_v54 = vmul.f32 0.03125, %v180_v52  ;;  %v212_v55 = vmul.f32 %v514_v50, %v514_v50 }
 0x15f   :  { %v183_v56 = vpop.xlane.xlu0 %182 }
 0x160   :  { %v520_v57 = vsub.f32 %v164_v31, %v197_v54  ;;  %v198_v58 = vmul.f32 0.03125, %v183_v56  ;;  %v224_v59 = vsel %vm75_vm0, %v212_v55, 0.0  ;;  %v210_v60 = vmul.f32 %v516_v53, %v516_v53 }
 0x161   :  { %v186_v61 = vpop.xlane.xlu1 %185  ;;  %225 = vadd.xlane.f32.xlu0 %v224_v59 }
 0x162   :  { %v525_v62 = vsub.f32 %v165_v26, %v198_v58  ;;  %v199_v63 = vmul.f32 0.03125, %v186_v61  ;;  %v213_v0 = vmul.f32 %v520_v57, %v520_v57  ;;  %v218_v4 = vsel %vm75_vm0, %v210_v60, 0.0 }
 0x163   :  { %v174_v1 = vpop.xlane.xlu0 %173 }
 0x164   :  { %v195_v2 = vmul.f32 0.03125, %v174_v1  ;;  %v227_v3 = vsel %vm75_vm0, %v213_v0, 0.0  ;;  %v214_v5 = vmul.f32 %v525_v62, %v525_v62  ;;  %v533_v7 = vsub.f32 %v166_v35, %v199_v63 }
 0x165   :  { %228 = vadd.xlane.f32.xlu1 %v227_v3  ;;  %v192_v6 = vpop.xlane.xlu1 %191  ;;  %219 = vadd.xlane.f32.xlu0 %v218_v4 }
 0x166   :  { %v535_v8 = vsub.f32 %v162_v39, %v195_v2  ;;  %v201_v9 = vmul.f32 0.03125, %v192_v6  ;;  %v230_v12 = vsel %vm75_vm0, %v214_v5, 0.0  ;;  %v215_v17 = vmul.f32 %v533_v7, %v533_v7 }
 0x167   :  { %v189_v10 = vpop.xlane.xlu0 %188 }
 0x168   :  { %v200_v11 = vmul.f32 0.03125, %v189_v10  ;;  %v211_v13 = vmul.f32 %v535_v8, %v535_v8  ;;  %v540_v14 = vsub.f32 %v168_v42, %v201_v9  ;;  %v233_v19 = vsel %vm75_vm0, %v215_v17, 0.0 }
 0x169   :  { %231 = vadd.xlane.f32.xlu0 %v230_v12 }
 0x16a   :  { %v542_v15 = vsub.f32 %v167_v44, %v200_v11  ;;  %v221_v16 = vsel %vm75_vm0, %v211_v13, 0.0  ;;  %v217_v21 = vmul.f32 %v540_v14, %v540_v14 }
 0x16b   :  { %222 = vadd.xlane.f32.xlu1 %v221_v16 }
 0x16c   :  { %v216_v18 = vmul.f32 %v542_v15, %v542_v15  ;;  %v239_v22 = vsel %vm75_vm0, %v217_v21, 0.0 }
 0x16e   :  { %v236_v20 = vsel %vm75_vm0, %v216_v18, 0.0 }
 0x16f   :  { %234 = vadd.xlane.f32.xlu1 %v233_v19  ;;  %237 = vadd.xlane.f32.xlu0 %v236_v20 }
 0x173   :  { %240 = vadd.xlane.f32.xlu1 %v239_v22 }
 0x1ea   :  { %v226_v23 = vpop.xlane.xlu0 %225 }
 0x1eb   :  { %v244_v24 = vmul.f32 0.03125, %v226_v23 }
 0x1ed   :  { %v252_v25 = vadd.f32 1e-05, %v244_v24 }
 0x1ee   :  { %v229_v26 = vpop.xlane.xlu1 %228  ;;  %v220_v27 = vpop.xlane.xlu0 %219 }
 0x1ef   :  { %406 = vrsqrt.f32 %v252_v25  ;;  %v245_v28 = vmul.f32 0.03125, %v229_v26  ;;  %v242_v29 = vmul.f32 0.03125, %v220_v27 }
 0x1f1   :  { %v253_v30 = vadd.f32 1e-05, %v245_v28  ;;  %v250_v31 = vadd.f32 1e-05, %v242_v29 }
 0x1f2   :  { %v232_v32 = vpop.xlane.xlu0 %231 }
 0x1f3   :  { %408 = vrsqrt.f32 %v253_v30  ;;  %v246_v33 = vmul.f32 0.03125, %v232_v32 }
 0x1f4   :  { %410 = vrsqrt.f32 %v250_v31  ;;  %v223_v34 = vpop.xlane.xlu1 %222 }
 0x1f5   :  { %v254_v35 = vadd.f32 1e-05, %v246_v33  ;;  %v243_v36 = vmul.f32 0.03125, %v223_v34 }
 0x1f7   :  { %412 = vrsqrt.f32 %v254_v35  ;;  %v251_v37 = vadd.f32 1e-05, %v243_v36 }
 0x1f8   :  { %v235_v38 = vpop.xlane.xlu1 %234  ;;  %v238_v39 = vpop.xlane.xlu0 %237 }
 0x1f9   :  { %414 = vrsqrt.f32 %v251_v37  ;;  %v247_v40 = vmul.f32 0.03125, %v235_v38  ;;  %v248_v41 = vmul.f32 0.03125, %v238_v39 }
 0x1fb   :  { %v255_v42 = vadd.f32 1e-05, %v247_v40  ;;  %v256_v43 = vadd.f32 1e-05, %v248_v41 }
 0x1fc   :  { %v407_v44 = vpop.eup %406  ;;  %v241_v46 = vpop.xlane.xlu1 %240 }
 0x1fd   :  { %v268_v47 = vmul.f32 %v407_v44, %v514_v50  ;;  %416 = vrsqrt.f32 %v255_v42  ;;  %v249_v48 = vmul.f32 0.03125, %v241_v46 }
 0x1fe   :  { %418 = vrsqrt.f32 %v256_v43 }
 0x1ff   :  { %v283_v51 = vmul.f32 %v360_v45, %v268_v47  ;;  %v257_v52 = vadd.f32 1e-05, %v249_v48 }
 0x200   :  { %v409_v54 = vpop.eup %408 }
 0x201   :  { %v411_v55 = vpop.eup %410  ;;  %v298_v56 = vadd.f32 %v361_v49, %v283_v51  ;;  %v269_v58 = vmul.f32 %v409_v54, %v520_v57  ;;  %420 = vrsqrt.f32 %v257_v52 }
 0x202   :  { %v266_v59 = vmul.f32 %v411_v55, %v516_v53 }
 0x203   :  { %v372_v60 = vpack.c.bf16 %v298_v56, %v298_v56  ;;  %v284_v50 = vmul.f32 %v360_v45, %v269_v58 }
 0x204   :  { %v413_v61 = vpop.eup %412  ;;  %v281_v63 = vmul.f32 %v360_v45, %v266_v59 }
 0x205   :  { %339 = vst.msk [vmem:[%s606_s6 + $0x8] sm:$0xf] %vm336_vm1, %v372_v60  ;;  %v299_v0 = vadd.f32 %v361_v49, %v284_v50  ;;  %v270_v1 = vmul.f32 %v413_v61, %v525_v62 }
 0x206   :  { %v415_v2 = vpop.eup %414  ;;  %v296_v3 = vadd.f32 %v361_v49, %v281_v63 }
 0x207   :  { %v373_v4 = vpack.c.bf16 %v299_v0, %v299_v0  ;;  %v285_v57 = vmul.f32 %v360_v45, %v270_v1  ;;  %v267_v5 = vmul.f32 %v415_v2, %v535_v8 }
 0x208   :  { %v370_v6 = vpack.c.bf16 %v296_v3, %v296_v3 }
 0x209   :  { %340 = vst.msk [vmem:[%s606_s6 + $0xc] sm:$0xf] %vm336_vm1, %v373_v4  ;;  %v300_v53 = vadd.f32 %v361_v49, %v285_v57  ;;  %v282_v9 = vmul.f32 %v360_v45, %v267_v5 }
 0x20a   :  { %v417_v10 = vpop.eup %416  ;;  %337 = vst.msk [vmem:[%s606_s6] sm:$0xf] %vm336_vm1, %v370_v6 }
 0x20b   :  { %v419_v62 = vpop.eup %418  ;;  %v374_v11 = vpack.c.bf16 %v300_v53, %v300_v53  ;;  %v297_v12 = vadd.f32 %v361_v49, %v282_v9  ;;  %v271_v13 = vmul.f32 %v417_v10, %v533_v7 }
 0x20c   :  { %v272_v8 = vmul.f32 %v419_v62, %v542_v15 }
 0x20d   :  { %341 = vst.msk [vmem:[%s606_s6 + $0x10] sm:$0xf] %vm336_vm1, %v374_v11  ;;  %v371_v16 = vpack.c.bf16 %v297_v12, %v297_v12  ;;  %v286_v17 = vmul.f32 %v360_v45, %v271_v13 }
 0x20e   :  { %v421_v18 = vpop.eup %420  ;;  %v287_v19 = vmul.f32 %v360_v45, %v272_v8 }
 0x20f   :  { %338 = vst.msk [vmem:[%s606_s6 + $0x4] sm:$0xf] %vm336_vm1, %v371_v16  ;;  %v301_v20 = vadd.f32 %v361_v49, %v286_v17  ;;  %v273_v21 = vmul.f32 %v421_v18, %v540_v14 }
 0x210   :  { %v302_v7 = vadd.f32 %v361_v49, %v287_v19 }
 0x211   :  { %v375_v22 = vpack.c.bf16 %v301_v20, %v301_v20  ;;  %v288_v15 = vmul.f32 %v360_v45, %v273_v21 }
 0x212   :  { %v376_v23 = vpack.c.bf16 %v302_v7, %v302_v7 }
 0x213   :  { %342 = vst.msk [vmem:[%s606_s6 + $0x14] sm:$0xf] %vm336_vm1, %v375_v22  ;;  %v303_v24 = vadd.f32 %v361_v49, %v288_v15 }
 0x214   :  { %343 = vst.msk [vmem:[%s606_s6 + $0x18] sm:$0xf] %vm336_vm1, %v376_v23 }
 0x215   :  { %v377_v25 = vpack.c.bf16 %v303_v24, %v303_v24 }
 0x217   :  { %344 = vst.msk [vmem:[%s606_s6 + $0x1c] sm:$0xf] %vm336_vm1, %v377_v25 }

// kernel: residual_block.18
= control target key start
LH: loop header
LB: loop body
LE: loop exit
PB: predicated region body
PF: predicated region fallthrough
CT: control target
= control target key end

     0   :  { %vm202_vm0 = vcmask 1043456   ;;  %vm189_vm1 = vcmask 64512   ;;  %vm75_vm2 = vcmask 261120   ;;  %vm423_vm3 = vcmask 257024   ;;  %s688_s4 = inlined_call_operand.vmem [shape: bf16[8,64], index: 4, kind: input, shape index: {}]   ;;  %s689_s2 = inlined_call_operand.vmem [shape: bf16[32,64], index: 2, kind: input, shape index: {}]   ;;  %s690_s1 = inlined_call_operand.vmem [shape: bf16[64,8], index: 1, kind: input, shape index: {}]   ;;  %s691_s0 = inlined_call_operand.vmem [shape: bf16[64,32], index: 0, kind: input, shape index: {}]   ;;  %s692_s5 = inlined_call_operand.vmem [shape: f32[1,64], index: 5, kind: input, shape index: {}]   ;;  %s693_s3 = inlined_call_operand.vmem [shape: f32[1,64], index: 3, kind: input, shape index: {}]   ;;  %s694_s6 = inlined_call_operand.vmem [shape: bf16[64,32], index: 6, kind: output, shape index: {}]  }
   0x1   :  { %v161_v0 = vld [vmem:[%s688_s4] sm:$0xf]  ;;  %v515_v2 = vld [vmem:[%s689_s2 + $0x8] sm:$0xff]   ;;  %v521_v8 = vld [vmem:[%s690_s1 + $0x10] sm:$0xff]  }
   0x2   :  { %513 = vmatprep.subr.msk.bf16.mxu1 %vm202_vm0, %v161_v0  ;;  %v204_v1 = vsel %vm202_vm0, %v161_v0, 0  ;;  %v516_v3 = vld [vmem:[%s690_s1] sm:$0xff]   ;;  %491 = vmatprep.subr.bf16.mxu0 %v515_v2  ;;  %v517_v4 = vld [vmem:[%s690_s1 + $0x8] sm:$0xff]   ;;  %v522_v9 = vld [vmem:[%s690_s1 + $0x18] sm:$0xff]  }
   0x3   :  { %504 = vmatpush3.bf16.msra.mxu1 %v204_v1  ;;  %492 = vmatpush3.bf16.msra.mxu0 %v515_v2  ;;  %v518_v5 = vld [vmem:[%s689_s2] sm:$0xff]   ;;  %v520_v7 = vld [vmem:[%s691_s0 + $0x8] sm:$0xff]   ;;  %v523_v10 = vld [vmem:[%s691_s0 + $0x10] sm:$0xff]  }
   0x4   :  { %505 = vmatprep.mubr.msk.bf16.mxu1 %vm189_vm1, %v516_v3  ;;  %v519_v6 = vld [vmem:[%s691_s0] sm:$0xff]   ;;  %493 = vmatprep.subr.bf16.mxu0 %v518_v5  ;;  %v524_v11 = vld [vmem:[%s691_s0 + $0x18] sm:$0xff]   ;;  %s573_s0 = smov 96  }
   0x5   :  { %495 = vmatprep.mubr.msk.bf16.mxu0 %vm75_vm2, %v519_v6  ;;  %v447_v13 = vld [vmem:[%s692_s5] ss:$0 sm:$0xff] }
   0x6   :  { %506 = vmatmul.mubr.msk.bf16.vlgmr.msra.gmra.mxu1 %vm189_vm1, %v517_v4  ;;  %v436_v17 = vld [vmem:[%s693_s3] ss:$0 sm:$0xff] }
   0x7   :  { %494 = vmatpush3.bf16.msra.mxu0 %v518_v5  ;;  %509 = vmatprep.mubr.msk.bf16.mxu1 %vm189_vm1, %v521_v8 }
   0xa   :  { %496 = vmatmul.mubr.msk.bf16.vlgmr.msra.gmra.mxu0 %vm75_vm2, %v520_v7 }
   0xb   :  { %499 = vmatprep.mubr.msk.bf16.mxu0 %vm75_vm2, %v523_v10 }
   0xe   :  { %510 = vmatmul.mubr.msk.bf16.gmra.mxu1 %vm189_vm1, %v522_v9 }
  0x12   :  { %500 = vmatmul.mubr.msk.bf16.gmra.mxu0 %vm75_vm2, %v524_v11 }
  0xc6   :  { %v507_v12 = vpop.f32.mrf.mxu1 }
  0xc7   :  { %v249_v15 = vadd.f32 %v507_v12, %v447_v13 }
  0xc8   :  { %v240_v14 = vpop.f32.mrf.mxu1 }
  0xc9   :  { %v281_v20 = vmax.f32 %v249_v15, 0.0  ;;  %v241_v21 = vadd.f32 %v447_v13, %v240_v14 }
  0xca   :  { %v508_v16 = vpop.f32.mrf.mxu1  ;;  %v497_v18 = vpop.f32.mrf.mxu0 }
  0xcb   :  { %v131_v22 = vadd.f32 %v497_v18, %v436_v17  ;;  %v252_v25 = vadd.f32 %v508_v16, %v447_v13  ;;  %v279_v30 = vmax.f32 %v241_v21, 0.0 }
  0xcc   :  { %v243_v19 = vpop.f32.mrf.mxu1  ;;  %v122_v23 = vpop.f32.mrf.mxu0 }
  0xcd   :  { %v273_v26 = vmax.f32 %v131_v22, 0.0  ;;  %v123_v27 = vadd.f32 %v436_v17, %v122_v23  ;;  %v244_v34 = vadd.f32 %v447_v13, %v243_v19  ;;  %v282_v36 = vmax.f32 %v252_v25, 0.0 }
  0xce   :  { %v511_v24 = vpop.f32.mrf.mxu1  ;;  %v498_v28 = vpop.f32.mrf.mxu0 }
  0xcf   :  { %v652_v31 = vadd.f32 %v281_v20, %v273_v26  ;;  %v271_v32 = vmax.f32 %v123_v27, 0.0  ;;  %v134_v33 = vadd.f32 %v498_v28, %v436_v17  ;;  %v265_v42 = vadd.f32 %v511_v24, %v447_v13 }
  0xd0   :  { %v256_v29 = vpop.f32.mrf.mxu1  ;;  %v125_v35 = vpop.f32.mrf.mxu0  ;;  %v280_v46 = vmax.f32 %v244_v34, 0.0 }
  0xd1   :  { %525 = vtanh.f32 %v652_v31  ;;  %v287_v37 = vadd.f32 %v279_v30, %v271_v32  ;;  %v274_v38 = vmax.f32 %v134_v33, 0.0  ;;  %v126_v40 = vadd.f32 %v436_v17, %v125_v35 }
  0xd2   :  { %v512_v39 = vpop.f32.mrf.mxu1  ;;  %v501_v41 = vpop.f32.mrf.mxu0  ;;  %v257_v44 = vadd.f32 %v447_v13, %v256_v29  ;;  %v285_v53 = vmax.f32 %v265_v42, 0.0  ;;  %v458_v14 = vmul.f32 -1.442695, %v652_v31 }
  0xd3   :  { %v290_v43 = vadd.f32 %v282_v36, %v274_v38  ;;  %v147_v45 = vadd.f32 %v501_v41, %v436_v17  ;;  %527 = vtanh.f32 %v287_v37  ;;  %v272_v47 = vmax.f32 %v126_v40, 0.0 }
  0xd4   :  { %v138_v48 = vpop.f32.mrf.mxu0  ;;  %v259_v49 = vpop.f32.mrf.mxu1  ;;  %v283_v54 = vmax.f32 %v257_v44, 0.0  ;;  %v268_v61 = vadd.f32 %v512_v39, %v447_v13  ;;  %v456_v15 = vmul.f32 -1.442695, %v287_v37 }
  0xd5   :  { %v139_v50 = vadd.f32 %v436_v17, %v138_v48  ;;  %529 = vtanh.f32 %v290_v43  ;;  %v288_v51 = vadd.f32 %v280_v46, %v272_v47  ;;  %v277_v55 = vmax.f32 %v147_v45, 0.0 }
  0xd6   :  { %v502_v52 = vpop.f32.mrf.mxu0  ;;  %v260_v57 = vadd.f32 %v447_v13, %v259_v49  ;;  %v286_v4 = vmax.f32 %v268_v61, 0.0  ;;  %v459_v16 = vmul.f32 -1.442695, %v290_v43 }
  0xd7   :  { %v275_v56 = vmax.f32 %v139_v50, 0.0  ;;  %531 = vtanh.f32 %v288_v51  ;;  %v150_v58 = vadd.f32 %v502_v52, %v436_v17  ;;  %v293_v63 = vadd.f32 %v285_v53, %v277_v55 }
  0xd8   :  { %v141_v59 = vpop.f32.mrf.mxu0  ;;  %v284_v0 = vmax.f32 %v260_v57, 0.0 }
  0xd9   :  { %v291_v60 = vadd.f32 %v283_v54, %v275_v56  ;;  %v142_v62 = vadd.f32 %v436_v17, %v141_v59  ;;  %v278_v1 = vmax.f32 %v150_v58, 0.0  ;;  %v457_v17 = vmul.f32 -1.442695, %v288_v51 }
  0xda   :  { %v462_v19 = vmul.f32 -1.442695, %v293_v63 }
  0xdb   :  { %533 = vtanh.f32 %v291_v60  ;;  %v276_v2 = vmax.f32 %v142_v62, 0.0  ;;  %v294_v6 = vadd.f32 %v286_v4, %v278_v1  ;;  %v460_v18 = vmul.f32 -1.442695, %v291_v60 }
  0xdc   :  { %535 = vtanh.f32 %v293_v63 }
  0xdd   :  { %v292_v5 = vadd.f32 %v284_v0, %v276_v2  ;;  %v463_v22 = vmul.f32 -1.442695, %v294_v6 }
  0xde   :  { %v526_v3 = vpop.eup %525 }
  0xdf   :  { %363 = vrot.lane.b32.xlu1 %v526_v3, %s573_s0  ;;  %537 = vtanh.f32 %v292_v5  ;;  %v461_v20 = vmul.f32 -1.442695, %v292_v5 }
  0xe0   :  { %v528_v7 = vpop.eup %527  ;;  %539 = vtanh.f32 %v294_v6 }
  0xe1   :  { %359 = vrot.lane.b32.xlu0 %v528_v7, %s573_s0  ;;  %541 = vpow2.f32 %v458_v14 }
  0xe2   :  { %v530_v8 = vpop.eup %529  ;;  %543 = vpow2.f32 %v456_v15 }
  0xe3   :  { %365 = vrot.lane.b32.xlu1 %v530_v8, %s573_s0  ;;  %545 = vpow2.f32 %v459_v16 }
  0xe4   :  { %v532_v9 = vpop.eup %531  ;;  %547 = vpow2.f32 %v457_v17 }
  0xe5   :  { %361 = vrot.lane.b32.xlu0 %v532_v9, %s573_s0  ;;  %549 = vpow2.f32 %v460_v18 }
  0xe6   :  { %551 = vpow2.f32 %v462_v19 }
  0xe7   :  { %553 = vpow2.f32 %v461_v20 }
  0xe8   :  { %v534_v10 = vpop.eup %533  ;;  %555 = vpow2.f32 %v463_v22 }
  0xe9   :  { %367 = vrot.lane.b32.xlu0 %v534_v10, %s573_s0  ;;  %v536_v11 = vpop.eup %535 }
  0xec   :  { %v538_v12 = vpop.eup %537 }
  0xed   :  { %369 = vrot.lane.b32.xlu1 %v538_v12, %s573_s0  ;;  %371 = vrot.lane.b32.xlu0 %v536_v11, %s573_s0  ;;  %v540_v13 = vpop.eup %539 }
  0xee   :  { %v542_v21 = vpop.eup %541 }
  0xef   :  { %v544_v23 = vpop.eup %543  ;;  %v321_v24 = vadd.f32 1.0, %v542_v21 }
  0xf0   :  { %v546_v25 = vpop.eup %545  ;;  %v319_v26 = vadd.f32 1.0, %v544_v23 }
  0xf1   :  { %373 = vrot.lane.b32.xlu1 %v540_v13, %s573_s0  ;;  %v548_v27 = vpop.eup %547  ;;  %557 = vrcp.f32 %v321_v24  ;;  %v322_v28 = vadd.f32 1.0, %v546_v25 }
  0xf2   :  { %559 = vrcp.f32 %v319_v26  ;;  %v320_v29 = vadd.f32 1.0, %v548_v27  ;;  %v550_v30 = vpop.eup %549 }
  0xf3   :  { %561 = vrcp.f32 %v322_v28  ;;  %v552_v31 = vpop.eup %551  ;;  %v323_v32 = vadd.f32 1.0, %v550_v30 }
  0xf4   :  { %563 = vrcp.f32 %v320_v29  ;;  %v554_v33 = vpop.eup %553  ;;  %v325_v34 = vadd.f32 1.0, %v552_v31 }
  0xf5   :  { %565 = vrcp.f32 %v323_v32  ;;  %v324_v35 = vadd.f32 1.0, %v554_v33  ;;  %v556_v36 = vpop.eup %555 }
  0xf6   :  { %567 = vrcp.f32 %v325_v34  ;;  %v326_v40 = vadd.f32 1.0, %v556_v36 }
  0xf7   :  { %569 = vrcp.f32 %v324_v35 }
  0xf8   :  { %571 = vrcp.f32 %v326_v40 }
  0xfe   :  { %v558_v37 = vpop.eup %557 }
  0xff   :  { %v560_v41 = vpop.eup %559 }
 0x100   :  { %v562_v45 = vpop.eup %561 }
 0x101   :  { %v564_v49 = vpop.eup %563 }
 0x102   :  { %v566_v54 = vpop.eup %565 }
 0x103   :  { %v568_v57 = vpop.eup %567 }
 0x104   :  { %v570_v59 = vpop.eup %569 }
 0x105   :  { %v572_v2 = vpop.eup %571 }
 0x151   :  { %v364_v38 = vpop.permute.xlu1 %363 }
 0x152   :  { %v385_v39 = vmul.f32 %v558_v37, %v364_v38 }
 0x153   :  { %v360_v43 = vpop.permute.xlu0 %359 }
 0x154   :  { %v474_v42 = vpack.c.bf16 %v385_v39, %v385_v39  ;;  %v383_v44 = vmul.f32 %v560_v41, %v360_v43 }
 0x155   :  { %v366_v46 = vpop.permute.xlu1 %365 }
 0x156   :  { %426 = vst.msk [vmem:[%s694_s6 + $0x8] sm:$0xf] %vm423_vm3, %v474_v42  ;;  %v472_v47 = vpack.c.bf16 %v383_v44, %v383_v44  ;;  %v386_v48 = vmul.f32 %v562_v45, %v366_v46 }
 0x157   :  { %v362_v50 = vpop.permute.xlu0 %361 }
 0x158   :  { %424 = vst.msk [vmem:[%s694_s6] sm:$0xf] %vm423_vm3, %v472_v47  ;;  %v475_v51 = vpack.c.bf16 %v386_v48, %v386_v48  ;;  %v384_v52 = vmul.f32 %v564_v49, %v362_v50 }
 0x15a   :  { %427 = vst.msk [vmem:[%s694_s6 + $0xc] sm:$0xf] %vm423_vm3, %v475_v51  ;;  %v473_v53 = vpack.c.bf16 %v384_v52, %v384_v52 }
 0x15b   :  { %v368_v55 = vpop.permute.xlu0 %367 }
 0x15c   :  { %425 = vst.msk [vmem:[%s694_s6 + $0x4] sm:$0xf] %vm423_vm3, %v473_v53  ;;  %v387_v56 = vmul.f32 %v566_v54, %v368_v55 }
 0x15e   :  { %v476_v58 = vpack.c.bf16 %v387_v56, %v387_v56 }
 0x15f   :  { %v370_v60 = vpop.permute.xlu1 %369  ;;  %v372_v61 = vpop.permute.xlu0 %371 }
 0x160   :  { %428 = vst.msk [vmem:[%s694_s6 + $0x10] sm:$0xf] %vm423_vm3, %v476_v58  ;;  %v388_v62 = vmul.f32 %v570_v59, %v370_v60  ;;  %v389_v63 = vmul.f32 %v568_v57, %v372_v61 }
 0x162   :  { %v477_v0 = vpack.c.bf16 %v388_v62, %v388_v62  ;;  %v478_v1 = vpack.c.bf16 %v389_v63, %v389_v63 }
 0x163   :  { %v374_v3 = vpop.permute.xlu1 %373 }
 0x164   :  { %429 = vst.msk [vmem:[%s694_s6 + $0x14] sm:$0xf] %vm423_vm3, %v477_v0  ;;  %430 = vst.msk [vmem:[%s694_s6 + $0x18] sm:$0xf] %vm423_vm3, %v478_v1  ;;  %v390_v4 = vmul.f32 %v572_v2, %v374_v3 }
 0x166   :  { %v479_v5 = vpack.c.bf16 %v390_v4, %v390_v4 }
 0x168   :  { %431 = vst.msk [vmem:[%s694_s6 + $0x1c] sm:$0xf] %vm423_vm3, %v479_v5 }

// kernel: residual_block.19
= control target key start
LH: loop header
LB: loop body
LE: loop exit
PB: predicated region body
PF: predicated region fallthrough
CT: control target
= control target key end

     0   :  { %vm69_vm0 = vcmask 261120   ;;  %vm187_vm1 = vcmask 523264   ;;  %s353_s2 = inlined_call_operand.vmem [shape: bf16[32,64], index: 2, kind: input, shape index: {}]   ;;  %s354_s0 = inlined_call_operand.vmem [shape: bf16[64,32], index: 0, kind: input, shape index: {}]   ;;  %s355_s1 = inlined_call_operand.vmem [shape: f32[64,32], index: 1, kind: input, shape index: {}]   ;;  %s356_s3 = inlined_call_operand.vmem [shape: f32[1,64], index: 3, kind: input, shape index: {}]   ;;  %s357_s4 = inlined_call_operand.vmem [shape: f32[64,64], index: 4, kind: output, shape index: {}]  }
   0x1   :  { %v233_v0 = vld [vmem:[%s353_s2 + $0x8] sm:$0xff]   ;;  %v234_v1 = vld [vmem:[%s353_s2] sm:$0xff]   ;;  %v236_v3 = vld [vmem:[%s354_s0 + $0x10] sm:$0xff]  }
   0x2   :  { %217 = vmatprep.subr.bf16.mxu0 %v233_v0  ;;  %229 = vmatprep.subr.bf16.mxu1 %v233_v0  ;;  %v235_v2 = vld [vmem:[%s354_s0] sm:$0xff]   ;;  %v237_v4 = vld [vmem:[%s354_s0 + $0x8] sm:$0xff]   ;;  %v238_v5 = vld [vmem:[%s354_s0 + $0x18] sm:$0xff]  }
   0x3   :  { %218 = vmatpush3.bf16.msra.mxu0 %v233_v0  ;;  %231 = vmatpush3.bf16.msra.mxu1 %v233_v0  ;;  %v157_v6 = vld [vmem:[%s355_s1 + $0x10] sm:$0xff]  ;;  %v155_v9 = vld [vmem:[%s355_s1] sm:$0xff]  ;;  %v158_v13 = vld [vmem:[%s355_s1 + $0x18] sm:$0xff] }
   0x4   :  { %219 = vmatprep.subr.bf16.mxu0 %v234_v1  ;;  %230 = vmatprep.subr.bf16.mxu1 %v234_v1  ;;  %v161_v7 = vld [vmem:[%s355_s1 + $0x30] sm:$0xff]  ;;  %v165_v8 = vmul.f32 0.70710677, %v157_v6  ;;  %v159_v10 = vld [vmem:[%s355_s1 + $0x20] sm:$0xff]  ;;  %v162_v14 = vld [vmem:[%s355_s1 + $0x38] sm:$0xff] }
   0x5   :  { %221 = vmatprep.mubr.msk.bf16.mxu0 %vm69_vm0, %v235_v2  ;;  %225 = vmatprep.mubr.msk.bf16.mxu1 %vm69_vm0, %v236_v3  ;;  %v200_v11 = vld [vmem:[%s356_s3] ss:$0 sm:$0xff]  ;;  %v169_v12 = vmul.f32 0.70710677, %v161_v7  ;;  %v163_v17 = vmul.f32 0.70710677, %v155_v9 }
   0x6   :  { %v167_v18 = vmul.f32 0.70710677, %v159_v10  ;;  %v173_v20 = vsel %vm69_vm0, %v165_v8, 0.0  ;;  %v156_v22 = vld [vmem:[%s355_s1 + $0x8] sm:$0xff]  ;;  %v166_v27 = vmul.f32 0.70710677, %v158_v13 }
   0x7   :  { %220 = vmatpush3.bf16.msra.mxu0 %v234_v1  ;;  %232 = vmatpush3.bf16.msra.mxu1 %v234_v1  ;;  %v160_v23 = vld [vmem:[%s355_s1 + $0x28] sm:$0xff]  ;;  %v177_v24 = vsel %vm69_vm0, %v169_v12, 0.0  ;;  %v170_v28 = vmul.f32 0.70710677, %v162_v14  ;;  %v171_v33 = vsel %vm69_vm0, %v163_v17, 0.0 }
   0x8   :  { %v175_v34 = vsel %vm69_vm0, %v167_v18, 0.0  ;;  %v164_v37 = vmul.f32 0.70710677, %v156_v22  ;;  %v168_v38 = vmul.f32 0.70710677, %v160_v23  ;;  %v174_v44 = vsel %vm69_vm0, %v166_v27, 0.0 }
   0x9   :  { %v178_v46 = vsel %vm69_vm0, %v170_v28, 0.0 }
   0xa   :  { %222 = vmatmul.mubr.msk.bf16.vlgmr.msra.gmra.mxu0 %vm69_vm0, %v237_v4  ;;  %226 = vmatmul.mubr.msk.bf16.vlgmr.msra.gmra.mxu1 %vm69_vm0, %v238_v5  ;;  %v172_v55 = vsel %vm69_vm0, %v164_v37, 0.0  ;;  %v176_v56 = vsel %vm69_vm0, %v168_v38, 0.0 }
  0xca   :  { %v223_v15 = vpop.f32.mrf.mxu0  ;;  %v227_v16 = vpop.f32.mrf.mxu1 }
  0xcb   :  { %v125_v19 = vadd.f32 %v223_v15, %v200_v11  ;;  %v141_v21 = vadd.f32 %v227_v16, %v200_v11 }
  0xcc   :  { %v116_v25 = vpop.f32.mrf.mxu0  ;;  %v132_v26 = vpop.f32.mrf.mxu1 }
  0xcd   :  { %v149_v29 = vmax.f32 %v125_v19, 0.0  ;;  %v153_v30 = vmax.f32 %v141_v21, 0.0  ;;  %v117_v31 = vadd.f32 %v200_v11, %v116_v25  ;;  %v133_v32 = vadd.f32 %v200_v11, %v132_v26 }
  0xce   :  { %v224_v35 = vpop.f32.mrf.mxu0  ;;  %v228_v36 = vpop.f32.mrf.mxu1 }
  0xcf   :  { %v181_v39 = vadd.f32 %v173_v20, %v149_v29  ;;  %v185_v40 = vadd.f32 %v177_v24, %v153_v30  ;;  %v147_v41 = vmax.f32 %v117_v31, 0.0  ;;  %v151_v42 = vmax.f32 %v133_v32, 0.0 }
  0xd0   :  { %v128_v43 = vadd.f32 %v224_v35, %v200_v11  ;;  %v144_v45 = vadd.f32 %v228_v36, %v200_v11  ;;  %v119_v47 = vpop.f32.mrf.mxu0  ;;  %v135_v48 = vpop.f32.mrf.mxu1 }
  0xd1   :  { %190 = vst.msk [vmem:[%s357_s4 + $0x10] sm:$0xff] %vm187_vm1, %v181_v39  ;;  %194 = vst.msk [vmem:[%s357_s4 + $0x30] sm:$0xff] %vm187_vm1, %v185_v40  ;;  %v179_v49 = vadd.f32 %v171_v33, %v147_v41  ;;  %v183_v50 = vadd.f32 %v175_v34, %v151_v42  ;;  %v120_v51 = vadd.f32 %v200_v11, %v119_v47 }
  0xd2   :  { %v136_v52 = vadd.f32 %v200_v11, %v135_v48  ;;  %v150_v53 = vmax.f32 %v128_v43, 0.0  ;;  %v154_v54 = vmax.f32 %v144_v45, 0.0 }
  0xd3   :  { %188 = vst.msk [vmem:[%s357_s4] sm:$0xff] %vm187_vm1, %v179_v49  ;;  %192 = vst.msk [vmem:[%s357_s4 + $0x20] sm:$0xff] %vm187_vm1, %v183_v50  ;;  %v148_v57 = vmax.f32 %v120_v51, 0.0 }
  0xd4   :  { %v152_v58 = vmax.f32 %v136_v52, 0.0  ;;  %v182_v59 = vadd.f32 %v174_v44, %v150_v53  ;;  %v186_v60 = vadd.f32 %v178_v46, %v154_v54 }
  0xd5   :  { %v180_v61 = vadd.f32 %v172_v55, %v148_v57 }
  0xd6   :  { %v184_v62 = vadd.f32 %v176_v56, %v152_v58  ;;  %191 = vst.msk [vmem:[%s357_s4 + $0x18] sm:$0xff] %vm187_vm1, %v182_v59  ;;  %195 = vst.msk [vmem:[%s357_s4 + $0x38] sm:$0xff] %vm187_vm1, %v186_v60 }
  0xd7   :  { %189 = vst.msk [vmem:[%s357_s4 + $0x8] sm:$0xff] %vm187_vm1, %v180_v61 }
  0xd8   :  { %193 = vst.msk [vmem:[%s357_s4 + $0x28] sm:$0xff] %vm187_vm1, %v184_v62 }

// kernel: residual_block.15
= control target key start
LH: loop header
LB: loop body
LE: loop exit
PB: predicated region body
PF: predicated region fallthrough
CT: control target
= control target key end

     0   :  { %vm111_vm0 = vcmask 64512   ;;  %v4216_v0 = vmov 0.0   ;;  %vm4217_vm1 = vmmov 0   ;;  %vm1971_vm2 = vcmask 1043456   ;;  %s5294_s1 = inlined_call_operand.vmem [shape: bf16[32,8,8], index: 1, kind: input, shape index: {}]   ;;  %s5295_s0 = inlined_call_operand.vmem [shape: bf16[32,8,8], index: 0, kind: input, shape index: {}]   ;;  %s5296_s2 = inlined_call_operand.vmem [shape: bf16[32,8,8], index: 2, kind: input, shape index: {}]   ;;  %s5297_s3 = inlined_call_operand.vmem [shape: bf16[32,8,8], index: 3, kind: output, shape index: {}]  }
   0x1   :  { %3702 = vmatprep.subr.bf16.mxu0 %v4216_v0  ;;  %3708 = vmatprep.subr.bf16.mxu1 %v4216_v0  ;;  %v47_v1 = vld [vmem:[%s5294_s1] sm:$0xf]  ;;  %v48_v2 = vld [vmem:[%s5294_s1 + $0x4] sm:$0xf]  ;;  %v49_v5 = vld [vmem:[%s5294_s1 + $0x8] sm:$0xf] }
   0x2   :  { %v116_v3 = vsel %vm111_vm0, %v47_v1, 0  ;;  %v162_v4 = vsel %vm111_vm0, %v48_v2, 0  ;;  %3704 = vmatprep.mubr.msk.bf16.mxu0 %vm4217_vm1, %v4216_v0  ;;  %3710 = vmatprep.mubr.msk.bf16.mxu1 %vm4217_vm1, %v4216_v0  ;;  %v50_v6 = vld [vmem:[%s5294_s1 + $0xc] sm:$0xf]  ;;  %v15_v7 = vld [vmem:[%s5295_s0] sm:$0xf] }
   0x3   :  { %3703 = vmatpush3.bf16.xpose.msra.mxu0 %v116_v3  ;;  %3709 = vmatpush3.bf16.xpose.msra.mxu1 %v162_v4  ;;  %v16_v8 = vld [vmem:[%s5295_s0 + $0x4] sm:$0xf]  ;;  %v208_v9 = vsel %vm111_vm0, %v49_v5, 0  ;;  %v254_v10 = vsel %vm111_vm0, %v50_v6, 0  ;;  %v51_v11 = vld [vmem:[%s5294_s1 + $0x10] sm:$0xf] }
   0x4   :  { %3714 = vmatprep.subr.bf16.mxu0 %v4216_v0  ;;  %3720 = vmatprep.subr.bf16.mxu1 %v4216_v0  ;;  %v52_v12 = vld [vmem:[%s5294_s1 + $0x14] sm:$0xf]  ;;  %v17_v13 = vld [vmem:[%s5295_s0 + $0x8] sm:$0xf]  ;;  %v18_v14 = vld [vmem:[%s5295_s0 + $0xc] sm:$0xf] }
   0x5   :  { %v300_v15 = vsel %vm111_vm0, %v51_v11, 0  ;;  %v346_v16 = vsel %vm111_vm0, %v52_v12, 0  ;;  %v53_v17 = vld [vmem:[%s5294_s1 + $0x18] sm:$0xf]  ;;  %v54_v18 = vld [vmem:[%s5294_s1 + $0x1c] sm:$0xf] }
   0x6   :  { %v19_v19 = vld [vmem:[%s5295_s0 + $0x10] sm:$0xf]  ;;  %v20_v20 = vld [vmem:[%s5295_s0 + $0x14] sm:$0xf]  ;;  %v392_v21 = vsel %vm111_vm0, %v53_v17, 0  ;;  %v438_v22 = vsel %vm111_vm0, %v54_v18, 0 }
   0x7   :  { %v55_v23 = vld [vmem:[%s5294_s1 + $0x20] sm:$0xf]  ;;  %v56_v24 = vld [vmem:[%s5294_s1 + $0x24] sm:$0xf]  ;;  %v21_v25 = vld [vmem:[%s5295_s0 + $0x18] sm:$0xf] }
   0x8   :  { %v22_v26 = vld [vmem:[%s5295_s0 + $0x1c] sm:$0xf]  ;;  %v484_v27 = vsel %vm111_vm0, %v55_v23, 0  ;;  %v530_v28 = vsel %vm111_vm0, %v56_v24, 0  ;;  %v57_v29 = vld [vmem:[%s5294_s1 + $0x28] sm:$0xf] }
   0x9   :  { %v58_v30 = vld [vmem:[%s5294_s1 + $0x2c] sm:$0xf]  ;;  %v23_v31 = vld [vmem:[%s5295_s0 + $0x20] sm:$0xf]  ;;  %v24_v32 = vld [vmem:[%s5295_s0 + $0x24] sm:$0xf] }
   0xa   :  { %3705 = vmatmul.mubr.msk.bf16.vlgmr.msra.gmra.mxu0 %vm111_vm0, %v15_v7  ;;  %3711 = vmatmul.mubr.msk.bf16.vlgmr.msra.gmra.mxu1 %vm111_vm0, %v16_v8  ;;  %v576_v33 = vsel %vm111_vm0, %v57_v29, 0  ;;  %v622_v34 = vsel %vm111_vm0, %v58_v30, 0  ;;  %v59_v35 = vld [vmem:[%s5294_s1 + $0x30] sm:$0xf]  ;;  %v60_v36 = vld [vmem:[%s5294_s1 + $0x34] sm:$0xf] }
   0xb   :  { %3715 = vmatpush3.bf16.xpose.msra.mxu0 %v208_v9  ;;  %3721 = vmatpush3.bf16.xpose.msra.mxu1 %v254_v10  ;;  %v25_v37 = vld [vmem:[%s5295_s0 + $0x28] sm:$0xf]  ;;  %v26_v38 = vld [vmem:[%s5295_s0 + $0x2c] sm:$0xf]  ;;  %v668_v39 = vsel %vm111_vm0, %v59_v35, 0  ;;  %v714_v40 = vsel %vm111_vm0, %v60_v36, 0 }
   0xc   :  { %3716 = vmatprep.mubr.msk.bf16.mxu0 %vm4217_vm1, %v4216_v0  ;;  %3722 = vmatprep.mubr.msk.bf16.mxu1 %vm4217_vm1, %v4216_v0  ;;  %v61_v41 = vld [vmem:[%s5294_s1 + $0x38] sm:$0xf]  ;;  %v62_v42 = vld [vmem:[%s5294_s1 + $0x3c] sm:$0xf]  ;;  %v27_v43 = vld [vmem:[%s5295_s0 + $0x30] sm:$0xf] }
   0xd   :  { %3726 = vmatprep.subr.bf16.mxu0 %v4216_v0  ;;  %3732 = vmatprep.subr.bf16.mxu1 %v4216_v0  ;;  %v28_v44 = vld [vmem:[%s5295_s0 + $0x34] sm:$0xf]  ;;  %v760_v45 = vsel %vm111_vm0, %v61_v41, 0  ;;  %v806_v46 = vsel %vm111_vm0, %v62_v42, 0  ;;  %v63_v47 = vld [vmem:[%s5294_s1 + $0x40] sm:$0xf] }
   0xe   :  { %v64_v48 = vld [vmem:[%s5294_s1 + $0x44] sm:$0xf]  ;;  %v29_v49 = vld [vmem:[%s5295_s0 + $0x38] sm:$0xf]  ;;  %v30_v50 = vld [vmem:[%s5295_s0 + $0x3c] sm:$0xf] }
   0xf   :  { %v852_v51 = vsel %vm111_vm0, %v63_v47, 0  ;;  %v898_v52 = vsel %vm111_vm0, %v64_v48, 0  ;;  %v65_v53 = vld [vmem:[%s5294_s1 + $0x48] sm:$0xf]  ;;  %v66_v54 = vld [vmem:[%s5294_s1 + $0x4c] sm:$0xf] }
  0x10   :  { %v31_v55 = vld [vmem:[%s5295_s0 + $0x40] sm:$0xf]  ;;  %v32_v56 = vld [vmem:[%s5295_s0 + $0x44] sm:$0xf]  ;;  %v944_v57 = vsel %vm111_vm0, %v65_v53, 0  ;;  %v990_v58 = vsel %vm111_vm0, %v66_v54, 0 }
  0x11   :  { %v67_v59 = vld [vmem:[%s5294_s1 + $0x50] sm:$0xf]  ;;  %v68_v60 = vld [vmem:[%s5294_s1 + $0x54] sm:$0xf]  ;;  %v33_v61 = vld [vmem:[%s5295_s0 + $0x48] sm:$0xf] }
  0x12   :  { %3717 = vmatmul.mubr.msk.bf16.vlgmr.msra.gmra.mxu0 %vm111_vm0, %v17_v13  ;;  %3723 = vmatmul.mubr.msk.bf16.vlgmr.msra.gmra.mxu1 %vm111_vm0, %v18_v14  ;;  %v34_v62 = vld [vmem:[%s5295_s0 + $0x4c] sm:$0xf]  ;;  %v1036_v63 = vsel %vm111_vm0, %v67_v59, 0  ;;  %v1082_v1 = vsel %vm111_vm0, %v68_v60, 0  ;;  %v69_v2 = vld [vmem:[%s5294_s1 + $0x58] sm:$0xf] }
  0x13   :  { %3727 = vmatpush3.bf16.xpose.msra.mxu0 %v300_v15  ;;  %3733 = vmatpush3.bf16.xpose.msra.mxu1 %v346_v16  ;;  %v70_v3 = vld [vmem:[%s5294_s1 + $0x5c] sm:$0xf]  ;;  %v35_v4 = vld [vmem:[%s5295_s0 + $0x50] sm:$0xf]  ;;  %v36_v5 = vld [vmem:[%s5295_s0 + $0x54] sm:$0xf] }
  0x14   :  { %3728 = vmatprep.mubr.msk.bf16.mxu0 %vm4217_vm1, %v4216_v0  ;;  %3734 = vmatprep.mubr.msk.bf16.mxu1 %vm4217_vm1, %v4216_v0  ;;  %v1128_v6 = vsel %vm111_vm0, %v69_v2, 0  ;;  %v1174_v7 = vsel %vm111_vm0, %v70_v3, 0  ;;  %v71_v8 = vld [vmem:[%s5294_s1 + $0x60] sm:$0xf]  ;;  %v72_v9 = vld [vmem:[%s5294_s1 + $0x64] sm:$0xf] }
  0x15   :  { %3738 = vmatprep.subr.bf16.mxu0 %v4216_v0  ;;  %3744 = vmatprep.subr.bf16.mxu1 %v4216_v0  ;;  %v37_v10 = vld [vmem:[%s5295_s0 + $0x58] sm:$0xf]  ;;  %v38_v11 = vld [vmem:[%s5295_s0 + $0x5c] sm:$0xf]  ;;  %v1220_v12 = vsel %vm111_vm0, %v71_v8, 0  ;;  %v1266_v13 = vsel %vm111_vm0, %v72_v9, 0 }
  0x16   :  { %v73_v14 = vld [vmem:[%s5294_s1 + $0x68] sm:$0xf]  ;;  %v74_v15 = vld [vmem:[%s5294_s1 + $0x6c] sm:$0xf]  ;;  %v39_v16 = vld [vmem:[%s5295_s0 + $0x60] sm:$0xf] }
  0x17   :  { %v40_v17 = vld [vmem:[%s5295_s0 + $0x64] sm:$0xf]  ;;  %v1312_v18 = vsel %vm111_vm0, %v73_v14, 0  ;;  %v42_v23 = vld [vmem:[%s5295_s0 + $0x6c] sm:$0xf]  ;;  %vm3473_vm3 = vcmask 60416  }
  0x18   :  { %v44_v29 = vld [vmem:[%s5295_s0 + $0x74] sm:$0xf] }
  0x1a   :  { %3729 = vmatmul.mubr.msk.bf16.vlgmr.msra.gmra.mxu0 %vm111_vm0, %v19_v19  ;;  %3735 = vmatmul.mubr.msk.bf16.vlgmr.msra.gmra.mxu1 %vm111_vm0, %v20_v20  ;;  %v1358_v19 = vsel %vm111_vm0, %v74_v15, 0  ;;  %v75_v20 = vld [vmem:[%s5294_s1 + $0x70] sm:$0xf] }
  0x1b   :  { %3739 = vmatpush3.bf16.xpose.msra.mxu0 %v392_v21  ;;  %3745 = vmatpush3.bf16.xpose.msra.mxu1 %v438_v22  ;;  %v76_v21 = vld [vmem:[%s5294_s1 + $0x74] sm:$0xf]  ;;  %v41_v22 = vld [vmem:[%s5295_s0 + $0x68] sm:$0xf]  ;;  %v1404_v24 = vsel %vm111_vm0, %v75_v20, 0 }
  0x1c   :  { %3740 = vmatprep.mubr.msk.bf16.mxu0 %vm4217_vm1, %v4216_v0  ;;  %3746 = vmatprep.mubr.msk.bf16.mxu1 %vm4217_vm1, %v4216_v0 }
  0x1d   :  { %3750 = vmatprep.subr.bf16.mxu0 %v4216_v0  ;;  %3756 = vmatprep.subr.bf16.mxu1 %v4216_v0 }
  0x22   :  { %3741 = vmatmul.mubr.msk.bf16.vlgmr.msra.gmra.mxu0 %vm111_vm0, %v21_v25  ;;  %3747 = vmatmul.mubr.msk.bf16.vlgmr.msra.gmra.mxu1 %vm111_vm0, %v22_v26  ;;  %v1450_v25 = vsel %vm111_vm0, %v76_v21, 0  ;;  %v77_v26 = vld [vmem:[%s5294_s1 + $0x78] sm:$0xf] }
  0x23   :  { %3751 = vmatpush3.bf16.xpose.msra.mxu0 %v484_v27  ;;  %3757 = vmatpush3.bf16.xpose.msra.mxu1 %v530_v28  ;;  %v78_v27 = vld [vmem:[%s5294_s1 + $0x7c] sm:$0xf]  ;;  %v43_v28 = vld [vmem:[%s5295_s0 + $0x70] sm:$0xf]  ;;  %v1496_v30 = vsel %vm111_vm0, %v77_v26, 0 }
  0x24   :  { %3752 = vmatprep.mubr.msk.bf16.mxu0 %vm4217_vm1, %v4216_v0  ;;  %3758 = vmatprep.mubr.msk.bf16.mxu1 %vm4217_vm1, %v4216_v0 }
  0x25   :  { %3762 = vmatprep.subr.bf16.mxu0 %v4216_v0  ;;  %3768 = vmatprep.subr.bf16.mxu1 %v4216_v0 }
  0x2a   :  { %3753 = vmatmul.mubr.msk.bf16.vlgmr.msra.gmra.mxu0 %vm111_vm0, %v23_v31  ;;  %3759 = vmatmul.mubr.msk.bf16.vlgmr.msra.gmra.mxu1 %vm111_vm0, %v24_v32  ;;  %v1542_v31 = vsel %vm111_vm0, %v78_v27, 0  ;;  %v45_v32 = vld [vmem:[%s5295_s0 + $0x78] sm:$0xf] }
  0x2b   :  { %3763 = vmatpush3.bf16.xpose.msra.mxu0 %v576_v33  ;;  %3769 = vmatpush3.bf16.xpose.msra.mxu1 %v622_v34  ;;  %v46_v33 = vld [vmem:[%s5295_s0 + $0x7c] sm:$0xf] }
  0x2c   :  { %3764 = vmatprep.mubr.msk.bf16.mxu0 %vm4217_vm1, %v4216_v0  ;;  %3770 = vmatprep.mubr.msk.bf16.mxu1 %vm4217_vm1, %v4216_v0 }
  0x2d   :  { %3774 = vmatprep.subr.bf16.mxu0 %v4216_v0  ;;  %3780 = vmatprep.subr.bf16.mxu1 %v4216_v0 }
  0x32   :  { %3765 = vmatmul.mubr.msk.bf16.vlgmr.msra.gmra.mxu0 %vm111_vm0, %v25_v37  ;;  %3771 = vmatmul.mubr.msk.bf16.vlgmr.msra.gmra.mxu1 %vm111_vm0, %v26_v38 }
  0x33   :  { %3775 = vmatpush3.bf16.xpose.msra.mxu0 %v668_v39  ;;  %3781 = vmatpush3.bf16.xpose.msra.mxu1 %v714_v40 }
  0x34   :  { %3776 = vmatprep.mubr.msk.bf16.mxu0 %vm4217_vm1, %v4216_v0  ;;  %3782 = vmatprep.mubr.msk.bf16.mxu1 %vm4217_vm1, %v4216_v0 }
  0x35   :  { %3786 = vmatprep.subr.bf16.mxu0 %v4216_v0  ;;  %3792 = vmatprep.subr.bf16.mxu1 %v4216_v0 }
  0x3a   :  { %3777 = vmatmul.mubr.msk.bf16.vlgmr.msra.gmra.mxu0 %vm111_vm0, %v27_v43  ;;  %3783 = vmatmul.mubr.msk.bf16.vlgmr.msra.gmra.mxu1 %vm111_vm0, %v28_v44 }
  0x3b   :  { %3787 = vmatpush3.bf16.xpose.msra.mxu0 %v760_v45  ;;  %3793 = vmatpush3.bf16.xpose.msra.mxu1 %v806_v46 }
  0x3c   :  { %3788 = vmatprep.mubr.msk.bf16.mxu0 %vm4217_vm1, %v4216_v0  ;;  %3794 = vmatprep.mubr.msk.bf16.mxu1 %vm4217_vm1, %v4216_v0 }
  0x3d   :  { %3798 = vmatprep.subr.bf16.mxu0 %v4216_v0  ;;  %3804 = vmatprep.subr.bf16.mxu1 %v4216_v0 }
  0x42   :  { %3789 = vmatmul.mubr.msk.bf16.vlgmr.msra.gmra.mxu0 %vm111_vm0, %v29_v49  ;;  %3795 = vmatmul.mubr.msk.bf16.vlgmr.msra.gmra.mxu1 %vm111_vm0, %v30_v50 }
  0x43   :  { %3799 = vmatpush3.bf16.xpose.msra.mxu0 %v852_v51  ;;  %3805 = vmatpush3.bf16.xpose.msra.mxu1 %v898_v52 }
  0x44   :  { %3800 = vmatprep.mubr.msk.bf16.mxu0 %vm4217_vm1, %v4216_v0  ;;  %3806 = vmatprep.mubr.msk.bf16.mxu1 %vm4217_vm1, %v4216_v0 }
  0x45   :  { %3810 = vmatprep.subr.bf16.mxu0 %v4216_v0  ;;  %3816 = vmatprep.subr.bf16.mxu1 %v4216_v0 }
  0x4a   :  { %3801 = vmatmul.mubr.msk.bf16.vlgmr.msra.gmra.mxu0 %vm111_vm0, %v31_v55  ;;  %3807 = vmatmul.mubr.msk.bf16.vlgmr.msra.gmra.mxu1 %vm111_vm0, %v32_v56 }
  0x4b   :  { %3811 = vmatpush3.bf16.xpose.msra.mxu0 %v944_v57  ;;  %3817 = vmatpush3.bf16.xpose.msra.mxu1 %v990_v58 }
  0x4c   :  { %3812 = vmatprep.mubr.msk.bf16.mxu0 %vm4217_vm1, %v4216_v0  ;;  %3818 = vmatprep.mubr.msk.bf16.mxu1 %vm4217_vm1, %v4216_v0 }
  0x4d   :  { %3822 = vmatprep.subr.bf16.mxu0 %v4216_v0  ;;  %3828 = vmatprep.subr.bf16.mxu1 %v4216_v0 }
  0x52   :  { %3813 = vmatmul.mubr.msk.bf16.vlgmr.msra.gmra.mxu0 %vm111_vm0, %v33_v61  ;;  %3819 = vmatmul.mubr.msk.bf16.vlgmr.msra.gmra.mxu1 %vm111_vm0, %v34_v62 }
  0x53   :  { %3823 = vmatpush3.bf16.xpose.msra.mxu0 %v1036_v63  ;;  %3829 = vmatpush3.bf16.xpose.msra.mxu1 %v1082_v1 }
  0x54   :  { %3824 = vmatprep.mubr.msk.bf16.mxu0 %vm4217_vm1, %v4216_v0  ;;  %3830 = vmatprep.mubr.msk.bf16.mxu1 %vm4217_vm1, %v4216_v0 }
  0x55   :  { %3834 = vmatprep.subr.bf16.mxu0 %v4216_v0  ;;  %3840 = vmatprep.subr.bf16.mxu1 %v4216_v0 }
  0x5a   :  { %3825 = vmatmul.mubr.msk.bf16.vlgmr.msra.gmra.mxu0 %vm111_vm0, %v35_v4  ;;  %3831 = vmatmul.mubr.msk.bf16.vlgmr.msra.gmra.mxu1 %vm111_vm0, %v36_v5 }
  0x5b   :  { %3835 = vmatpush3.bf16.xpose.msra.mxu0 %v1128_v6  ;;  %3841 = vmatpush3.bf16.xpose.msra.mxu1 %v1174_v7 }
  0x5c   :  { %3836 = vmatprep.mubr.msk.bf16.mxu0 %vm4217_vm1, %v4216_v0  ;;  %3842 = vmatprep.mubr.msk.bf16.mxu1 %vm4217_vm1, %v4216_v0 }
  0x5d   :  { %3846 = vmatprep.subr.bf16.mxu0 %v4216_v0  ;;  %3852 = vmatprep.subr.bf16.mxu1 %v4216_v0 }
  0x62   :  { %3837 = vmatmul.mubr.msk.bf16.vlgmr.msra.gmra.mxu0 %vm111_vm0, %v37_v10  ;;  %3843 = vmatmul.mubr.msk.bf16.vlgmr.msra.gmra.mxu1 %vm111_vm0, %v38_v11 }
  0x63   :  { %3847 = vmatpush3.bf16.xpose.msra.mxu0 %v1220_v12  ;;  %3853 = vmatpush3.bf16.xpose.msra.mxu1 %v1266_v13 }
  0x64   :  { %3848 = vmatprep.mubr.msk.bf16.mxu0 %vm4217_vm1, %v4216_v0  ;;  %3854 = vmatprep.mubr.msk.bf16.mxu1 %vm4217_vm1, %v4216_v0 }
  0x65   :  { %3858 = vmatprep.subr.bf16.mxu0 %v4216_v0  ;;  %3864 = vmatprep.subr.bf16.mxu1 %v4216_v0 }
  0x6a   :  { %3849 = vmatmul.mubr.msk.bf16.vlgmr.msra.gmra.mxu0 %vm111_vm0, %v39_v16  ;;  %3855 = vmatmul.mubr.msk.bf16.vlgmr.msra.gmra.mxu1 %vm111_vm0, %v40_v17 }
  0x6b   :  { %3859 = vmatpush3.bf16.xpose.msra.mxu0 %v1312_v18  ;;  %3865 = vmatpush3.bf16.xpose.msra.mxu1 %v1358_v19 }
  0x6c   :  { %3860 = vmatprep.mubr.msk.bf16.mxu0 %vm4217_vm1, %v4216_v0  ;;  %3866 = vmatprep.mubr.msk.bf16.mxu1 %vm4217_vm1, %v4216_v0 }
  0x6d   :  { %3870 = vmatprep.subr.bf16.mxu0 %v4216_v0  ;;  %3876 = vmatprep.subr.bf16.mxu1 %v4216_v0 }
  0x72   :  { %3861 = vmatmul.mubr.msk.bf16.vlgmr.msra.gmra.mxu0 %vm111_vm0, %v41_v22  ;;  %3867 = vmatmul.mubr.msk.bf16.vlgmr.msra.gmra.mxu1 %vm111_vm0, %v42_v23 }
  0x73   :  { %3871 = vmatpush3.bf16.xpose.msra.mxu0 %v1404_v24  ;;  %3877 = vmatpush3.bf16.xpose.msra.mxu1 %v1450_v25 }
  0x74   :  { %3872 = vmatprep.mubr.msk.bf16.mxu0 %vm4217_vm1, %v4216_v0  ;;  %3878 = vmatprep.mubr.msk.bf16.mxu1 %vm4217_vm1, %v4216_v0 }
  0x75   :  { %3882 = vmatprep.subr.bf16.mxu0 %v4216_v0  ;;  %3888 = vmatprep.subr.bf16.mxu1 %v4216_v0 }
  0x7a   :  { %3873 = vmatmul.mubr.msk.bf16.vlgmr.msra.gmra.mxu0 %vm111_vm0, %v43_v28  ;;  %3879 = vmatmul.mubr.msk.bf16.vlgmr.msra.gmra.mxu1 %vm111_vm0, %v44_v29 }
  0x7b   :  { %3883 = vmatpush3.bf16.xpose.msra.mxu0 %v1496_v30  ;;  %3889 = vmatpush3.bf16.xpose.msra.mxu1 %v1542_v31 }
  0x7c   :  { %3884 = vmatprep.mubr.msk.bf16.mxu0 %vm4217_vm1, %v4216_v0  ;;  %3890 = vmatprep.mubr.msk.bf16.mxu1 %vm4217_vm1, %v4216_v0 }
  0x7d   :  { %3894 = vmatprep.subr.bf16.mxu0 %v4216_v0  ;;  %3900 = vmatprep.subr.bf16.mxu1 %v4216_v0 }
  0x82   :  { %3885 = vmatmul.mubr.msk.bf16.vlgmr.msra.gmra.mxu0 %vm111_vm0, %v45_v32  ;;  %3891 = vmatmul.mubr.msk.bf16.vlgmr.msra.gmra.mxu1 %vm111_vm0, %v46_v33 }
  0x83   :  { %3896 = vmatprep.mubr.msk.bf16.mxu0 %vm4217_vm1, %v4216_v0  ;;  %3902 = vmatprep.mubr.msk.bf16.mxu1 %vm4217_vm1, %v4216_v0 }
  0xca   :  { %v4596_v34 = vpop.f32.mrf.mxu0  ;;  %v4598_v35 = vpop.f32.mrf.mxu1 }
  0xcb   :  { %v1584_v36 = vsel %vm111_vm0, %v4596_v34, -inf  ;;  %v1587_v39 = vsel %vm111_vm0, %v4598_v35, -inf }
  0xcc   :  { %v3712_v37 = vpop.f32.mrf.mxu1  ;;  %1585 = vmax.xlane.f32.xlu0 %v1584_v36  ;;  %v3706_v38 = vpop.f32.mrf.mxu0 }
  0xce   :  { %v155_v40 = vpop.f32.mrf.mxu0  ;;  %v201_v41 = vpop.f32.mrf.mxu1 }
  0xd0   :  { %v3713_v42 = vpop.f32.mrf.mxu1  ;;  %1588 = vmax.xlane.f32.xlu0 %v1587_v39  ;;  %v3707_v43 = vpop.f32.mrf.mxu0 }
  0xd2   :  { %v4604_v44 = vpop.f32.mrf.mxu0  ;;  %v4606_v45 = vpop.f32.mrf.mxu1 }
  0xd3   :  { %v1590_v46 = vsel %vm111_vm0, %v4604_v44, -inf  ;;  %v1593_v49 = vsel %vm111_vm0, %v4606_v45, -inf }
  0xd4   :  { %v3724_v47 = vpop.f32.mrf.mxu1  ;;  %1591 = vmax.xlane.f32.xlu1 %v1590_v46  ;;  %v3718_v48 = vpop.f32.mrf.mxu0 }
  0xd6   :  { %v247_v50 = vpop.f32.mrf.mxu0  ;;  %v293_v51 = vpop.f32.mrf.mxu1 }
  0xd8   :  { %v3725_v52 = vpop.f32.mrf.mxu1  ;;  %1594 = vmax.xlane.f32.xlu1 %v1593_v49  ;;  %v3719_v53 = vpop.f32.mrf.mxu0 }
  0xda   :  { %v4612_v54 = vpop.f32.mrf.mxu0  ;;  %v4614_v55 = vpop.f32.mrf.mxu1 }
  0xdb   :  { %v1599_v56 = vsel %vm111_vm0, %v4614_v55, -inf  ;;  %v1596_v57 = vsel %vm111_vm0, %v4612_v54, -inf }
  0xdc   :  { %v3736_v58 = vpop.f32.mrf.mxu1  ;;  %1600 = vmax.xlane.f32.xlu1 %v1599_v56  ;;  %1597 = vmax.xlane.f32.xlu0 %v1596_v57  ;;  %v3730_v59 = vpop.f32.mrf.mxu0 }
  0xde   :  { %v339_v60 = vpop.f32.mrf.mxu0  ;;  %v385_v61 = vpop.f32.mrf.mxu1 }
  0xe0   :  { %v3731_v62 = vpop.f32.mrf.mxu0  ;;  %v3737_v63 = vpop.f32.mrf.mxu1 }
  0xe2   :  { %v4620_v1 = vpop.f32.mrf.mxu0  ;;  %v4622_v2 = vpop.f32.mrf.mxu1 }
  0xe3   :  { %v1605_v3 = vsel %vm111_vm0, %v4622_v2, -inf  ;;  %v1602_v4 = vsel %vm111_vm0, %v4620_v1, -inf }
  0xe4   :  { %v3748_v5 = vpop.f32.mrf.mxu1  ;;  %1606 = vmax.xlane.f32.xlu1 %v1605_v3  ;;  %1603 = vmax.xlane.f32.xlu0 %v1602_v4  ;;  %v3742_v6 = vpop.f32.mrf.mxu0 }
  0xe6   :  { %v431_v7 = vpop.f32.mrf.mxu0  ;;  %v477_v8 = vpop.f32.mrf.mxu1 }
  0xe8   :  { %v3743_v9 = vpop.f32.mrf.mxu0  ;;  %v3749_v10 = vpop.f32.mrf.mxu1 }
  0xea   :  { %v4628_v11 = vpop.f32.mrf.mxu0  ;;  %v4630_v12 = vpop.f32.mrf.mxu1 }
  0xeb   :  { %v1611_v13 = vsel %vm111_vm0, %v4630_v12, -inf  ;;  %v1608_v14 = vsel %vm111_vm0, %v4628_v11, -inf }
  0xec   :  { %v3760_v15 = vpop.f32.mrf.mxu1  ;;  %1612 = vmax.xlane.f32.xlu1 %v1611_v13  ;;  %1609 = vmax.xlane.f32.xlu0 %v1608_v14  ;;  %v3754_v16 = vpop.f32.mrf.mxu0 }
  0xee   :  { %v523_v17 = vpop.f32.mrf.mxu0  ;;  %v569_v18 = vpop.f32.mrf.mxu1 }
  0xf0   :  { %v3755_v19 = vpop.f32.mrf.mxu0  ;;  %v3761_v20 = vpop.f32.mrf.mxu1 }
  0xf2   :  { %v4636_v21 = vpop.f32.mrf.mxu0  ;;  %v4638_v22 = vpop.f32.mrf.mxu1 }
  0xf3   :  { %v1617_v23 = vsel %vm111_vm0, %v4638_v22, -inf  ;;  %v1614_v24 = vsel %vm111_vm0, %v4636_v21, -inf }
  0xf4   :  { %v3772_v25 = vpop.f32.mrf.mxu1  ;;  %1618 = vmax.xlane.f32.xlu1 %v1617_v23  ;;  %1615 = vmax.xlane.f32.xlu0 %v1614_v24  ;;  %v3766_v26 = vpop.f32.mrf.mxu0 }
  0xf6   :  { %v615_v27 = vpop.f32.mrf.mxu0  ;;  %v661_v28 = vpop.f32.mrf.mxu1 }
  0xf8   :  { %v3767_v29 = vpop.f32.mrf.mxu0  ;;  %v3773_v30 = vpop.f32.mrf.mxu1 }
  0xfa   :  { %v4644_v31 = vpop.f32.mrf.mxu0  ;;  %v4646_v32 = vpop.f32.mrf.mxu1 }
  0xfb   :  { %v1623_v33 = vsel %vm111_vm0, %v4646_v32, -inf  ;;  %v1620_v36 = vsel %vm111_vm0, %v4644_v31, -inf }
  0xfc   :  { %v3784_v37 = vpop.f32.mrf.mxu1  ;;  %1624 = vmax.xlane.f32.xlu1 %v1623_v33  ;;  %1621 = vmax.xlane.f32.xlu0 %v1620_v36  ;;  %v3778_v38 = vpop.f32.mrf.mxu0 }
  0xfe   :  { %v707_v39 = vpop.f32.mrf.mxu0  ;;  %v753_v40 = vpop.f32.mrf.mxu1 }
 0x100   :  { %v3779_v41 = vpop.f32.mrf.mxu0  ;;  %v3785_v42 = vpop.f32.mrf.mxu1 }
 0x102   :  { %v4652_v43 = vpop.f32.mrf.mxu0  ;;  %v4654_v46 = vpop.f32.mrf.mxu1 }
 0x103   :  { %v1629_v47 = vsel %vm111_vm0, %v4654_v46, -inf  ;;  %v1626_v48 = vsel %vm111_vm0, %v4652_v43, -inf }
 0x104   :  { %v3796_v49 = vpop.f32.mrf.mxu1  ;;  %1630 = vmax.xlane.f32.xlu1 %v1629_v47  ;;  %1627 = vmax.xlane.f32.xlu0 %v1626_v48  ;;  %v3790_v50 = vpop.f32.mrf.mxu0 }
 0x106   :  { %v799_v51 = vpop.f32.mrf.mxu0  ;;  %v845_v52 = vpop.f32.mrf.mxu1 }
 0x108   :  { %v3791_v53 = vpop.f32.mrf.mxu0  ;;  %v3797_v56 = vpop.f32.mrf.mxu1 }
 0x10a   :  { %v4660_v57 = vpop.f32.mrf.mxu0  ;;  %v4662_v58 = vpop.f32.mrf.mxu1 }
 0x10b   :  { %v1635_v59 = vsel %vm111_vm0, %v4662_v58, -inf  ;;  %v1632_v60 = vsel %vm111_vm0, %v4660_v57, -inf }
 0x10c   :  { %v3808_v61 = vpop.f32.mrf.mxu1  ;;  %1636 = vmax.xlane.f32.xlu1 %v1635_v59  ;;  %1633 = vmax.xlane.f32.xlu0 %v1632_v60  ;;  %v3802_v62 = vpop.f32.mrf.mxu0 }
 0x10e   :  { %v891_v63 = vpop.f32.mrf.mxu0  ;;  %v937_v3 = vpop.f32.mrf.mxu1 }
 0x110   :  { %v3803_v4 = vpop.f32.mrf.mxu0  ;;  %v3809_v5 = vpop.f32.mrf.mxu1 }
 0x112   :  { %v4668_v6 = vpop.f32.mrf.mxu0  ;;  %v4670_v7 = vpop.f32.mrf.mxu1 }
 0x113   :  { %v1641_v8 = vsel %vm111_vm0, %v4670_v7, -inf  ;;  %v1638_v9 = vsel %vm111_vm0, %v4668_v6, -inf }
 0x114   :  { %v3820_v10 = vpop.f32.mrf.mxu1  ;;  %1642 = vmax.xlane.f32.xlu1 %v1641_v8  ;;  %1639 = vmax.xlane.f32.xlu0 %v1638_v9  ;;  %v3814_v13 = vpop.f32.mrf.mxu0 }
 0x116   :  { %v983_v14 = vpop.f32.mrf.mxu0  ;;  %v1029_v15 = vpop.f32.mrf.mxu1 }
 0x118   :  { %v3815_v16 = vpop.f32.mrf.mxu0  ;;  %v3821_v17 = vpop.f32.mrf.mxu1 }
 0x11a   :  { %v4676_v18 = vpop.f32.mrf.mxu0  ;;  %v4678_v19 = vpop.f32.mrf.mxu1 }
 0x11b   :  { %v1647_v20 = vsel %vm111_vm0, %v4678_v19, -inf  ;;  %v1644_v23 = vsel %vm111_vm0, %v4676_v18, -inf }
 0x11c   :  { %v3832_v24 = vpop.f32.mrf.mxu1  ;;  %1648 = vmax.xlane.f32.xlu1 %v1647_v20  ;;  %1645 = vmax.xlane.f32.xlu0 %v1644_v23  ;;  %v3826_v25 = vpop.f32.mrf.mxu0 }
 0x11e   :  { %v1075_v26 = vpop.f32.mrf.mxu0  ;;  %v1121_v27 = vpop.f32.mrf.mxu1 }
 0x120   :  { %v3827_v28 = vpop.f32.mrf.mxu0  ;;  %v3833_v29 = vpop.f32.mrf.mxu1 }
 0x122   :  { %v4684_v30 = vpop.f32.mrf.mxu0  ;;  %v4686_v33 = vpop.f32.mrf.mxu1 }
 0x123   :  { %v1653_v36 = vsel %vm111_vm0, %v4686_v33, -inf  ;;  %v1650_v37 = vsel %vm111_vm0, %v4684_v30, -inf }
 0x124   :  { %1654 = vmax.xlane.f32.xlu1 %v1653_v36  ;;  %1651 = vmax.xlane.f32.xlu0 %v1650_v37  ;;  %v3838_v38 = vpop.f32.mrf.mxu0  ;;  %v3844_v39 = vpop.f32.mrf.mxu1 }
 0x126   :  { %v1167_v40 = vpop.f32.mrf.mxu0  ;;  %v1213_v41 = vpop.f32.mrf.mxu1 }
 0x128   :  { %v3839_v42 = vpop.f32.mrf.mxu0  ;;  %v3845_v47 = vpop.f32.mrf.mxu1 }
 0x12a   :  { %v4692_v48 = vpop.f32.mrf.mxu0  ;;  %v4694_v49 = vpop.f32.mrf.mxu1 }
 0x12c   :  { %v3850_v50 = vpop.f32.mrf.mxu0  ;;  %v3856_v51 = vpop.f32.mrf.mxu1 }
 0x12e   :  { %v1259_v52 = vpop.f32.mrf.mxu0  ;;  %v1305_v53 = vpop.f32.mrf.mxu1 }
 0x130   :  { %v3851_v56 = vpop.f32.mrf.mxu0  ;;  %v3857_v59 = vpop.f32.mrf.mxu1 }
 0x132   :  { %v4696_v60 = vpop.f32.mrf.mxu0  ;;  %v4698_v61 = vpop.f32.mrf.mxu1 }
 0x134   :  { %v3862_v62 = vpop.f32.mrf.mxu0  ;;  %v3868_v63 = vpop.f32.mrf.mxu1 }
 0x136   :  { %v1351_v3 = vpop.f32.mrf.mxu0  ;;  %v1397_v4 = vpop.f32.mrf.mxu1 }
 0x138   :  { %v3863_v5 = vpop.f32.mrf.mxu0  ;;  %v3869_v8 = vpop.f32.mrf.mxu1 }
 0x139   :  { %v1656_v5 = vsel %vm111_vm0, %v4692_v48, -inf }
 0x13a   :  { %v4700_v9 = vpop.f32.mrf.mxu0  ;;  %v4702_v10 = vpop.f32.mrf.mxu1 }
 0x13c   :  { %v3874_v13 = vpop.f32.mrf.mxu0  ;;  %v3880_v14 = vpop.f32.mrf.mxu1 }
 0x13e   :  { %v1443_v15 = vpop.f32.mrf.mxu0  ;;  %v1489_v16 = vpop.f32.mrf.mxu1 }
 0x13f   :  { %v1659_v15 = vsel %vm111_vm0, %v4694_v49, -inf }
 0x140   :  { %v3875_v17 = vpop.f32.mrf.mxu0  ;;  %v3881_v20 = vpop.f32.mrf.mxu1 }
 0x142   :  { %v4704_v23 = vpop.f32.mrf.mxu0  ;;  %v4706_v24 = vpop.f32.mrf.mxu1 }
 0x144   :  { %v3886_v25 = vpop.f32.mrf.mxu0  ;;  %v3892_v26 = vpop.f32.mrf.mxu1 }
 0x145   :  { %v1662_v26 = vsel %vm111_vm0, %v4696_v60, -inf }
 0x146   :  { %v1535_v27 = vpop.f32.mrf.mxu0  ;;  %v1581_v28 = vpop.f32.mrf.mxu1 }
 0x148   :  { %v3887_v29 = vpop.f32.mrf.mxu0  ;;  %v3893_v36 = vpop.f32.mrf.mxu1 }
 0x155   :  { %v1586_v37 = vpop.xlane.xlu0 %1585 }
 0x156   :  { %v1680_v38 = vsub.f32 %v4596_v34, %v1586_v37  ;;  %v1665_v37 = vsel %vm111_vm0, %v4698_v61, -inf }
 0x158   :  { %v1712_v39 = vmul.f32 1.442695, %v1680_v38 }
 0x159   :  { %v1589_v40 = vpop.xlane.xlu0 %1588 }
 0x15a   :  { %4088 = vpow2.f32 %v1712_v39  ;;  %v1681_v41 = vsub.f32 %v4598_v35, %v1589_v40 }
 0x15c   :  { %v1714_v42 = vmul.f32 1.442695, %v1681_v41 }
 0x15d   :  { %v1592_v47 = vpop.xlane.xlu1 %1591 }
 0x15e   :  { %4090 = vpow2.f32 %v1714_v42  ;;  %v1682_v50 = vsub.f32 %v4604_v44, %v1592_v47 }
 0x160   :  { %v1716_v51 = vmul.f32 1.442695, %v1682_v50 }
 0x161   :  { %v1595_v52 = vpop.xlane.xlu1 %1594 }
 0x162   :  { %4092 = vpow2.f32 %v1716_v51  ;;  %v1683_v53 = vsub.f32 %v4606_v45, %v1595_v52 }
 0x164   :  { %v1718_v56 = vmul.f32 1.442695, %v1683_v53  ;;  %v1671_v53 = vsel %vm111_vm0, %v4702_v10, -inf }
 0x165   :  { %v1601_v59 = vpop.xlane.xlu1 %1600  ;;  %v1598_v62 = vpop.xlane.xlu0 %1597 }
 0x166   :  { %4094 = vpow2.f32 %v1718_v56  ;;  %v1685_v34 = vsub.f32 %v4614_v55, %v1601_v59  ;;  %v1684_v63 = vsub.f32 %v4612_v54, %v1598_v62 }
 0x167   :  { %v4714_v3 = vpop.eup %4088 }
 0x168   :  { %v1722_v35 = vmul.f32 1.442695, %v1685_v34  ;;  %v1720_v4 = vmul.f32 1.442695, %v1684_v63  ;;  %v1776_v44 = vsel %vm111_vm0, %v4714_v3, 0.0 }
 0x169   :  { %1777 = vadd.xlane.f32.xlu0 %v1776_v44 }
 0x16a   :  { %4096 = vpow2.f32 %v1720_v4 }
 0x16b   :  { %v4720_v45 = vpop.eup %4090  ;;  %4098 = vpow2.f32 %v1722_v35  ;;  %v1674_v35 = vsel %vm111_vm0, %v4704_v23, -inf }
 0x16c   :  { %v1779_v55 = vsel %vm111_vm0, %v4720_v45, 0.0 }
 0x16d   :  { %1780 = vadd.xlane.f32.xlu1 %v1779_v55  ;;  %v1607_v54 = vpop.xlane.xlu1 %1606  ;;  %v1604_v8 = vpop.xlane.xlu0 %1603  ;;  %1657 = vmax.xlane.f32.xlu0 %v1656_v5  ;;  %v80_v55 = vld [vmem:[%s5296_s2 + $0x4] sm:$0xf] }
 0x16e   :  { %v1687_v13 = vsub.f32 %v4622_v2, %v1607_v54  ;;  %v1686_v14 = vsub.f32 %v4620_v1, %v1604_v8 }
 0x16f   :  { %v4728_v16 = vpop.eup %4092 }
 0x170   :  { %v1726_v17 = vmul.f32 1.442695, %v1687_v13  ;;  %v1724_v20 = vmul.f32 1.442695, %v1686_v14  ;;  %v1782_v25 = vsel %vm111_vm0, %v4728_v16, 0.0  ;;  %v1677_v13 = vsel %vm111_vm0, %v4706_v24, -inf }
 0x171   :  { %1660 = vmax.xlane.f32.xlu1 %v1659_v15  ;;  %1783 = vadd.xlane.f32.xlu0 %v1782_v25  ;;  %v2019_v14 = vsel %vm1971_vm2, %v80_v55, 0 }
 0x172   :  { %4100 = vpow2.f32 %v1724_v20  ;;  %3901 = vmatpush3.bf16.msra.mxu1 %v2019_v14 }
 0x173   :  { %v4734_v27 = vpop.eup %4094  ;;  %4102 = vpow2.f32 %v1726_v17  ;;  %3912 = vmatprep.subr.bf16.mxu1 %v4216_v0 }
 0x174   :  { %v1785_v1 = vsel %vm111_vm0, %v4734_v27, 0.0 }
 0x175   :  { %1786 = vadd.xlane.f32.xlu1 %v1785_v1  ;;  %v1613_v2 = vpop.xlane.xlu1 %1612  ;;  %v1610_v28 = vpop.xlane.xlu0 %1609  ;;  %1663 = vmax.xlane.f32.xlu0 %v1662_v26 }
 0x176   :  { %v1689_v29 = vsub.f32 %v4630_v12, %v1613_v2  ;;  %v1688_v36 = vsub.f32 %v4628_v11, %v1610_v28  ;;  %v1668_v12 = vsel %vm111_vm0, %v4700_v9, -inf }
 0x177   :  { %v4742_v38 = vpop.eup %4096 }
 0x178   :  { %v1730_v39 = vmul.f32 1.442695, %v1689_v29  ;;  %v1728_v40 = vmul.f32 1.442695, %v1688_v36  ;;  %v4744_v41 = vpop.eup %4098  ;;  %v1788_v42 = vsel %vm111_vm0, %v4742_v38, 0.0 }
 0x179   :  { %1666 = vmax.xlane.f32.xlu1 %v1665_v37  ;;  %1789 = vadd.xlane.f32.xlu0 %v1788_v42  ;;  %v1791_v11 = vsel %vm111_vm0, %v4744_v41, 0.0 }
 0x17a   :  { %4104 = vpow2.f32 %v1728_v40 }
 0x17b   :  { %4106 = vpow2.f32 %v1730_v39 }
 0x17d   :  { %1792 = vadd.xlane.f32.xlu1 %v1791_v11  ;;  %v1619_v47 = vpop.xlane.xlu1 %1618  ;;  %v1616_v50 = vpop.xlane.xlu0 %1615  ;;  %1669 = vmax.xlane.f32.xlu0 %v1668_v12 }
 0x17e   :  { %v1691_v51 = vsub.f32 %v4638_v22, %v1619_v47  ;;  %v1690_v52 = vsub.f32 %v4636_v21, %v1616_v50  ;;  %v79_v22 = vld [vmem:[%s5296_s2] sm:$0xf] }
 0x17f   :  { %v4756_v56 = vpop.eup %4100  ;;  %v1973_v21 = vsel %vm1971_vm2, %v79_v22, 0 }
 0x180   :  { %v1734_v59 = vmul.f32 1.442695, %v1691_v51  ;;  %v1732_v62 = vmul.f32 1.442695, %v1690_v52  ;;  %v4758_v34 = vpop.eup %4102  ;;  %v1794_v63 = vsel %vm111_vm0, %v4756_v56, 0.0  ;;  %3895 = vmatpush3.bf16.msra.mxu0 %v1973_v21 }
 0x181   :  { %1672 = vmax.xlane.f32.xlu1 %v1671_v53  ;;  %1795 = vadd.xlane.f32.xlu0 %v1794_v63  ;;  %v1797_v4 = vsel %vm111_vm0, %v4758_v34, 0.0 }
 0x182   :  { %4108 = vpow2.f32 %v1734_v59  ;;  %3906 = vmatprep.subr.bf16.mxu0 %v4216_v0 }
 0x183   :  { %4110 = vpow2.f32 %v1732_v62 }
 0x185   :  { %1798 = vadd.xlane.f32.xlu1 %v1797_v4  ;;  %v1625_v44 = vpop.xlane.xlu1 %1624  ;;  %v1622_v5 = vpop.xlane.xlu0 %1621  ;;  %1675 = vmax.xlane.f32.xlu0 %v1674_v35 }
 0x186   :  { %v1693_v54 = vsub.f32 %v4646_v32, %v1625_v44  ;;  %v1692_v8 = vsub.f32 %v4644_v31, %v1622_v5 }
 0x187   :  { %v4779_v15 = vpop.eup %4104 }
 0x188   :  { %v1738_v17 = vmul.f32 1.442695, %v1693_v54  ;;  %v1736_v20 = vmul.f32 1.442695, %v1692_v8  ;;  %v4782_v25 = vpop.eup %4106  ;;  %v1800_v32 = vsel %vm111_vm0, %v4779_v15, 0.0 }
 0x189   :  { %1678 = vmax.xlane.f32.xlu1 %v1677_v13  ;;  %1801 = vadd.xlane.f32.xlu0 %v1800_v32  ;;  %v1803_v31 = vsel %vm111_vm0, %v4782_v25, 0.0 }
 0x18a   :  { %4112 = vpow2.f32 %v1738_v17 }
 0x18b   :  { %4114 = vpow2.f32 %v1736_v20 }
 0x18d   :  { %1804 = vadd.xlane.f32.xlu1 %v1803_v31  ;;  %v1631_v26 = vpop.xlane.xlu1 %1630  ;;  %v1628_v1 = vpop.xlane.xlu0 %1627 }
 0x18e   :  { %v1695_v2 = vsub.f32 %v4654_v46, %v1631_v26  ;;  %v1694_v28 = vsub.f32 %v4652_v43, %v1628_v1 }
 0x18f   :  { %v4790_v29 = vpop.eup %4108 }
 0x190   :  { %v4792_v36 = vpop.eup %4110  ;;  %v1742_v37 = vmul.f32 1.442695, %v1695_v2  ;;  %v1740_v39 = vmul.f32 1.442695, %v1694_v28  ;;  %v1809_v40 = vsel %vm111_vm0, %v4790_v29, 0.0 }
 0x191   :  { %1810 = vadd.xlane.f32.xlu1 %v1809_v40  ;;  %v1806_v42 = vsel %vm111_vm0, %v4792_v36, 0.0 }
 0x192   :  { %4116 = vpow2.f32 %v1742_v37  ;;  %1807 = vadd.xlane.f32.xlu0 %v1806_v42 }
 0x193   :  { %4118 = vpow2.f32 %v1740_v39 }
 0x195   :  { %v1637_v12 = vpop.xlane.xlu1 %1636  ;;  %v1634_v46 = vpop.xlane.xlu0 %1633 }
 0x196   :  { %v1697_v43 = vsub.f32 %v4662_v58, %v1637_v12  ;;  %v1696_v11 = vsub.f32 %v4660_v57, %v1634_v46 }
 0x197   :  { %v4800_v47 = vpop.eup %4112 }
 0x198   :  { %v4802_v50 = vpop.eup %4114  ;;  %v1746_v51 = vmul.f32 1.442695, %v1697_v43  ;;  %v1744_v52 = vmul.f32 1.442695, %v1696_v11  ;;  %v1815_v53 = vsel %vm111_vm0, %v4800_v47, 0.0 }
 0x199   :  { %1816 = vadd.xlane.f32.xlu1 %v1815_v53  ;;  %v1812_v59 = vsel %vm111_vm0, %v4802_v50, 0.0 }
 0x19a   :  { %4120 = vpow2.f32 %v1746_v51  ;;  %1813 = vadd.xlane.f32.xlu0 %v1812_v59 }
 0x19b   :  { %4122 = vpow2.f32 %v1744_v52 }
 0x19d   :  { %v1643_v62 = vpop.xlane.xlu1 %1642  ;;  %v1640_v58 = vpop.xlane.xlu0 %1639 }
 0x19e   :  { %v1699_v57 = vsub.f32 %v4670_v7, %v1643_v62  ;;  %v1698_v63 = vsub.f32 %v4668_v6, %v1640_v58 }
 0x19f   :  { %v4810_v22 = vpop.eup %4116 }
 0x1a0   :  { %v4812_v21 = vpop.eup %4118  ;;  %v1750_v35 = vmul.f32 1.442695, %v1699_v57  ;;  %v1748_v4 = vmul.f32 1.442695, %v1698_v63  ;;  %v1821_v44 = vsel %vm111_vm0, %v4810_v22, 0.0 }
 0x1a1   :  { %1822 = vadd.xlane.f32.xlu1 %v1821_v44  ;;  %v1818_v5 = vsel %vm111_vm0, %v4812_v21, 0.0 }
 0x1a2   :  { %4124 = vpow2.f32 %v1750_v35  ;;  %1819 = vadd.xlane.f32.xlu0 %v1818_v5 }
 0x1a3   :  { %4126 = vpow2.f32 %v1748_v4 }
 0x1a5   :  { %v1649_v55 = vpop.xlane.xlu1 %1648  ;;  %v1646_v7 = vpop.xlane.xlu0 %1645 }
 0x1a6   :  { %v1701_v6 = vsub.f32 %v4678_v19, %v1649_v55  ;;  %v1700_v54 = vsub.f32 %v4676_v18, %v1646_v7 }
 0x1a7   :  { %v4820_v8 = vpop.eup %4120 }
 0x1a8   :  { %v4822_v13 = vpop.eup %4122  ;;  %v1754_v14 = vmul.f32 1.442695, %v1701_v6  ;;  %v1752_v17 = vmul.f32 1.442695, %v1700_v54  ;;  %v1827_v20 = vsel %vm111_vm0, %v4820_v8, 0.0 }
 0x1a9   :  { %1828 = vadd.xlane.f32.xlu1 %v1827_v20  ;;  %v1824_v32 = vsel %vm111_vm0, %v4822_v13, 0.0  ;;  %v81_v6 = vld [vmem:[%s5296_s2 + $0x8] sm:$0xf] }
 0x1aa   :  { %4128 = vpow2.f32 %v1754_v14  ;;  %1825 = vadd.xlane.f32.xlu0 %v1824_v32  ;;  %v2065_v32 = vsel %vm1971_vm2, %v81_v6, 0 }
 0x1ab   :  { %4130 = vpow2.f32 %v1752_v17 }
 0x1ad   :  { %v1655_v31 = vpop.xlane.xlu1 %1654  ;;  %v1652_v19 = vpop.xlane.xlu0 %1651 }
 0x1ae   :  { %v1703_v18 = vsub.f32 %v4686_v33, %v1655_v31  ;;  %v1702_v26 = vsub.f32 %v4684_v30, %v1652_v19 }
 0x1af   :  { %v4830_v1 = vpop.eup %4124 }
 0x1b0   :  { %v4832_v2 = vpop.eup %4126  ;;  %v1758_v28 = vmul.f32 1.442695, %v1703_v18  ;;  %v1756_v37 = vmul.f32 1.442695, %v1702_v26  ;;  %v1833_v39 = vsel %vm111_vm0, %v4830_v1, 0.0 }
 0x1b1   :  { %1834 = vadd.xlane.f32.xlu1 %v1833_v39  ;;  %v1830_v40 = vsel %vm111_vm0, %v4832_v2, 0.0 }
 0x1b2   :  { %4132 = vpow2.f32 %v1758_v28  ;;  %1831 = vadd.xlane.f32.xlu0 %v1830_v40 }
 0x1b3   :  { %4134 = vpow2.f32 %v1756_v37 }
 0x1b7   :  { %v4838_v42 = vpop.eup %4128 }
 0x1b8   :  { %v4840_v33 = vpop.eup %4130  ;;  %v1839_v30 = vsel %vm111_vm0, %v4838_v42, 0.0 }
 0x1b9   :  { %1840 = vadd.xlane.f32.xlu1 %v1839_v30  ;;  %v1836_v12 = vsel %vm111_vm0, %v4840_v33, 0.0  ;;  %v83_v30 = vld [vmem:[%s5296_s2 + $0x10] sm:$0xf] }
 0x1ba   :  { %1837 = vadd.xlane.f32.xlu0 %v1836_v12 }
 0x1bf   :  { %v4846_v46 = vpop.eup %4132 }
 0x1c0   :  { %v4848_v43 = vpop.eup %4134  ;;  %v1845_v11 = vsel %vm111_vm0, %v4846_v46, 0.0 }
 0x1c1   :  { %1846 = vadd.xlane.f32.xlu1 %v1845_v11  ;;  %v1842_v51 = vsel %vm111_vm0, %v4848_v43, 0.0 }
 0x1c2   :  { %1843 = vadd.xlane.f32.xlu0 %v1842_v51 }
 0x1f2   :  { %v1778_v52 = vpop.xlane.xlu0 %1777 }
 0x1f3   :  { %4136 = vrcp.f32 %v1778_v52 }
 0x1f6   :  { %v1781_v53 = vpop.xlane.xlu1 %1780  ;;  %v1658_v59 = vpop.xlane.xlu0 %1657 }
 0x1f7   :  { %4138 = vrcp.f32 %v1781_v53  ;;  %v1704_v62 = vsub.f32 %v4692_v48, %v1658_v59 }
 0x1f9   :  { %v1760_v58 = vmul.f32 1.442695, %v1704_v62  ;;  %v2157_v62 = vsel %vm1971_vm2, %v83_v30, 0 }
 0x1fa   :  { %v1661_v57 = vpop.xlane.xlu1 %1660  ;;  %v1784_v63 = vpop.xlane.xlu0 %1783 }
 0x1fb   :  { %4140 = vpow2.f32 %v1760_v58  ;;  %v1705_v35 = vsub.f32 %v4694_v49, %v1661_v57 }
 0x1fc   :  { %4142 = vrcp.f32 %v1784_v63 }
 0x1fd   :  { %v1762_v4 = vmul.f32 1.442695, %v1705_v35 }
 0x1fe   :  { %v1787_v44 = vpop.xlane.xlu1 %1786  ;;  %v1664_v5 = vpop.xlane.xlu0 %1663 }
 0x1ff   :  { %4144 = vpow2.f32 %v1762_v4  ;;  %v1706_v55 = vsub.f32 %v4696_v60, %v1664_v5  ;;  %v82_v60 = vld [vmem:[%s5296_s2 + $0xc] sm:$0xf] }
 0x200   :  { %v4137_v7 = vpop.eup %4136  ;;  %4146 = vrcp.f32 %v1787_v44  ;;  %v2111_v28 = vsel %vm1971_vm2, %v82_v60, 0 }
 0x201   :  { %v1764_v48 = vmul.f32 1.442695, %v1706_v55  ;;  %v1904_v54 = vmul.f32 %v4137_v7, %v4714_v3 }
 0x202   :  { %v1667_v14 = vpop.xlane.xlu1 %1666  ;;  %v1790_v17 = vpop.xlane.xlu0 %1789 }
 0x203   :  { %4148 = vpow2.f32 %v1764_v48  ;;  %v1707_v49 = vsub.f32 %v4698_v61, %v1667_v14  ;;  %v1936_v20 = vpack.c.bf16 %v1904_v54, %v1904_v54  ;;  %v85_v48 = vld [vmem:[%s5296_s2 + $0x18] sm:$0xf] }
 0x204   :  { %v4139_v31 = vpop.eup %4138  ;;  %4150 = vrcp.f32 %v1790_v17 }
 0x205   :  { %v1766_v19 = vmul.f32 1.442695, %v1707_v49  ;;  %3897 = vmatmul.mubr.msk.bf16.vlgmr.msra.gmra.mxu0 %vm111_vm0, %v1936_v20  ;;  %v1905_v18 = vmul.f32 %v4139_v31, %v4720_v45  ;;  %v2249_v31 = vsel %vm1971_vm2, %v85_v48, 0 }
 0x206   :  { %v1793_v3 = vpop.xlane.xlu1 %1792  ;;  %3907 = vmatpush3.bf16.msra.mxu0 %v2065_v32  ;;  %3908 = vmatprep.mubr.msk.bf16.mxu0 %vm4217_vm1, %v4216_v0  ;;  %v1670_v61 = vpop.xlane.xlu0 %1669 }
 0x207   :  { %4152 = vpow2.f32 %v1766_v19  ;;  %v1937_v26 = vpack.c.bf16 %v1905_v18, %v1905_v18  ;;  %3918 = vmatprep.subr.bf16.mxu0 %v4216_v0  ;;  %v1708_v39 = vsub.f32 %v4700_v9, %v1670_v61 }
 0x208   :  { %v4872_v37 = vpop.eup %4140  ;;  %4154 = vrcp.f32 %v1793_v3 }
 0x209   :  { %v4143_v40 = vpop.eup %4142  ;;  %3903 = vmatmul.mubr.msk.bf16.vlgmr.msra.gmra.mxu1 %vm111_vm0, %v1937_v26  ;;  %v1848_v45 = vsel %vm111_vm0, %v4872_v37, 0.0  ;;  %v1768_v12 = vmul.f32 1.442695, %v1708_v39 }
 0x20a   :  { %v1673_v11 = vpop.xlane.xlu1 %1672  ;;  %1849 = vadd.xlane.f32.xlu0 %v1848_v45  ;;  %v1906_v51 = vmul.f32 %v4143_v40, %v4728_v16  ;;  %3913 = vmatpush3.bf16.msra.mxu1 %v2111_v28  ;;  %v1796_v53 = vpop.xlane.xlu0 %1795  ;;  %v87_v45 = vld [vmem:[%s5296_s2 + $0x20] sm:$0xf] }
 0x20b   :  { %v1709_v52 = vsub.f32 %v4702_v10, %v1673_v11  ;;  %3914 = vmatprep.mubr.msk.bf16.mxu1 %vm4217_vm1, %v4216_v0  ;;  %3924 = vmatprep.subr.bf16.mxu1 %v4216_v0  ;;  %4156 = vpow2.f32 %v1768_v12  ;;  %v84_v10 = vld [vmem:[%s5296_s2 + $0x14] sm:$0xf] }
 0x20c   :  { %v4886_v9 = vpop.eup %4144  ;;  %v1938_v59 = vpack.c.bf16 %v1906_v51, %v1906_v51  ;;  %4158 = vrcp.f32 %v1796_v53  ;;  %v2203_v7 = vsel %vm1971_vm2, %v84_v10, 0 }
 0x20d   :  { %v4147_v58 = vpop.eup %4146  ;;  %v1770_v57 = vmul.f32 1.442695, %v1709_v52  ;;  %v1851_v16 = vsel %vm111_vm0, %v4886_v9, 0.0 }
 0x20e   :  { %3909 = vmatmul.mubr.msk.bf16.vlgmr.msra.gmra.mxu0 %vm111_vm0, %v1938_v59  ;;  %1852 = vadd.xlane.f32.xlu1 %v1851_v16  ;;  %v1799_v63 = vpop.xlane.xlu1 %1798  ;;  %v1907_v35 = vmul.f32 %v4147_v58, %v4734_v27  ;;  %v1676_v4 = vpop.xlane.xlu0 %1675  ;;  %v2341_v59 = vsel %vm1971_vm2, %v87_v45, 0 }
 0x20f   :  { %4160 = vpow2.f32 %v1770_v57  ;;  %3919 = vmatpush3.bf16.msra.mxu0 %v2157_v62  ;;  %3920 = vmatprep.mubr.msk.bf16.mxu0 %vm4217_vm1, %v4216_v0  ;;  %v1710_v5 = vsub.f32 %v4704_v23, %v1676_v4 }
 0x210   :  { %v4898_v44 = vpop.eup %4148  ;;  %4162 = vrcp.f32 %v1799_v63  ;;  %v1939_v55 = vpack.c.bf16 %v1907_v35, %v1907_v35  ;;  %3930 = vmatprep.subr.bf16.mxu0 %v4216_v0  ;;  %v89_v35 = vld [vmem:[%s5296_s2 + $0x28] sm:$0xf] }
 0x211   :  { %v4151_v6 = vpop.eup %4150  ;;  %v1854_v27 = vsel %vm111_vm0, %v4898_v44, 0.0  ;;  %v1772_v54 = vmul.f32 1.442695, %v1710_v5  ;;  %v2433_v48 = vsel %vm1971_vm2, %v89_v35, 0 }
 0x212   :  { %3915 = vmatmul.mubr.msk.bf16.vlgmr.msra.gmra.mxu1 %vm111_vm0, %v1939_v55  ;;  %v1679_v14 = vpop.xlane.xlu1 %1678  ;;  %1855 = vadd.xlane.f32.xlu0 %v1854_v27  ;;  %v1908_v23 = vmul.f32 %v4151_v6, %v4742_v38  ;;  %v1802_v17 = vpop.xlane.xlu0 %1801 }
 0x213   :  { %v1711_v49 = vsub.f32 %v4706_v24, %v1679_v14  ;;  %3925 = vmatpush3.bf16.msra.mxu1 %v2203_v7  ;;  %3926 = vmatprep.mubr.msk.bf16.mxu1 %vm4217_vm1, %v4216_v0  ;;  %4164 = vpow2.f32 %v1772_v54  ;;  %v86_v24 = vld [vmem:[%s5296_s2 + $0x1c] sm:$0xf] }
 0x214   :  { %v4913_v20 = vpop.eup %4152  ;;  %v1940_v32 = vpack.c.bf16 %v1908_v23, %v1908_v23  ;;  %3936 = vmatprep.subr.bf16.mxu1 %v4216_v0  ;;  %4166 = vrcp.f32 %v1802_v17  ;;  %v2295_v26 = vsel %vm1971_vm2, %v86_v24, 0 }
 0x215   :  { %v4155_v60 = vpop.eup %4154  ;;  %v1774_v19 = vmul.f32 1.442695, %v1711_v49  ;;  %v1857_v38 = vsel %vm111_vm0, %v4913_v20, 0.0 }
 0x216   :  { %3921 = vmatmul.mubr.msk.bf16.vlgmr.msra.gmra.mxu0 %vm111_vm0, %v1940_v32  ;;  %1858 = vadd.xlane.f32.xlu1 %v1857_v38  ;;  %v1805_v18 = vpop.xlane.xlu1 %1804  ;;  %v1909_v3 = vmul.f32 %v4155_v60, %v4744_v41 }
 0x217   :  { %4168 = vpow2.f32 %v1774_v19  ;;  %3931 = vmatpush3.bf16.msra.mxu0 %v2249_v31  ;;  %3932 = vmatprep.mubr.msk.bf16.mxu0 %vm4217_vm1, %v4216_v0 }
 0x218   :  { %4170 = vrcp.f32 %v1805_v18  ;;  %v1941_v61 = vpack.c.bf16 %v1909_v3, %v1909_v3  ;;  %3942 = vmatprep.subr.bf16.mxu0 %v4216_v0  ;;  %v4928_v28 = vpop.eup %4156 }
 0x219   :  { %v4159_v39 = vpop.eup %4158  ;;  %v1860_v41 = vsel %vm111_vm0, %v4928_v28, 0.0 }
 0x21a   :  { %3927 = vmatmul.mubr.msk.bf16.vlgmr.msra.gmra.mxu1 %vm111_vm0, %v1941_v61  ;;  %v1811_v40 = vpop.xlane.xlu1 %1810  ;;  %1861 = vadd.xlane.f32.xlu0 %v1860_v41  ;;  %v1910_v12 = vmul.f32 %v4159_v39, %v4756_v56  ;;  %v88_v56 = vld [vmem:[%s5296_s2 + $0x24] sm:$0xf] }
 0x21b   :  { %4172 = vrcp.f32 %v1811_v40  ;;  %v1808_v30 = vpop.xlane.xlu0 %1807  ;;  %3937 = vmatpush3.bf16.msra.mxu1 %v2295_v26  ;;  %3938 = vmatprep.mubr.msk.bf16.mxu1 %vm4217_vm1, %v4216_v0  ;;  %v2387_v57 = vsel %vm1971_vm2, %v88_v56, 0  ;;  %v93_v40 = vld [vmem:[%s5296_s2 + $0x38] sm:$0xf] }
 0x21c   :  { %v4937_v11 = vpop.eup %4160  ;;  %4174 = vrcp.f32 %v1808_v30  ;;  %3948 = vmatprep.subr.bf16.mxu1 %v4216_v0  ;;  %v1942_v52 = vpack.c.bf16 %v1910_v12, %v1910_v12  ;;  %v2617_v12 = vsel %vm1971_vm2, %v93_v40, 0  ;;  %v102_v40 = vld [vmem:[%s5296_s2 + $0x5c] sm:$0xf] }
 0x21d   :  { %v4163_v51 = vpop.eup %4162  ;;  %v1863_v53 = vsel %vm111_vm0, %v4937_v11, 0.0 }
 0x21e   :  { %1864 = vadd.xlane.f32.xlu1 %v1863_v53  ;;  %v1911_v62 = vmul.f32 %v4163_v51, %v4758_v34  ;;  %3933 = vmatmul.mubr.msk.bf16.vlgmr.msra.gmra.mxu0 %vm111_vm0, %v1942_v52 }
 0x21f   :  { %3943 = vmatpush3.bf16.msra.mxu0 %v2341_v59  ;;  %3944 = vmatprep.mubr.msk.bf16.mxu0 %vm4217_vm1, %v4216_v0 }
 0x220   :  { %v1943_v58 = vpack.c.bf16 %v1911_v62, %v1911_v62  ;;  %v4953_v16 = vpop.eup %4164  ;;  %3954 = vmatprep.subr.bf16.mxu0 %v4216_v0  ;;  %v95_v62 = vld [vmem:[%s5296_s2 + $0x40] sm:$0xf] }
 0x221   :  { %v4167_v10 = vpop.eup %4166  ;;  %v1866_v34 = vsel %vm111_vm0, %v4953_v16, 0.0 }
 0x222   :  { %3939 = vmatmul.mubr.msk.bf16.vlgmr.msra.gmra.mxu1 %vm111_vm0, %v1943_v58  ;;  %v1817_v63 = vpop.xlane.xlu1 %1816  ;;  %1867 = vadd.xlane.f32.xlu0 %v1866_v34  ;;  %v1912_v5 = vmul.f32 %v4167_v10, %v4779_v15  ;;  %v90_v15 = vld [vmem:[%s5296_s2 + $0x2c] sm:$0xf] }
 0x223   :  { %4176 = vrcp.f32 %v1817_v63  ;;  %v1814_v4 = vpop.xlane.xlu0 %1813  ;;  %3949 = vmatpush3.bf16.msra.mxu1 %v2387_v57  ;;  %3950 = vmatprep.mubr.msk.bf16.mxu1 %vm4217_vm1, %v4216_v0  ;;  %v2479_v49 = vsel %vm1971_vm2, %v90_v15, 0  ;;  %v2709_v63 = vsel %vm1971_vm2, %v95_v62, 0 }
 0x224   :  { %v4963_v55 = vpop.eup %4168  ;;  %4178 = vrcp.f32 %v1814_v4  ;;  %3960 = vmatprep.subr.bf16.mxu1 %v4216_v0  ;;  %v1944_v6 = vpack.c.bf16 %v1912_v5, %v1912_v5 }
 0x225   :  { %v4171_v7 = vpop.eup %4170  ;;  %v1869_v27 = vsel %vm111_vm0, %v4963_v55, 0.0 }
 0x226   :  { %1870 = vadd.xlane.f32.xlu1 %v1869_v27  ;;  %v1913_v54 = vmul.f32 %v4171_v7, %v4782_v25  ;;  %3945 = vmatmul.mubr.msk.bf16.vlgmr.msra.gmra.mxu0 %vm111_vm0, %v1944_v6  ;;  %v91_v25 = vld [vmem:[%s5296_s2 + $0x30] sm:$0xf]  ;;  %v97_v6 = vld [vmem:[%s5296_s2 + $0x48] sm:$0xf] }
 0x227   :  { %3955 = vmatpush3.bf16.msra.mxu0 %v2433_v48  ;;  %3956 = vmatprep.mubr.msk.bf16.mxu0 %vm4217_vm1, %v4216_v0  ;;  %v2525_v24 = vsel %vm1971_vm2, %v91_v25, 0 }
 0x228   :  { %v4173_v14 = vpop.eup %4172  ;;  %v1945_v23 = vpack.c.bf16 %v1913_v54, %v1913_v54  ;;  %3966 = vmatprep.subr.bf16.mxu0 %v4216_v0  ;;  %v2801_v54 = vsel %vm1971_vm2, %v97_v6, 0 }
 0x229   :  { %v4175_v17 = vpop.eup %4174  ;;  %v1915_v38 = vmul.f32 %v4173_v14, %v4790_v29 }
 0x22a   :  { %3951 = vmatmul.mubr.msk.bf16.vlgmr.msra.gmra.mxu1 %vm111_vm0, %v1945_v23  ;;  %v1823_v32 = vpop.xlane.xlu1 %1822  ;;  %v1914_v31 = vmul.f32 %v4175_v17, %v4792_v36  ;;  %v92_v36 = vld [vmem:[%s5296_s2 + $0x34] sm:$0xf] }
 0x22b   :  { %4180 = vrcp.f32 %v1823_v32  ;;  %v1820_v60 = vpop.xlane.xlu0 %1819  ;;  %3961 = vmatpush3.bf16.msra.mxu1 %v2479_v49  ;;  %3962 = vmatprep.mubr.msk.bf16.mxu1 %vm4217_vm1, %v4216_v0  ;;  %v1947_v3 = vpack.c.bf16 %v1915_v38, %v1915_v38  ;;  %v2571_v61 = vsel %vm1971_vm2, %v92_v36, 0 }
 0x22c   :  { %4182 = vrcp.f32 %v1820_v60  ;;  %v1946_v19 = vpack.c.bf16 %v1914_v31, %v1914_v31  ;;  %3972 = vmatprep.subr.bf16.mxu1 %v4216_v0  ;;  %v99_v31 = vld [vmem:[%s5296_s2 + $0x50] sm:$0xf] }
 0x22d   :  { %v2893_v38 = vsel %vm1971_vm2, %v99_v31, 0 }
 0x22e   :  { %3957 = vmatmul.mubr.msk.bf16.vlgmr.msra.gmra.mxu0 %vm111_vm0, %v1946_v19 }
 0x22f   :  { %3967 = vmatpush3.bf16.msra.mxu0 %v2525_v24  ;;  %3968 = vmatprep.mubr.msk.bf16.mxu0 %vm4217_vm1, %v4216_v0 }
 0x230   :  { %v4177_v18 = vpop.eup %4176  ;;  %3978 = vmatprep.subr.bf16.mxu0 %v4216_v0 }
 0x231   :  { %v4179_v26 = vpop.eup %4178  ;;  %v1917_v30 = vmul.f32 %v4177_v18, %v4800_v47 }
 0x232   :  { %3963 = vmatmul.mubr.msk.bf16.vlgmr.msra.gmra.mxu1 %vm111_vm0, %v1947_v3  ;;  %v1829_v29 = vpop.xlane.xlu1 %1828  ;;  %v1916_v39 = vmul.f32 %v4179_v26, %v4802_v50  ;;  %v94_v50 = vld [vmem:[%s5296_s2 + $0x3c] sm:$0xf] }
 0x233   :  { %4184 = vrcp.f32 %v1829_v29  ;;  %v1826_v41 = vpop.xlane.xlu0 %1825  ;;  %3973 = vmatpush3.bf16.msra.mxu1 %v2571_v61  ;;  %3974 = vmatprep.mubr.msk.bf16.mxu1 %vm4217_vm1, %v4216_v0  ;;  %v1949_v52 = vpack.c.bf16 %v1917_v30, %v1917_v30  ;;  %v2663_v53 = vsel %vm1971_vm2, %v94_v50, 0  ;;  %v101_v61 = vld [vmem:[%s5296_s2 + $0x58] sm:$0xf] }
 0x234   :  { %4186 = vrcp.f32 %v1826_v41  ;;  %v1948_v45 = vpack.c.bf16 %v1916_v39, %v1916_v39  ;;  %3984 = vmatprep.subr.bf16.mxu1 %v4216_v0  ;;  %v2985_v39 = vsel %vm1971_vm2, %v101_v61, 0 }
 0x236   :  { %3969 = vmatmul.mubr.msk.bf16.vlgmr.msra.gmra.mxu0 %vm111_vm0, %v1948_v45  ;;  %v3031_v45 = vsel %vm1971_vm2, %v102_v40, 0 }
 0x237   :  { %3979 = vmatpush3.bf16.msra.mxu0 %v2617_v12  ;;  %3980 = vmatprep.mubr.msk.bf16.mxu0 %vm4217_vm1, %v4216_v0  ;;  %v103_v12 = vld [vmem:[%s5296_s2 + $0x60] sm:$0xf] }
 0x238   :  { %v4181_v51 = vpop.eup %4180  ;;  %3990 = vmatprep.subr.bf16.mxu0 %v4216_v0 }
 0x239   :  { %v4183_v59 = vpop.eup %4182  ;;  %v1919_v10 = vmul.f32 %v4181_v51, %v4810_v22 }
 0x23a   :  { %3975 = vmatmul.mubr.msk.bf16.vlgmr.msra.gmra.mxu1 %vm111_vm0, %v1949_v52  ;;  %v1835_v47 = vpop.xlane.xlu1 %1834  ;;  %v1918_v56 = vmul.f32 %v4183_v59, %v4812_v21  ;;  %v96_v21 = vld [vmem:[%s5296_s2 + $0x44] sm:$0xf]  ;;  %v3077_v52 = vsel %vm1971_vm2, %v103_v12, 0 }
 0x23b   :  { %4188 = vrcp.f32 %v1835_v47  ;;  %v1832_v58 = vpop.xlane.xlu0 %1831  ;;  %3985 = vmatpush3.bf16.msra.mxu1 %v2663_v53  ;;  %3986 = vmatprep.mubr.msk.bf16.mxu1 %vm4217_vm1, %v4216_v0  ;;  %v1951_v35 = vpack.c.bf16 %v1919_v10, %v1919_v10  ;;  %v2755_v4 = vsel %vm1971_vm2, %v96_v21, 0  ;;  %v104_v53 = vld [vmem:[%s5296_s2 + $0x64] sm:$0xf] }
 0x23c   :  { %4190 = vrcp.f32 %v1832_v58  ;;  %v1950_v57 = vpack.c.bf16 %v1918_v56, %v1918_v56  ;;  %3996 = vmatprep.subr.bf16.mxu1 %v4216_v0  ;;  %v3123_v59 = vsel %vm1971_vm2, %v104_v53, 0 }
 0x23e   :  { %3981 = vmatmul.mubr.msk.bf16.vlgmr.msra.gmra.mxu0 %vm111_vm0, %v1950_v57  ;;  %v105_v57 = vld [vmem:[%s5296_s2 + $0x68] sm:$0xf] }
 0x23f   :  { %3991 = vmatpush3.bf16.msra.mxu0 %v2709_v63  ;;  %3992 = vmatprep.mubr.msk.bf16.mxu0 %vm4217_vm1, %v4216_v0 }
 0x240   :  { %v4185_v34 = vpop.eup %4184  ;;  %4002 = vmatprep.subr.bf16.mxu0 %v4216_v0 }
 0x241   :  { %v4187_v5 = vpop.eup %4186  ;;  %v1921_v15 = vmul.f32 %v4185_v34, %v4820_v8  ;;  %v3169_v34 = vsel %vm1971_vm2, %v105_v57, 0 }
 0x242   :  { %3987 = vmatmul.mubr.msk.bf16.vlgmr.msra.gmra.mxu1 %vm111_vm0, %v1951_v35  ;;  %v1841_v22 = vpop.xlane.xlu1 %1840  ;;  %v1920_v7 = vmul.f32 %v4187_v5, %v4822_v13  ;;  %v98_v13 = vld [vmem:[%s5296_s2 + $0x4c] sm:$0xf] }
 0x243   :  { %4192 = vrcp.f32 %v1841_v22  ;;  %v1838_v27 = vpop.xlane.xlu0 %1837  ;;  %3997 = vmatpush3.bf16.msra.mxu1 %v2755_v4  ;;  %3998 = vmatprep.mubr.msk.bf16.mxu1 %vm4217_vm1, %v4216_v0  ;;  %v1953_v23 = vpack.c.bf16 %v1921_v15, %v1921_v15  ;;  %v2847_v49 = vsel %vm1971_vm2, %v98_v13, 0  ;;  %v106_v4 = vld [vmem:[%s5296_s2 + $0x6c] sm:$0xf] }
 0x244   :  { %4194 = vrcp.f32 %v1838_v27  ;;  %v1952_v48 = vpack.c.bf16 %v1920_v7, %v1920_v7  ;;  %4008 = vmatprep.subr.bf16.mxu1 %v4216_v0  ;;  %v3215_v7 = vsel %vm1971_vm2, %v106_v4, 0  ;;  %v107_v27 = vld [vmem:[%s5296_s2 + $0x70] sm:$0xf] }
 0x246   :  { %3993 = vmatmul.mubr.msk.bf16.vlgmr.msra.gmra.mxu0 %vm111_vm0, %v1952_v48 }
 0x247   :  { %4003 = vmatpush3.bf16.msra.mxu0 %v2801_v54  ;;  %4004 = vmatprep.mubr.msk.bf16.mxu0 %vm4217_vm1, %v4216_v0  ;;  %v3261_v54 = vsel %vm1971_vm2, %v107_v27, 0 }
 0x248   :  { %v4189_v14 = vpop.eup %4188  ;;  %4014 = vmatprep.subr.bf16.mxu0 %v4216_v0 }
 0x249   :  { %v4191_v17 = vpop.eup %4190  ;;  %v1923_v19 = vmul.f32 %v4189_v14, %v4830_v1  ;;  %v108_v14 = vld [vmem:[%s5296_s2 + $0x74] sm:$0xf] }
 0x24a   :  { %3999 = vmatmul.mubr.msk.bf16.vlgmr.msra.gmra.mxu1 %vm111_vm0, %v1953_v23  ;;  %v1847_v8 = vpop.xlane.xlu1 %1846  ;;  %v1922_v32 = vmul.f32 %v4191_v17, %v4832_v2  ;;  %v100_v2 = vld [vmem:[%s5296_s2 + $0x54] sm:$0xf]  ;;  %v3307_v17 = vsel %vm1971_vm2, %v108_v14, 0 }
 0x24b   :  { %4196 = vrcp.f32 %v1847_v8  ;;  %v1844_v25 = vpop.xlane.xlu0 %1843  ;;  %4009 = vmatpush3.bf16.msra.mxu1 %v2847_v49  ;;  %4010 = vmatprep.mubr.msk.bf16.mxu1 %vm4217_vm1, %v4216_v0  ;;  %v1955_v36 = vpack.c.bf16 %v1923_v19, %v1923_v19  ;;  %v2939_v18 = vsel %vm1971_vm2, %v100_v2, 0  ;;  %v110_v19 = vld [vmem:[%s5296_s2 + $0x7c] sm:$0xf] }
 0x24c   :  { %4198 = vrcp.f32 %v1844_v25  ;;  %v1954_v60 = vpack.c.bf16 %v1922_v32, %v1922_v32  ;;  %4020 = vmatprep.subr.bf16.mxu1 %v4216_v0 }
 0x24e   :  { %4005 = vmatmul.mubr.msk.bf16.vlgmr.msra.gmra.mxu0 %vm111_vm0, %v1954_v60 }
 0x24f   :  { %4015 = vmatpush3.bf16.msra.mxu0 %v2893_v38  ;;  %4016 = vmatprep.mubr.msk.bf16.mxu0 %vm4217_vm1, %v4216_v0 }
 0x250   :  { %v4193_v24 = vpop.eup %4192  ;;  %4026 = vmatprep.subr.bf16.mxu0 %v4216_v0 }
 0x251   :  { %v4195_v3 = vpop.eup %4194  ;;  %v1925_v29 = vmul.f32 %v4193_v24, %v4838_v42 }
 0x252   :  { %4011 = vmatmul.mubr.msk.bf16.vlgmr.msra.gmra.mxu1 %vm111_vm0, %v1955_v36  ;;  %v1924_v1 = vmul.f32 %v4195_v3, %v4840_v33 }
 0x253   :  { %4021 = vmatpush3.bf16.msra.mxu1 %v2939_v18  ;;  %4022 = vmatprep.mubr.msk.bf16.mxu1 %vm4217_vm1, %v4216_v0  ;;  %v1957_v41 = vpack.c.bf16 %v1925_v29, %v1925_v29 }
 0x254   :  { %v1956_v26 = vpack.c.bf16 %v1924_v1, %v1924_v1  ;;  %4032 = vmatprep.subr.bf16.mxu1 %v4216_v0 }
 0x256   :  { %4017 = vmatmul.mubr.msk.bf16.vlgmr.msra.gmra.mxu0 %vm111_vm0, %v1956_v26 }
 0x257   :  { %4027 = vmatpush3.bf16.msra.mxu0 %v2985_v39  ;;  %4028 = vmatprep.mubr.msk.bf16.mxu0 %vm4217_vm1, %v4216_v0 }
 0x258   :  { %v4197_v33 = vpop.eup %4196  ;;  %4038 = vmatprep.subr.bf16.mxu0 %v4216_v0 }
 0x259   :  { %v4199_v30 = vpop.eup %4198  ;;  %v1927_v51 = vmul.f32 %v4197_v33, %v4846_v46 }
 0x25a   :  { %4023 = vmatmul.mubr.msk.bf16.vlgmr.msra.gmra.mxu1 %vm111_vm0, %v1957_v41  ;;  %v1926_v42 = vmul.f32 %v4199_v30, %v4848_v43 }
 0x25b   :  { %4033 = vmatpush3.bf16.msra.mxu1 %v3031_v45  ;;  %4034 = vmatprep.mubr.msk.bf16.mxu1 %vm4217_vm1, %v4216_v0  ;;  %v1959_v43 = vpack.c.bf16 %v1927_v51, %v1927_v51 }
 0x25c   :  { %v1958_v50 = vpack.c.bf16 %v1926_v42, %v1926_v42  ;;  %4044 = vmatprep.subr.bf16.mxu1 %v4216_v0 }
 0x25e   :  { %4029 = vmatmul.mubr.msk.bf16.vlgmr.msra.gmra.mxu0 %vm111_vm0, %v1958_v50 }
 0x25f   :  { %4039 = vmatpush3.bf16.msra.mxu0 %v3077_v52  ;;  %4040 = vmatprep.mubr.msk.bf16.mxu0 %vm4217_vm1, %v4216_v0 }
 0x260   :  { %4050 = vmatprep.subr.bf16.mxu0 %v4216_v0 }
 0x262   :  { %4035 = vmatmul.mubr.msk.bf16.vlgmr.msra.gmra.mxu1 %vm111_vm0, %v1959_v43 }
 0x263   :  { %4045 = vmatpush3.bf16.msra.mxu1 %v3123_v59  ;;  %4046 = vmatprep.mubr.msk.bf16.mxu1 %vm4217_vm1, %v4216_v0 }
 0x264   :  { %4056 = vmatprep.subr.bf16.mxu1 %v4216_v0 }
 0x293   :  { %v1850_v46 = vpop.xlane.xlu0 %1849 }
 0x294   :  { %4200 = vrcp.f32 %v1850_v46 }
 0x297   :  { %v1853_v47 = vpop.xlane.xlu1 %1852 }
 0x298   :  { %4202 = vrcp.f32 %v1853_v47 }
 0x29b   :  { %v1856_v56 = vpop.xlane.xlu0 %1855 }
 0x29c   :  { %4204 = vrcp.f32 %v1856_v56 }
 0x29f   :  { %v1859_v62 = vpop.xlane.xlu1 %1858 }
 0x2a0   :  { %4206 = vrcp.f32 %v1859_v62 }
 0x2a1   :  { %v4201_v58 = vpop.eup %4200 }
 0x2a2   :  { %v1928_v10 = vmul.f32 %v4201_v58, %v4872_v37 }
 0x2a3   :  { %v1862_v21 = vpop.xlane.xlu0 %1861 }
 0x2a4   :  { %v1960_v63 = vpack.c.bf16 %v1928_v10, %v1928_v10  ;;  %4208 = vrcp.f32 %v1862_v21 }
 0x2a5   :  { %v4203_v35 = vpop.eup %4202 }
 0x2a6   :  { %v1929_v5 = vmul.f32 %v4203_v35, %v4886_v9  ;;  %4041 = vmatmul.mubr.msk.bf16.vlgmr.msra.gmra.mxu0 %vm111_vm0, %v1960_v63 }
 0x2a7   :  { %v1865_v22 = vpop.xlane.xlu1 %1864  ;;  %4051 = vmatpush3.bf16.msra.mxu0 %v3169_v34  ;;  %4052 = vmatprep.mubr.msk.bf16.mxu0 %vm4217_vm1, %v4216_v0 }
 0x2a8   :  { %v1961_v37 = vpack.c.bf16 %v1929_v5, %v1929_v5  ;;  %4210 = vrcp.f32 %v1865_v22  ;;  %4062 = vmatprep.subr.bf16.mxu0 %v4216_v0 }
 0x2a9   :  { %v4205_v6 = vpop.eup %4204 }
 0x2aa   :  { %v1930_v9 = vmul.f32 %v4205_v6, %v4898_v44  ;;  %4047 = vmatmul.mubr.msk.bf16.vlgmr.msra.gmra.mxu1 %vm111_vm0, %v1961_v37 }
 0x2ab   :  { %4057 = vmatpush3.bf16.msra.mxu1 %v3215_v7  ;;  %4058 = vmatprep.mubr.msk.bf16.mxu1 %vm4217_vm1, %v4216_v0  ;;  %v1868_v15 = vpop.xlane.xlu0 %1867 }
 0x2ac   :  { %v1962_v48 = vpack.c.bf16 %v1930_v9, %v1930_v9  ;;  %4068 = vmatprep.subr.bf16.mxu1 %v4216_v0  ;;  %4212 = vrcp.f32 %v1868_v15 }
 0x2ad   :  { %v4207_v13 = vpop.eup %4206 }
 0x2ae   :  { %v1931_v44 = vmul.f32 %v4207_v13, %v4913_v20  ;;  %4053 = vmatmul.mubr.msk.bf16.vlgmr.msra.gmra.mxu0 %vm111_vm0, %v1962_v48  ;;  %v109_v20 = vld [vmem:[%s5296_s2 + $0x78] sm:$0xf] }
 0x2af   :  { %v1871_v23 = vpop.xlane.xlu1 %1870  ;;  %4063 = vmatpush3.bf16.msra.mxu0 %v3261_v54  ;;  %4064 = vmatprep.mubr.msk.bf16.mxu0 %vm4217_vm1, %v4216_v0  ;;  %v3353_v60 = vsel %vm1971_vm2, %v109_v20, 0 }
 0x2b0   :  { %v1963_v49 = vpack.c.bf16 %v1931_v44, %v1931_v44  ;;  %4214 = vrcp.f32 %v1871_v23  ;;  %4074 = vmatprep.subr.bf16.mxu0 %v4216_v0 }
 0x2b1   :  { %v4209_v8 = vpop.eup %4208 }
 0x2b2   :  { %4059 = vmatmul.mubr.msk.bf16.vlgmr.msra.gmra.mxu1 %vm111_vm0, %v1963_v49  ;;  %v1932_v32 = vmul.f32 %v4209_v8, %v4928_v28  ;;  %v3399_v28 = vsel %vm1971_vm2, %v110_v19, 0 }
 0x2b3   :  { %4069 = vmatpush3.bf16.msra.mxu1 %v3307_v17  ;;  %4070 = vmatprep.mubr.msk.bf16.mxu1 %vm4217_vm1, %v4216_v0 }
 0x2b4   :  { %4080 = vmatprep.subr.bf16.mxu1 %v4216_v0  ;;  %v1964_v25 = vpack.c.bf16 %v1932_v32, %v1932_v32 }
 0x2b5   :  { %v4211_v31 = vpop.eup %4210 }
 0x2b6   :  { %v1933_v38 = vmul.f32 %v4211_v31, %v4937_v11  ;;  %4065 = vmatmul.mubr.msk.bf16.vlgmr.msra.gmra.mxu0 %vm111_vm0, %v1964_v25 }
 0x2b7   :  { %4075 = vmatpush3.bf16.msra.mxu0 %v3353_v60  ;;  %4076 = vmatprep.mubr.msk.bf16.mxu0 %vm4217_vm1, %v4216_v0 }
 0x2b8   :  { %v1965_v2 = vpack.c.bf16 %v1933_v38, %v1933_v38 }
 0x2b9   :  { %v4213_v24 = vpop.eup %4212 }
 0x2ba   :  { %4071 = vmatmul.mubr.msk.bf16.vlgmr.msra.gmra.mxu1 %vm111_vm0, %v1965_v2  ;;  %v1934_v36 = vmul.f32 %v4213_v24, %v4953_v16 }
 0x2bb   :  { %4081 = vmatpush3.bf16.msra.mxu1 %v3399_v28  ;;  %4082 = vmatprep.mubr.msk.bf16.mxu1 %vm4217_vm1, %v4216_v0 }
 0x2bc   :  { %v1966_v11 = vpack.c.bf16 %v1934_v36, %v1934_v36 }
 0x2bd   :  { %v4215_v18 = vpop.eup %4214 }
 0x2be   :  { %v1935_v3 = vmul.f32 %v4215_v18, %v4963_v55  ;;  %4077 = vmatmul.mubr.msk.bf16.vlgmr.msra.gmra.mxu0 %vm111_vm0, %v1966_v11 }
 0x2c0   :  { %v1967_v1 = vpack.c.bf16 %v1935_v3, %v1935_v3 }
 0x2c2   :  { %4083 = vmatmul.mubr.msk.bf16.vlgmr.msra.gmra.mxu1 %vm111_vm0, %v1967_v1 }
 0x2c5   :  { %v2009_v61 = vpop.f32.mrf.mxu0 }
 0x2c6   :  { %v3441_v26 = vpack.c.bf16 %v2009_v61, %v2009_v61 }
 0x2c7   :  { %v3898_v29 = vpop.f32.mrf.mxu0 }
 0x2c8   :  { %3474 = vst.msk [vmem:[%s5297_s3] sm:$0xf] %vm3473_vm3, %v3441_v26 }
 0x2c9   :  { %v2012_v16 = vpop.f32.mrf.mxu0  ;;  %v2055_v0 = vpop.f32.mrf.mxu1 }
 0x2ca   :  { %v3442_v39 = vpack.c.bf16 %v2055_v0, %v2055_v0 }
 0x2cb   :  { %v3899_v40 = vpop.f32.mrf.mxu0  ;;  %v3904_v33 = vpop.f32.mrf.mxu1 }
 0x2cc   :  { %3475 = vst.msk [vmem:[%s5297_s3 + $0x4] sm:$0xf] %vm3473_vm3, %v3442_v39 }
 0x2cd   :  { %v2058_v55 = vpop.f32.mrf.mxu1 }
 0x2ce   :  { %v2101_v41 = vpop.f32.mrf.mxu0 }
 0x2cf   :  { %v3443_v45 = vpack.c.bf16 %v2101_v41, %v2101_v41  ;;  %v3905_v30 = vpop.f32.mrf.mxu1 }
 0x2d0   :  { %v3910_v42 = vpop.f32.mrf.mxu0 }
 0x2d1   :  { %3476 = vst.msk [vmem:[%s5297_s3 + $0x8] sm:$0xf] %vm3473_vm3, %v3443_v45 }
 0x2d2   :  { %v2104_v12 = vpop.f32.mrf.mxu0  ;;  %v2147_v50 = vpop.f32.mrf.mxu1 }
 0x2d3   :  { %v3444_v51 = vpack.c.bf16 %v2147_v50, %v2147_v50 }
 0x2d4   :  { %v3911_v52 = vpop.f32.mrf.mxu0  ;;  %v3916_v53 = vpop.f32.mrf.mxu1 }
 0x2d5   :  { %3477 = vst.msk [vmem:[%s5297_s3 + $0xc] sm:$0xf] %vm3473_vm3, %v3444_v51 }
 0x2d6   :  { %v2150_v43 = vpop.f32.mrf.mxu1  ;;  %v2193_v59 = vpop.f32.mrf.mxu0 }
 0x2d7   :  { %v3445_v46 = vpack.c.bf16 %v2193_v59, %v2193_v59 }
 0x2d8   :  { %v3917_v47 = vpop.f32.mrf.mxu1  ;;  %v3922_v56 = vpop.f32.mrf.mxu0 }
 0x2d9   :  { %3478 = vst.msk [vmem:[%s5297_s3 + $0x10] sm:$0xf] %vm3473_vm3, %v3445_v46 }
 0x2da   :  { %v2196_v62 = vpop.f32.mrf.mxu0  ;;  %v2239_v58 = vpop.f32.mrf.mxu1 }
 0x2db   :  { %v3446_v57 = vpack.c.bf16 %v2239_v58, %v2239_v58 }
 0x2dc   :  { %v3923_v10 = vpop.f32.mrf.mxu0  ;;  %v3928_v63 = vpop.f32.mrf.mxu1 }
 0x2dd   :  { %3479 = vst.msk [vmem:[%s5297_s3 + $0x14] sm:$0xf] %vm3473_vm3, %v3446_v57 }
 0x2de   :  { %v2242_v21 = vpop.f32.mrf.mxu1  ;;  %v2285_v34 = vpop.f32.mrf.mxu0 }
 0x2df   :  { %v3447_v35 = vpack.c.bf16 %v2285_v34, %v2285_v34 }
 0x2e0   :  { %v3929_v4 = vpop.f32.mrf.mxu1  ;;  %v3934_v5 = vpop.f32.mrf.mxu0 }
 0x2e1   :  { %3480 = vst.msk [vmem:[%s5297_s3 + $0x18] sm:$0xf] %vm3473_vm3, %v3447_v35 }
 0x2e2   :  { %v2331_v22 = vpop.f32.mrf.mxu1  ;;  %v2288_v37 = vpop.f32.mrf.mxu0 }
 0x2e3   :  { %v3448_v7 = vpack.c.bf16 %v2331_v22, %v2331_v22 }
 0x2e4   :  { %v3940_v6 = vpop.f32.mrf.mxu1  ;;  %v3935_v27 = vpop.f32.mrf.mxu0 }
 0x2e5   :  { %3481 = vst.msk [vmem:[%s5297_s3 + $0x1c] sm:$0xf] %vm3473_vm3, %v3448_v7 }
 0x2e6   :  { %v2334_v9 = vpop.f32.mrf.mxu1  ;;  %v2377_v48 = vpop.f32.mrf.mxu0 }
 0x2e7   :  { %v3449_v15 = vpack.c.bf16 %v2377_v48, %v2377_v48 }
 0x2e8   :  { %v3941_v54 = vpop.f32.mrf.mxu1  ;;  %v3946_v13 = vpop.f32.mrf.mxu0 }
 0x2e9   :  { %3482 = vst.msk [vmem:[%s5297_s3 + $0x20] sm:$0xf] %vm3473_vm3, %v3449_v15 }
 0x2ea   :  { %v2423_v14 = vpop.f32.mrf.mxu1  ;;  %v2380_v44 = vpop.f32.mrf.mxu0 }
 0x2eb   :  { %v3450_v23 = vpack.c.bf16 %v2423_v14, %v2423_v14 }
 0x2ec   :  { %v3952_v49 = vpop.f32.mrf.mxu1  ;;  %v3947_v17 = vpop.f32.mrf.mxu0 }
 0x2ed   :  { %3483 = vst.msk [vmem:[%s5297_s3 + $0x24] sm:$0xf] %vm3473_vm3, %v3450_v23 }
 0x2ee   :  { %v2426_v8 = vpop.f32.mrf.mxu1  ;;  %v2469_v20 = vpop.f32.mrf.mxu0 }
 0x2ef   :  { %v3451_v32 = vpack.c.bf16 %v2469_v20, %v2469_v20 }
 0x2f0   :  { %v3953_v31 = vpop.f32.mrf.mxu1  ;;  %v3958_v25 = vpop.f32.mrf.mxu0 }
 0x2f1   :  { %3484 = vst.msk [vmem:[%s5297_s3 + $0x28] sm:$0xf] %vm3473_vm3, %v3451_v32 }
 0x2f2   :  { %v2515_v60 = vpop.f32.mrf.mxu1  ;;  %v2472_v19 = vpop.f32.mrf.mxu0 }
 0x2f3   :  { %v3452_v38 = vpack.c.bf16 %v2515_v60, %v2515_v60 }
 0x2f4   :  { %v3964_v2 = vpop.f32.mrf.mxu1  ;;  %v3959_v28 = vpop.f32.mrf.mxu0 }
 0x2f5   :  { %3485 = vst.msk [vmem:[%s5297_s3 + $0x2c] sm:$0xf] %vm3473_vm3, %v3452_v38 }
 0x2f6   :  { %v2518_v24 = vpop.f32.mrf.mxu1  ;;  %v2561_v36 = vpop.f32.mrf.mxu0 }
 0x2f7   :  { %v3453_v18 = vpack.c.bf16 %v2561_v36, %v2561_v36 }
 0x2f8   :  { %v3965_v11 = vpop.f32.mrf.mxu1  ;;  %v3970_v3 = vpop.f32.mrf.mxu0 }
 0x2f9   :  { %3486 = vst.msk [vmem:[%s5297_s3 + $0x30] sm:$0xf] %vm3473_vm3, %v3453_v18 }
 0x2fa   :  { %v2607_v1 = vpop.f32.mrf.mxu1  ;;  %v2564_v61 = vpop.f32.mrf.mxu0 }
 0x2fb   :  { %v3454_v26 = vpack.c.bf16 %v2607_v1, %v2607_v1 }
 0x2fc   :  { %v3976_v29 = vpop.f32.mrf.mxu1  ;;  %v3971_v16 = vpop.f32.mrf.mxu0 }
 0x2fd   :  { %3487 = vst.msk [vmem:[%s5297_s3 + $0x34] sm:$0xf] %vm3473_vm3, %v3454_v26 }
 0x2fe   :  { %v2610_v0 = vpop.f32.mrf.mxu1  ;;  %v2653_v39 = vpop.f32.mrf.mxu0 }
 0x2ff   :  { %v3455_v40 = vpack.c.bf16 %v2653_v39, %v2653_v39 }
 0x300   :  { %v3977_v33 = vpop.f32.mrf.mxu1  ;;  %v3982_v55 = vpop.f32.mrf.mxu0 }
 0x301   :  { %3488 = vst.msk [vmem:[%s5297_s3 + $0x38] sm:$0xf] %vm3473_vm3, %v3455_v40 }
 0x302   :  { %v2699_v41 = vpop.f32.mrf.mxu1  ;;  %v2656_v45 = vpop.f32.mrf.mxu0 }
 0x303   :  { %v3456_v30 = vpack.c.bf16 %v2699_v41, %v2699_v41 }
 0x304   :  { %v3988_v42 = vpop.f32.mrf.mxu1  ;;  %v3983_v12 = vpop.f32.mrf.mxu0 }
 0x305   :  { %3489 = vst.msk [vmem:[%s5297_s3 + $0x3c] sm:$0xf] %vm3473_vm3, %v3456_v30 }
 0x306   :  { %v2702_v50 = vpop.f32.mrf.mxu1  ;;  %v2745_v51 = vpop.f32.mrf.mxu0 }
 0x307   :  { %v3457_v52 = vpack.c.bf16 %v2745_v51, %v2745_v51 }
 0x308   :  { %v3989_v53 = vpop.f32.mrf.mxu1  ;;  %v3994_v43 = vpop.f32.mrf.mxu0 }
 0x309   :  { %3490 = vst.msk [vmem:[%s5297_s3 + $0x40] sm:$0xf] %vm3473_vm3, %v3457_v52 }
 0x30a   :  { %v2791_v59 = vpop.f32.mrf.mxu1  ;;  %v2748_v46 = vpop.f32.mrf.mxu0 }
 0x30b   :  { %v3458_v47 = vpack.c.bf16 %v2791_v59, %v2791_v59 }
 0x30c   :  { %v4000_v56 = vpop.f32.mrf.mxu1  ;;  %v3995_v62 = vpop.f32.mrf.mxu0 }
 0x30d   :  { %3491 = vst.msk [vmem:[%s5297_s3 + $0x44] sm:$0xf] %vm3473_vm3, %v3458_v47 }
 0x30e   :  { %v2794_v58 = vpop.f32.mrf.mxu1  ;;  %v2837_v57 = vpop.f32.mrf.mxu0 }
 0x30f   :  { %v3459_v10 = vpack.c.bf16 %v2837_v57, %v2837_v57 }
 0x310   :  { %v4001_v63 = vpop.f32.mrf.mxu1  ;;  %v4006_v21 = vpop.f32.mrf.mxu0 }
 0x311   :  { %3492 = vst.msk [vmem:[%s5297_s3 + $0x48] sm:$0xf] %vm3473_vm3, %v3459_v10 }
 0x312   :  { %v2883_v34 = vpop.f32.mrf.mxu1  ;;  %v2840_v35 = vpop.f32.mrf.mxu0 }
 0x313   :  { %v3460_v4 = vpack.c.bf16 %v2883_v34, %v2883_v34 }
 0x314   :  { %v4012_v5 = vpop.f32.mrf.mxu1  ;;  %v4007_v22 = vpop.f32.mrf.mxu0 }
 0x315   :  { %3493 = vst.msk [vmem:[%s5297_s3 + $0x4c] sm:$0xf] %vm3473_vm3, %v3460_v4 }
 0x316   :  { %v2886_v37 = vpop.f32.mrf.mxu1  ;;  %v2929_v7 = vpop.f32.mrf.mxu0 }
 0x317   :  { %v3461_v6 = vpack.c.bf16 %v2929_v7, %v2929_v7 }
 0x318   :  { %v4013_v27 = vpop.f32.mrf.mxu1  ;;  %v4018_v9 = vpop.f32.mrf.mxu0 }
 0x319   :  { %3494 = vst.msk [vmem:[%s5297_s3 + $0x50] sm:$0xf] %vm3473_vm3, %v3461_v6 }
 0x31a   :  { %v2975_v48 = vpop.f32.mrf.mxu1  ;;  %v2932_v15 = vpop.f32.mrf.mxu0 }
 0x31b   :  { %v3462_v54 = vpack.c.bf16 %v2975_v48, %v2975_v48 }
 0x31c   :  { %v4024_v13 = vpop.f32.mrf.mxu1  ;;  %v4019_v14 = vpop.f32.mrf.mxu0 }
 0x31d   :  { %3495 = vst.msk [vmem:[%s5297_s3 + $0x54] sm:$0xf] %vm3473_vm3, %v3462_v54 }
 0x31e   :  { %v2978_v44 = vpop.f32.mrf.mxu1  ;;  %v3021_v23 = vpop.f32.mrf.mxu0 }
 0x31f   :  { %v3463_v49 = vpack.c.bf16 %v3021_v23, %v3021_v23 }
 0x320   :  { %v4025_v17 = vpop.f32.mrf.mxu1  ;;  %v4030_v8 = vpop.f32.mrf.mxu0 }
 0x321   :  { %3496 = vst.msk [vmem:[%s5297_s3 + $0x58] sm:$0xf] %vm3473_vm3, %v3463_v49 }
 0x322   :  { %v3067_v20 = vpop.f32.mrf.mxu1  ;;  %v3024_v32 = vpop.f32.mrf.mxu0 }
 0x323   :  { %v3464_v31 = vpack.c.bf16 %v3067_v20, %v3067_v20 }
 0x324   :  { %v4036_v25 = vpop.f32.mrf.mxu1  ;;  %v4031_v60 = vpop.f32.mrf.mxu0 }
 0x325   :  { %3497 = vst.msk [vmem:[%s5297_s3 + $0x5c] sm:$0xf] %vm3473_vm3, %v3464_v31 }
 0x326   :  { %v3070_v19 = vpop.f32.mrf.mxu1 }
 0x328   :  { %v4037_v38 = vpop.f32.mrf.mxu1 }
 0x366   :  { %v3113_v2 = vpop.f32.mrf.mxu0 }
 0x367   :  { %v3465_v28 = vpack.c.bf16 %v3113_v2, %v3113_v2 }
 0x368   :  { %v4042_v24 = vpop.f32.mrf.mxu0 }
 0x369   :  { %3498 = vst.msk [vmem:[%s5297_s3 + $0x60] sm:$0xf] %vm3473_vm3, %v3465_v28 }
 0x36a   :  { %v3116_v36 = vpop.f32.mrf.mxu0  ;;  %v3159_v18 = vpop.f32.mrf.mxu1 }
 0x36b   :  { %v3466_v11 = vpack.c.bf16 %v3159_v18, %v3159_v18 }
 0x36c   :  { %v4043_v3 = vpop.f32.mrf.mxu0  ;;  %v4048_v1 = vpop.f32.mrf.mxu1 }
 0x36d   :  { %3499 = vst.msk [vmem:[%s5297_s3 + $0x64] sm:$0xf] %vm3473_vm3, %v3466_v11 }
 0x36e   :  { %v3162_v61 = vpop.f32.mrf.mxu1  ;;  %v3205_v26 = vpop.f32.mrf.mxu0 }
 0x36f   :  { %v3467_v29 = vpack.c.bf16 %v3205_v26, %v3205_v26 }
 0x370   :  { %v4049_v16 = vpop.f32.mrf.mxu1  ;;  %v4054_v0 = vpop.f32.mrf.mxu0 }
 0x371   :  { %3500 = vst.msk [vmem:[%s5297_s3 + $0x68] sm:$0xf] %vm3473_vm3, %v3467_v29 }
 0x372   :  { %v3208_v39 = vpop.f32.mrf.mxu0  ;;  %v3251_v40 = vpop.f32.mrf.mxu1 }
 0x373   :  { %v3468_v33 = vpack.c.bf16 %v3251_v40, %v3251_v40 }
 0x374   :  { %v4055_v55 = vpop.f32.mrf.mxu0  ;;  %v4060_v41 = vpop.f32.mrf.mxu1 }
 0x375   :  { %3501 = vst.msk [vmem:[%s5297_s3 + $0x6c] sm:$0xf] %vm3473_vm3, %v3468_v33 }
 0x376   :  { %v3254_v45 = vpop.f32.mrf.mxu1  ;;  %v3297_v30 = vpop.f32.mrf.mxu0 }
 0x377   :  { %v3469_v42 = vpack.c.bf16 %v3297_v30, %v3297_v30 }
 0x378   :  { %v4061_v12 = vpop.f32.mrf.mxu1  ;;  %v4066_v50 = vpop.f32.mrf.mxu0 }
 0x379   :  { %3502 = vst.msk [vmem:[%s5297_s3 + $0x70] sm:$0xf] %vm3473_vm3, %v3469_v42 }
 0x37a   :  { %v3343_v51 = vpop.f32.mrf.mxu1  ;;  %v3300_v52 = vpop.f32.mrf.mxu0 }
 0x37b   :  { %v3470_v53 = vpack.c.bf16 %v3343_v51, %v3343_v51 }
 0x37c   :  { %v4072_v43 = vpop.f32.mrf.mxu1  ;;  %v4067_v59 = vpop.f32.mrf.mxu0 }
 0x37d   :  { %3503 = vst.msk [vmem:[%s5297_s3 + $0x74] sm:$0xf] %vm3473_vm3, %v3470_v53 }
 0x37e   :  { %v3346_v46 = vpop.f32.mrf.mxu1  ;;  %v3389_v47 = vpop.f32.mrf.mxu0 }
 0x37f   :  { %v3471_v56 = vpack.c.bf16 %v3389_v47, %v3389_v47 }
 0x380   :  { %v4073_v62 = vpop.f32.mrf.mxu1  ;;  %v4078_v58 = vpop.f32.mrf.mxu0 }
 0x381   :  { %3504 = vst.msk [vmem:[%s5297_s3 + $0x78] sm:$0xf] %vm3473_vm3, %v3471_v56 }
 0x382   :  { %v3435_v57 = vpop.f32.mrf.mxu1  ;;  %v3392_v10 = vpop.f32.mrf.mxu0 }
 0x383   :  { %v3472_v63 = vpack.c.bf16 %v3435_v57, %v3435_v57 }
 0x384   :  { %v4084_v21 = vpop.f32.mrf.mxu1  ;;  %v4079_v34 = vpop.f32.mrf.mxu0 }
 0x385   :  { %3505 = vst.msk [vmem:[%s5297_s3 + $0x7c] sm:$0xf] %vm3473_vm3, %v3472_v63 }
 0x386   :  { %v3438_v35 = vpop.f32.mrf.mxu1 }
 0x388   :  { %v4085_v4 = vpop.f32.mrf.mxu1 }

// kernel: residual_block.11
= control target key start
LH: loop header
LB: loop body
LE: loop exit
PB: predicated region body
PF: predicated region fallthrough
CT: control target
= control target key end

     0   :  { %vm207_vm0 = vcmask 64512   ;;  %v10548_v0 = vmov 0.0   ;;  %vm8411_vm1 = vmmov 0   ;;  %vm3152_vm2 = vcmask 27648   ;;  %s10544_s1 = inlined_call_operand.vmem [shape: bf16[64,4,8], index: 1, kind: input, shape index: {}]   ;;  %s10545_s0 = inlined_call_operand.vmem [shape: bf16[64,4,8], index: 0, kind: input, shape index: {}]   ;;  %s10546_s2 = inlined_call_operand.vmem [shape: bf16[64,4,8], index: 2, kind: input, shape index: {}]   ;;  %s10547_s3 = inlined_call_operand.vmem [shape: bf16[64,4,8], index: 3, kind: output, shape index: {}]  }
   0x1   :  { %7384 = vmatprep.subr.bf16.mxu0 %v10548_v0  ;;  %7390 = vmatprep.subr.bf16.mxu1 %v10548_v0  ;;  %v79_v1 = vld [vmem:[%s10544_s1] sm:$0x3]  ;;  %v80_v2 = vld [vmem:[%s10544_s1 + $0x2] sm:$0x3]  ;;  %v81_v5 = vld [vmem:[%s10544_s1 + $0x4] sm:$0x3] }
   0x2   :  { %v212_v3 = vsel %vm207_vm0, %v79_v1, 0  ;;  %v258_v4 = vsel %vm207_vm0, %v80_v2, 0  ;;  %7386 = vmatprep.mubr.msk.bf16.mxu0 %vm8411_vm1, %v10548_v0  ;;  %7392 = vmatprep.mubr.msk.bf16.mxu1 %vm8411_vm1, %v10548_v0  ;;  %v82_v6 = vld [vmem:[%s10544_s1 + $0x6] sm:$0x3]  ;;  %v15_v7 = vld [vmem:[%s10545_s0] sm:$0x3] }
   0x3   :  { %7385 = vmatpush3.bf16.xpose.msra.mxu0 %v212_v3  ;;  %7391 = vmatpush3.bf16.xpose.msra.mxu1 %v258_v4  ;;  %v16_v8 = vld [vmem:[%s10545_s0 + $0x2] sm:$0x3]  ;;  %v304_v9 = vsel %vm207_vm0, %v81_v5, 0  ;;  %v350_v10 = vsel %vm207_vm0, %v82_v6, 0  ;;  %v83_v11 = vld [vmem:[%s10544_s1 + $0x8] sm:$0x3] }
   0x4   :  { %7396 = vmatprep.subr.bf16.mxu0 %v10548_v0  ;;  %7402 = vmatprep.subr.bf16.mxu1 %v10548_v0  ;;  %v84_v12 = vld [vmem:[%s10544_s1 + $0xa] sm:$0x3]  ;;  %v17_v13 = vld [vmem:[%s10545_s0 + $0x4] sm:$0x3]  ;;  %v18_v14 = vld [vmem:[%s10545_s0 + $0x6] sm:$0x3] }
   0x5   :  { %v396_v15 = vsel %vm207_vm0, %v83_v11, 0  ;;  %v442_v16 = vsel %vm207_vm0, %v84_v12, 0  ;;  %v85_v17 = vld [vmem:[%s10544_s1 + $0xc] sm:$0x3]  ;;  %v86_v18 = vld [vmem:[%s10544_s1 + $0xe] sm:$0x3] }
   0x6   :  { %v19_v19 = vld [vmem:[%s10545_s0 + $0x8] sm:$0x3]  ;;  %v20_v20 = vld [vmem:[%s10545_s0 + $0xa] sm:$0x3]  ;;  %v488_v21 = vsel %vm207_vm0, %v85_v17, 0  ;;  %v534_v22 = vsel %vm207_vm0, %v86_v18, 0 }
   0x7   :  { %v87_v23 = vld [vmem:[%s10544_s1 + $0x10] sm:$0x3]  ;;  %v88_v24 = vld [vmem:[%s10544_s1 + $0x12] sm:$0x3]  ;;  %v21_v25 = vld [vmem:[%s10545_s0 + $0xc] sm:$0x3] }
   0x8   :  { %v22_v26 = vld [vmem:[%s10545_s0 + $0xe] sm:$0x3]  ;;  %v580_v27 = vsel %vm207_vm0, %v87_v23, 0  ;;  %v626_v28 = vsel %vm207_vm0, %v88_v24, 0  ;;  %v89_v29 = vld [vmem:[%s10544_s1 + $0x14] sm:$0x3] }
   0x9   :  { %v90_v30 = vld [vmem:[%s10544_s1 + $0x16] sm:$0x3]  ;;  %v23_v31 = vld [vmem:[%s10545_s0 + $0x10] sm:$0x3]  ;;  %v24_v32 = vld [vmem:[%s10545_s0 + $0x12] sm:$0x3] }
   0xa   :  { %7387 = vmatmul.mubr.msk.bf16.vlgmr.msra.gmra.mxu0 %vm207_vm0, %v15_v7  ;;  %7393 = vmatmul.mubr.msk.bf16.vlgmr.msra.gmra.mxu1 %vm207_vm0, %v16_v8  ;;  %v672_v33 = vsel %vm207_vm0, %v89_v29, 0  ;;  %v718_v34 = vsel %vm207_vm0, %v90_v30, 0  ;;  %v91_v35 = vld [vmem:[%s10544_s1 + $0x18] sm:$0x3]  ;;  %v92_v36 = vld [vmem:[%s10544_s1 + $0x1a] sm:$0x3] }
   0xb   :  { %7397 = vmatpush3.bf16.xpose.msra.mxu0 %v304_v9  ;;  %7403 = vmatpush3.bf16.xpose.msra.mxu1 %v350_v10  ;;  %v25_v37 = vld [vmem:[%s10545_s0 + $0x14] sm:$0x3]  ;;  %v26_v38 = vld [vmem:[%s10545_s0 + $0x16] sm:$0x3]  ;;  %v764_v39 = vsel %vm207_vm0, %v91_v35, 0  ;;  %v810_v40 = vsel %vm207_vm0, %v92_v36, 0 }
   0xc   :  { %7398 = vmatprep.mubr.msk.bf16.mxu0 %vm8411_vm1, %v10548_v0  ;;  %7404 = vmatprep.mubr.msk.bf16.mxu1 %vm8411_vm1, %v10548_v0  ;;  %v93_v41 = vld [vmem:[%s10544_s1 + $0x1c] sm:$0x3]  ;;  %v94_v42 = vld [vmem:[%s10544_s1 + $0x1e] sm:$0x3]  ;;  %v27_v43 = vld [vmem:[%s10545_s0 + $0x18] sm:$0x3] }
   0xd   :  { %7408 = vmatprep.subr.bf16.mxu0 %v10548_v0  ;;  %7414 = vmatprep.subr.bf16.mxu1 %v10548_v0  ;;  %v28_v44 = vld [vmem:[%s10545_s0 + $0x1a] sm:$0x3]  ;;  %v856_v45 = vsel %vm207_vm0, %v93_v41, 0  ;;  %v902_v46 = vsel %vm207_vm0, %v94_v42, 0  ;;  %v95_v47 = vld [vmem:[%s10544_s1 + $0x20] sm:$0x3] }
   0xe   :  { %v96_v48 = vld [vmem:[%s10544_s1 + $0x22] sm:$0x3]  ;;  %v29_v49 = vld [vmem:[%s10545_s0 + $0x1c] sm:$0x3]  ;;  %v30_v50 = vld [vmem:[%s10545_s0 + $0x1e] sm:$0x3] }
   0xf   :  { %v948_v51 = vsel %vm207_vm0, %v95_v47, 0  ;;  %v994_v52 = vsel %vm207_vm0, %v96_v48, 0  ;;  %v97_v53 = vld [vmem:[%s10544_s1 + $0x24] sm:$0x3]  ;;  %v98_v54 = vld [vmem:[%s10544_s1 + $0x26] sm:$0x3] }
  0x10   :  { %v31_v55 = vld [vmem:[%s10545_s0 + $0x20] sm:$0x3]  ;;  %v32_v56 = vld [vmem:[%s10545_s0 + $0x22] sm:$0x3]  ;;  %v1040_v57 = vsel %vm207_vm0, %v97_v53, 0  ;;  %v1086_v58 = vsel %vm207_vm0, %v98_v54, 0 }
  0x11   :  { %v99_v59 = vld [vmem:[%s10544_s1 + $0x28] sm:$0x3]  ;;  %v100_v60 = vld [vmem:[%s10544_s1 + $0x2a] sm:$0x3]  ;;  %v33_v61 = vld [vmem:[%s10545_s0 + $0x24] sm:$0x3] }
  0x12   :  { %7399 = vmatmul.mubr.msk.bf16.vlgmr.msra.gmra.mxu0 %vm207_vm0, %v17_v13  ;;  %7405 = vmatmul.mubr.msk.bf16.vlgmr.msra.gmra.mxu1 %vm207_vm0, %v18_v14  ;;  %v34_v62 = vld [vmem:[%s10545_s0 + $0x26] sm:$0x3]  ;;  %v1132_v63 = vsel %vm207_vm0, %v99_v59, 0  ;;  %v1178_v1 = vsel %vm207_vm0, %v100_v60, 0  ;;  %v101_v2 = vld [vmem:[%s10544_s1 + $0x2c] sm:$0x3] }
  0x13   :  { %7409 = vmatpush3.bf16.xpose.msra.mxu0 %v396_v15  ;;  %7415 = vmatpush3.bf16.xpose.msra.mxu1 %v442_v16  ;;  %v102_v3 = vld [vmem:[%s10544_s1 + $0x2e] sm:$0x3]  ;;  %v35_v4 = vld [vmem:[%s10545_s0 + $0x28] sm:$0x3]  ;;  %v36_v5 = vld [vmem:[%s10545_s0 + $0x2a] sm:$0x3] }
  0x14   :  { %7410 = vmatprep.mubr.msk.bf16.mxu0 %vm8411_vm1, %v10548_v0  ;;  %7416 = vmatprep.mubr.msk.bf16.mxu1 %vm8411_vm1, %v10548_v0  ;;  %v1224_v6 = vsel %vm207_vm0, %v101_v2, 0  ;;  %v1270_v7 = vsel %vm207_vm0, %v102_v3, 0  ;;  %v103_v8 = vld [vmem:[%s10544_s1 + $0x30] sm:$0x3]  ;;  %v104_v9 = vld [vmem:[%s10544_s1 + $0x32] sm:$0x3] }
  0x15   :  { %7420 = vmatprep.subr.bf16.mxu0 %v10548_v0  ;;  %7426 = vmatprep.subr.bf16.mxu1 %v10548_v0  ;;  %v37_v10 = vld [vmem:[%s10545_s0 + $0x2c] sm:$0x3]  ;;  %v38_v11 = vld [vmem:[%s10545_s0 + $0x2e] sm:$0x3]  ;;  %v1316_v12 = vsel %vm207_vm0, %v103_v8, 0  ;;  %v1362_v13 = vsel %vm207_vm0, %v104_v9, 0 }
  0x16   :  { %v105_v14 = vld [vmem:[%s10544_s1 + $0x34] sm:$0x3]  ;;  %v106_v15 = vld [vmem:[%s10544_s1 + $0x36] sm:$0x3]  ;;  %v39_v16 = vld [vmem:[%s10545_s0 + $0x30] sm:$0x3] }
  0x17   :  { %v40_v17 = vld [vmem:[%s10545_s0 + $0x32] sm:$0x3]  ;;  %v1408_v18 = vsel %vm207_vm0, %v105_v14, 0  ;;  %v42_v23 = vld [vmem:[%s10545_s0 + $0x36] sm:$0x3]  ;;  %vm3925_vm3 = vcmask 1041408  }
  0x18   :  { %v44_v29 = vld [vmem:[%s10545_s0 + $0x3a] sm:$0x3]  ;;  %v46_v35 = vld [vmem:[%s10545_s0 + $0x3e] sm:$0x3]  ;;  %v48_v41 = vld [vmem:[%s10545_s0 + $0x42] sm:$0x3] }
  0x19   :  { %v50_v47 = vld [vmem:[%s10545_s0 + $0x46] sm:$0x3]  ;;  %v52_v53 = vld [vmem:[%s10545_s0 + $0x4a] sm:$0x3]  ;;  %v54_v59 = vld [vmem:[%s10545_s0 + $0x4e] sm:$0x3] }
  0x1a   :  { %7411 = vmatmul.mubr.msk.bf16.vlgmr.msra.gmra.mxu0 %vm207_vm0, %v19_v19  ;;  %7417 = vmatmul.mubr.msk.bf16.vlgmr.msra.gmra.mxu1 %vm207_vm0, %v20_v20  ;;  %v1454_v19 = vsel %vm207_vm0, %v106_v15, 0  ;;  %v107_v20 = vld [vmem:[%s10544_s1 + $0x38] sm:$0x3]  ;;  %v56_v2 = vld [vmem:[%s10545_s0 + $0x52] sm:$0x3]  ;;  %vm3921_vm4 = vcmask 31744  }
  0x1b   :  { %7421 = vmatpush3.bf16.xpose.msra.mxu0 %v488_v21  ;;  %7427 = vmatpush3.bf16.xpose.msra.mxu1 %v534_v22  ;;  %v108_v21 = vld [vmem:[%s10544_s1 + $0x3a] sm:$0x3]  ;;  %v41_v22 = vld [vmem:[%s10545_s0 + $0x34] sm:$0x3]  ;;  %v1500_v24 = vsel %vm207_vm0, %v107_v20, 0  ;;  %vm6931_vm5 = vcmask 58368  }
  0x1c   :  { %7422 = vmatprep.mubr.msk.bf16.mxu0 %vm8411_vm1, %v10548_v0  ;;  %7428 = vmatprep.mubr.msk.bf16.mxu1 %vm8411_vm1, %v10548_v0  ;;  %v58_v8 = vld [vmem:[%s10545_s0 + $0x56] sm:$0x3]  ;;  %v60_v14 = vld [vmem:[%s10545_s0 + $0x5a] sm:$0x3]  ;;  %v62_v20 = vld [vmem:[%s10545_s0 + $0x5e] sm:$0x3] }
  0x1d   :  { %7432 = vmatprep.subr.bf16.mxu0 %v10548_v0  ;;  %7438 = vmatprep.subr.bf16.mxu1 %v10548_v0 }
  0x22   :  { %7423 = vmatmul.mubr.msk.bf16.vlgmr.msra.gmra.mxu0 %vm207_vm0, %v21_v25  ;;  %7429 = vmatmul.mubr.msk.bf16.vlgmr.msra.gmra.mxu1 %vm207_vm0, %v22_v26  ;;  %v1546_v25 = vsel %vm207_vm0, %v108_v21, 0  ;;  %v109_v26 = vld [vmem:[%s10544_s1 + $0x3c] sm:$0x3] }
  0x23   :  { %7433 = vmatpush3.bf16.xpose.msra.mxu0 %v580_v27  ;;  %7439 = vmatpush3.bf16.xpose.msra.mxu1 %v626_v28  ;;  %v110_v27 = vld [vmem:[%s10544_s1 + $0x3e] sm:$0x3]  ;;  %v43_v28 = vld [vmem:[%s10545_s0 + $0x38] sm:$0x3]  ;;  %v1592_v30 = vsel %vm207_vm0, %v109_v26, 0 }
  0x24   :  { %7434 = vmatprep.mubr.msk.bf16.mxu0 %vm8411_vm1, %v10548_v0  ;;  %7440 = vmatprep.mubr.msk.bf16.mxu1 %vm8411_vm1, %v10548_v0  ;;  %v64_v26 = vld [vmem:[%s10545_s0 + $0x62] sm:$0x3] }
  0x25   :  { %7444 = vmatprep.subr.bf16.mxu0 %v10548_v0  ;;  %7450 = vmatprep.subr.bf16.mxu1 %v10548_v0 }
  0x2a   :  { %7435 = vmatmul.mubr.msk.bf16.vlgmr.msra.gmra.mxu0 %vm207_vm0, %v23_v31  ;;  %7441 = vmatmul.mubr.msk.bf16.vlgmr.msra.gmra.mxu1 %vm207_vm0, %v24_v32  ;;  %v1638_v31 = vsel %vm207_vm0, %v110_v27, 0  ;;  %v111_v32 = vld [vmem:[%s10544_s1 + $0x40] sm:$0x3] }
  0x2b   :  { %7445 = vmatpush3.bf16.xpose.msra.mxu0 %v672_v33  ;;  %7451 = vmatpush3.bf16.xpose.msra.mxu1 %v718_v34  ;;  %v112_v33 = vld [vmem:[%s10544_s1 + $0x42] sm:$0x3]  ;;  %v45_v34 = vld [vmem:[%s10545_s0 + $0x3c] sm:$0x3]  ;;  %v1684_v36 = vsel %vm207_vm0, %v111_v32, 0 }
  0x2c   :  { %7446 = vmatprep.mubr.msk.bf16.mxu0 %vm8411_vm1, %v10548_v0  ;;  %7452 = vmatprep.mubr.msk.bf16.mxu1 %vm8411_vm1, %v10548_v0 }
  0x2d   :  { %7456 = vmatprep.subr.bf16.mxu0 %v10548_v0  ;;  %7462 = vmatprep.subr.bf16.mxu1 %v10548_v0 }
  0x32   :  { %7447 = vmatmul.mubr.msk.bf16.vlgmr.msra.gmra.mxu0 %vm207_vm0, %v25_v37  ;;  %7453 = vmatmul.mubr.msk.bf16.vlgmr.msra.gmra.mxu1 %vm207_vm0, %v26_v38  ;;  %v1730_v37 = vsel %vm207_vm0, %v112_v33, 0  ;;  %v113_v38 = vld [vmem:[%s10544_s1 + $0x44] sm:$0x3] }
  0x33   :  { %7457 = vmatpush3.bf16.xpose.msra.mxu0 %v764_v39  ;;  %7463 = vmatpush3.bf16.xpose.msra.mxu1 %v810_v40  ;;  %v114_v39 = vld [vmem:[%s10544_s1 + $0x46] sm:$0x3]  ;;  %v47_v40 = vld [vmem:[%s10545_s0 + $0x40] sm:$0x3]  ;;  %v1776_v42 = vsel %vm207_vm0, %v113_v38, 0 }
  0x34   :  { %7458 = vmatprep.mubr.msk.bf16.mxu0 %vm8411_vm1, %v10548_v0  ;;  %7464 = vmatprep.mubr.msk.bf16.mxu1 %vm8411_vm1, %v10548_v0 }
  0x35   :  { %7468 = vmatprep.subr.bf16.mxu0 %v10548_v0  ;;  %7474 = vmatprep.subr.bf16.mxu1 %v10548_v0 }
  0x3a   :  { %7459 = vmatmul.mubr.msk.bf16.vlgmr.msra.gmra.mxu0 %vm207_vm0, %v27_v43  ;;  %7465 = vmatmul.mubr.msk.bf16.vlgmr.msra.gmra.mxu1 %vm207_vm0, %v28_v44  ;;  %v1822_v43 = vsel %vm207_vm0, %v114_v39, 0  ;;  %v115_v44 = vld [vmem:[%s10544_s1 + $0x48] sm:$0x3]  ;;  %v65_v39 = vld [vmem:[%s10545_s0 + $0x64] sm:$0x3] }
  0x3b   :  { %7469 = vmatpush3.bf16.xpose.msra.mxu0 %v856_v45  ;;  %7475 = vmatpush3.bf16.xpose.msra.mxu1 %v902_v46  ;;  %v116_v45 = vld [vmem:[%s10544_s1 + $0x4a] sm:$0x3]  ;;  %v49_v46 = vld [vmem:[%s10545_s0 + $0x44] sm:$0x3]  ;;  %v1868_v48 = vsel %vm207_vm0, %v115_v44, 0 }
  0x3c   :  { %7470 = vmatprep.mubr.msk.bf16.mxu0 %vm8411_vm1, %v10548_v0  ;;  %7476 = vmatprep.mubr.msk.bf16.mxu1 %vm8411_vm1, %v10548_v0 }
  0x3d   :  { %7480 = vmatprep.subr.bf16.mxu0 %v10548_v0  ;;  %7486 = vmatprep.subr.bf16.mxu1 %v10548_v0 }
  0x42   :  { %7471 = vmatmul.mubr.msk.bf16.vlgmr.msra.gmra.mxu0 %vm207_vm0, %v29_v49  ;;  %7477 = vmatmul.mubr.msk.bf16.vlgmr.msra.gmra.mxu1 %vm207_vm0, %v30_v50  ;;  %v1914_v49 = vsel %vm207_vm0, %v116_v45, 0  ;;  %v117_v50 = vld [vmem:[%s10544_s1 + $0x4c] sm:$0x3] }
  0x43   :  { %7481 = vmatpush3.bf16.xpose.msra.mxu0 %v948_v51  ;;  %7487 = vmatpush3.bf16.xpose.msra.mxu1 %v994_v52  ;;  %v118_v51 = vld [vmem:[%s10544_s1 + $0x4e] sm:$0x3]  ;;  %v51_v52 = vld [vmem:[%s10545_s0 + $0x48] sm:$0x3]  ;;  %v1960_v54 = vsel %vm207_vm0, %v117_v50, 0 }
  0x44   :  { %7482 = vmatprep.mubr.msk.bf16.mxu0 %vm8411_vm1, %v10548_v0  ;;  %7488 = vmatprep.mubr.msk.bf16.mxu1 %vm8411_vm1, %v10548_v0 }
  0x45   :  { %7492 = vmatprep.subr.bf16.mxu0 %v10548_v0  ;;  %7498 = vmatprep.subr.bf16.mxu1 %v10548_v0 }
  0x4a   :  { %7483 = vmatmul.mubr.msk.bf16.vlgmr.msra.gmra.mxu0 %vm207_vm0, %v31_v55  ;;  %7489 = vmatmul.mubr.msk.bf16.vlgmr.msra.gmra.mxu1 %vm207_vm0, %v32_v56  ;;  %v2006_v55 = vsel %vm207_vm0, %v118_v51, 0  ;;  %v119_v56 = vld [vmem:[%s10544_s1 + $0x50] sm:$0x3] }
  0x4b   :  { %7493 = vmatpush3.bf16.xpose.msra.mxu0 %v1040_v57  ;;  %7499 = vmatpush3.bf16.xpose.msra.mxu1 %v1086_v58  ;;  %v120_v57 = vld [vmem:[%s10544_s1 + $0x52] sm:$0x3]  ;;  %v53_v58 = vld [vmem:[%s10545_s0 + $0x4c] sm:$0x3]  ;;  %v2052_v60 = vsel %vm207_vm0, %v119_v56, 0 }
  0x4c   :  { %7494 = vmatprep.mubr.msk.bf16.mxu0 %vm8411_vm1, %v10548_v0  ;;  %7500 = vmatprep.mubr.msk.bf16.mxu1 %vm8411_vm1, %v10548_v0  ;;  %v68_v56 = vld [vmem:[%s10545_s0 + $0x6a] sm:$0x3] }
  0x4d   :  { %7504 = vmatprep.subr.bf16.mxu0 %v10548_v0  ;;  %7510 = vmatprep.subr.bf16.mxu1 %v10548_v0 }
  0x52   :  { %7495 = vmatmul.mubr.msk.bf16.vlgmr.msra.gmra.mxu0 %vm207_vm0, %v33_v61  ;;  %7501 = vmatmul.mubr.msk.bf16.vlgmr.msra.gmra.mxu1 %vm207_vm0, %v34_v62  ;;  %v2098_v61 = vsel %vm207_vm0, %v120_v57, 0  ;;  %v121_v62 = vld [vmem:[%s10544_s1 + $0x54] sm:$0x3]  ;;  %v133_v57 = vld [vmem:[%s10544_s1 + $0x6c] sm:$0x3] }
  0x53   :  { %7505 = vmatpush3.bf16.xpose.msra.mxu0 %v1132_v63  ;;  %7511 = vmatpush3.bf16.xpose.msra.mxu1 %v1178_v1  ;;  %v122_v63 = vld [vmem:[%s10544_s1 + $0x56] sm:$0x3]  ;;  %v55_v1 = vld [vmem:[%s10545_s0 + $0x50] sm:$0x3]  ;;  %v2144_v3 = vsel %vm207_vm0, %v121_v62, 0 }
  0x54   :  { %7506 = vmatprep.mubr.msk.bf16.mxu0 %vm8411_vm1, %v10548_v0  ;;  %7512 = vmatprep.mubr.msk.bf16.mxu1 %vm8411_vm1, %v10548_v0 }
  0x55   :  { %7516 = vmatprep.subr.bf16.mxu0 %v10548_v0  ;;  %7522 = vmatprep.subr.bf16.mxu1 %v10548_v0 }
  0x5a   :  { %7507 = vmatmul.mubr.msk.bf16.vlgmr.msra.gmra.mxu0 %vm207_vm0, %v35_v4  ;;  %7513 = vmatmul.mubr.msk.bf16.vlgmr.msra.gmra.mxu1 %vm207_vm0, %v36_v5  ;;  %v2190_v4 = vsel %vm207_vm0, %v122_v63, 0  ;;  %v123_v5 = vld [vmem:[%s10544_s1 + $0x58] sm:$0x3] }
  0x5b   :  { %7517 = vmatpush3.bf16.xpose.msra.mxu0 %v1224_v6  ;;  %7523 = vmatpush3.bf16.xpose.msra.mxu1 %v1270_v7  ;;  %v124_v6 = vld [vmem:[%s10544_s1 + $0x5a] sm:$0x3]  ;;  %v57_v7 = vld [vmem:[%s10545_s0 + $0x54] sm:$0x3]  ;;  %v2236_v9 = vsel %vm207_vm0, %v123_v5, 0 }
  0x5c   :  { %7518 = vmatprep.mubr.msk.bf16.mxu0 %vm8411_vm1, %v10548_v0  ;;  %7524 = vmatprep.mubr.msk.bf16.mxu1 %vm8411_vm1, %v10548_v0 }
  0x5d   :  { %7528 = vmatprep.subr.bf16.mxu0 %v10548_v0  ;;  %7534 = vmatprep.subr.bf16.mxu1 %v10548_v0 }
  0x62   :  { %7519 = vmatmul.mubr.msk.bf16.vlgmr.msra.gmra.mxu0 %vm207_vm0, %v37_v10  ;;  %7525 = vmatmul.mubr.msk.bf16.vlgmr.msra.gmra.mxu1 %vm207_vm0, %v38_v11  ;;  %v2282_v10 = vsel %vm207_vm0, %v124_v6, 0  ;;  %v125_v11 = vld [vmem:[%s10544_s1 + $0x5c] sm:$0x3] }
  0x63   :  { %7529 = vmatpush3.bf16.xpose.msra.mxu0 %v1316_v12  ;;  %7535 = vmatpush3.bf16.xpose.msra.mxu1 %v1362_v13  ;;  %v126_v12 = vld [vmem:[%s10544_s1 + $0x5e] sm:$0x3]  ;;  %v59_v13 = vld [vmem:[%s10545_s0 + $0x58] sm:$0x3]  ;;  %v2328_v15 = vsel %vm207_vm0, %v125_v11, 0 }
  0x64   :  { %7530 = vmatprep.mubr.msk.bf16.mxu0 %vm8411_vm1, %v10548_v0  ;;  %7536 = vmatprep.mubr.msk.bf16.mxu1 %vm8411_vm1, %v10548_v0 }
  0x65   :  { %7540 = vmatprep.subr.bf16.mxu0 %v10548_v0  ;;  %7546 = vmatprep.subr.bf16.mxu1 %v10548_v0 }
  0x6a   :  { %7531 = vmatmul.mubr.msk.bf16.vlgmr.msra.gmra.mxu0 %vm207_vm0, %v39_v16  ;;  %7537 = vmatmul.mubr.msk.bf16.vlgmr.msra.gmra.mxu1 %vm207_vm0, %v40_v17  ;;  %v2374_v16 = vsel %vm207_vm0, %v126_v12, 0  ;;  %v127_v17 = vld [vmem:[%s10544_s1 + $0x60] sm:$0x3]  ;;  %v70_v12 = vld [vmem:[%s10545_s0 + $0x6e] sm:$0x3] }
  0x6b   :  { %7541 = vmatpush3.bf16.xpose.msra.mxu0 %v1408_v18  ;;  %7547 = vmatpush3.bf16.xpose.msra.mxu1 %v1454_v19  ;;  %v128_v18 = vld [vmem:[%s10544_s1 + $0x62] sm:$0x3]  ;;  %v61_v19 = vld [vmem:[%s10545_s0 + $0x5c] sm:$0x3]  ;;  %v2420_v21 = vsel %vm207_vm0, %v127_v17, 0 }
  0x6c   :  { %7542 = vmatprep.mubr.msk.bf16.mxu0 %vm8411_vm1, %v10548_v0  ;;  %7548 = vmatprep.mubr.msk.bf16.mxu1 %vm8411_vm1, %v10548_v0 }
  0x6d   :  { %7552 = vmatprep.subr.bf16.mxu0 %v10548_v0  ;;  %7558 = vmatprep.subr.bf16.mxu1 %v10548_v0 }
  0x72   :  { %7543 = vmatmul.mubr.msk.bf16.vlgmr.msra.gmra.mxu0 %vm207_vm0, %v41_v22  ;;  %7549 = vmatmul.mubr.msk.bf16.vlgmr.msra.gmra.mxu1 %vm207_vm0, %v42_v23  ;;  %v2466_v22 = vsel %vm207_vm0, %v128_v18, 0  ;;  %v129_v23 = vld [vmem:[%s10544_s1 + $0x64] sm:$0x3] }
  0x73   :  { %7553 = vmatpush3.bf16.xpose.msra.mxu0 %v1500_v24  ;;  %7559 = vmatpush3.bf16.xpose.msra.mxu1 %v1546_v25  ;;  %v130_v24 = vld [vmem:[%s10544_s1 + $0x66] sm:$0x3]  ;;  %v63_v25 = vld [vmem:[%s10545_s0 + $0x60] sm:$0x3]  ;;  %v2512_v27 = vsel %vm207_vm0, %v129_v23, 0 }
  0x74   :  { %7554 = vmatprep.mubr.msk.bf16.mxu0 %vm8411_vm1, %v10548_v0  ;;  %7560 = vmatprep.mubr.msk.bf16.mxu1 %vm8411_vm1, %v10548_v0 }
  0x75   :  { %7564 = vmatprep.subr.bf16.mxu0 %v10548_v0  ;;  %7570 = vmatprep.subr.bf16.mxu1 %v10548_v0 }
  0x7a   :  { %7555 = vmatmul.mubr.msk.bf16.vlgmr.msra.gmra.mxu0 %vm207_vm0, %v43_v28  ;;  %7561 = vmatmul.mubr.msk.bf16.vlgmr.msra.gmra.mxu1 %vm207_vm0, %v44_v29  ;;  %v2558_v28 = vsel %vm207_vm0, %v130_v24, 0 }
  0x7b   :  { %7565 = vmatpush3.bf16.xpose.msra.mxu0 %v1592_v30  ;;  %7571 = vmatpush3.bf16.xpose.msra.mxu1 %v1638_v31 }
  0x7c   :  { %7566 = vmatprep.mubr.msk.bf16.mxu0 %vm8411_vm1, %v10548_v0  ;;  %7572 = vmatprep.mubr.msk.bf16.mxu1 %vm8411_vm1, %v10548_v0 }
  0x7d   :  { %7576 = vmatprep.subr.bf16.mxu0 %v10548_v0  ;;  %7582 = vmatprep.subr.bf16.mxu1 %v10548_v0 }
  0x82   :  { %7567 = vmatmul.mubr.msk.bf16.vlgmr.msra.gmra.mxu0 %vm207_vm0, %v45_v34  ;;  %7573 = vmatmul.mubr.msk.bf16.vlgmr.msra.gmra.mxu1 %vm207_vm0, %v46_v35  ;;  %v131_v35 = vld [vmem:[%s10544_s1 + $0x68] sm:$0x3] }
  0x83   :  { %7577 = vmatpush3.bf16.xpose.msra.mxu0 %v1684_v36  ;;  %7583 = vmatpush3.bf16.xpose.msra.mxu1 %v1730_v37  ;;  %v132_v36 = vld [vmem:[%s10544_s1 + $0x6a] sm:$0x3] }
  0x84   :  { %7578 = vmatprep.mubr.msk.bf16.mxu0 %vm8411_vm1, %v10548_v0  ;;  %7584 = vmatprep.mubr.msk.bf16.mxu1 %vm8411_vm1, %v10548_v0  ;;  %v2650_v44 = vsel %vm207_vm0, %v132_v36, 0 }
  0x85   :  { %7588 = vmatprep.subr.bf16.mxu0 %v10548_v0  ;;  %7594 = vmatprep.subr.bf16.mxu1 %v10548_v0 }
  0x8a   :  { %7579 = vmatmul.mubr.msk.bf16.vlgmr.msra.gmra.mxu0 %vm207_vm0, %v47_v40  ;;  %7585 = vmatmul.mubr.msk.bf16.vlgmr.msra.gmra.mxu1 %vm207_vm0, %v48_v41  ;;  %v66_v40 = vld [vmem:[%s10545_s0 + $0x66] sm:$0x3] }
  0x8b   :  { %7589 = vmatpush3.bf16.xpose.msra.mxu0 %v1776_v42  ;;  %7595 = vmatpush3.bf16.xpose.msra.mxu1 %v1822_v43  ;;  %v2604_v43 = vsel %vm207_vm0, %v131_v35, 0 }
  0x8c   :  { %7590 = vmatprep.mubr.msk.bf16.mxu0 %vm8411_vm1, %v10548_v0  ;;  %7596 = vmatprep.mubr.msk.bf16.mxu1 %vm8411_vm1, %v10548_v0 }
  0x8d   :  { %7600 = vmatprep.subr.bf16.mxu0 %v10548_v0  ;;  %7606 = vmatprep.subr.bf16.mxu1 %v10548_v0 }
  0x92   :  { %7591 = vmatmul.mubr.msk.bf16.vlgmr.msra.gmra.mxu0 %vm207_vm0, %v49_v46  ;;  %7597 = vmatmul.mubr.msk.bf16.vlgmr.msra.gmra.mxu1 %vm207_vm0, %v50_v47 }
  0x93   :  { %7601 = vmatpush3.bf16.xpose.msra.mxu0 %v1868_v48  ;;  %7607 = vmatpush3.bf16.xpose.msra.mxu1 %v1914_v49 }
  0x94   :  { %7602 = vmatprep.mubr.msk.bf16.mxu0 %vm8411_vm1, %v10548_v0  ;;  %7608 = vmatprep.mubr.msk.bf16.mxu1 %vm8411_vm1, %v10548_v0 }
  0x95   :  { %7612 = vmatprep.subr.bf16.mxu0 %v10548_v0  ;;  %7618 = vmatprep.subr.bf16.mxu1 %v10548_v0 }
  0x9a   :  { %7603 = vmatmul.mubr.msk.bf16.vlgmr.msra.gmra.mxu0 %vm207_vm0, %v51_v52  ;;  %7609 = vmatmul.mubr.msk.bf16.vlgmr.msra.gmra.mxu1 %vm207_vm0, %v52_v53 }
  0x9b   :  { %7613 = vmatpush3.bf16.xpose.msra.mxu0 %v1960_v54  ;;  %7619 = vmatpush3.bf16.xpose.msra.mxu1 %v2006_v55  ;;  %v67_v55 = vld [vmem:[%s10545_s0 + $0x68] sm:$0x3] }
  0x9c   :  { %7614 = vmatprep.mubr.msk.bf16.mxu0 %vm8411_vm1, %v10548_v0  ;;  %7620 = vmatprep.mubr.msk.bf16.mxu1 %vm8411_vm1, %v10548_v0 }
  0x9d   :  { %7624 = vmatprep.subr.bf16.mxu0 %v10548_v0  ;;  %7630 = vmatprep.subr.bf16.mxu1 %v10548_v0 }
  0xa2   :  { %7615 = vmatmul.mubr.msk.bf16.vlgmr.msra.gmra.mxu0 %vm207_vm0, %v53_v58  ;;  %7621 = vmatmul.mubr.msk.bf16.vlgmr.msra.gmra.mxu1 %vm207_vm0, %v54_v59 }
  0xa3   :  { %7625 = vmatpush3.bf16.xpose.msra.mxu0 %v2052_v60  ;;  %7631 = vmatpush3.bf16.xpose.msra.mxu1 %v2098_v61  ;;  %v2696_v60 = vsel %vm207_vm0, %v133_v57, 0  ;;  %v134_v61 = vld [vmem:[%s10544_s1 + $0x6e] sm:$0x3] }
  0xa4   :  { %7626 = vmatprep.mubr.msk.bf16.mxu0 %vm8411_vm1, %v10548_v0  ;;  %7636 = vmatprep.subr.bf16.mxu0 %v10548_v0 }
  0xa5   :  { %7632 = vmatprep.mubr.msk.bf16.mxu1 %vm8411_vm1, %v10548_v0  ;;  %7642 = vmatprep.subr.bf16.mxu1 %v10548_v0 }
  0xaa   :  { %7627 = vmatmul.mubr.msk.bf16.vlgmr.msra.gmra.mxu0 %vm207_vm0, %v55_v1  ;;  %7633 = vmatmul.mubr.msk.bf16.vlgmr.msra.gmra.mxu1 %vm207_vm0, %v56_v2  ;;  %v2742_v1 = vsel %vm207_vm0, %v134_v61, 0 }
  0xab   :  { %7637 = vmatpush3.bf16.xpose.msra.mxu0 %v2144_v3  ;;  %7643 = vmatpush3.bf16.xpose.msra.mxu1 %v2190_v4 }
  0xac   :  { %7638 = vmatprep.mubr.msk.bf16.mxu0 %vm8411_vm1, %v10548_v0  ;;  %7648 = vmatprep.subr.bf16.mxu0 %v10548_v0 }
  0xad   :  { %7644 = vmatprep.mubr.msk.bf16.mxu1 %vm8411_vm1, %v10548_v0  ;;  %7654 = vmatprep.subr.bf16.mxu1 %v10548_v0 }
  0xb2   :  { %7639 = vmatmul.mubr.msk.bf16.vlgmr.msra.gmra.mxu0 %vm207_vm0, %v57_v7  ;;  %7645 = vmatmul.mubr.msk.bf16.vlgmr.msra.gmra.mxu1 %vm207_vm0, %v58_v8  ;;  %v69_v8 = vld [vmem:[%s10545_s0 + $0x6c] sm:$0x3] }
  0xb3   :  { %7649 = vmatpush3.bf16.xpose.msra.mxu0 %v2236_v9  ;;  %7655 = vmatpush3.bf16.xpose.msra.mxu1 %v2282_v10  ;;  %v135_v9 = vld [vmem:[%s10544_s1 + $0x70] sm:$0x3] }
  0xb4   :  { %7650 = vmatprep.mubr.msk.bf16.mxu0 %vm8411_vm1, %v10548_v0  ;;  %7660 = vmatprep.subr.bf16.mxu0 %v10548_v0 }
  0xb5   :  { %7656 = vmatprep.mubr.msk.bf16.mxu1 %vm8411_vm1, %v10548_v0  ;;  %7666 = vmatprep.subr.bf16.mxu1 %v10548_v0 }
  0xba   :  { %7651 = vmatmul.mubr.msk.bf16.vlgmr.msra.gmra.mxu0 %vm207_vm0, %v59_v13  ;;  %7657 = vmatmul.mubr.msk.bf16.vlgmr.msra.gmra.mxu1 %vm207_vm0, %v60_v14  ;;  %v2788_v13 = vsel %vm207_vm0, %v135_v9, 0  ;;  %v136_v14 = vld [vmem:[%s10544_s1 + $0x72] sm:$0x3] }
  0xbb   :  { %7661 = vmatpush3.bf16.xpose.msra.mxu0 %v2328_v15  ;;  %7667 = vmatpush3.bf16.xpose.msra.mxu1 %v2374_v16  ;;  %v2834_v17 = vsel %vm207_vm0, %v136_v14, 0 }
  0xbc   :  { %7662 = vmatprep.mubr.msk.bf16.mxu0 %vm8411_vm1, %v10548_v0  ;;  %7668 = vmatprep.mubr.msk.bf16.mxu1 %vm8411_vm1, %v10548_v0 }
  0xbd   :  { %7672 = vmatprep.subr.bf16.mxu0 %v10548_v0  ;;  %7678 = vmatprep.subr.bf16.mxu1 %v10548_v0 }
  0xc2   :  { %7663 = vmatmul.mubr.msk.bf16.vlgmr.msra.gmra.mxu0 %vm207_vm0, %v61_v19  ;;  %7669 = vmatmul.mubr.msk.bf16.vlgmr.msra.gmra.mxu1 %vm207_vm0, %v62_v20 }
  0xc3   :  { %7673 = vmatpush3.bf16.xpose.msra.mxu0 %v2420_v21  ;;  %7679 = vmatpush3.bf16.xpose.msra.mxu1 %v2466_v22 }
  0xc4   :  { %7674 = vmatprep.mubr.msk.bf16.mxu0 %vm8411_vm1, %v10548_v0  ;;  %7680 = vmatprep.mubr.msk.bf16.mxu1 %vm8411_vm1, %v10548_v0 }
  0xc5   :  { %7684 = vmatprep.subr.bf16.mxu0 %v10548_v0  ;;  %7690 = vmatprep.subr.bf16.mxu1 %v10548_v0 }
  0xca   :  { %v8990_v29 = vpop.f32.mrf.mxu0  ;;  %v8992_v30 = vpop.f32.mrf.mxu1  ;;  %7675 = vmatmul.mubr.msk.bf16.vlgmr.msra.gmra.mxu0 %vm207_vm0, %v63_v25  ;;  %7681 = vmatmul.mubr.msk.bf16.vlgmr.msra.gmra.mxu1 %vm207_vm0, %v64_v26  ;;  %v71_v26 = vld [vmem:[%s10545_s0 + $0x70] sm:$0x3] }
  0xcb   :  { %v3153_v31 = vsel %vm3152_vm2, %v8990_v29, -inf  ;;  %7685 = vmatpush3.bf16.xpose.msra.mxu0 %v2512_v27  ;;  %7691 = vmatpush3.bf16.xpose.msra.mxu1 %v2558_v28  ;;  %v3156_v34 = vsel %vm3152_vm2, %v8992_v30, -inf  ;;  %v72_v27 = vld [vmem:[%s10545_s0 + $0x72] sm:$0x3]  ;;  %v137_v28 = vld [vmem:[%s10544_s1 + $0x74] sm:$0x3] }
  0xcc   :  { %v7394_v32 = vpop.f32.mrf.mxu1  ;;  %3154 = vmax.xlane.f32.xlu0 %v3153_v31  ;;  %v7388_v33 = vpop.f32.mrf.mxu0  ;;  %7686 = vmatprep.mubr.msk.bf16.mxu0 %vm8411_vm1, %v10548_v0 }
  0xcd   :  { %7692 = vmatprep.mubr.msk.bf16.mxu1 %vm8411_vm1, %v10548_v0  ;;  %7696 = vmatprep.subr.bf16.mxu0 %v10548_v0  ;;  %v2880_v33 = vsel %vm207_vm0, %v137_v28, 0 }
  0xce   :  { %v251_v37 = vpop.f32.mrf.mxu0  ;;  %v297_v38 = vpop.f32.mrf.mxu1  ;;  %7702 = vmatprep.subr.bf16.mxu1 %v10548_v0 }
  0xd0   :  { %v7395_v41 = vpop.f32.mrf.mxu1  ;;  %3157 = vmax.xlane.f32.xlu0 %v3156_v34  ;;  %v7389_v42 = vpop.f32.mrf.mxu0  ;;  %v138_v34 = vld [vmem:[%s10544_s1 + $0x76] sm:$0x3] }
  0xd1   :  { %v2926_v37 = vsel %vm207_vm0, %v138_v34, 0 }
  0xd2   :  { %v9020_v45 = vpop.f32.mrf.mxu0  ;;  %v9022_v46 = vpop.f32.mrf.mxu1  ;;  %7687 = vmatmul.mubr.msk.bf16.vlgmr.msra.gmra.mxu0 %vm207_vm0, %v65_v39  ;;  %7693 = vmatmul.mubr.msk.bf16.vlgmr.msra.gmra.mxu1 %vm207_vm0, %v66_v40 }
  0xd3   :  { %v3159_v47 = vsel %vm3152_vm2, %v9020_v45, -inf  ;;  %7697 = vmatpush3.bf16.xpose.msra.mxu0 %v2604_v43  ;;  %7703 = vmatpush3.bf16.xpose.msra.mxu1 %v2650_v44  ;;  %v3162_v50 = vsel %vm3152_vm2, %v9022_v46, -inf  ;;  %v73_v44 = vld [vmem:[%s10545_s0 + $0x74] sm:$0x3] }
  0xd4   :  { %v7406_v48 = vpop.f32.mrf.mxu1  ;;  %3160 = vmax.xlane.f32.xlu1 %v3159_v47  ;;  %v7400_v49 = vpop.f32.mrf.mxu0  ;;  %7698 = vmatprep.mubr.msk.bf16.mxu0 %vm8411_vm1, %v10548_v0  ;;  %v74_v47 = vld [vmem:[%s10545_s0 + $0x76] sm:$0x3] }
  0xd5   :  { %7704 = vmatprep.mubr.msk.bf16.mxu1 %vm8411_vm1, %v10548_v0  ;;  %7708 = vmatprep.subr.bf16.mxu0 %v10548_v0  ;;  %v139_v48 = vld [vmem:[%s10544_s1 + $0x78] sm:$0x3] }
  0xd6   :  { %v343_v51 = vpop.f32.mrf.mxu0  ;;  %v389_v52 = vpop.f32.mrf.mxu1  ;;  %7714 = vmatprep.subr.bf16.mxu1 %v10548_v0 }
  0xd7   :  { %v2972_v51 = vsel %vm207_vm0, %v139_v48, 0  ;;  %v140_v52 = vld [vmem:[%s10544_s1 + $0x7a] sm:$0x3] }
  0xd8   :  { %v7407_v53 = vpop.f32.mrf.mxu1  ;;  %3163 = vmax.xlane.f32.xlu1 %v3162_v50  ;;  %v7401_v54 = vpop.f32.mrf.mxu0 }
  0xda   :  { %v9045_v58 = vpop.f32.mrf.mxu0  ;;  %v9047_v59 = vpop.f32.mrf.mxu1  ;;  %7699 = vmatmul.mubr.msk.bf16.vlgmr.msra.gmra.mxu0 %vm207_vm0, %v67_v55  ;;  %7705 = vmatmul.mubr.msk.bf16.vlgmr.msra.gmra.mxu1 %vm207_vm0, %v68_v56  ;;  %v3018_v55 = vsel %vm207_vm0, %v140_v52, 0 }
  0xdb   :  { %v3168_v62 = vsel %vm3152_vm2, %v9047_v59, -inf  ;;  %v3165_v63 = vsel %vm3152_vm2, %v9045_v58, -inf  ;;  %7709 = vmatpush3.bf16.xpose.msra.mxu0 %v2696_v60  ;;  %7710 = vmatprep.mubr.msk.bf16.mxu0 %vm8411_vm1, %v10548_v0 }
  0xdc   :  { %v7418_v2 = vpop.f32.mrf.mxu1  ;;  %3169 = vmax.xlane.f32.xlu1 %v3168_v62  ;;  %3166 = vmax.xlane.f32.xlu0 %v3165_v63  ;;  %v7412_v3 = vpop.f32.mrf.mxu0 }
  0xdd   :  { %7715 = vmatpush3.bf16.xpose.msra.mxu1 %v2742_v1  ;;  %7716 = vmatprep.mubr.msk.bf16.mxu1 %vm8411_vm1, %v10548_v0  ;;  %v75_v1 = vld [vmem:[%s10545_s0 + $0x78] sm:$0x3]  ;;  %v76_v2 = vld [vmem:[%s10545_s0 + $0x7a] sm:$0x3]  ;;  %v141_v3 = vld [vmem:[%s10544_s1 + $0x7c] sm:$0x3] }
  0xde   :  { %v435_v4 = vpop.f32.mrf.mxu0  ;;  %v481_v5 = vpop.f32.mrf.mxu1  ;;  %7720 = vmatprep.subr.bf16.mxu0 %v10548_v0  ;;  %7726 = vmatprep.subr.bf16.mxu1 %v10548_v0 }
  0xe0   :  { %v7413_v6 = vpop.f32.mrf.mxu0  ;;  %v7419_v7 = vpop.f32.mrf.mxu1 }
  0xe1   :  { %v3064_v6 = vsel %vm207_vm0, %v141_v3, 0  ;;  %v142_v7 = vld [vmem:[%s10544_s1 + $0x7e] sm:$0x3] }
  0xe2   :  { %v9072_v10 = vpop.f32.mrf.mxu0  ;;  %v9074_v11 = vpop.f32.mrf.mxu1  ;;  %7711 = vmatmul.mubr.msk.bf16.vlgmr.msra.gmra.mxu0 %vm207_vm0, %v69_v8 }
  0xe3   :  { %v3174_v15 = vsel %vm3152_vm2, %v9074_v11, -inf  ;;  %v3171_v16 = vsel %vm3152_vm2, %v9072_v10, -inf  ;;  %7721 = vmatpush3.bf16.xpose.msra.mxu0 %v2788_v13  ;;  %7722 = vmatprep.mubr.msk.bf16.mxu0 %vm8411_vm1, %v10548_v0 }
  0xe4   :  { %v7430_v18 = vpop.f32.mrf.mxu1  ;;  %3175 = vmax.xlane.f32.xlu1 %v3174_v15  ;;  %3172 = vmax.xlane.f32.xlu0 %v3171_v16  ;;  %v7424_v19 = vpop.f32.mrf.mxu0 }
  0xe5   :  { %7717 = vmatmul.mubr.msk.bf16.vlgmr.msra.gmra.mxu1 %vm207_vm0, %v70_v12  ;;  %7732 = vmatprep.subr.bf16.mxu0 %v10548_v0  ;;  %v3110_v12 = vsel %vm207_vm0, %v142_v7, 0  ;;  %v77_v19 = vld [vmem:[%s10545_s0 + $0x7c] sm:$0x3] }
  0xe6   :  { %v527_v20 = vpop.f32.mrf.mxu0  ;;  %v573_v21 = vpop.f32.mrf.mxu1  ;;  %7727 = vmatpush3.bf16.xpose.msra.mxu1 %v2834_v17  ;;  %7728 = vmatprep.mubr.msk.bf16.mxu1 %vm8411_vm1, %v10548_v0 }
  0xe7   :  { %7738 = vmatprep.subr.bf16.mxu1 %v10548_v0  ;;  %v78_v20 = vld [vmem:[%s10545_s0 + $0x7e] sm:$0x3] }
  0xe8   :  { %v7425_v22 = vpop.f32.mrf.mxu0  ;;  %v7431_v23 = vpop.f32.mrf.mxu1 }
  0xea   :  { %v9096_v24 = vpop.f32.mrf.mxu0  ;;  %v9098_v25 = vpop.f32.mrf.mxu1  ;;  %7723 = vmatmul.mubr.msk.bf16.vlgmr.msra.gmra.mxu0 %vm207_vm0, %v71_v26 }
  0xeb   :  { %v3180_v31 = vsel %vm3152_vm2, %v9098_v25, -inf  ;;  %v3177_v32 = vsel %vm3152_vm2, %v9096_v24, -inf  ;;  %7733 = vmatpush3.bf16.xpose.msra.mxu0 %v2880_v33  ;;  %7734 = vmatprep.mubr.msk.bf16.mxu0 %vm8411_vm1, %v10548_v0 }
  0xec   :  { %v7442_v35 = vpop.f32.mrf.mxu1  ;;  %3181 = vmax.xlane.f32.xlu1 %v3180_v31  ;;  %3178 = vmax.xlane.f32.xlu0 %v3177_v32  ;;  %v7436_v36 = vpop.f32.mrf.mxu0 }
  0xed   :  { %7729 = vmatmul.mubr.msk.bf16.vlgmr.msra.gmra.mxu1 %vm207_vm0, %v72_v27  ;;  %7744 = vmatprep.subr.bf16.mxu0 %v10548_v0 }
  0xee   :  { %v619_v38 = vpop.f32.mrf.mxu0  ;;  %v665_v39 = vpop.f32.mrf.mxu1  ;;  %7739 = vmatpush3.bf16.xpose.msra.mxu1 %v2926_v37  ;;  %7740 = vmatprep.mubr.msk.bf16.mxu1 %vm8411_vm1, %v10548_v0 }
  0xef   :  { %7750 = vmatprep.subr.bf16.mxu1 %v10548_v0 }
  0xf0   :  { %v7437_v40 = vpop.f32.mrf.mxu0  ;;  %v7443_v41 = vpop.f32.mrf.mxu1 }
  0xf2   :  { %v9126_v42 = vpop.f32.mrf.mxu0  ;;  %v9128_v43 = vpop.f32.mrf.mxu1  ;;  %7735 = vmatmul.mubr.msk.bf16.vlgmr.msra.gmra.mxu0 %vm207_vm0, %v73_v44 }
  0xf3   :  { %v3186_v49 = vsel %vm3152_vm2, %v9128_v43, -inf  ;;  %v3183_v50 = vsel %vm3152_vm2, %v9126_v42, -inf  ;;  %7745 = vmatpush3.bf16.xpose.msra.mxu0 %v2972_v51  ;;  %7746 = vmatprep.mubr.msk.bf16.mxu0 %vm8411_vm1, %v10548_v0 }
  0xf4   :  { %v7454_v53 = vpop.f32.mrf.mxu1  ;;  %3187 = vmax.xlane.f32.xlu1 %v3186_v49  ;;  %3184 = vmax.xlane.f32.xlu0 %v3183_v50  ;;  %v7448_v54 = vpop.f32.mrf.mxu0 }
  0xf5   :  { %7741 = vmatmul.mubr.msk.bf16.vlgmr.msra.gmra.mxu1 %vm207_vm0, %v74_v47  ;;  %7756 = vmatprep.subr.bf16.mxu0 %v10548_v0 }
  0xf6   :  { %v711_v56 = vpop.f32.mrf.mxu0  ;;  %v757_v57 = vpop.f32.mrf.mxu1  ;;  %7751 = vmatpush3.bf16.xpose.msra.mxu1 %v3018_v55  ;;  %7752 = vmatprep.mubr.msk.bf16.mxu1 %vm8411_vm1, %v10548_v0 }
  0xf7   :  { %7762 = vmatprep.subr.bf16.mxu1 %v10548_v0 }
  0xf8   :  { %v7449_v60 = vpop.f32.mrf.mxu0  ;;  %v7455_v61 = vpop.f32.mrf.mxu1 }
  0xfa   :  { %v9156_v62 = vpop.f32.mrf.mxu0  ;;  %v9158_v63 = vpop.f32.mrf.mxu1  ;;  %7747 = vmatmul.mubr.msk.bf16.vlgmr.msra.gmra.mxu0 %vm207_vm0, %v75_v1 }
  0xfb   :  { %v3192_v4 = vsel %vm3152_vm2, %v9158_v63, -inf  ;;  %v3189_v5 = vsel %vm3152_vm2, %v9156_v62, -inf  ;;  %7757 = vmatpush3.bf16.xpose.msra.mxu0 %v3064_v6  ;;  %7758 = vmatprep.mubr.msk.bf16.mxu0 %vm8411_vm1, %v10548_v0 }
  0xfc   :  { %v7466_v8 = vpop.f32.mrf.mxu1  ;;  %3193 = vmax.xlane.f32.xlu1 %v3192_v4  ;;  %3190 = vmax.xlane.f32.xlu0 %v3189_v5  ;;  %v7460_v9 = vpop.f32.mrf.mxu0 }
  0xfd   :  { %7753 = vmatmul.mubr.msk.bf16.vlgmr.msra.gmra.mxu1 %vm207_vm0, %v76_v2  ;;  %7768 = vmatprep.subr.bf16.mxu0 %v10548_v0 }
  0xfe   :  { %v803_v13 = vpop.f32.mrf.mxu0  ;;  %v849_v14 = vpop.f32.mrf.mxu1  ;;  %7763 = vmatpush3.bf16.xpose.msra.mxu1 %v3110_v12  ;;  %7764 = vmatprep.mubr.msk.bf16.mxu1 %vm8411_vm1, %v10548_v0 }
  0xff   :  { %7774 = vmatprep.subr.bf16.mxu1 %v10548_v0 }
 0x100   :  { %v7461_v15 = vpop.f32.mrf.mxu0  ;;  %v7467_v16 = vpop.f32.mrf.mxu1 }
 0x102   :  { %v9186_v17 = vpop.f32.mrf.mxu0  ;;  %v9188_v18 = vpop.f32.mrf.mxu1  ;;  %7759 = vmatmul.mubr.msk.bf16.vlgmr.msra.gmra.mxu0 %vm207_vm0, %v77_v19 }
 0x103   :  { %v3198_v21 = vsel %vm3152_vm2, %v9188_v18, -inf  ;;  %v3195_v22 = vsel %vm3152_vm2, %v9186_v17, -inf  ;;  %7770 = vmatprep.mubr.msk.bf16.mxu0 %vm8411_vm1, %v10548_v0 }
 0x104   :  { %v7478_v23 = vpop.f32.mrf.mxu1  ;;  %3199 = vmax.xlane.f32.xlu1 %v3198_v21  ;;  %3196 = vmax.xlane.f32.xlu0 %v3195_v22  ;;  %v7472_v26 = vpop.f32.mrf.mxu0 }
 0x105   :  { %7765 = vmatmul.mubr.msk.bf16.vlgmr.msra.gmra.mxu1 %vm207_vm0, %v78_v20 }
 0x106   :  { %v895_v27 = vpop.f32.mrf.mxu0  ;;  %v941_v28 = vpop.f32.mrf.mxu1  ;;  %7776 = vmatprep.mubr.msk.bf16.mxu1 %vm8411_vm1, %v10548_v0 }
 0x108   :  { %v7473_v31 = vpop.f32.mrf.mxu0  ;;  %v7479_v32 = vpop.f32.mrf.mxu1 }
 0x10a   :  { %v9206_v33 = vpop.f32.mrf.mxu0  ;;  %v9208_v34 = vpop.f32.mrf.mxu1 }
 0x10b   :  { %v3204_v35 = vsel %vm3152_vm2, %v9208_v34, -inf  ;;  %v3201_v36 = vsel %vm3152_vm2, %v9206_v33, -inf }
 0x10c   :  { %v7490_v37 = vpop.f32.mrf.mxu1  ;;  %3205 = vmax.xlane.f32.xlu1 %v3204_v35  ;;  %3202 = vmax.xlane.f32.xlu0 %v3201_v36  ;;  %v7484_v38 = vpop.f32.mrf.mxu0 }
 0x10e   :  { %v987_v39 = vpop.f32.mrf.mxu0  ;;  %v1033_v40 = vpop.f32.mrf.mxu1 }
 0x110   :  { %v7485_v41 = vpop.f32.mrf.mxu0  ;;  %v7491_v44 = vpop.f32.mrf.mxu1 }
 0x112   :  { %v9214_v47 = vpop.f32.mrf.mxu0  ;;  %v9216_v48 = vpop.f32.mrf.mxu1 }
 0x113   :  { %v3210_v49 = vsel %vm3152_vm2, %v9216_v48, -inf  ;;  %v3207_v50 = vsel %vm3152_vm2, %v9214_v47, -inf }
 0x114   :  { %v7502_v51 = vpop.f32.mrf.mxu1  ;;  %3211 = vmax.xlane.f32.xlu1 %v3210_v49  ;;  %3208 = vmax.xlane.f32.xlu0 %v3207_v50  ;;  %v7496_v52 = vpop.f32.mrf.mxu0 }
 0x116   :  { %v1079_v53 = vpop.f32.mrf.mxu0  ;;  %v1125_v54 = vpop.f32.mrf.mxu1 }
 0x118   :  { %v7497_v55 = vpop.f32.mrf.mxu0  ;;  %v7503_v56 = vpop.f32.mrf.mxu1 }
 0x11a   :  { %v9222_v57 = vpop.f32.mrf.mxu0  ;;  %v9224_v60 = vpop.f32.mrf.mxu1 }
 0x11b   :  { %v3216_v61 = vsel %vm3152_vm2, %v9224_v60, -inf  ;;  %v3213_v1 = vsel %vm3152_vm2, %v9222_v57, -inf }
 0x11c   :  { %v7514_v2 = vpop.f32.mrf.mxu1  ;;  %3217 = vmax.xlane.f32.xlu1 %v3216_v61  ;;  %3214 = vmax.xlane.f32.xlu0 %v3213_v1  ;;  %v7508_v3 = vpop.f32.mrf.mxu0 }
 0x11e   :  { %v1171_v4 = vpop.f32.mrf.mxu0  ;;  %v1217_v5 = vpop.f32.mrf.mxu1 }
 0x120   :  { %v7509_v6 = vpop.f32.mrf.mxu0  ;;  %v7515_v7 = vpop.f32.mrf.mxu1 }
 0x122   :  { %v9230_v8 = vpop.f32.mrf.mxu0  ;;  %v9232_v9 = vpop.f32.mrf.mxu1 }
 0x123   :  { %v3222_v12 = vsel %vm3152_vm2, %v9232_v9, -inf  ;;  %v3219_v13 = vsel %vm3152_vm2, %v9230_v8, -inf }
 0x124   :  { %3223 = vmax.xlane.f32.xlu1 %v3222_v12  ;;  %3220 = vmax.xlane.f32.xlu0 %v3219_v13  ;;  %v7520_v14 = vpop.f32.mrf.mxu0  ;;  %v7526_v15 = vpop.f32.mrf.mxu1 }
 0x126   :  { %v1263_v16 = vpop.f32.mrf.mxu0  ;;  %v1309_v19 = vpop.f32.mrf.mxu1 }
 0x128   :  { %v7521_v20 = vpop.f32.mrf.mxu0  ;;  %v7527_v21 = vpop.f32.mrf.mxu1 }
 0x12a   :  { %v9238_v22 = vpop.f32.mrf.mxu0  ;;  %v9240_v23 = vpop.f32.mrf.mxu1 }
 0x12c   :  { %v7532_v26 = vpop.f32.mrf.mxu0  ;;  %v7538_v27 = vpop.f32.mrf.mxu1 }
 0x12e   :  { %v1355_v28 = vpop.f32.mrf.mxu0  ;;  %v1401_v31 = vpop.f32.mrf.mxu1 }
 0x130   :  { %v7533_v32 = vpop.f32.mrf.mxu0  ;;  %v7539_v35 = vpop.f32.mrf.mxu1 }
 0x132   :  { %v9242_v36 = vpop.f32.mrf.mxu0  ;;  %v9244_v37 = vpop.f32.mrf.mxu1 }
 0x134   :  { %v7544_v38 = vpop.f32.mrf.mxu0  ;;  %v7550_v39 = vpop.f32.mrf.mxu1 }
 0x136   :  { %v1447_v40 = vpop.f32.mrf.mxu0  ;;  %v1493_v41 = vpop.f32.mrf.mxu1 }
 0x138   :  { %v7545_v44 = vpop.f32.mrf.mxu0  ;;  %v7551_v49 = vpop.f32.mrf.mxu1 }
 0x13a   :  { %v9246_v50 = vpop.f32.mrf.mxu0  ;;  %v9248_v51 = vpop.f32.mrf.mxu1 }
 0x13c   :  { %v7556_v52 = vpop.f32.mrf.mxu0  ;;  %v7562_v53 = vpop.f32.mrf.mxu1 }
 0x13e   :  { %v1539_v54 = vpop.f32.mrf.mxu0  ;;  %v1585_v55 = vpop.f32.mrf.mxu1 }
 0x140   :  { %v7557_v56 = vpop.f32.mrf.mxu0  ;;  %v7563_v61 = vpop.f32.mrf.mxu1 }
 0x142   :  { %v9250_v1 = vpop.f32.mrf.mxu0  ;;  %v9252_v2 = vpop.f32.mrf.mxu1 }
 0x144   :  { %v7568_v3 = vpop.f32.mrf.mxu0  ;;  %v7574_v4 = vpop.f32.mrf.mxu1 }
 0x146   :  { %v1631_v5 = vpop.f32.mrf.mxu0  ;;  %v1677_v6 = vpop.f32.mrf.mxu1 }
 0x148   :  { %v7569_v7 = vpop.f32.mrf.mxu0  ;;  %v7575_v12 = vpop.f32.mrf.mxu1 }
 0x14a   :  { %v9254_v13 = vpop.f32.mrf.mxu0  ;;  %v9256_v14 = vpop.f32.mrf.mxu1 }
 0x14c   :  { %v7580_v15 = vpop.f32.mrf.mxu0  ;;  %v7586_v16 = vpop.f32.mrf.mxu1 }
 0x14e   :  { %v1723_v19 = vpop.f32.mrf.mxu0  ;;  %v1769_v20 = vpop.f32.mrf.mxu1 }
 0x150   :  { %v7581_v21 = vpop.f32.mrf.mxu0  ;;  %v7587_v26 = vpop.f32.mrf.mxu1 }
 0x152   :  { %v9258_v27 = vpop.f32.mrf.mxu0  ;;  %v9260_v28 = vpop.f32.mrf.mxu1 }
 0x154   :  { %v7592_v31 = vpop.f32.mrf.mxu0  ;;  %v7598_v32 = vpop.f32.mrf.mxu1 }
 0x155   :  { %v3155_v35 = vpop.xlane.xlu0 %3154 }
 0x156   :  { %v3345_v38 = vsub.f32 %v8990_v29, %v3155_v35  ;;  %v1815_v39 = vpop.f32.mrf.mxu0  ;;  %v1861_v40 = vpop.f32.mrf.mxu1 }
 0x158   :  { %v3409_v41 = vmul.f32 1.442695, %v3345_v38  ;;  %v7593_v44 = vpop.f32.mrf.mxu0  ;;  %v7599_v49 = vpop.f32.mrf.mxu1 }
 0x159   :  { %v3158_v52 = vpop.xlane.xlu0 %3157 }
 0x15a   :  { %8154 = vpow2.f32 %v3409_v41  ;;  %v3346_v53 = vsub.f32 %v8992_v30, %v3158_v52  ;;  %v9264_v54 = vpop.f32.mrf.mxu0  ;;  %v9266_v55 = vpop.f32.mrf.mxu1 }
 0x15c   :  { %v3411_v56 = vmul.f32 1.442695, %v3346_v53  ;;  %v7604_v61 = vpop.f32.mrf.mxu0  ;;  %v7610_v3 = vpop.f32.mrf.mxu1 }
 0x15d   :  { %v3161_v4 = vpop.xlane.xlu1 %3160 }
 0x15e   :  { %8156 = vpow2.f32 %v3411_v56  ;;  %v3347_v29 = vsub.f32 %v9020_v45, %v3161_v4  ;;  %v1907_v5 = vpop.f32.mrf.mxu0  ;;  %v1953_v6 = vpop.f32.mrf.mxu1  ;;  %v3225_v56 = vsel %vm3152_vm2, %v9238_v22, -inf }
 0x160   :  { %v3413_v7 = vmul.f32 1.442695, %v3347_v29  ;;  %v7605_v12 = vpop.f32.mrf.mxu0  ;;  %v7611_v15 = vpop.f32.mrf.mxu1 }
 0x161   :  { %v3164_v16 = vpop.xlane.xlu1 %3163  ;;  %v3228_v15 = vsel %vm3152_vm2, %v9240_v23, -inf }
 0x162   :  { %8158 = vpow2.f32 %v3413_v7  ;;  %v3348_v30 = vsub.f32 %v9022_v46, %v3164_v16  ;;  %v9270_v19 = vpop.f32.mrf.mxu0  ;;  %v9272_v20 = vpop.f32.mrf.mxu1 }
 0x164   :  { %v3415_v21 = vmul.f32 1.442695, %v3348_v30  ;;  %v7616_v26 = vpop.f32.mrf.mxu0  ;;  %v7622_v31 = vpop.f32.mrf.mxu1 }
 0x165   :  { %v3170_v32 = vpop.xlane.xlu1 %3169  ;;  %v3167_v35 = vpop.xlane.xlu0 %3166 }
 0x166   :  { %8160 = vpow2.f32 %v3415_v21  ;;  %v3350_v45 = vsub.f32 %v9047_v59, %v3170_v32  ;;  %v3349_v38 = vsub.f32 %v9045_v58, %v3167_v35  ;;  %v1999_v39 = vpop.f32.mrf.mxu0  ;;  %v2045_v40 = vpop.f32.mrf.mxu1 }
 0x167   :  { %v9276_v41 = vpop.eup %8154 }
 0x168   :  { %v3419_v44 = vmul.f32 1.442695, %v3350_v45  ;;  %v3417_v46 = vmul.f32 1.442695, %v3349_v38  ;;  %v3537_v49 = vsel %vm3152_vm2, %v9276_v41, 0.0  ;;  %v7617_v52 = vpop.f32.mrf.mxu0  ;;  %v7623_v53 = vpop.f32.mrf.mxu1 }
 0x169   :  { %3538 = vadd.xlane.f32.xlu0 %v3537_v49 }
 0x16a   :  { %v9282_v61 = vpop.f32.mrf.mxu0  ;;  %v9284_v59 = vpop.f32.mrf.mxu1  ;;  %8162 = vpow2.f32 %v3417_v46 }
 0x16b   :  { %v9286_v58 = vpop.eup %8156  ;;  %8164 = vpow2.f32 %v3419_v44 }
 0x16c   :  { %v3540_v3 = vsel %vm3152_vm2, %v9286_v58, 0.0  ;;  %v7628_v4 = vpop.f32.mrf.mxu0  ;;  %v7634_v29 = vpop.f32.mrf.mxu1 }
 0x16d   :  { %3541 = vadd.xlane.f32.xlu1 %v3540_v3  ;;  %v3176_v5 = vpop.xlane.xlu1 %3175  ;;  %v3173_v6 = vpop.xlane.xlu0 %3172  ;;  %3226 = vmax.xlane.f32.xlu0 %v3225_v56  ;;  %v3234_v3 = vsel %vm3152_vm2, %v9244_v37, -inf }
 0x16e   :  { %v3352_v7 = vsub.f32 %v9074_v11, %v3176_v5  ;;  %v3351_v12 = vsub.f32 %v9072_v10, %v3173_v6  ;;  %v2091_v16 = vpop.f32.mrf.mxu0  ;;  %v2137_v30 = vpop.f32.mrf.mxu1  ;;  %v3231_v11 = vsel %vm3152_vm2, %v9242_v36, -inf }
 0x16f   :  { %v9294_v21 = vpop.eup %8158 }
 0x170   :  { %v3423_v26 = vmul.f32 1.442695, %v3352_v7  ;;  %v3421_v31 = vmul.f32 1.442695, %v3351_v12  ;;  %v3543_v32 = vsel %vm3152_vm2, %v9294_v21, 0.0  ;;  %v7629_v35 = vpop.f32.mrf.mxu0  ;;  %v7635_v45 = vpop.f32.mrf.mxu1 }
 0x171   :  { %3229 = vmax.xlane.f32.xlu1 %v3228_v15  ;;  %3544 = vadd.xlane.f32.xlu0 %v3543_v32 }
 0x172   :  { %v9300_v10 = vpop.f32.mrf.mxu0  ;;  %v9302_v38 = vpop.f32.mrf.mxu1  ;;  %8166 = vpow2.f32 %v3421_v31 }
 0x173   :  { %10565 = vst [vmem:[#allocation2_spill] sm:$0xff] %v9302_v38  ;;  %v9304_v39 = vpop.eup %8160  ;;  %8168 = vpow2.f32 %v3423_v26  ;;  %v3237_v26 = vsel %vm3152_vm2, %v9246_v50, -inf }
 0x174   :  { %v3546_v40 = vsel %vm3152_vm2, %v9304_v39, 0.0  ;;  %v7640_v44 = vpop.f32.mrf.mxu0  ;;  %v7646_v46 = vpop.f32.mrf.mxu1 }
 0x175   :  { %3547 = vadd.xlane.f32.xlu1 %v3546_v40  ;;  %v3182_v49 = vpop.xlane.xlu1 %3181  ;;  %v3179_v52 = vpop.xlane.xlu0 %3178  ;;  %3232 = vmax.xlane.f32.xlu0 %v3231_v11  ;;  %v3240_v46 = vsel %vm3152_vm2, %v9248_v51, -inf }
 0x176   :  { %v3354_v53 = vsub.f32 %v9098_v25, %v3182_v49  ;;  %v3353_v56 = vsub.f32 %v9096_v24, %v3179_v52  ;;  %v2183_v4 = vpop.f32.mrf.mxu0  ;;  %v2229_v29 = vpop.f32.mrf.mxu1 }
 0x177   :  { %v9312_v5 = vpop.eup %8162 }
 0x178   :  { %v3427_v6 = vmul.f32 1.442695, %v3354_v53  ;;  %v3425_v7 = vmul.f32 1.442695, %v3353_v56  ;;  %v7641_v12 = vpop.f32.mrf.mxu0  ;;  %v7647_v15 = vpop.f32.mrf.mxu1  ;;  %v3549_v30 = vsel %vm3152_vm2, %v9312_v5, 0.0 }
 0x179   :  { %v9314_v16 = vpop.eup %8164  ;;  %3235 = vmax.xlane.f32.xlu1 %v3234_v3  ;;  %3550 = vadd.xlane.f32.xlu0 %v3549_v30  ;;  %v3243_v30 = vsel %vm3152_vm2, %v9250_v1, -inf }
 0x17a   :  { %v9318_v25 = vpop.f32.mrf.mxu0  ;;  %v9320_v24 = vpop.f32.mrf.mxu1  ;;  %8170 = vpow2.f32 %v3425_v7  ;;  %v3552_v31 = vsel %vm3152_vm2, %v9314_v16, 0.0 }
 0x17b   :  { %10566 = vst [vmem:[#allocation3_spill] sm:$0xff] %v9318_v25  ;;  %10567 = vst [vmem:[#allocation4_spill] sm:$0xff] %v9320_v24  ;;  %8172 = vpow2.f32 %v3427_v6 }
 0x17c   :  { %v7652_v32 = vpop.f32.mrf.mxu0  ;;  %v7658_v35 = vpop.f32.mrf.mxu1 }
 0x17d   :  { %3553 = vadd.xlane.f32.xlu1 %v3552_v31  ;;  %v3188_v45 = vpop.xlane.xlu1 %3187  ;;  %v3185_v11 = vpop.xlane.xlu0 %3184  ;;  %3238 = vmax.xlane.f32.xlu0 %v3237_v26 }
 0x17e   :  { %v3356_v40 = vsub.f32 %v9128_v43, %v3188_v45  ;;  %v3355_v44 = vsub.f32 %v9126_v42, %v3185_v11  ;;  %v2275_v49 = vpop.f32.mrf.mxu0  ;;  %v2321_v52 = vpop.f32.mrf.mxu1  ;;  %v143_v42 = vld [vmem:[%s10546_s2] sm:$0x3]  ;;  %v144_v11 = vld [vmem:[%s10546_s2 + $0x2] sm:$0x3] }
 0x17f   :  { %v9330_v53 = vpop.eup %8166  ;;  %v3927_v15 = vsel %vm3925_vm3, %v143_v42, 0  ;;  %v3973_v49 = vsel %vm3925_vm3, %v144_v11, 0 }
 0x180   :  { %v3431_v56 = vmul.f32 1.442695, %v3356_v40  ;;  %v3429_v3 = vmul.f32 1.442695, %v3355_v44  ;;  %v7653_v4 = vpop.f32.mrf.mxu0  ;;  %v7659_v29 = vpop.f32.mrf.mxu1  ;;  %v3555_v43 = vsel %vm3152_vm2, %v9330_v53, 0.0  ;;  %7769 = vmatpush3.bf16.msra.mxu0 %v3927_v15  ;;  %7775 = vmatpush3.bf16.msra.mxu1 %v3973_v49  ;;  %v3249_v15 = vsel %vm3152_vm2, %v9254_v13, -inf }
 0x181   :  { %v9332_v6 = vpop.eup %8168  ;;  %3241 = vmax.xlane.f32.xlu1 %v3240_v46  ;;  %3556 = vadd.xlane.f32.xlu0 %v3555_v43  ;;  %v3246_v46 = vsel %vm3152_vm2, %v9252_v2, -inf }
 0x182   :  { %v9339_v7 = vpop.f32.mrf.mxu0  ;;  %v9341_v12 = vpop.f32.mrf.mxu1  ;;  %8174 = vpow2.f32 %v3429_v3  ;;  %v3558_v26 = vsel %vm3152_vm2, %v9332_v6, 0.0  ;;  %7780 = vmatprep.subr.bf16.mxu0 %v10548_v0  ;;  %7786 = vmatprep.subr.bf16.mxu1 %v10548_v0 }
 0x183   :  { %10568 = vst [vmem:[#allocation5_spill] sm:$0xff] %v9339_v7  ;;  %10569 = vst [vmem:[#allocation6_spill] sm:$0xff] %v9341_v12  ;;  %8176 = vpow2.f32 %v3431_v56 }
 0x184   :  { %v7664_v31 = vpop.f32.mrf.mxu0  ;;  %v7670_v32 = vpop.f32.mrf.mxu1 }
 0x185   :  { %3559 = vadd.xlane.f32.xlu1 %v3558_v26  ;;  %v3194_v35 = vpop.xlane.xlu1 %3193  ;;  %v3191_v45 = vpop.xlane.xlu0 %3190  ;;  %3244 = vmax.xlane.f32.xlu0 %v3243_v30 }
 0x186   :  { %v3358_v40 = vsub.f32 %v9158_v63, %v3194_v35  ;;  %v3357_v44 = vsub.f32 %v9156_v62, %v3191_v45  ;;  %v2367_v52 = vpop.f32.mrf.mxu0  ;;  %v2413_v56 = vpop.f32.mrf.mxu1 }
 0x187   :  { %v9357_v3 = vpop.eup %8170 }
 0x188   :  { %v3435_v4 = vmul.f32 1.442695, %v3358_v40  ;;  %v3433_v29 = vmul.f32 1.442695, %v3357_v44  ;;  %v7665_v43 = vpop.f32.mrf.mxu0  ;;  %v7671_v42 = vpop.f32.mrf.mxu1  ;;  %v3561_v62 = vsel %vm3152_vm2, %v9357_v3, 0.0  ;;  %v3252_v40 = vsel %vm3152_vm2, %v9256_v14, -inf }
 0x189   :  { %v9360_v63 = vpop.eup %8172  ;;  %3247 = vmax.xlane.f32.xlu1 %v3246_v46  ;;  %3562 = vadd.xlane.f32.xlu0 %v3561_v62  ;;  %v3255_v62 = vsel %vm3152_vm2, %v9258_v27, -inf }
 0x18a   :  { %8178 = vpow2.f32 %v3433_v29  ;;  %v3564_v30 = vsel %vm3152_vm2, %v9360_v63, 0.0  ;;  %v9368_v26 = vpop.f32.mrf.mxu0  ;;  %v9370_v31 = vpop.f32.mrf.mxu1 }
 0x18b   :  { %8180 = vpow2.f32 %v3435_v4 }
 0x18c   :  { %v7676_v44 = vpop.f32.mrf.mxu0  ;;  %v7682_v46 = vpop.f32.mrf.mxu1 }
 0x18d   :  { %3565 = vadd.xlane.f32.xlu1 %v3564_v30  ;;  %v3200_v32 = vpop.xlane.xlu1 %3199  ;;  %v3197_v35 = vpop.xlane.xlu0 %3196  ;;  %3250 = vmax.xlane.f32.xlu0 %v3249_v15  ;;  %v3258_v44 = vsel %vm3152_vm2, %v9260_v28, -inf }
 0x18e   :  { %v3360_v45 = vsub.f32 %v9188_v18, %v3200_v32  ;;  %v3359_v11 = vsub.f32 %v9186_v17, %v3197_v35  ;;  %v2459_v4 = vpop.f32.mrf.mxu0  ;;  %v2505_v29 = vpop.f32.mrf.mxu1 }
 0x18f   :  { %v9376_v49 = vpop.eup %8174 }
 0x190   :  { %v3439_v52 = vmul.f32 1.442695, %v3360_v45  ;;  %v3437_v56 = vmul.f32 1.442695, %v3359_v11  ;;  %v9378_v43 = vpop.eup %8176  ;;  %v3567_v18 = vsel %vm3152_vm2, %v9376_v49, 0.0  ;;  %v7677_v17 = vpop.f32.mrf.mxu0 }
 0x191   :  { %3253 = vmax.xlane.f32.xlu1 %v3252_v40  ;;  %3568 = vadd.xlane.f32.xlu0 %v3567_v18  ;;  %v7683_v42 = vpop.f32.mrf.mxu1  ;;  %v3570_v15 = vsel %vm3152_vm2, %v9378_v43, 0.0 }
 0x192   :  { %8182 = vpow2.f32 %v3437_v56  ;;  %v9386_v30 = vpop.f32.mrf.mxu0 }
 0x193   :  { %8184 = vpow2.f32 %v3439_v52  ;;  %v9388_v32 = vpop.f32.mrf.mxu1 }
 0x194   :  { %v7688_v46 = vpop.f32.mrf.mxu0 }
 0x195   :  { %3571 = vadd.xlane.f32.xlu1 %v3570_v15  ;;  %v3206_v35 = vpop.xlane.xlu1 %3205  ;;  %v3203_v45 = vpop.xlane.xlu0 %3202  ;;  %3256 = vmax.xlane.f32.xlu0 %v3255_v62  ;;  %v3261_v15 = vsel %vm3152_vm2, %v9264_v54, -inf }
 0x196   :  { %v3362_v11 = vsub.f32 %v9208_v34, %v3206_v35  ;;  %v3361_v40 = vsub.f32 %v9206_v33, %v3203_v45  ;;  %v7694_v52 = vpop.f32.mrf.mxu1  ;;  %v2551_v18 = vpop.f32.mrf.mxu0 }
 0x197   :  { %v9394_v56 = vpop.eup %8178 }
 0x198   :  { %v3443_v4 = vmul.f32 1.442695, %v3362_v11  ;;  %v3441_v29 = vmul.f32 1.442695, %v3361_v40  ;;  %v2597_v17 = vpop.f32.mrf.mxu1  ;;  %v9396_v42 = vpop.eup %8180  ;;  %v3573_v34 = vsel %vm3152_vm2, %v9394_v56, 0.0 }
 0x199   :  { %10570 = vst [vmem:[#allocation7_spill] sm:$0xff] %v9396_v42  ;;  %3259 = vmax.xlane.f32.xlu1 %v3258_v44  ;;  %3574 = vadd.xlane.f32.xlu0 %v3573_v34  ;;  %v7689_v33 = vpop.f32.mrf.mxu0  ;;  %v3576_v35 = vsel %vm3152_vm2, %v9396_v42, 0.0 }
 0x19a   :  { %v7695_v62 = vpop.f32.mrf.mxu1  ;;  %8186 = vpow2.f32 %v3441_v29  ;;  %v3264_v29 = vsel %vm3152_vm2, %v9266_v55, -inf }
 0x19b   :  { %8188 = vpow2.f32 %v3443_v4  ;;  %v9404_v45 = vpop.f32.mrf.mxu0 }
 0x19c   :  { %v9406_v11 = vpop.f32.mrf.mxu1 }
 0x19d   :  { %3577 = vadd.xlane.f32.xlu1 %v3576_v35  ;;  %v3212_v40 = vpop.xlane.xlu1 %3211  ;;  %v3209_v44 = vpop.xlane.xlu0 %3208  ;;  %3262 = vmax.xlane.f32.xlu0 %v3261_v15  ;;  %v3267_v35 = vsel %vm3152_vm2, %v9270_v19, -inf }
 0x19e   :  { %v3364_v46 = vsub.f32 %v9216_v48, %v3212_v40  ;;  %v3363_v52 = vsub.f32 %v9214_v47, %v3209_v44  ;;  %v7700_v18 = vpop.f32.mrf.mxu0  ;;  %v7706_v4 = vpop.f32.mrf.mxu1 }
 0x19f   :  { %v9412_v17 = vpop.eup %8182  ;;  %v3270_v18 = vsel %vm3152_vm2, %v9272_v20, -inf }
 0x1a0   :  { %v3447_v34 = vmul.f32 1.442695, %v3364_v46  ;;  %v3445_v33 = vmul.f32 1.442695, %v3363_v52  ;;  %v2643_v62 = vpop.f32.mrf.mxu0  ;;  %v2689_v0 = vpop.f32.mrf.mxu1  ;;  %v3579_v48 = vsel %vm3152_vm2, %v9412_v17, 0.0 }
 0x1a1   :  { %v9414_v42 = vpop.eup %8184  ;;  %3265 = vmax.xlane.f32.xlu1 %v3264_v29  ;;  %3580 = vadd.xlane.f32.xlu0 %v3579_v48 }
 0x1a2   :  { %v7701_v47 = vpop.f32.mrf.mxu0  ;;  %v7707_v15 = vpop.f32.mrf.mxu1  ;;  %8190 = vpow2.f32 %v3445_v33  ;;  %v3582_v40 = vsel %vm3152_vm2, %v9414_v42, 0.0 }
 0x1a3   :  { %8192 = vpow2.f32 %v3447_v34 }
 0x1a4   :  { %v9422_v44 = vpop.f32.mrf.mxu0 }
 0x1a5   :  { %3583 = vadd.xlane.f32.xlu1 %v3582_v40  ;;  %v3218_v0 = vpop.xlane.xlu1 %3217  ;;  %v3215_v46 = vpop.xlane.xlu0 %3214  ;;  %3268 = vmax.xlane.f32.xlu0 %v3267_v35 }
 0x1a6   :  { %v3366_v52 = vsub.f32 %v9224_v60, %v3218_v0  ;;  %v3365_v29 = vsub.f32 %v9222_v57, %v3215_v46  ;;  %v9428_v4 = vpop.f32.mrf.mxu1  ;;  %v7712_v33 = vpop.f32.mrf.mxu0  ;;  %v3273_v0 = vsel %vm3152_vm2, %v9282_v61, -inf }
 0x1a7   :  { %v9430_v34 = vpop.eup %8186 }
 0x1a8   :  { %10571 = vst [vmem:[#allocation8_spill] sm:$0xff] %v9430_v34  ;;  %v3451_v62 = vmul.f32 1.442695, %v3366_v52  ;;  %v3449_v48 = vmul.f32 1.442695, %v3365_v29  ;;  %v7718_v47 = vpop.f32.mrf.mxu1  ;;  %v2735_v15 = vpop.f32.mrf.mxu0  ;;  %v3585_v60 = vsel %vm3152_vm2, %v9430_v34, 0.0 }
 0x1a9   :  { %v9432_v40 = vpop.eup %8188  ;;  %3271 = vmax.xlane.f32.xlu1 %v3270_v18  ;;  %3586 = vadd.xlane.f32.xlu0 %v3585_v60 }
 0x1aa   :  { %10572 = vst [vmem:[#allocation9_spill] sm:$0xff] %v9432_v40  ;;  %v2781_v57 = vpop.f32.mrf.mxu1  ;;  %v7713_v35 = vpop.f32.mrf.mxu0  ;;  %8194 = vpow2.f32 %v3449_v48  ;;  %v3588_v46 = vsel %vm3152_vm2, %v9432_v40, 0.0  ;;  %v3276_v48 = vsel %vm3152_vm2, %v9284_v59, -inf }
 0x1ab   :  { %8196 = vpow2.f32 %v3451_v62 }
 0x1ac   :  { %v7719_v52 = vpop.f32.mrf.mxu1  ;;  %v9440_v29 = vpop.f32.mrf.mxu0 }
 0x1ad   :  { %3589 = vadd.xlane.f32.xlu1 %v3588_v46  ;;  %v3224_v33 = vpop.xlane.xlu1 %3223  ;;  %v3221_v18 = vpop.xlane.xlu0 %3220  ;;  %3274 = vmax.xlane.f32.xlu0 %v3273_v0 }
 0x1ae   :  { %v3368_v47 = vsub.f32 %v9232_v9, %v3224_v33  ;;  %v3367_v15 = vsub.f32 %v9230_v8, %v3221_v18  ;;  %v9446_v60 = vpop.f32.mrf.mxu1  ;;  %v7724_v62 = vpop.f32.mrf.mxu0  ;;  %v3279_v33 = vsel %vm3152_vm2, %v9300_v10, -inf }
 0x1af   :  { %v9448_v57 = vpop.eup %8190 }
 0x1b0   :  { %10573 = vst [vmem:[#allocation10_spill] sm:$0xff] %v9448_v57  ;;  %v3455_v35 = vmul.f32 1.442695, %v3368_v47  ;;  %v3453_v52 = vmul.f32 1.442695, %v3367_v15  ;;  %v7730_v40 = vpop.f32.mrf.mxu1  ;;  %v2827_v34 = vpop.f32.mrf.mxu0  ;;  %v3591_v9 = vsel %vm3152_vm2, %v9448_v57, 0.0 }
 0x1b1   :  { %v9450_v46 = vpop.eup %8192  ;;  %3277 = vmax.xlane.f32.xlu1 %v3276_v48  ;;  %3592 = vadd.xlane.f32.xlu0 %v3591_v9  ;;  %v3282_v40 = vsel %vm3152_vm2, %v9302_v38, -inf }
 0x1b2   :  { %10574 = vst [vmem:[#allocation11_spill] sm:$0xff] %v9450_v46  ;;  %v2873_v8 = vpop.f32.mrf.mxu1  ;;  %v7725_v0 = vpop.f32.mrf.mxu0  ;;  %8198 = vpow2.f32 %v3453_v52  ;;  %v3594_v18 = vsel %vm3152_vm2, %v9450_v46, 0.0 }
 0x1b3   :  { %8200 = vpow2.f32 %v3455_v35 }
 0x1b4   :  { %v7731_v47 = vpop.f32.mrf.mxu1  ;;  %v9458_v34 = vpop.f32.mrf.mxu0 }
 0x1b5   :  { %3595 = vadd.xlane.f32.xlu1 %v3594_v18  ;;  %3280 = vmax.xlane.f32.xlu0 %v3279_v33  ;;  %v3285_v33 = vsel %vm3152_vm2, %v9318_v25, -inf }
 0x1b6   :  { %v9462_v15 = vpop.f32.mrf.mxu1  ;;  %v7736_v48 = vpop.f32.mrf.mxu0 }
 0x1b7   :  { %v9464_v62 = vpop.eup %8194 }
 0x1b8   :  { %10575 = vst [vmem:[#allocation12_spill] sm:$0xff] %v9464_v62  ;;  %v7742_v52 = vpop.f32.mrf.mxu1  ;;  %v9466_v9 = vpop.eup %8196  ;;  %v3597_v35 = vsel %vm3152_vm2, %v9464_v62, 0.0 }
 0x1b9   :  { %10576 = vst [vmem:[#allocation13_spill] sm:$0xff] %v9466_v9  ;;  %3283 = vmax.xlane.f32.xlu1 %v3282_v40  ;;  %v2919_v8 = vpop.f32.mrf.mxu0  ;;  %3598 = vadd.xlane.f32.xlu0 %v3597_v35  ;;  %v3600_v47 = vsel %vm3152_vm2, %v9466_v9, 0.0  ;;  %v3288_v40 = vsel %vm3152_vm2, %v9320_v24, -inf }
 0x1ba   :  { %v2965_v0 = vpop.f32.mrf.mxu1 }
 0x1bb   :  { %v7737_v18 = vpop.f32.mrf.mxu0 }
 0x1bc   :  { %v7743_v48 = vpop.f32.mrf.mxu1 }
 0x1bd   :  { %3601 = vadd.xlane.f32.xlu1 %v3600_v47  ;;  %v9474_v46 = vpop.f32.mrf.mxu0  ;;  %3286 = vmax.xlane.f32.xlu0 %v3285_v33  ;;  %v3291_v33 = vsel %vm3152_vm2, %v9339_v7, -inf }
 0x1be   :  { %v9478_v52 = vpop.f32.mrf.mxu1 }
 0x1bf   :  { %v7748_v8 = vpop.f32.mrf.mxu0  ;;  %v9480_v35 = vpop.eup %8198 }
 0x1c0   :  { %10577 = vst [vmem:[#allocation14_spill] sm:$0xff] %v9480_v35  ;;  %v7754_v0 = vpop.f32.mrf.mxu1  ;;  %v9482_v62 = vpop.eup %8200  ;;  %v3603_v18 = vsel %vm3152_vm2, %v9480_v35, 0.0 }
 0x1c1   :  { %10578 = vst [vmem:[#allocation15_spill] sm:$0xff] %v9482_v62  ;;  %3289 = vmax.xlane.f32.xlu1 %v3288_v40  ;;  %v3011_v48 = vpop.f32.mrf.mxu0  ;;  %3604 = vadd.xlane.f32.xlu0 %v3603_v18  ;;  %v3606_v24 = vsel %vm3152_vm2, %v9482_v62, 0.0  ;;  %v3294_v40 = vsel %vm3152_vm2, %v9341_v12, -inf }
 0x1c2   :  { %v3057_v47 = vpop.f32.mrf.mxu1 }
 0x1c3   :  { %v7749_v9 = vpop.f32.mrf.mxu0 }
 0x1c4   :  { %v7755_v8 = vpop.f32.mrf.mxu1 }
 0x1c5   :  { %3607 = vadd.xlane.f32.xlu1 %v3606_v24  ;;  %v9490_v57 = vpop.f32.mrf.mxu0  ;;  %3292 = vmax.xlane.f32.xlu0 %v3291_v33 }
 0x1c6   :  { %10579 = vst [vmem:[#allocation16_spill] sm:$0xff] %v9490_v57  ;;  %v9494_v0 = vpop.f32.mrf.mxu1 }
 0x1c7   :  { %v7760_v48 = vpop.f32.mrf.mxu0 }
 0x1c8   :  { %v7766_v18 = vpop.f32.mrf.mxu1 }
 0x1c9   :  { %3295 = vmax.xlane.f32.xlu1 %v3294_v40  ;;  %v3103_v47 = vpop.f32.mrf.mxu0 }
 0x1ca   :  { %v3149_v35 = vpop.f32.mrf.mxu1 }
 0x1cb   :  { %v7761_v7 = vpop.f32.mrf.mxu0 }
 0x1cc   :  { %v7767_v9 = vpop.f32.mrf.mxu1 }
 0x1f2   :  { %v3539_v25 = vpop.xlane.xlu0 %3538 }
 0x1f3   :  { %8202 = vrcp.f32 %v3539_v25  ;;  %v145_v25 = vld [vmem:[%s10546_s2 + $0x4] sm:$0x3] }
 0x1f6   :  { %v3542_v62 = vpop.xlane.xlu1 %3541  ;;  %v3227_v8 = vpop.xlane.xlu0 %3226 }
 0x1f7   :  { %8204 = vrcp.f32 %v3542_v62  ;;  %v3369_v24 = vsub.f32 %v9238_v22, %v3227_v8 }
 0x1f9   :  { %v3457_v33 = vmul.f32 1.442695, %v3369_v24 }
 0x1fa   :  { %v3230_v57 = vpop.xlane.xlu1 %3229  ;;  %v3545_v38 = vpop.xlane.xlu0 %3544 }
 0x1fb   :  { %8206 = vpow2.f32 %v3457_v33  ;;  %v3370_v12 = vsub.f32 %v9240_v23, %v3230_v57  ;;  %v10580_v33 = vmov 0.0  }
 0x1fc   :  { %8208 = vrcp.f32 %v3545_v38 }
 0x1fd   :  { %v3459_v48 = vmul.f32 1.442695, %v3370_v12  ;;  %v4019_v12 = vsel %vm3925_vm3, %v145_v25, 0  ;;  %v147_v25 = vld [vmem:[%s10546_s2 + $0x8] sm:$0x3] }
 0x1fe   :  { %v3548_v40 = vpop.xlane.xlu1 %3547  ;;  %v3233_v18 = vpop.xlane.xlu0 %3232 }
 0x1ff   :  { %8210 = vpow2.f32 %v3459_v48  ;;  %v3371_v7 = vsub.f32 %v9242_v36, %v3233_v18  ;;  %v146_v36 = vld [vmem:[%s10546_s2 + $0x6] sm:$0x3] }
 0x200   :  { %v8203_v35 = vpop.eup %8202  ;;  %8212 = vrcp.f32 %v3548_v40  ;;  %v4065_v40 = vsel %vm3925_vm3, %v146_v36, 0 }
 0x201   :  { %v3793_v22 = vmul.f32 %v8203_v35, %v9276_v41  ;;  %v3461_v62 = vmul.f32 1.442695, %v3371_v7 }
 0x202   :  { %v3236_v47 = vpop.xlane.xlu1 %3235  ;;  %v3551_v38 = vpop.xlane.xlu0 %3550 }
 0x203   :  { %v3857_v9 = vpack.c.bf16 %v3793_v22, %v3793_v22  ;;  %8214 = vpow2.f32 %v3461_v62  ;;  %v3372_v23 = vsub.f32 %v9244_v37, %v3236_v47 }
 0x204   :  { %v8205_v57 = vpop.eup %8204  ;;  %8216 = vrcp.f32 %v3551_v38 }
 0x205   :  { %v3794_v8 = vmul.f32 %v8205_v57, %v9286_v58  ;;  %v3463_v24 = vmul.f32 1.442695, %v3372_v23  ;;  %7771 = vmatmul.mubr.msk.bf16.vlgmr.msra.gmra.mxu0 %vm3921_vm4, %v3857_v9 }
 0x206   :  { %v3554_v41 = vpop.xlane.xlu1 %3553  ;;  %7781 = vmatpush3.bf16.msra.mxu0 %v4019_v12  ;;  %7782 = vmatprep.mubr.msk.bf16.mxu0 %vm8411_vm1, %v10580_v33  ;;  %v3239_v48 = vpop.xlane.xlu0 %3238  ;;  %v3297_v12 = vsel %vm3152_vm2, %v9368_v26, -inf }
 0x207   :  { %v3858_v37 = vpack.c.bf16 %v3794_v8, %v3794_v8  ;;  %8218 = vpow2.f32 %v3463_v24  ;;  %7792 = vmatprep.subr.bf16.mxu0 %v10580_v33  ;;  %v3373_v58 = vsub.f32 %v9246_v50, %v3239_v48  ;;  %v148_v8 = vld [vmem:[%s10546_s2 + $0xa] sm:$0x3]  ;;  %v3300_v48 = vsel %vm3152_vm2, %v9370_v31, -inf }
 0x208   :  { %v9514_v18 = vpop.eup %8206  ;;  %8220 = vrcp.f32 %v3554_v41 }
 0x209   :  { %v8209_v7 = vpop.eup %8208  ;;  %7777 = vmatmul.mubr.msk.bf16.vlgmr.msra.gmra.mxu1 %vm3921_vm4, %v3858_v37  ;;  %v3609_v35 = vsel %vm3152_vm2, %v9514_v18, 0.0  ;;  %v3465_v62 = vmul.f32 1.442695, %v3373_v58 }
 0x20a   :  { %v3795_v22 = vmul.f32 %v8209_v7, %v9294_v21  ;;  %v3242_v47 = vpop.xlane.xlu1 %3241  ;;  %3610 = vadd.xlane.f32.xlu0 %v3609_v35  ;;  %7787 = vmatpush3.bf16.msra.mxu1 %v4065_v40  ;;  %v3557_v23 = vpop.xlane.xlu0 %3556  ;;  %v4111_v21 = vsel %vm3925_vm3, %v147_v25, 0 }
 0x20b   :  { %v3374_v9 = vsub.f32 %v9248_v51, %v3242_v47  ;;  %7788 = vmatprep.mubr.msk.bf16.mxu1 %vm8411_vm1, %v10580_v33  ;;  %7798 = vmatprep.subr.bf16.mxu1 %v10580_v33  ;;  %8222 = vpow2.f32 %v3465_v62 }
 0x20c   :  { %v9528_v50 = vpop.eup %8210  ;;  %v3859_v38 = vpack.c.bf16 %v3795_v22, %v3795_v22  ;;  %8224 = vrcp.f32 %v3557_v23  ;;  %v149_v22 = vld [vmem:[%s10546_s2 + $0xc] sm:$0x3] }
 0x20d   :  { %v8213_v57 = vpop.eup %8212  ;;  %v3467_v36 = vmul.f32 1.442695, %v3374_v9  ;;  %v3612_v51 = vsel %vm3152_vm2, %v9528_v50, 0.0 }
 0x20e   :  { %v3796_v24 = vmul.f32 %v8213_v57, %v9304_v39  ;;  %7783 = vmatmul.mubr.msk.bf16.vlgmr.msra.gmra.mxu0 %vm3921_vm4, %v3859_v38  ;;  %3613 = vadd.xlane.f32.xlu1 %v3612_v51  ;;  %v3560_v41 = vpop.xlane.xlu1 %3559  ;;  %v3245_v37 = vpop.xlane.xlu0 %3244  ;;  %v4157_v39 = vsel %vm3925_vm3, %v148_v8, 0  ;;  %v150_v51 = vld [vmem:[%s10546_s2 + $0xe] sm:$0x3] }
 0x20f   :  { %8226 = vpow2.f32 %v3467_v36  ;;  %3298 = vmax.xlane.f32.xlu0 %v3297_v12  ;;  %7793 = vmatpush3.bf16.msra.mxu0 %v4111_v21  ;;  %v3375_v7 = vsub.f32 %v9250_v1, %v3245_v37  ;;  %v3303_v21 = vsel %vm3152_vm2, %v9386_v30, -inf  ;;  %v3306_v37 = vsel %vm3152_vm2, %v9388_v32, -inf }
 0x210   :  { %v9542_v40 = vpop.eup %8214  ;;  %v3860_v58 = vpack.c.bf16 %v3796_v24, %v3796_v24  ;;  %8228 = vrcp.f32 %v3560_v41  ;;  %7794 = vmatprep.mubr.msk.bf16.mxu0 %vm8411_vm1, %v10580_v33  ;;  %7804 = vmatprep.subr.bf16.mxu0 %v10580_v33 }
 0x211   :  { %v8217_v35 = vpop.eup %8216  ;;  %v3615_v25 = vsel %vm3152_vm2, %v9542_v40, 0.0  ;;  %v3469_v47 = vmul.f32 1.442695, %v3375_v7 }
 0x212   :  { %v3797_v62 = vmul.f32 %v8217_v35, %v9312_v5  ;;  %7789 = vmatmul.mubr.msk.bf16.vlgmr.msra.gmra.mxu1 %vm3921_vm4, %v3860_v58  ;;  %3301 = vmax.xlane.f32.xlu1 %v3300_v48  ;;  %v3248_v1 = vpop.xlane.xlu1 %3247  ;;  %v3563_v23 = vpop.xlane.xlu0 %3562  ;;  %v4203_v5 = vsel %vm3925_vm3, %v149_v22, 0 }
 0x213   :  { %v3376_v9 = vsub.f32 %v9252_v2, %v3248_v1  ;;  %3616 = vadd.xlane.f32.xlu0 %v3615_v25  ;;  %7799 = vmatpush3.bf16.msra.mxu1 %v4157_v39  ;;  %8230 = vpow2.f32 %v3469_v47  ;;  %v151_v39 = vld [vmem:[%s10546_s2 + $0x10] sm:$0x3] }
 0x214   :  { %v9557_v38 = vpop.eup %8218  ;;  %v3861_v12 = vpack.c.bf16 %v3797_v62, %v3797_v62  ;;  %7800 = vmatprep.mubr.msk.bf16.mxu1 %vm8411_vm1, %v10580_v33  ;;  %7810 = vmatprep.subr.bf16.mxu1 %v10580_v33  ;;  %8232 = vrcp.f32 %v3563_v23  ;;  %v3309_v23 = vsel %vm3152_vm2, %v9404_v45, -inf }
 0x215   :  { %v8221_v57 = vpop.eup %8220  ;;  %v3471_v36 = vmul.f32 1.442695, %v3376_v9  ;;  %v3618_v2 = vsel %vm3152_vm2, %v9557_v38, 0.0 }
 0x216   :  { %v3798_v8 = vmul.f32 %v8221_v57, %v9314_v16  ;;  %7795 = vmatmul.mubr.msk.bf16.vlgmr.msra.gmra.mxu0 %vm3921_vm4, %v3861_v12  ;;  %3619 = vadd.xlane.f32.xlu1 %v3618_v2  ;;  %v3566_v24 = vpop.xlane.xlu1 %3565  ;;  %v3251_v41 = vpop.xlane.xlu0 %3250  ;;  %v4249_v16 = vsel %vm3925_vm3, %v150_v51, 0  ;;  %v4295_v12 = vsel %vm3925_vm3, %v151_v39, 0  ;;  %v152_v57 = vld [vmem:[%s10546_s2 + $0x12] sm:$0x3] }
 0x217   :  { %8234 = vpow2.f32 %v3471_v36  ;;  %3304 = vmax.xlane.f32.xlu0 %v3303_v21  ;;  %7805 = vmatpush3.bf16.msra.mxu0 %v4203_v5  ;;  %v3377_v58 = vsub.f32 %v9254_v13, %v3251_v41 }
 0x218   :  { %v3862_v48 = vpack.c.bf16 %v3798_v8, %v3798_v8  ;;  %8236 = vrcp.f32 %v3566_v24  ;;  %7806 = vmatprep.mubr.msk.bf16.mxu0 %vm8411_vm1, %v10580_v33  ;;  %7816 = vmatprep.subr.bf16.mxu0 %v10580_v33  ;;  %v9579_v7 = vpop.eup %8222  ;;  %v3312_v8 = vsel %vm3152_vm2, %v9406_v11, -inf }
 0x219   :  { %v8225_v35 = vpop.eup %8224  ;;  %v3473_v25 = vmul.f32 1.442695, %v3377_v58  ;;  %v3621_v13 = vsel %vm3152_vm2, %v9579_v7, 0.0 }
 0x21a   :  { %7801 = vmatmul.mubr.msk.bf16.vlgmr.msra.gmra.mxu1 %vm3921_vm4, %v3862_v48  ;;  %3307 = vmax.xlane.f32.xlu1 %v3306_v37  ;;  %v3254_v22 = vpop.xlane.xlu1 %3253  ;;  %v3799_v62 = vmul.f32 %v8225_v35, %v9330_v53  ;;  %v3569_v1 = vpop.xlane.xlu0 %3568  ;;  %v153_v48 = vld [vmem:[%s10546_s2 + $0x14] sm:$0x3] }
 0x21b   :  { %v3378_v47 = vsub.f32 %v9256_v14, %v3254_v22  ;;  %3622 = vadd.xlane.f32.xlu0 %v3621_v13  ;;  %7811 = vmatpush3.bf16.msra.mxu1 %v4249_v16  ;;  %8238 = vpow2.f32 %v3473_v25 }
 0x21c   :  { %v9589_v9 = vpop.eup %8226  ;;  %7812 = vmatprep.mubr.msk.bf16.mxu1 %vm8411_vm1, %v10580_v33  ;;  %7822 = vmatprep.subr.bf16.mxu1 %v10580_v33  ;;  %v3863_v53 = vpack.c.bf16 %v3799_v62, %v3799_v62  ;;  %8240 = vrcp.f32 %v3569_v1  ;;  %v3315_v62 = vsel %vm3152_vm2, %v9422_v44, -inf }
 0x21d   :  { %v8229_v21 = vpop.eup %8228  ;;  %v3475_v5 = vmul.f32 1.442695, %v3378_v47  ;;  %v3624_v14 = vsel %vm3152_vm2, %v9589_v9, 0.0  ;;  %v4387_v47 = vsel %vm3925_vm3, %v153_v48, 0 }
 0x21e   :  { %v3800_v36 = vmul.f32 %v8229_v21, %v9332_v6  ;;  %3625 = vadd.xlane.f32.xlu1 %v3624_v14  ;;  %v3572_v2 = vpop.xlane.xlu1 %3571  ;;  %7807 = vmatmul.mubr.msk.bf16.vlgmr.msra.gmra.mxu0 %vm3921_vm4, %v3863_v53  ;;  %v3257_v51 = vpop.xlane.xlu0 %3256  ;;  %v4341_v6 = vsel %vm3925_vm3, %v152_v57, 0  ;;  %v3318_v14 = vsel %vm3152_vm2, %v9428_v4, -inf }
 0x21f   :  { %8242 = vpow2.f32 %v3475_v5  ;;  %3310 = vmax.xlane.f32.xlu0 %v3309_v23  ;;  %v3379_v41 = vsub.f32 %v9258_v27, %v3257_v51  ;;  %7817 = vmatpush3.bf16.msra.mxu0 %v4295_v12  ;;  %v154_v12 = vld [vmem:[%s10546_s2 + $0x16] sm:$0x3]  ;;  %v155_v51 = vld [vmem:[%s10546_s2 + $0x18] sm:$0x3] }
 0x220   :  { %v3864_v24 = vpack.c.bf16 %v3800_v36, %v3800_v36  ;;  %8244 = vrcp.f32 %v3572_v2  ;;  %7818 = vmatprep.mubr.msk.bf16.mxu0 %vm8411_vm1, %v10580_v33  ;;  %v9610_v37 = vpop.eup %8230  ;;  %7828 = vmatprep.subr.bf16.mxu0 %v10580_v33 }
 0x221   :  { %v8233_v58 = vpop.eup %8232  ;;  %v3477_v16 = vmul.f32 1.442695, %v3379_v41  ;;  %v3627_v39 = vsel %vm3152_vm2, %v9610_v37, 0.0 }
 0x222   :  { %7813 = vmatmul.mubr.msk.bf16.vlgmr.msra.gmra.mxu1 %vm3921_vm4, %v3864_v24  ;;  %3313 = vmax.xlane.f32.xlu1 %v3312_v8  ;;  %v3260_v27 = vpop.xlane.xlu1 %3259  ;;  %v3801_v35 = vmul.f32 %v8233_v58, %v9357_v3  ;;  %v3575_v22 = vpop.xlane.xlu0 %3574 }
 0x223   :  { %v3380_v25 = vsub.f32 %v9260_v28, %v3260_v27  ;;  %3628 = vadd.xlane.f32.xlu0 %v3627_v39  ;;  %7823 = vmatpush3.bf16.msra.mxu1 %v4341_v6  ;;  %8246 = vpow2.f32 %v3477_v16  ;;  %v3321_v27 = vsel %vm3152_vm2, %v9440_v29, -inf  ;;  %v4479_v39 = vsel %vm3925_vm3, %v155_v51, 0 }
 0x224   :  { %v9621_v13 = vpop.eup %8234  ;;  %7824 = vmatprep.mubr.msk.bf16.mxu1 %vm8411_vm1, %v10580_v33  ;;  %7834 = vmatprep.subr.bf16.mxu1 %v10580_v33  ;;  %v3865_v3 = vpack.c.bf16 %v3801_v35, %v3801_v35  ;;  %8248 = vrcp.f32 %v3575_v22  ;;  %v156_v22 = vld [vmem:[%s10546_s2 + $0x1a] sm:$0x3] }
 0x225   :  { %v8237_v1 = vpop.eup %8236  ;;  %v3479_v23 = vmul.f32 1.442695, %v3380_v25  ;;  %v3630_v28 = vsel %vm3152_vm2, %v9621_v13, 0.0 }
 0x226   :  { %v3802_v21 = vmul.f32 %v8237_v1, %v9360_v63  ;;  %3631 = vadd.xlane.f32.xlu1 %v3630_v28  ;;  %v3578_v53 = vpop.xlane.xlu1 %3577  ;;  %7819 = vmatmul.mubr.msk.bf16.vlgmr.msra.gmra.mxu0 %vm3921_vm4, %v3865_v3  ;;  %v3263_v5 = vpop.xlane.xlu0 %3262  ;;  %v4433_v63 = vsel %vm3925_vm3, %v154_v12, 0  ;;  %v3324_v3 = vsel %vm3152_vm2, %v9446_v60, -inf }
 0x227   :  { %8250 = vpow2.f32 %v3479_v23  ;;  %3316 = vmax.xlane.f32.xlu0 %v3315_v62  ;;  %v3381_v36 = vsub.f32 %v9264_v54, %v3263_v5  ;;  %7829 = vmatpush3.bf16.msra.mxu0 %v4387_v47 }
 0x228   :  { %v3866_v57 = vpack.c.bf16 %v3802_v21, %v3802_v21  ;;  %8252 = vrcp.f32 %v3578_v53  ;;  %7830 = vmatprep.mubr.msk.bf16.mxu0 %vm8411_vm1, %v10580_v33  ;;  %v9642_v2 = vpop.eup %8238  ;;  %7840 = vmatprep.subr.bf16.mxu0 %v10580_v33  ;;  %v157_v21 = vld [vmem:[%s10546_s2 + $0x1c] sm:$0x3] }
 0x229   :  { %v8241_v8 = vpop.eup %8240  ;;  %v3481_v24 = vmul.f32 1.442695, %v3381_v36  ;;  %v3633_v41 = vsel %vm3152_vm2, %v9642_v2, 0.0 }
 0x22a   :  { %7825 = vmatmul.mubr.msk.bf16.vlgmr.msra.gmra.mxu1 %vm3921_vm4, %v3866_v57  ;;  %3319 = vmax.xlane.f32.xlu1 %v3318_v14  ;;  %v3266_v54 = vpop.xlane.xlu1 %3265  ;;  %v3803_v6 = vmul.f32 %v8241_v8, %v9376_v49  ;;  %v3581_v58 = vpop.xlane.xlu0 %3580  ;;  %v3327_v8 = vsel %vm3152_vm2, %v9458_v34, -inf }
 0x22b   :  { %v3382_v48 = vsub.f32 %v9266_v55, %v3266_v54  ;;  %3634 = vadd.xlane.f32.xlu0 %v3633_v41  ;;  %7835 = vmatpush3.bf16.msra.mxu1 %v4433_v63  ;;  %8254 = vpow2.f32 %v3481_v24  ;;  %v4571_v24 = vsel %vm3925_vm3, %v157_v21, 0 }
 0x22c   :  { %v9653_v16 = vpop.eup %8242  ;;  %7836 = vmatprep.mubr.msk.bf16.mxu1 %vm8411_vm1, %v10580_v33  ;;  %7846 = vmatprep.subr.bf16.mxu1 %v10580_v33  ;;  %v3867_v49 = vpack.c.bf16 %v3803_v6, %v3803_v6  ;;  %8256 = vrcp.f32 %v3581_v58  ;;  %v158_v6 = vld [vmem:[%s10546_s2 + $0x1e] sm:$0x3] }
 0x22d   :  { %v8245_v35 = vpop.eup %8244  ;;  %v3483_v25 = vmul.f32 1.442695, %v3382_v48  ;;  %v3636_v55 = vsel %vm3152_vm2, %v9653_v16, 0.0  ;;  %v10581_v48 = vld [vmem:[#allocation7_spill] sm:$0xff] }
 0x22e   :  { %v3804_v62 = vmul.f32 %v8245_v35, %v9378_v43  ;;  %3637 = vadd.xlane.f32.xlu1 %v3636_v55  ;;  %v3584_v47 = vpop.xlane.xlu1 %3583  ;;  %7831 = vmatmul.mubr.msk.bf16.vlgmr.msra.gmra.mxu0 %vm3921_vm4, %v3867_v49  ;;  %v3269_v1 = vpop.xlane.xlu0 %3268  ;;  %v4525_v43 = vsel %vm3925_vm3, %v156_v22, 0  ;;  %v3330_v35 = vsel %vm3152_vm2, %v9462_v15, -inf  ;;  %v4617_v55 = vsel %vm3925_vm3, %v158_v6, 0 }
 0x22f   :  { %8258 = vpow2.f32 %v3483_v25  ;;  %3322 = vmax.xlane.f32.xlu0 %v3321_v27  ;;  %v3383_v28 = vsub.f32 %v9270_v19, %v3269_v1  ;;  %7841 = vmatpush3.bf16.msra.mxu0 %v4479_v39 }
 0x230   :  { %v3868_v23 = vpack.c.bf16 %v3804_v62, %v3804_v62  ;;  %8260 = vrcp.f32 %v3584_v47  ;;  %7842 = vmatprep.mubr.msk.bf16.mxu0 %vm8411_vm1, %v10580_v33  ;;  %v9674_v12 = vpop.eup %8246  ;;  %7852 = vmatprep.subr.bf16.mxu0 %v10580_v33  ;;  %v159_v62 = vld [vmem:[%s10546_s2 + $0x20] sm:$0x3] }
 0x231   :  { %v8249_v53 = vpop.eup %8248  ;;  %v3485_v5 = vmul.f32 1.442695, %v3383_v28  ;;  %v3639_v14 = vsel %vm3152_vm2, %v9674_v12, 0.0 }
 0x232   :  { %7837 = vmatmul.mubr.msk.bf16.vlgmr.msra.gmra.mxu1 %vm3921_vm4, %v3868_v23  ;;  %3325 = vmax.xlane.f32.xlu1 %v3324_v3  ;;  %v3272_v19 = vpop.xlane.xlu1 %3271  ;;  %v3805_v57 = vmul.f32 %v8249_v53, %v9394_v56  ;;  %v3587_v63 = vpop.xlane.xlu0 %3586  ;;  %v3333_v53 = vsel %vm3152_vm2, %v9474_v46, -inf }
 0x233   :  { %v3384_v36 = vsub.f32 %v9272_v20, %v3272_v19  ;;  %3640 = vadd.xlane.f32.xlu0 %v3639_v14  ;;  %7847 = vmatpush3.bf16.msra.mxu1 %v4525_v43  ;;  %8262 = vpow2.f32 %v3485_v5  ;;  %v4663_v5 = vsel %vm3925_vm3, %v159_v62, 0  ;;  %v10584_v62 = vld [vmem:[#allocation16_spill] sm:$0xff] }
 0x234   :  { %v9685_v51 = vpop.eup %8250  ;;  %7848 = vmatprep.mubr.msk.bf16.mxu1 %vm8411_vm1, %v10580_v33  ;;  %7858 = vmatprep.subr.bf16.mxu1 %v10580_v33  ;;  %v3869_v56 = vpack.c.bf16 %v3805_v57, %v3805_v57  ;;  %8264 = vrcp.f32 %v3587_v63  ;;  %v160_v57 = vld [vmem:[%s10546_s2 + $0x22] sm:$0x3] }
 0x235   :  { %v8253_v54 = vpop.eup %8252  ;;  %v3487_v41 = vmul.f32 1.442695, %v3384_v36  ;;  %v3642_v20 = vsel %vm3152_vm2, %v9685_v51, 0.0 }
 0x236   :  { %v3806_v58 = vmul.f32 %v8253_v54, %v10581_v48  ;;  %3643 = vadd.xlane.f32.xlu1 %v3642_v20  ;;  %v3590_v27 = vpop.xlane.xlu1 %3589  ;;  %7843 = vmatmul.mubr.msk.bf16.vlgmr.msra.gmra.mxu0 %vm3921_vm4, %v3869_v56  ;;  %v3275_v39 = vpop.xlane.xlu0 %3274  ;;  %v161_v20 = vld [vmem:[%s10546_s2 + $0x24] sm:$0x3] }
 0x237   :  { %8266 = vpow2.f32 %v3487_v41  ;;  %3328 = vmax.xlane.f32.xlu0 %v3327_v8  ;;  %v3385_v25 = vsub.f32 %v9282_v61, %v3275_v39  ;;  %7853 = vmatpush3.bf16.msra.mxu0 %v4571_v24  ;;  %v3336_v24 = vsel %vm3152_vm2, %v9478_v52, -inf }
 0x238   :  { %v3870_v49 = vpack.c.bf16 %v3806_v58, %v3806_v58  ;;  %8268 = vrcp.f32 %v3590_v27  ;;  %7854 = vmatprep.mubr.msk.bf16.mxu0 %vm8411_vm1, %v10580_v33  ;;  %v9706_v22 = vpop.eup %8254  ;;  %7864 = vmatprep.subr.bf16.mxu0 %v10580_v33  ;;  %v10582_v27 = vld [vmem:[#allocation8_spill] sm:$0xff] }
 0x239   :  { %v8257_v47 = vpop.eup %8256  ;;  %v3489_v1 = vmul.f32 1.442695, %v3385_v25  ;;  %v3645_v3 = vsel %vm3152_vm2, %v9706_v22, 0.0 }
 0x23a   :  { %7849 = vmatmul.mubr.msk.bf16.vlgmr.msra.gmra.mxu1 %vm3921_vm4, %v3870_v49  ;;  %3331 = vmax.xlane.f32.xlu1 %v3330_v35  ;;  %v3278_v61 = vpop.xlane.xlu1 %3277  ;;  %v3807_v23 = vmul.f32 %v8257_v47, %v9412_v17  ;;  %v3593_v43 = vpop.xlane.xlu0 %3592  ;;  %v10583_v35 = vld [vmem:[#allocation2_spill] sm:$0xff]  ;;  %v3339_v47 = vsel %vm3152_vm2, %v10584_v62, -inf }
 0x23b   :  { %v3386_v28 = vsub.f32 %v9284_v59, %v3278_v61  ;;  %3646 = vadd.xlane.f32.xlu0 %v3645_v3  ;;  %7859 = vmatpush3.bf16.msra.mxu1 %v4617_v55  ;;  %8270 = vpow2.f32 %v3489_v1  ;;  %v4755_v1 = vsel %vm3925_vm3, %v161_v20, 0 }
 0x23c   :  { %v9717_v21 = vpop.eup %8258  ;;  %7860 = vmatprep.mubr.msk.bf16.mxu1 %vm8411_vm1, %v10580_v33  ;;  %7870 = vmatprep.subr.bf16.mxu1 %v10580_v33  ;;  %v3871_v17 = vpack.c.bf16 %v3807_v23, %v3807_v23  ;;  %8272 = vrcp.f32 %v3593_v43  ;;  %v162_v43 = vld [vmem:[%s10546_s2 + $0x26] sm:$0x3] }
 0x23d   :  { %v8261_v19 = vpop.eup %8260  ;;  %v3491_v14 = vmul.f32 1.442695, %v3386_v28  ;;  %v3648_v59 = vsel %vm3152_vm2, %v9717_v21, 0.0 }
 0x23e   :  { %v3808_v36 = vmul.f32 %v8261_v19, %v9414_v42  ;;  %3649 = vadd.xlane.f32.xlu1 %v3648_v59  ;;  %v3596_v63 = vpop.xlane.xlu1 %3595  ;;  %7855 = vmatmul.mubr.msk.bf16.vlgmr.msra.gmra.mxu0 %vm3921_vm4, %v3871_v17  ;;  %v3281_v8 = vpop.xlane.xlu0 %3280  ;;  %v4709_v42 = vsel %vm3925_vm3, %v160_v57, 0  ;;  %v10586_v57 = vld [vmem:[#allocation3_spill] sm:$0xff] }
 0x23f   :  { %8274 = vpow2.f32 %v3491_v14  ;;  %3334 = vmax.xlane.f32.xlu0 %v3333_v53  ;;  %v3387_v56 = vsub.f32 %v9300_v10, %v3281_v8  ;;  %7865 = vmatpush3.bf16.msra.mxu0 %v4663_v5  ;;  %v10585_v53 = vld [vmem:[#allocation9_spill] sm:$0xff]  ;;  %v3342_v14 = vsel %vm3152_vm2, %v9494_v0, -inf }
 0x240   :  { %v3872_v54 = vpack.c.bf16 %v3808_v36, %v3808_v36  ;;  %8276 = vrcp.f32 %v3596_v63  ;;  %7866 = vmatprep.mubr.msk.bf16.mxu0 %vm8411_vm1, %v10580_v33  ;;  %v9738_v41 = vpop.eup %8262  ;;  %7876 = vmatprep.subr.bf16.mxu0 %v10580_v33  ;;  %v4801_v63 = vsel %vm3925_vm3, %v162_v43, 0 }
 0x241   :  { %v8265_v6 = vpop.eup %8264  ;;  %v3493_v48 = vmul.f32 1.442695, %v3387_v56  ;;  %v3651_v58 = vsel %vm3152_vm2, %v9738_v41, 0.0 }
 0x242   :  { %7861 = vmatmul.mubr.msk.bf16.vlgmr.msra.gmra.mxu1 %vm3921_vm4, %v3872_v54  ;;  %3337 = vmax.xlane.f32.xlu1 %v3336_v24  ;;  %v3284_v10 = vpop.xlane.xlu1 %3283  ;;  %v3809_v39 = vmul.f32 %v8265_v6, %v10582_v27  ;;  %v3599_v25 = vpop.xlane.xlu0 %3598  ;;  %v163_v24 = vld [vmem:[%s10546_s2 + $0x28] sm:$0x3]  ;;  %v10587_v6 = vld [vmem:[#allocation10_spill] sm:$0xff] }
 0x243   :  { %v3388_v49 = vsub.f32 %v10583_v35, %v3284_v10  ;;  %3652 = vadd.xlane.f32.xlu0 %v3651_v58  ;;  %7871 = vmatpush3.bf16.msra.mxu1 %v4709_v42  ;;  %8278 = vpow2.f32 %v3493_v48  ;;  %v10588_v10 = vld [vmem:[#allocation4_spill] sm:$0xff]  ;;  %v4847_v35 = vsel %vm3925_vm3, %v163_v24, 0  ;;  %v165_v24 = vld [vmem:[%s10546_s2 + $0x2c] sm:$0x3] }
 0x244   :  { %v9749_v55 = vpop.eup %8266  ;;  %7872 = vmatprep.mubr.msk.bf16.mxu1 %vm8411_vm1, %v10580_v33  ;;  %7882 = vmatprep.subr.bf16.mxu1 %v10580_v33  ;;  %v3873_v3 = vpack.c.bf16 %v3809_v39, %v3809_v39  ;;  %8280 = vrcp.f32 %v3599_v25 }
 0x245   :  { %v8269_v61 = vpop.eup %8268  ;;  %v3495_v23 = vmul.f32 1.442695, %v3388_v49  ;;  %v3654_v28 = vsel %vm3152_vm2, %v9749_v55, 0.0 }
 0x246   :  { %v3810_v5 = vmul.f32 %v8269_v61, %v10585_v53  ;;  %3655 = vadd.xlane.f32.xlu1 %v3654_v28  ;;  %v3602_v19 = vpop.xlane.xlu1 %3601  ;;  %7867 = vmatmul.mubr.msk.bf16.vlgmr.msra.gmra.mxu0 %vm3921_vm4, %v3873_v3  ;;  %v3287_v17 = vpop.xlane.xlu0 %3286  ;;  %v164_v61 = vld [vmem:[%s10546_s2 + $0x2a] sm:$0x3] }
 0x247   :  { %8282 = vpow2.f32 %v3495_v23  ;;  %3340 = vmax.xlane.f32.xlu0 %v3339_v47  ;;  %v3389_v36 = vsub.f32 %v10586_v57, %v3287_v17  ;;  %7877 = vmatpush3.bf16.msra.mxu0 %v4755_v1  ;;  %v10589_v3 = vld [vmem:[#allocation11_spill] sm:$0xff]  ;;  %v4893_v17 = vsel %vm3925_vm3, %v164_v61, 0 }
 0x248   :  { %v3874_v59 = vpack.c.bf16 %v3810_v5, %v3810_v5  ;;  %8284 = vrcp.f32 %v3602_v19  ;;  %7878 = vmatprep.mubr.msk.bf16.mxu0 %vm8411_vm1, %v10580_v33  ;;  %v9770_v8 = vpop.eup %8270  ;;  %7888 = vmatprep.subr.bf16.mxu0 %v10580_v33  ;;  %v10590_v5 = vld [vmem:[#allocation5_spill] sm:$0xff] }
 0x249   :  { %v8273_v54 = vpop.eup %8272  ;;  %v3497_v56 = vmul.f32 1.442695, %v3389_v36  ;;  %v3657_v20 = vsel %vm3152_vm2, %v9770_v8, 0.0 }
 0x24a   :  { %7873 = vmatmul.mubr.msk.bf16.vlgmr.msra.gmra.mxu1 %vm3921_vm4, %v3874_v59  ;;  %3343 = vmax.xlane.f32.xlu1 %v3342_v14  ;;  %v3290_v42 = vpop.xlane.xlu1 %3289  ;;  %v3811_v48 = vmul.f32 %v8273_v54, %v10587_v6  ;;  %v3605_v27 = vpop.xlane.xlu0 %3604  ;;  %v10591_v54 = vld [vmem:[#allocation12_spill] sm:$0xff] }
 0x24b   :  { %v3390_v58 = vsub.f32 %v10588_v10, %v3290_v42  ;;  %3658 = vadd.xlane.f32.xlu0 %v3657_v20  ;;  %7883 = vmatpush3.bf16.msra.mxu1 %v4801_v63  ;;  %8286 = vpow2.f32 %v3497_v56  ;;  %v10592_v42 = vld [vmem:[#allocation6_spill] sm:$0xff] }
 0x24c   :  { %v9781_v39 = vpop.eup %8274  ;;  %7884 = vmatprep.mubr.msk.bf16.mxu1 %vm8411_vm1, %v10580_v33  ;;  %7894 = vmatprep.subr.bf16.mxu1 %v10580_v33  ;;  %v3875_v25 = vpack.c.bf16 %v3811_v48, %v3811_v48  ;;  %8288 = vrcp.f32 %v3605_v27 }
 0x24d   :  { %v8277_v49 = vpop.eup %8276  ;;  %v3499_v47 = vmul.f32 1.442695, %v3390_v58  ;;  %v3660_v1 = vsel %vm3152_vm2, %v9781_v39, 0.0 }
 0x24e   :  { %v3812_v23 = vmul.f32 %v8277_v49, %v10589_v3  ;;  %3661 = vadd.xlane.f32.xlu1 %v3660_v1  ;;  %v3608_v28 = vpop.xlane.xlu1 %3607  ;;  %7879 = vmatmul.mubr.msk.bf16.vlgmr.msra.gmra.mxu0 %vm3921_vm4, %v3875_v25  ;;  %v3293_v43 = vpop.xlane.xlu0 %3292  ;;  %v166_v49 = vld [vmem:[%s10546_s2 + $0x2e] sm:$0x3]  ;;  %v10593_v25 = vld [vmem:[#allocation13_spill] sm:$0xff] }
 0x24f   :  { %8290 = vpow2.f32 %v3499_v47  ;;  %v3391_v19 = vsub.f32 %v10590_v5, %v3293_v43  ;;  %7889 = vmatpush3.bf16.msra.mxu0 %v4847_v35  ;;  %7890 = vmatprep.mubr.msk.bf16.mxu0 %vm8411_vm1, %v10580_v33  ;;  %v4939_v35 = vsel %vm3925_vm3, %v165_v24, 0  ;;  %v4985_v61 = vsel %vm3925_vm3, %v166_v49, 0  ;;  %v167_v43 = vld [vmem:[%s10546_s2 + $0x30] sm:$0x3]  ;;  %v10595_v24 = vld [vmem:[#allocation15_spill] sm:$0xff] }
 0x250   :  { %v3876_v53 = vpack.c.bf16 %v3812_v23, %v3812_v23  ;;  %8292 = vrcp.f32 %v3608_v28  ;;  %v9798_v14 = vpop.eup %8278  ;;  %7900 = vmatprep.subr.bf16.mxu0 %v10580_v33 }
 0x251   :  { %v8281_v59 = vpop.eup %8280  ;;  %v3501_v57 = vmul.f32 1.442695, %v3391_v19  ;;  %v3663_v63 = vsel %vm3152_vm2, %v9798_v14, 0.0 }
 0x252   :  { %7885 = vmatmul.mubr.msk.bf16.vlgmr.msra.gmra.mxu1 %vm3921_vm4, %v3876_v53  ;;  %v3296_v36 = vpop.xlane.xlu1 %3295  ;;  %v3813_v56 = vmul.f32 %v8281_v59, %v10591_v54  ;;  %3664 = vadd.xlane.f32.xlu0 %v3663_v63  ;;  %v10594_v53 = vld [vmem:[#allocation14_spill] sm:$0xff]  ;;  %v168_v63 = vld [vmem:[%s10546_s2 + $0x32] sm:$0x3] }
 0x253   :  { %v3392_v20 = vsub.f32 %v10592_v42, %v3296_v36  ;;  %7895 = vmatpush3.bf16.msra.mxu1 %v4893_v17  ;;  %8294 = vpow2.f32 %v3501_v57  ;;  %7896 = vmatprep.mubr.msk.bf16.mxu1 %vm8411_vm1, %v10580_v33  ;;  %v5031_v36 = vsel %vm3925_vm3, %v167_v43, 0  ;;  %v5077_v42 = vsel %vm3925_vm3, %v168_v63, 0 }
 0x254   :  { %v9809_v6 = vpop.eup %8282  ;;  %7906 = vmatprep.subr.bf16.mxu1 %v10580_v33  ;;  %v3877_v10 = vpack.c.bf16 %v3813_v56, %v3813_v56 }
 0x255   :  { %v8285_v48 = vpop.eup %8284  ;;  %v3503_v58 = vmul.f32 1.442695, %v3392_v20  ;;  %v3666_v27 = vsel %vm3152_vm2, %v9809_v6, 0.0 }
 0x256   :  { %v3814_v47 = vmul.f32 %v8285_v48, %v10593_v25  ;;  %3667 = vadd.xlane.f32.xlu1 %v3666_v27  ;;  %7891 = vmatmul.mubr.msk.bf16.vlgmr.msra.gmra.mxu0 %vm3921_vm4, %v3877_v10 }
 0x257   :  { %8296 = vpow2.f32 %v3503_v58  ;;  %7901 = vmatpush3.bf16.msra.mxu0 %v4939_v35  ;;  %7902 = vmatprep.mubr.msk.bf16.mxu0 %vm8411_vm1, %v10580_v33 }
 0x258   :  { %v3878_v1 = vpack.c.bf16 %v3814_v47, %v3814_v47  ;;  %v9825_v3 = vpop.eup %8286  ;;  %7912 = vmatprep.subr.bf16.mxu0 %v10580_v33 }
 0x259   :  { %v8289_v23 = vpop.eup %8288  ;;  %v3669_v28 = vsel %vm3152_vm2, %v9825_v3, 0.0 }
 0x25a   :  { %7897 = vmatmul.mubr.msk.bf16.vlgmr.msra.gmra.mxu1 %vm3921_vm4, %v3878_v1  ;;  %v3815_v5 = vmul.f32 %v8289_v23, %v10594_v53  ;;  %3670 = vadd.xlane.f32.xlu0 %v3669_v28 }
 0x25b   :  { %7907 = vmatpush3.bf16.msra.mxu1 %v4985_v61  ;;  %7908 = vmatprep.mubr.msk.bf16.mxu1 %vm8411_vm1, %v10580_v33 }
 0x25c   :  { %v9835_v19 = vpop.eup %8290  ;;  %7918 = vmatprep.subr.bf16.mxu1 %v10580_v33  ;;  %v3879_v59 = vpack.c.bf16 %v3815_v5, %v3815_v5 }
 0x25d   :  { %v8293_v17 = vpop.eup %8292  ;;  %v3672_v57 = vsel %vm3152_vm2, %v9835_v19, 0.0 }
 0x25e   :  { %v3816_v54 = vmul.f32 %v8293_v17, %v10595_v24  ;;  %3673 = vadd.xlane.f32.xlu1 %v3672_v57  ;;  %7903 = vmatmul.mubr.msk.bf16.vlgmr.msra.gmra.mxu0 %vm3921_vm4, %v3879_v59  ;;  %v169_v59 = vld [vmem:[%s10546_s2 + $0x34] sm:$0x3] }
 0x25f   :  { %7913 = vmatpush3.bf16.msra.mxu0 %v5031_v36  ;;  %7914 = vmatprep.mubr.msk.bf16.mxu0 %vm8411_vm1, %v10580_v33 }
 0x260   :  { %v3880_v56 = vpack.c.bf16 %v3816_v54, %v3816_v54  ;;  %v9851_v20 = vpop.eup %8294  ;;  %7924 = vmatprep.subr.bf16.mxu0 %v10580_v33  ;;  %v5123_v54 = vsel %vm3925_vm3, %v169_v59, 0 }
 0x261   :  { %v3675_v48 = vsel %vm3152_vm2, %v9851_v20, 0.0 }
 0x262   :  { %7909 = vmatmul.mubr.msk.bf16.vlgmr.msra.gmra.mxu1 %vm3921_vm4, %v3880_v56  ;;  %3676 = vadd.xlane.f32.xlu0 %v3675_v48 }
 0x263   :  { %7919 = vmatpush3.bf16.msra.mxu1 %v5077_v42  ;;  %7920 = vmatprep.mubr.msk.bf16.mxu1 %vm8411_vm1, %v10580_v33 }
 0x264   :  { %v9857_v10 = vpop.eup %8296  ;;  %7930 = vmatprep.subr.bf16.mxu1 %v10580_v33 }
 0x265   :  { %v3678_v58 = vsel %vm3152_vm2, %v9857_v10, 0.0 }
 0x266   :  { %3679 = vadd.xlane.f32.xlu1 %v3678_v58 }
 0x293   :  { %v3611_v27 = vpop.xlane.xlu0 %3610 }
 0x294   :  { %8298 = vrcp.f32 %v3611_v27 }
 0x297   :  { %v3614_v35 = vpop.xlane.xlu1 %3613 }
 0x298   :  { %8300 = vrcp.f32 %v3614_v35  ;;  %v3299_v49 = vpop.xlane.xlu0 %3298 }
 0x299   :  { %v3393_v25 = vsub.f32 %v9368_v26, %v3299_v49  ;;  %v171_v49 = vld [vmem:[%s10546_s2 + $0x38] sm:$0x3] }
 0x29b   :  { %v3505_v47 = vmul.f32 1.442695, %v3393_v25  ;;  %v3302_v1 = vpop.xlane.xlu1 %3301 }
 0x29c   :  { %v3394_v61 = vsub.f32 %v9370_v31, %v3302_v1  ;;  %v3617_v23 = vpop.xlane.xlu0 %3616 }
 0x29d   :  { %8302 = vpow2.f32 %v3505_v47 }
 0x29e   :  { %v3507_v28 = vmul.f32 1.442695, %v3394_v61  ;;  %8304 = vrcp.f32 %v3617_v23 }
 0x29f   :  { %v3620_v43 = vpop.xlane.xlu1 %3619 }
 0x2a0   :  { %8306 = vpow2.f32 %v3507_v28  ;;  %v3305_v53 = vpop.xlane.xlu0 %3304 }
 0x2a1   :  { %v8299_v5 = vpop.eup %8298  ;;  %8308 = vrcp.f32 %v3620_v43  ;;  %v3395_v17 = vsub.f32 %v9386_v30, %v3305_v53  ;;  %v170_v30 = vld [vmem:[%s10546_s2 + $0x36] sm:$0x3]  ;;  %v5215_v53 = vsel %vm3925_vm3, %v171_v49, 0 }
 0x2a2   :  { %v3817_v26 = vmul.f32 %v8299_v5, %v9514_v18  ;;  %v5169_v27 = vsel %vm3925_vm3, %v170_v30, 0 }
 0x2a3   :  { %v3509_v57 = vmul.f32 1.442695, %v3395_v17  ;;  %v3308_v36 = vpop.xlane.xlu1 %3307 }
 0x2a4   :  { %v3881_v31 = vpack.c.bf16 %v3817_v26, %v3817_v26  ;;  %v3396_v63 = vsub.f32 %v9388_v32, %v3308_v36  ;;  %v3623_v24 = vpop.xlane.xlu0 %3622 }
 0x2a5   :  { %v8301_v56 = vpop.eup %8300  ;;  %8310 = vpow2.f32 %v3509_v57 }
 0x2a6   :  { %v3818_v42 = vmul.f32 %v8301_v56, %v9528_v50  ;;  %v3511_v48 = vmul.f32 1.442695, %v3396_v63  ;;  %8312 = vrcp.f32 %v3623_v24  ;;  %7915 = vmatmul.mubr.msk.bf16.vlgmr.msra.gmra.mxu0 %vm3921_vm4, %v3881_v31 }
 0x2a7   :  { %v3626_v18 = vpop.xlane.xlu1 %3625  ;;  %7925 = vmatpush3.bf16.msra.mxu0 %v5123_v54  ;;  %7926 = vmatprep.mubr.msk.bf16.mxu0 %vm8411_vm1, %v10580_v33 }
 0x2a8   :  { %v3882_v32 = vpack.c.bf16 %v3818_v42, %v3818_v42  ;;  %8314 = vpow2.f32 %v3511_v48  ;;  %v3311_v58 = vpop.xlane.xlu0 %3310  ;;  %7936 = vmatprep.subr.bf16.mxu0 %v10580_v33 }
 0x2a9   :  { %8316 = vrcp.f32 %v3626_v18  ;;  %v3397_v35 = vsub.f32 %v9404_v45, %v3311_v58 }
 0x2aa   :  { %v9883_v50 = vpop.eup %8302  ;;  %7921 = vmatmul.mubr.msk.bf16.vlgmr.msra.gmra.mxu1 %vm3921_vm4, %v3882_v32 }
 0x2ab   :  { %v8305_v25 = vpop.eup %8304  ;;  %v3513_v47 = vmul.f32 1.442695, %v3397_v35  ;;  %v3314_v1 = vpop.xlane.xlu1 %3313  ;;  %v3681_v61 = vsel %vm3152_vm2, %v9883_v50, 0.0  ;;  %7931 = vmatpush3.bf16.msra.mxu1 %v5169_v27  ;;  %7932 = vmatprep.mubr.msk.bf16.mxu1 %vm8411_vm1, %v10580_v33 }
 0x2ac   :  { %v3819_v45 = vmul.f32 %v8305_v25, %v9542_v40  ;;  %v3398_v23 = vsub.f32 %v9406_v11, %v3314_v1  ;;  %v3629_v28 = vpop.xlane.xlu0 %3628  ;;  %3682 = vadd.xlane.f32.xlu0 %v3681_v61  ;;  %7942 = vmatprep.subr.bf16.mxu1 %v10580_v33  ;;  %v172_v11 = vld [vmem:[%s10546_s2 + $0x3a] sm:$0x3] }
 0x2ad   :  { %v9896_v43 = vpop.eup %8306  ;;  %8318 = vpow2.f32 %v3513_v47  ;;  %v5261_v24 = vsel %vm3925_vm3, %v172_v11, 0 }
 0x2ae   :  { %v8309_v5 = vpop.eup %8308  ;;  %v3883_v17 = vpack.c.bf16 %v3819_v45, %v3819_v45  ;;  %v3515_v59 = vmul.f32 1.442695, %v3398_v23  ;;  %8320 = vrcp.f32 %v3629_v28  ;;  %v3684_v26 = vsel %vm3152_vm2, %v9896_v43, 0.0 }
 0x2af   :  { %v3820_v40 = vmul.f32 %v8309_v5, %v9557_v38  ;;  %3685 = vadd.xlane.f32.xlu1 %v3684_v26  ;;  %v3632_v57 = vpop.xlane.xlu1 %3631  ;;  %v173_v38 = vld [vmem:[%s10546_s2 + $0x3c] sm:$0x3] }
 0x2b0   :  { %8322 = vpow2.f32 %v3515_v59  ;;  %7927 = vmatmul.mubr.msk.bf16.vlgmr.msra.gmra.mxu0 %vm3921_vm4, %v3883_v17  ;;  %v3317_v36 = vpop.xlane.xlu0 %3316  ;;  %v5307_v27 = vsel %vm3925_vm3, %v173_v38, 0 }
 0x2b1   :  { %v3884_v31 = vpack.c.bf16 %v3820_v40, %v3820_v40  ;;  %8324 = vrcp.f32 %v3632_v57  ;;  %v3399_v63 = vsub.f32 %v9422_v44, %v3317_v36  ;;  %7937 = vmatpush3.bf16.msra.mxu0 %v5215_v53  ;;  %7938 = vmatprep.mubr.msk.bf16.mxu0 %vm8411_vm1, %v10580_v33 }
 0x2b2   :  { %v9910_v54 = vpop.eup %8310  ;;  %7948 = vmatprep.subr.bf16.mxu0 %v10580_v33 }
 0x2b3   :  { %v8313_v56 = vpop.eup %8312  ;;  %v3517_v30 = vmul.f32 1.442695, %v3399_v63  ;;  %7933 = vmatmul.mubr.msk.bf16.vlgmr.msra.gmra.mxu1 %vm3921_vm4, %v3884_v31  ;;  %v3320_v42 = vpop.xlane.xlu1 %3319  ;;  %v3687_v44 = vsel %vm3152_vm2, %v9910_v54, 0.0 }
 0x2b4   :  { %v3821_v48 = vmul.f32 %v8313_v56, %v9579_v7  ;;  %v3400_v18 = vsub.f32 %v9428_v4, %v3320_v42  ;;  %v3635_v32 = vpop.xlane.xlu0 %3634  ;;  %3688 = vadd.xlane.f32.xlu0 %v3687_v44  ;;  %7943 = vmatpush3.bf16.msra.mxu1 %v5261_v24  ;;  %v174_v7 = vld [vmem:[%s10546_s2 + $0x3e] sm:$0x3] }
 0x2b5   :  { %v9921_v58 = vpop.eup %8314  ;;  %8326 = vpow2.f32 %v3517_v30  ;;  %7944 = vmatprep.mubr.msk.bf16.mxu1 %vm8411_vm1, %v10580_v33  ;;  %7954 = vmatprep.subr.bf16.mxu1 %v10580_v33  ;;  %v5353_v28 = vsel %vm3925_vm3, %v174_v7, 0 }
 0x2b6   :  { %v8317_v35 = vpop.eup %8316  ;;  %v3885_v49 = vpack.c.bf16 %v3821_v48, %v3821_v48  ;;  %v3519_v25 = vmul.f32 1.442695, %v3400_v18  ;;  %8328 = vrcp.f32 %v3635_v32  ;;  %v3690_v4 = vsel %vm3152_vm2, %v9921_v58, 0.0 }
 0x2b7   :  { %v3822_v47 = vmul.f32 %v8317_v35, %v9589_v9  ;;  %3691 = vadd.xlane.f32.xlu1 %v3690_v4  ;;  %v3638_v1 = vpop.xlane.xlu1 %3637  ;;  %v175_v9 = vld [vmem:[%s10546_s2 + $0x40] sm:$0x3] }
 0x2b8   :  { %8330 = vpow2.f32 %v3519_v25  ;;  %7939 = vmatmul.mubr.msk.bf16.vlgmr.msra.gmra.mxu0 %vm3921_vm4, %v3885_v49  ;;  %v3323_v61 = vpop.xlane.xlu0 %3322  ;;  %v5399_v36 = vsel %vm3925_vm3, %v175_v9, 0 }
 0x2b9   :  { %v3886_v45 = vpack.c.bf16 %v3822_v47, %v3822_v47  ;;  %8332 = vrcp.f32 %v3638_v1  ;;  %v3401_v23 = vsub.f32 %v9440_v29, %v3323_v61  ;;  %7949 = vmatpush3.bf16.msra.mxu0 %v5307_v27  ;;  %7950 = vmatprep.mubr.msk.bf16.mxu0 %vm8411_vm1, %v10580_v33 }
 0x2ba   :  { %v9938_v53 = vpop.eup %8318  ;;  %7960 = vmatprep.subr.bf16.mxu0 %v10580_v33 }
 0x2bb   :  { %v8321_v5 = vpop.eup %8320  ;;  %v3521_v17 = vmul.f32 1.442695, %v3401_v23  ;;  %7945 = vmatmul.mubr.msk.bf16.vlgmr.msra.gmra.mxu1 %vm3921_vm4, %v3886_v45  ;;  %v3326_v59 = vpop.xlane.xlu1 %3325  ;;  %v3693_v29 = vsel %vm3152_vm2, %v9938_v53, 0.0  ;;  %v178_v23 = vld [vmem:[%s10546_s2 + $0x46] sm:$0x3] }
 0x2bc   :  { %v3823_v26 = vmul.f32 %v8321_v5, %v9610_v37  ;;  %v3402_v11 = vsub.f32 %v9446_v60, %v3326_v59  ;;  %v3641_v40 = vpop.xlane.xlu0 %3640  ;;  %3694 = vadd.xlane.f32.xlu0 %v3693_v29  ;;  %7955 = vmatpush3.bf16.msra.mxu1 %v5353_v28  ;;  %v176_v37 = vld [vmem:[%s10546_s2 + $0x42] sm:$0x3] }
 0x2bd   :  { %v9949_v57 = vpop.eup %8322  ;;  %8334 = vpow2.f32 %v3521_v17  ;;  %7956 = vmatprep.mubr.msk.bf16.mxu1 %vm8411_vm1, %v10580_v33  ;;  %7966 = vmatprep.subr.bf16.mxu1 %v10580_v33  ;;  %v5445_v48 = vsel %vm3925_vm3, %v176_v37, 0 }
 0x2be   :  { %v8325_v31 = vpop.eup %8324  ;;  %v3887_v63 = vpack.c.bf16 %v3823_v26, %v3823_v26  ;;  %v3523_v24 = vmul.f32 1.442695, %v3402_v11  ;;  %8336 = vrcp.f32 %v3641_v40  ;;  %v3696_v60 = vsel %vm3152_vm2, %v9949_v57, 0.0 }
 0x2bf   :  { %v3824_v38 = vmul.f32 %v8325_v31, %v9621_v13  ;;  %3697 = vadd.xlane.f32.xlu1 %v3696_v60  ;;  %v3644_v56 = vpop.xlane.xlu1 %3643  ;;  %v177_v13 = vld [vmem:[%s10546_s2 + $0x44] sm:$0x3]  ;;  %v5537_v40 = vsel %vm3925_vm3, %v178_v23, 0 }
 0x2c0   :  { %8338 = vpow2.f32 %v3523_v24  ;;  %7951 = vmatmul.mubr.msk.bf16.vlgmr.msra.gmra.mxu0 %vm3921_vm4, %v3887_v63  ;;  %v3329_v30 = vpop.xlane.xlu0 %3328  ;;  %v5491_v1 = vsel %vm3925_vm3, %v177_v13, 0  ;;  %v179_v63 = vld [vmem:[%s10546_s2 + $0x48] sm:$0x3] }
 0x2c1   :  { %v3888_v42 = vpack.c.bf16 %v3824_v38, %v3824_v38  ;;  %8340 = vrcp.f32 %v3644_v56  ;;  %v3403_v44 = vsub.f32 %v9458_v34, %v3329_v30  ;;  %7961 = vmatpush3.bf16.msra.mxu0 %v5399_v36  ;;  %7962 = vmatprep.mubr.msk.bf16.mxu0 %vm8411_vm1, %v10580_v33 }
 0x2c2   :  { %v9966_v18 = vpop.eup %8326  ;;  %7972 = vmatprep.subr.bf16.mxu0 %v10580_v33 }
 0x2c3   :  { %v8329_v32 = vpop.eup %8328  ;;  %v3525_v27 = vmul.f32 1.442695, %v3403_v44  ;;  %7957 = vmatmul.mubr.msk.bf16.vlgmr.msra.gmra.mxu1 %vm3921_vm4, %v3888_v42  ;;  %v3332_v35 = vpop.xlane.xlu1 %3331  ;;  %v3699_v34 = vsel %vm3152_vm2, %v9966_v18, 0.0 }
 0x2c4   :  { %v3825_v49 = vmul.f32 %v8329_v32, %v9642_v2  ;;  %v3404_v25 = vsub.f32 %v9462_v15, %v3332_v35  ;;  %v3647_v4 = vpop.xlane.xlu0 %3646  ;;  %3700 = vadd.xlane.f32.xlu0 %v3699_v34  ;;  %7967 = vmatpush3.bf16.msra.mxu1 %v5445_v48 }
 0x2c5   :  { %v9977_v7 = vpop.eup %8330  ;;  %8342 = vpow2.f32 %v3525_v27  ;;  %v3963_v47 = vpop.f32.mrf.mxu0  ;;  %7968 = vmatprep.mubr.msk.bf16.mxu1 %vm8411_vm1, %v10580_v33  ;;  %7978 = vmatprep.subr.bf16.mxu1 %v10580_v33 }
 0x2c6   :  { %v8333_v61 = vpop.eup %8332  ;;  %v3889_v45 = vpack.c.bf16 %v3825_v49, %v3825_v49  ;;  %v3527_v2 = vmul.f32 1.442695, %v3404_v25  ;;  %8344 = vrcp.f32 %v3647_v4  ;;  %v6867_v15 = vpack.c.bf16 %v3963_v47, %v3963_v47  ;;  %v180_v49 = vld [vmem:[%s10546_s2 + $0x4a] sm:$0x3] }
 0x2c7   :  { %v3826_v28 = vmul.f32 %v8333_v61, %v9653_v16  ;;  %v3702_v9 = vsel %vm3152_vm2, %v9977_v7, 0.0  ;;  %v3650_v5 = vpop.xlane.xlu1 %3649  ;;  %v7772_v17 = vpop.f32.mrf.mxu0 }
 0x2c8   :  { %8346 = vpow2.f32 %v3527_v2  ;;  %6932 = vst.msk [vmem:[%s10547_s3] sm:$0x3] %vm6931_vm5, %v6867_v15  ;;  %7963 = vmatmul.mubr.msk.bf16.vlgmr.msra.gmra.mxu0 %vm3921_vm4, %v3889_v45  ;;  %3703 = vadd.xlane.f32.xlu1 %v3702_v9  ;;  %v3335_v59 = vpop.xlane.xlu0 %3334 }
 0x2c9   :  { %v3890_v29 = vpack.c.bf16 %v3826_v28, %v3826_v28  ;;  %8348 = vrcp.f32 %v3650_v5  ;;  %v3405_v26 = vsub.f32 %v9474_v46, %v3335_v59  ;;  %v3966_v16 = vpop.f32.mrf.mxu0  ;;  %v4009_v11 = vpop.f32.mrf.mxu1  ;;  %7973 = vmatpush3.bf16.msra.mxu0 %v5491_v1  ;;  %7974 = vmatprep.mubr.msk.bf16.mxu0 %vm8411_vm1, %v10580_v33  ;;  %v181_v5 = vld [vmem:[%s10546_s2 + $0x4c] sm:$0x3] }
 0x2ca   :  { %v9998_v36 = vpop.eup %8334  ;;  %v6868_v31 = vpack.c.bf16 %v4009_v11, %v4009_v11  ;;  %7984 = vmatprep.subr.bf16.mxu0 %v10580_v33 }
 0x2cb   :  { %v8337_v24 = vpop.eup %8336  ;;  %v3529_v60 = vmul.f32 1.442695, %v3405_v26  ;;  %7969 = vmatmul.mubr.msk.bf16.vlgmr.msra.gmra.mxu1 %vm3921_vm4, %v3890_v29  ;;  %v7778_v46 = vpop.f32.mrf.mxu1  ;;  %v3705_v38 = vsel %vm3152_vm2, %v9998_v36, 0.0 }
 0x2cc   :  { %v3338_v37 = vpop.xlane.xlu1 %3337  ;;  %v3827_v56 = vmul.f32 %v8337_v24, %v9674_v12  ;;  %6933 = vst.msk [vmem:[%s10547_s3 + $0x2] sm:$0x3] %vm6931_vm5, %v6868_v31  ;;  %v3653_v42 = vpop.xlane.xlu0 %3652  ;;  %3706 = vadd.xlane.f32.xlu0 %v3705_v38  ;;  %7979 = vmatpush3.bf16.msra.mxu1 %v5537_v40  ;;  %v5583_v12 = vsel %vm3925_vm3, %v179_v63, 0 }
 0x2cd   :  { %v3406_v30 = vsub.f32 %v9478_v52, %v3338_v37  ;;  %v7773_v44 = vpop.f32.mrf.mxu0  ;;  %v10013_v48 = vpop.eup %8338  ;;  %8350 = vpow2.f32 %v3529_v60  ;;  %7980 = vmatprep.mubr.msk.bf16.mxu1 %vm8411_vm1, %v10580_v33  ;;  %7990 = vmatprep.subr.bf16.mxu1 %v10580_v33 }
 0x2ce   :  { %v4012_v13 = vpop.f32.mrf.mxu1  ;;  %v8341_v32 = vpop.eup %8340  ;;  %v3891_v27 = vpack.c.bf16 %v3827_v56, %v3827_v56  ;;  %8352 = vrcp.f32 %v3653_v42  ;;  %v3708_v34 = vsel %vm3152_vm2, %v10013_v48, 0.0  ;;  %v182_v56 = vld [vmem:[%s10546_s2 + $0x4e] sm:$0x3] }
 0x2cf   :  { %v3531_v35 = vmul.f32 1.442695, %v3406_v30  ;;  %v4055_v52 = vpop.f32.mrf.mxu0  ;;  %v3828_v25 = vmul.f32 %v8341_v32, %v9685_v51  ;;  %3709 = vadd.xlane.f32.xlu1 %v3708_v34  ;;  %v5629_v51 = vsel %vm3925_vm3, %v180_v49, 0 }
 0x2d0   :  { %v6869_v4 = vpack.c.bf16 %v4055_v52, %v4055_v52  ;;  %v7779_v47 = vpop.f32.mrf.mxu1  ;;  %v3656_v1 = vpop.xlane.xlu1 %3655  ;;  %7975 = vmatmul.mubr.msk.bf16.vlgmr.msra.gmra.mxu0 %vm3921_vm4, %v3891_v27 }
 0x2d1   :  { %8354 = vpow2.f32 %v3531_v35  ;;  %v3341_v61 = vpop.xlane.xlu0 %3340  ;;  %v7784_v45 = vpop.f32.mrf.mxu0  ;;  %v3892_v2 = vpack.c.bf16 %v3828_v25, %v3828_v25  ;;  %7985 = vmatpush3.bf16.msra.mxu0 %v5583_v12  ;;  %7986 = vmatprep.mubr.msk.bf16.mxu0 %vm8411_vm1, %v10580_v33  ;;  %v5721_v35 = vsel %vm3925_vm3, %v182_v56, 0  ;;  %v183_v47 = vld [vmem:[%s10546_s2 + $0x50] sm:$0x3] }
 0x2d2   :  { %6934 = vst.msk [vmem:[%s10547_s3 + $0x4] sm:$0x3] %vm6931_vm5, %v6869_v4  ;;  %8356 = vrcp.f32 %v3656_v1  ;;  %v3407_v15 = vsub.f32 %v10584_v62, %v3341_v61  ;;  %v10034_v23 = vpop.eup %8342  ;;  %v4101_v9 = vpop.f32.mrf.mxu1  ;;  %7996 = vmatprep.subr.bf16.mxu0 %v10580_v33 }
 0x2d3   :  { %v4058_v28 = vpop.f32.mrf.mxu0  ;;  %v8345_v17 = vpop.eup %8344  ;;  %v6870_v29 = vpack.c.bf16 %v4101_v9, %v4101_v9  ;;  %7981 = vmatmul.mubr.msk.bf16.vlgmr.msra.gmra.mxu1 %vm3921_vm4, %v3892_v2  ;;  %v3711_v26 = vsel %vm3152_vm2, %v10034_v23, 0.0 }
 0x2d4   :  { %v3533_v59 = vmul.f32 1.442695, %v3407_v15  ;;  %v3344_v62 = vpop.xlane.xlu1 %3343  ;;  %v3829_v16 = vmul.f32 %v8345_v17, %v9706_v22  ;;  %v7790_v11 = vpop.f32.mrf.mxu1  ;;  %3712 = vadd.xlane.f32.xlu0 %v3711_v26  ;;  %7991 = vmatpush3.bf16.msra.mxu1 %v5629_v51  ;;  %v5675_v22 = vsel %vm3925_vm3, %v181_v5, 0  ;;  %v5767_v5 = vsel %vm3925_vm3, %v183_v47, 0  ;;  %v184_v17 = vld [vmem:[%s10546_s2 + $0x52] sm:$0x3] }
 0x2d5   :  { %v3408_v40 = vsub.f32 %v9494_v0, %v3344_v62  ;;  %v3659_v31 = vpop.xlane.xlu0 %3658  ;;  %v10045_v63 = vpop.eup %8346  ;;  %6935 = vst.msk [vmem:[%s10547_s3 + $0x6] sm:$0x3] %vm6931_vm5, %v6870_v29  ;;  %7992 = vmatprep.mubr.msk.bf16.mxu1 %vm8411_vm1, %v10580_v33  ;;  %8002 = vmatprep.subr.bf16.mxu1 %v10580_v33 }
 0x2d6   :  { %8358 = vpow2.f32 %v3533_v59  ;;  %v7785_v24 = vpop.f32.mrf.mxu0  ;;  %v8349_v0 = vpop.eup %8348  ;;  %v3893_v60 = vpack.c.bf16 %v3829_v16, %v3829_v16  ;;  %v3714_v38 = vsel %vm3152_vm2, %v10045_v63, 0.0 }
 0x2d7   :  { %v3535_v46 = vmul.f32 1.442695, %v3408_v40  ;;  %8360 = vrcp.f32 %v3659_v31  ;;  %v4104_v37 = vpop.f32.mrf.mxu1  ;;  %v3830_v30 = vmul.f32 %v8349_v0, %v9717_v21  ;;  %3715 = vadd.xlane.f32.xlu1 %v3714_v38  ;;  %v5813_v31 = vsel %vm3925_vm3, %v184_v17, 0 }
 0x2d8   :  { %v4147_v42 = vpop.f32.mrf.mxu0  ;;  %v3662_v44 = vpop.xlane.xlu1 %3661  ;;  %7987 = vmatmul.mubr.msk.bf16.vlgmr.msra.gmra.mxu0 %vm3921_vm4, %v3893_v60  ;;  %v185_v37 = vld [vmem:[%s10546_s2 + $0x54] sm:$0x3] }
 0x2d9   :  { %8362 = vpow2.f32 %v3535_v46  ;;  %v6871_v13 = vpack.c.bf16 %v4147_v42, %v4147_v42  ;;  %v7791_v12 = vpop.f32.mrf.mxu1  ;;  %v3894_v32 = vpack.c.bf16 %v3830_v30, %v3830_v30  ;;  %7997 = vmatpush3.bf16.msra.mxu0 %v5675_v22  ;;  %7998 = vmatprep.mubr.msk.bf16.mxu0 %vm8411_vm1, %v10580_v33 }
 0x2da   :  { %8364 = vrcp.f32 %v3662_v44  ;;  %v7796_v27 = vpop.f32.mrf.mxu0  ;;  %v10065_v52 = vpop.eup %8350  ;;  %8008 = vmatprep.subr.bf16.mxu0 %v10580_v33 }
 0x2db   :  { %6936 = vst.msk [vmem:[%s10547_s3 + $0x8] sm:$0x3] %vm6931_vm5, %v6871_v13  ;;  %v4193_v21 = vpop.f32.mrf.mxu1  ;;  %v8353_v34 = vpop.eup %8352  ;;  %7993 = vmatmul.mubr.msk.bf16.vlgmr.msra.gmra.mxu1 %vm3921_vm4, %v3894_v32  ;;  %v3717_v4 = vsel %vm3152_vm2, %v10065_v52, 0.0  ;;  %v5859_v27 = vsel %vm3925_vm3, %v185_v37, 0 }
 0x2dc   :  { %v4150_v49 = vpop.f32.mrf.mxu0  ;;  %v6872_v25 = vpack.c.bf16 %v4193_v21, %v4193_v21  ;;  %v3831_v1 = vmul.f32 %v8353_v34, %v9738_v41  ;;  %3718 = vadd.xlane.f32.xlu0 %v3717_v4  ;;  %v3665_v45 = vpop.xlane.xlu0 %3664  ;;  %8003 = vmatpush3.bf16.msra.mxu1 %v5721_v35  ;;  %v186_v35 = vld [vmem:[%s10546_s2 + $0x56] sm:$0x3] }
 0x2dd   :  { %v7802_v61 = vpop.f32.mrf.mxu1  ;;  %8366 = vrcp.f32 %v3665_v45  ;;  %8004 = vmatprep.mubr.msk.bf16.mxu1 %vm8411_vm1, %v10580_v33  ;;  %8014 = vmatprep.subr.bf16.mxu1 %v10580_v33 }
 0x2de   :  { %v10079_v2 = vpop.eup %8354  ;;  %6937 = vst.msk [vmem:[%s10547_s3 + $0xa] sm:$0x3] %vm6931_vm5, %v6872_v25  ;;  %v7797_v15 = vpop.f32.mrf.mxu0  ;;  %v3895_v41 = vpack.c.bf16 %v3831_v1, %v3831_v1  ;;  %v5905_v61 = vsel %vm3925_vm3, %v186_v35, 0  ;;  %v190_v35 = vld [vmem:[%s10546_s2 + $0x5e] sm:$0x3] }
 0x2df   :  { %v8357_v51 = vpop.eup %8356  ;;  %v4196_v28 = vpop.f32.mrf.mxu1  ;;  %v3720_v9 = vsel %vm3152_vm2, %v10079_v2, 0.0 }
 0x2e0   :  { %v3832_v59 = vmul.f32 %v8357_v51, %v9749_v55  ;;  %v4239_v29 = vpop.f32.mrf.mxu0  ;;  %3721 = vadd.xlane.f32.xlu1 %v3720_v9  ;;  %v3668_v62 = vpop.xlane.xlu1 %3667  ;;  %7999 = vmatmul.mubr.msk.bf16.vlgmr.msra.gmra.mxu0 %vm3921_vm4, %v3895_v41  ;;  %v187_v28 = vld [vmem:[%s10546_s2 + $0x58] sm:$0x3] }
 0x2e1   :  { %v6873_v26 = vpack.c.bf16 %v4239_v29, %v4239_v29  ;;  %v7803_v16 = vpop.f32.mrf.mxu1  ;;  %8368 = vrcp.f32 %v3668_v62  ;;  %8009 = vmatpush3.bf16.msra.mxu0 %v5767_v5  ;;  %8010 = vmatprep.mubr.msk.bf16.mxu0 %vm8411_vm1, %v10580_v33 }
 0x2e2   :  { %v3896_v11 = vpack.c.bf16 %v3832_v59, %v3832_v59  ;;  %v7808_v40 = vpop.f32.mrf.mxu0  ;;  %8020 = vmatprep.subr.bf16.mxu0 %v10580_v33  ;;  %v188_v16 = vld [vmem:[%s10546_s2 + $0x5a] sm:$0x3] }
 0x2e3   :  { %v10099_v24 = vpop.eup %8358  ;;  %6938 = vst.msk [vmem:[%s10547_s3 + $0xc] sm:$0x3] %vm6931_vm5, %v6873_v26  ;;  %v4285_v55 = vpop.f32.mrf.mxu1  ;;  %v5951_v26 = vsel %vm3925_vm3, %v187_v28, 0 }
 0x2e4   :  { %v8361_v22 = vpop.eup %8360  ;;  %v4242_v0 = vpop.f32.mrf.mxu0  ;;  %v6874_v60 = vpack.c.bf16 %v4285_v55, %v4285_v55  ;;  %8005 = vmatmul.mubr.msk.bf16.vlgmr.msra.gmra.mxu1 %vm3921_vm4, %v3896_v11  ;;  %v3723_v46 = vsel %vm3152_vm2, %v10099_v24, 0.0 }
 0x2e5   :  { %v3833_v38 = vmul.f32 %v8361_v22, %v9770_v8  ;;  %v7814_v56 = vpop.f32.mrf.mxu1  ;;  %3724 = vadd.xlane.f32.xlu0 %v3723_v46  ;;  %v3671_v30 = vpop.xlane.xlu0 %3670  ;;  %8015 = vmatpush3.bf16.msra.mxu1 %v5813_v31 }
 0x2e6   :  { %v10113_v42 = vpop.eup %8362  ;;  %6939 = vst.msk [vmem:[%s10547_s3 + $0xe] sm:$0x3] %vm6931_vm5, %v6874_v60  ;;  %8370 = vrcp.f32 %v3671_v30  ;;  %v7809_v44 = vpop.f32.mrf.mxu0  ;;  %8016 = vmatprep.mubr.msk.bf16.mxu1 %vm8411_vm1, %v10580_v33  ;;  %8026 = vmatprep.subr.bf16.mxu1 %v10580_v33  ;;  %v189_v30 = vld [vmem:[%s10546_s2 + $0x5c] sm:$0x3] }
 0x2e7   :  { %v8365_v13 = vpop.eup %8364  ;;  %v3897_v8 = vpack.c.bf16 %v3833_v38, %v3833_v38  ;;  %v4288_v12 = vpop.f32.mrf.mxu1  ;;  %v3726_v32 = vsel %vm3152_vm2, %v10113_v42, 0.0 }
 0x2e8   :  { %v3834_v21 = vmul.f32 %v8365_v13, %v9781_v39  ;;  %v4331_v34 = vpop.f32.mrf.mxu0  ;;  %3727 = vadd.xlane.f32.xlu1 %v3726_v32  ;;  %v3674_v49 = vpop.xlane.xlu1 %3673 }
 0x2e9   :  { %v6875_v25 = vpack.c.bf16 %v4331_v34, %v4331_v34  ;;  %8011 = vmatmul.mubr.msk.bf16.vlgmr.msra.gmra.mxu0 %vm3921_vm4, %v3897_v8  ;;  %v7815_v4 = vpop.f32.mrf.mxu1  ;;  %8372 = vrcp.f32 %v3674_v49 }
 0x2ea   :  { %v3898_v47 = vpack.c.bf16 %v3834_v21, %v3834_v21  ;;  %v7820_v1 = vpop.f32.mrf.mxu0  ;;  %8021 = vmatpush3.bf16.msra.mxu0 %v5859_v27  ;;  %8022 = vmatprep.mubr.msk.bf16.mxu0 %vm8411_vm1, %v10580_v33  ;;  %v8367_v45 = vpop.eup %8366  ;;  %v6043_v27 = vsel %vm3925_vm3, %v189_v30, 0 }
 0x2eb   :  { %6940 = vst.msk [vmem:[%s10547_s3 + $0x10] sm:$0x3] %vm6931_vm5, %v6875_v25  ;;  %v4377_v39 = vpop.f32.mrf.mxu1  ;;  %8032 = vmatprep.subr.bf16.mxu0 %v10580_v33  ;;  %v3835_v15 = vmul.f32 %v8367_v45, %v9798_v14  ;;  %v3677_v5 = vpop.xlane.xlu0 %3676 }
 0x2ec   :  { %v4334_v51 = vpop.f32.mrf.mxu0  ;;  %v6876_v41 = vpack.c.bf16 %v4377_v39, %v4377_v39  ;;  %8017 = vmatmul.mubr.msk.bf16.vlgmr.msra.gmra.mxu1 %vm3921_vm4, %v3898_v47  ;;  %8374 = vrcp.f32 %v3677_v5 }
 0x2ed   :  { %v7826_v9 = vpop.f32.mrf.mxu1  ;;  %8027 = vmatpush3.bf16.msra.mxu1 %v5905_v61  ;;  %8028 = vmatprep.mubr.msk.bf16.mxu1 %vm8411_vm1, %v10580_v33  ;;  %v3899_v59 = vpack.c.bf16 %v3835_v15, %v3835_v15  ;;  %v191_v15 = vld [vmem:[%s10546_s2 + $0x60] sm:$0x3] }
 0x2ee   :  { %v8369_v17 = vpop.eup %8368  ;;  %6941 = vst.msk [vmem:[%s10547_s3 + $0x12] sm:$0x3] %vm6931_vm5, %v6876_v41  ;;  %v7821_v14 = vpop.f32.mrf.mxu0  ;;  %8038 = vmatprep.subr.bf16.mxu1 %v10580_v33 }
 0x2ef   :  { %v3836_v29 = vmul.f32 %v8369_v17, %v9809_v6  ;;  %v4380_v62 = vpop.f32.mrf.mxu1  ;;  %v3680_v40 = vpop.xlane.xlu1 %3679  ;;  %v5997_v6 = vsel %vm3925_vm3, %v188_v16, 0  ;;  %v6135_v17 = vsel %vm3925_vm3, %v191_v15, 0 }
 0x2f0   :  { %v4423_v11 = vpop.f32.mrf.mxu0  ;;  %8376 = vrcp.f32 %v3680_v40 }
 0x2f1   :  { %v3900_v31 = vpack.c.bf16 %v3836_v29, %v3836_v29  ;;  %v6877_v55 = vpack.c.bf16 %v4423_v11, %v4423_v11  ;;  %8023 = vmatmul.mubr.msk.bf16.vlgmr.msra.gmra.mxu0 %vm3921_vm4, %v3899_v59  ;;  %v7827_v22 = vpop.f32.mrf.mxu1  ;;  %v192_v59 = vld [vmem:[%s10546_s2 + $0x62] sm:$0x3] }
 0x2f2   :  { %v7832_v0 = vpop.f32.mrf.mxu0  ;;  %8033 = vmatpush3.bf16.msra.mxu0 %v5951_v26  ;;  %8034 = vmatprep.mubr.msk.bf16.mxu0 %vm8411_vm1, %v10580_v33  ;;  %v6181_v11 = vsel %vm3925_vm3, %v192_v59, 0 }
 0x2f3   :  { %v8371_v60 = vpop.eup %8370  ;;  %6942 = vst.msk [vmem:[%s10547_s3 + $0x14] sm:$0x3] %vm6931_vm5, %v6877_v55  ;;  %v4469_v46 = vpop.f32.mrf.mxu1  ;;  %8044 = vmatprep.subr.bf16.mxu0 %v10580_v33 }
 0x2f4   :  { %v3837_v37 = vmul.f32 %v8371_v60, %v9825_v3  ;;  %v4426_v38 = vpop.f32.mrf.mxu0  ;;  %v6878_v56 = vpack.c.bf16 %v4469_v46, %v4469_v46  ;;  %8029 = vmatmul.mubr.msk.bf16.vlgmr.msra.gmra.mxu1 %vm3921_vm4, %v3900_v31 }
 0x2f5   :  { %v7838_v44 = vpop.f32.mrf.mxu1  ;;  %8039 = vmatpush3.bf16.msra.mxu1 %v5997_v6  ;;  %8040 = vmatprep.mubr.msk.bf16.mxu1 %vm8411_vm1, %v10580_v33 }
 0x2f6   :  { %v8373_v13 = vpop.eup %8372  ;;  %v3901_v8 = vpack.c.bf16 %v3837_v37, %v3837_v37  ;;  %6943 = vst.msk [vmem:[%s10547_s3 + $0x16] sm:$0x3] %vm6931_vm5, %v6878_v56  ;;  %v7833_v3 = vpop.f32.mrf.mxu0  ;;  %8050 = vmatprep.subr.bf16.mxu1 %v10580_v33 }
 0x2f7   :  { %v3838_v12 = vmul.f32 %v8373_v13, %v9835_v19  ;;  %v4472_v32 = vpop.f32.mrf.mxu1  ;;  %v6089_v19 = vsel %vm3925_vm3, %v190_v35, 0 }
 0x2f8   :  { %v4515_v21 = vpop.f32.mrf.mxu0 }
 0x2f9   :  { %v3902_v34 = vpack.c.bf16 %v3838_v12, %v3838_v12  ;;  %v6879_v49 = vpack.c.bf16 %v4515_v21, %v4515_v21  ;;  %8035 = vmatmul.mubr.msk.bf16.vlgmr.msra.gmra.mxu0 %vm3921_vm4, %v3901_v8  ;;  %v7839_v25 = vpop.f32.mrf.mxu1  ;;  %v8375_v47 = vpop.eup %8374 }
 0x2fa   :  { %v7844_v4 = vpop.f32.mrf.mxu0  ;;  %8045 = vmatpush3.bf16.msra.mxu0 %v6043_v27  ;;  %8046 = vmatprep.mubr.msk.bf16.mxu0 %vm8411_vm1, %v10580_v33  ;;  %v3839_v61 = vmul.f32 %v8375_v47, %v9851_v20 }
 0x2fb   :  { %6944 = vst.msk [vmem:[%s10547_s3 + $0x18] sm:$0x3] %vm6931_vm5, %v6879_v49  ;;  %v4561_v1 = vpop.f32.mrf.mxu1  ;;  %8056 = vmatprep.subr.bf16.mxu0 %v10580_v33 }
 0x2fc   :  { %v4518_v45 = vpop.f32.mrf.mxu0  ;;  %v6880_v39 = vpack.c.bf16 %v4561_v1, %v4561_v1  ;;  %8041 = vmatmul.mubr.msk.bf16.vlgmr.msra.gmra.mxu1 %vm3921_vm4, %v3902_v34  ;;  %v3903_v28 = vpack.c.bf16 %v3839_v61, %v3839_v61 }
 0x2fd   :  { %v7850_v51 = vpop.f32.mrf.mxu1  ;;  %8051 = vmatpush3.bf16.msra.mxu1 %v6089_v19  ;;  %8052 = vmatprep.mubr.msk.bf16.mxu1 %vm8411_vm1, %v10580_v33  ;;  %v8377_v41 = vpop.eup %8376 }
 0x2fe   :  { %6945 = vst.msk [vmem:[%s10547_s3 + $0x1a] sm:$0x3] %vm6931_vm5, %v6880_v39  ;;  %v7845_v20 = vpop.f32.mrf.mxu0  ;;  %8062 = vmatprep.subr.bf16.mxu1 %v10580_v33  ;;  %v3840_v9 = vmul.f32 %v8377_v41, %v9857_v10 }
 0x2ff   :  { %v4564_v5 = vpop.f32.mrf.mxu1 }
 0x300   :  { %v4607_v14 = vpop.f32.mrf.mxu0  ;;  %v3904_v29 = vpack.c.bf16 %v3840_v9, %v3840_v9 }
 0x301   :  { %v6881_v62 = vpack.c.bf16 %v4607_v14, %v4607_v14  ;;  %8047 = vmatmul.mubr.msk.bf16.vlgmr.msra.gmra.mxu0 %vm3921_vm4, %v3903_v28  ;;  %v7851_v26 = vpop.f32.mrf.mxu1 }
 0x302   :  { %v7856_v16 = vpop.f32.mrf.mxu0  ;;  %8057 = vmatpush3.bf16.msra.mxu0 %v6135_v17  ;;  %8058 = vmatprep.mubr.msk.bf16.mxu0 %vm8411_vm1, %v10580_v33 }
 0x303   :  { %6946 = vst.msk [vmem:[%s10547_s3 + $0x1c] sm:$0x3] %vm6931_vm5, %v6881_v62  ;;  %v4653_v10 = vpop.f32.mrf.mxu1  ;;  %8068 = vmatprep.subr.bf16.mxu0 %v10580_v33 }
 0x304   :  { %v4610_v40 = vpop.f32.mrf.mxu0  ;;  %v6882_v31 = vpack.c.bf16 %v4653_v10, %v4653_v10  ;;  %8053 = vmatmul.mubr.msk.bf16.vlgmr.msra.gmra.mxu1 %vm3921_vm4, %v3904_v29 }
 0x305   :  { %v7862_v55 = vpop.f32.mrf.mxu1  ;;  %8063 = vmatpush3.bf16.msra.mxu1 %v6181_v11  ;;  %8064 = vmatprep.mubr.msk.bf16.mxu1 %vm8411_vm1, %v10580_v33 }
 0x306   :  { %6947 = vst.msk [vmem:[%s10547_s3 + $0x1e] sm:$0x3] %vm6931_vm5, %v6882_v31  ;;  %v7857_v22 = vpop.f32.mrf.mxu0  ;;  %8074 = vmatprep.subr.bf16.mxu1 %v10580_v33 }
 0x307   :  { %v4656_v0 = vpop.f32.mrf.mxu1 }
 0x308   :  { %v4699_v6 = vpop.f32.mrf.mxu0  ;;  %v193_v0 = vld [vmem:[%s10546_s2 + $0x64] sm:$0x3] }
 0x309   :  { %v6883_v60 = vpack.c.bf16 %v4699_v6, %v4699_v6  ;;  %v7863_v46 = vpop.f32.mrf.mxu1 }
 0x30a   :  { %v7868_v37 = vpop.f32.mrf.mxu0 }
 0x30b   :  { %6948 = vst.msk [vmem:[%s10547_s3 + $0x20] sm:$0x3] %vm6931_vm5, %v6883_v60  ;;  %v4745_v38 = vpop.f32.mrf.mxu1 }
 0x30c   :  { %v4702_v56 = vpop.f32.mrf.mxu0  ;;  %v6884_v30 = vpack.c.bf16 %v4745_v38, %v4745_v38  ;;  %v6227_v38 = vsel %vm3925_vm3, %v193_v0, 0 }
 0x30d   :  { %v7874_v44 = vpop.f32.mrf.mxu1  ;;  %v194_v56 = vld [vmem:[%s10546_s2 + $0x66] sm:$0x3] }
 0x30e   :  { %6949 = vst.msk [vmem:[%s10547_s3 + $0x22] sm:$0x3] %vm6931_vm5, %v6884_v30  ;;  %v7869_v13 = vpop.f32.mrf.mxu0 }
 0x30f   :  { %v4748_v8 = vpop.f32.mrf.mxu1 }
 0x310   :  { %v4791_v3 = vpop.f32.mrf.mxu0 }
 0x311   :  { %v6885_v12 = vpack.c.bf16 %v4791_v3, %v4791_v3  ;;  %v7875_v32 = vpop.f32.mrf.mxu1 }
 0x312   :  { %v7880_v27 = vpop.f32.mrf.mxu0 }
 0x313   :  { %6950 = vst.msk [vmem:[%s10547_s3 + $0x24] sm:$0x3] %vm6931_vm5, %v6885_v12  ;;  %v4837_v35 = vpop.f32.mrf.mxu1 }
 0x314   :  { %v4794_v21 = vpop.f32.mrf.mxu0  ;;  %v6886_v34 = vpack.c.bf16 %v4837_v35, %v4837_v35 }
 0x315   :  { %v7886_v49 = vpop.f32.mrf.mxu1  ;;  %v196_v21 = vld [vmem:[%s10546_s2 + $0x6a] sm:$0x3] }
 0x316   :  { %6951 = vst.msk [vmem:[%s10547_s3 + $0x26] sm:$0x3] %vm6931_vm5, %v6886_v34  ;;  %v7881_v25 = vpop.f32.mrf.mxu0 }
 0x317   :  { %v4840_v4 = vpop.f32.mrf.mxu1  ;;  %v6365_v25 = vsel %vm3925_vm3, %v196_v21, 0  ;;  %v204_v21 = vld [vmem:[%s10546_s2 + $0x7a] sm:$0x3] }
 0x318   :  { %v4883_v19 = vpop.f32.mrf.mxu0 }
 0x319   :  { %v6887_v47 = vpack.c.bf16 %v4883_v19, %v4883_v19  ;;  %v7887_v1 = vpop.f32.mrf.mxu1 }
 0x31a   :  { %v7892_v61 = vpop.f32.mrf.mxu0 }
 0x31b   :  { %6952 = vst.msk [vmem:[%s10547_s3 + $0x28] sm:$0x3] %vm6931_vm5, %v6887_v47  ;;  %v4929_v45 = vpop.f32.mrf.mxu1 }
 0x31c   :  { %v4886_v39 = vpop.f32.mrf.mxu0  ;;  %v6888_v15 = vpack.c.bf16 %v4929_v45, %v4929_v45 }
 0x31d   :  { %v7898_v51 = vpop.f32.mrf.mxu1  ;;  %v198_v39 = vld [vmem:[%s10546_s2 + $0x6e] sm:$0x3] }
 0x31e   :  { %6953 = vst.msk [vmem:[%s10547_s3 + $0x2a] sm:$0x3] %vm6931_vm5, %v6888_v15  ;;  %v7893_v41 = vpop.f32.mrf.mxu0 }
 0x31f   :  { %v4932_v28 = vpop.f32.mrf.mxu1  ;;  %v6457_v41 = vsel %vm3925_vm3, %v198_v39, 0 }
 0x320   :  { %v4975_v20 = vpop.f32.mrf.mxu0 }
 0x321   :  { %v6889_v9 = vpack.c.bf16 %v4975_v20, %v4975_v20  ;;  %v7899_v5 = vpop.f32.mrf.mxu1 }
 0x322   :  { %v7904_v17 = vpop.f32.mrf.mxu0 }
 0x323   :  { %6954 = vst.msk [vmem:[%s10547_s3 + $0x2c] sm:$0x3] %vm6931_vm5, %v6889_v9  ;;  %v5021_v59 = vpop.f32.mrf.mxu1 }
 0x324   :  { %v4978_v14 = vpop.f32.mrf.mxu0  ;;  %v6890_v29 = vpack.c.bf16 %v5021_v59, %v5021_v59 }
 0x325   :  { %v7910_v62 = vpop.f32.mrf.mxu1  ;;  %v200_v14 = vld [vmem:[%s10546_s2 + $0x72] sm:$0x3] }
 0x326   :  { %6955 = vst.msk [vmem:[%s10547_s3 + $0x2e] sm:$0x3] %vm6931_vm5, %v6890_v29  ;;  %v7905_v26 = vpop.f32.mrf.mxu0 }
 0x327   :  { %v5024_v16 = vpop.f32.mrf.mxu1  ;;  %v6549_v26 = vsel %vm3925_vm3, %v200_v14, 0 }
 0x329   :  { %v7911_v11 = vpop.f32.mrf.mxu1 }
 0x32a   :  { %v201_v11 = vld [vmem:[%s10546_s2 + $0x74] sm:$0x3] }
 0x335   :  { %v3683_v10 = vpop.xlane.xlu0 %3682 }
 0x336   :  { %8378 = vrcp.f32 %v3683_v10 }
 0x338   :  { %v3686_v40 = vpop.xlane.xlu1 %3685 }
 0x339   :  { %8380 = vrcp.f32 %v3686_v40 }
 0x33d   :  { %v3689_v31 = vpop.xlane.xlu0 %3688 }
 0x33e   :  { %8382 = vrcp.f32 %v3689_v31 }
 0x340   :  { %v3692_v55 = vpop.xlane.xlu1 %3691 }
 0x341   :  { %8384 = vrcp.f32 %v3692_v55 }
 0x343   :  { %v8379_v22 = vpop.eup %8378 }
 0x344   :  { %v3841_v6 = vmul.f32 %v8379_v22, %v9883_v50  ;;  %v6273_v50 = vsel %vm3925_vm3, %v194_v56, 0  ;;  %v6595_v22 = vsel %vm3925_vm3, %v201_v11, 0 }
 0x345   :  { %v3695_v60 = vpop.xlane.xlu0 %3694 }
 0x346   :  { %v8381_v46 = vpop.eup %8380  ;;  %v3905_v37 = vpack.c.bf16 %v3841_v6, %v3841_v6  ;;  %8386 = vrcp.f32 %v3695_v60 }
 0x347   :  { %v3842_v30 = vmul.f32 %v8381_v46, %v9896_v43  ;;  %v195_v43 = vld [vmem:[%s10546_s2 + $0x68] sm:$0x3] }
 0x348   :  { %8059 = vmatmul.mubr.msk.bf16.vlgmr.msra.gmra.mxu0 %vm3921_vm4, %v3905_v37  ;;  %v3698_v44 = vpop.xlane.xlu1 %3697  ;;  %v6319_v35 = vsel %vm3925_vm3, %v195_v43, 0 }
 0x349   :  { %v3906_v13 = vpack.c.bf16 %v3842_v30, %v3842_v30  ;;  %8388 = vrcp.f32 %v3698_v44  ;;  %8069 = vmatpush3.bf16.msra.mxu0 %v6227_v38  ;;  %8070 = vmatprep.mubr.msk.bf16.mxu0 %vm8411_vm1, %v10580_v33 }
 0x34a   :  { %8080 = vmatprep.subr.bf16.mxu0 %v10580_v33 }
 0x34b   :  { %v8383_v8 = vpop.eup %8382  ;;  %8065 = vmatmul.mubr.msk.bf16.vlgmr.msra.gmra.mxu1 %vm3921_vm4, %v3906_v13  ;;  %v203_v13 = vld [vmem:[%s10546_s2 + $0x78] sm:$0x3] }
 0x34c   :  { %v3843_v3 = vmul.f32 %v8383_v8, %v9910_v54  ;;  %8075 = vmatpush3.bf16.msra.mxu1 %v6273_v50  ;;  %8076 = vmatprep.mubr.msk.bf16.mxu1 %vm8411_vm1, %v10580_v33 }
 0x34d   :  { %v3701_v12 = vpop.xlane.xlu0 %3700  ;;  %8086 = vmatprep.subr.bf16.mxu1 %v10580_v33 }
 0x34e   :  { %v8385_v32 = vpop.eup %8384  ;;  %v3907_v27 = vpack.c.bf16 %v3843_v3, %v3843_v3  ;;  %8390 = vrcp.f32 %v3701_v12 }
 0x34f   :  { %v3844_v34 = vmul.f32 %v8385_v32, %v9921_v58  ;;  %v197_v58 = vld [vmem:[%s10546_s2 + $0x6c] sm:$0x3] }
 0x350   :  { %8071 = vmatmul.mubr.msk.bf16.vlgmr.msra.gmra.mxu0 %vm3921_vm4, %v3907_v27  ;;  %v6411_v45 = vsel %vm3925_vm3, %v197_v58, 0 }
 0x351   :  { %v3908_v54 = vpack.c.bf16 %v3844_v34, %v3844_v34  ;;  %v3704_v49 = vpop.xlane.xlu1 %3703  ;;  %8081 = vmatpush3.bf16.msra.mxu0 %v6319_v35  ;;  %8082 = vmatprep.mubr.msk.bf16.mxu0 %vm8411_vm1, %v10580_v33 }
 0x352   :  { %8392 = vrcp.f32 %v3704_v49  ;;  %8092 = vmatprep.subr.bf16.mxu0 %v10580_v33 }
 0x353   :  { %v8387_v4 = vpop.eup %8386  ;;  %8077 = vmatmul.mubr.msk.bf16.vlgmr.msra.gmra.mxu1 %vm3921_vm4, %v3908_v54 }
 0x354   :  { %v3845_v19 = vmul.f32 %v8387_v4, %v9938_v53  ;;  %8087 = vmatpush3.bf16.msra.mxu1 %v6365_v25  ;;  %8088 = vmatprep.mubr.msk.bf16.mxu1 %vm8411_vm1, %v10580_v33 }
 0x355   :  { %v3707_v47 = vpop.xlane.xlu0 %3706  ;;  %8098 = vmatprep.subr.bf16.mxu1 %v10580_v33 }
 0x356   :  { %v8389_v1 = vpop.eup %8388  ;;  %v3909_v61 = vpack.c.bf16 %v3845_v19, %v3845_v19  ;;  %8394 = vrcp.f32 %v3707_v47  ;;  %v6733_v19 = vsel %vm3925_vm3, %v204_v21, 0 }
 0x357   :  { %v3846_v15 = vmul.f32 %v8389_v1, %v9949_v57  ;;  %v199_v57 = vld [vmem:[%s10546_s2 + $0x70] sm:$0x3]  ;;  %v205_v1 = vld [vmem:[%s10546_s2 + $0x7c] sm:$0x3] }
 0x358   :  { %8083 = vmatmul.mubr.msk.bf16.vlgmr.msra.gmra.mxu0 %vm3921_vm4, %v3909_v61  ;;  %v3710_v53 = vpop.xlane.xlu1 %3709  ;;  %v6503_v17 = vsel %vm3925_vm3, %v199_v57, 0 }
 0x359   :  { %v3910_v51 = vpack.c.bf16 %v3846_v15, %v3846_v15  ;;  %8396 = vrcp.f32 %v3710_v53  ;;  %8093 = vmatpush3.bf16.msra.mxu0 %v6411_v45  ;;  %8094 = vmatprep.mubr.msk.bf16.mxu0 %vm8411_vm1, %v10580_v33 }
 0x35a   :  { %8104 = vmatprep.subr.bf16.mxu0 %v10580_v33 }
 0x35b   :  { %v8391_v28 = vpop.eup %8390  ;;  %8089 = vmatmul.mubr.msk.bf16.vlgmr.msra.gmra.mxu1 %vm3921_vm4, %v3910_v51 }
 0x35c   :  { %v3847_v20 = vmul.f32 %v8391_v28, %v9966_v18  ;;  %8099 = vmatpush3.bf16.msra.mxu1 %v6457_v41  ;;  %8100 = vmatprep.mubr.msk.bf16.mxu1 %vm8411_vm1, %v10580_v33 }
 0x35d   :  { %v3713_v9 = vpop.xlane.xlu0 %3712  ;;  %8110 = vmatprep.subr.bf16.mxu1 %v10580_v33 }
 0x35e   :  { %v3911_v5 = vpack.c.bf16 %v3847_v20, %v3847_v20  ;;  %8398 = vrcp.f32 %v3713_v9  ;;  %v206_v20 = vld [vmem:[%s10546_s2 + $0x7e] sm:$0x3] }
 0x35f   :  { %v8393_v59 = vpop.eup %8392 }
 0x360   :  { %v3848_v29 = vmul.f32 %v8393_v59, %v9977_v7  ;;  %8095 = vmatmul.mubr.msk.bf16.vlgmr.msra.gmra.mxu0 %vm3921_vm4, %v3911_v5  ;;  %v3716_v18 = vpop.xlane.xlu1 %3715 }
 0x361   :  { %8400 = vrcp.f32 %v3716_v18  ;;  %8105 = vmatpush3.bf16.msra.mxu0 %v6503_v17  ;;  %8106 = vmatprep.mubr.msk.bf16.mxu0 %vm8411_vm1, %v10580_v33 }
 0x362   :  { %v3912_v62 = vpack.c.bf16 %v3848_v29, %v3848_v29  ;;  %8116 = vmatprep.subr.bf16.mxu0 %v10580_v33  ;;  %v6825_v29 = vsel %vm3925_vm3, %v206_v20, 0 }
 0x363   :  { %v8395_v16 = vpop.eup %8394 }
 0x364   :  { %v3849_v7 = vmul.f32 %v8395_v16, %v9998_v36  ;;  %8101 = vmatmul.mubr.msk.bf16.vlgmr.msra.gmra.mxu1 %vm3921_vm4, %v3912_v62  ;;  %v202_v36 = vld [vmem:[%s10546_s2 + $0x76] sm:$0x3] }
 0x365   :  { %8111 = vmatpush3.bf16.msra.mxu1 %v6549_v26  ;;  %v3719_v10 = vpop.xlane.xlu0 %3718  ;;  %8112 = vmatprep.mubr.msk.bf16.mxu1 %vm8411_vm1, %v10580_v33  ;;  %v6641_v56 = vsel %vm3925_vm3, %v202_v36, 0 }
 0x366   :  { %v8397_v40 = vpop.eup %8396  ;;  %v3913_v31 = vpack.c.bf16 %v3849_v7, %v3849_v7  ;;  %8402 = vrcp.f32 %v3719_v10  ;;  %v5067_v55 = vpop.f32.mrf.mxu0  ;;  %8122 = vmatprep.subr.bf16.mxu1 %v10580_v33 }
 0x367   :  { %v3850_v0 = vmul.f32 %v8397_v40, %v10013_v48  ;;  %v6891_v6 = vpack.c.bf16 %v5067_v55, %v5067_v55 }
 0x368   :  { %8107 = vmatmul.mubr.msk.bf16.vlgmr.msra.gmra.mxu0 %vm3921_vm4, %v3913_v31  ;;  %v7916_v46 = vpop.f32.mrf.mxu0 }
 0x369   :  { %v3722_v60 = vpop.xlane.xlu1 %3721  ;;  %v3914_v37 = vpack.c.bf16 %v3850_v0, %v3850_v0  ;;  %6956 = vst.msk [vmem:[%s10547_s3 + $0x30] sm:$0x3] %vm6931_vm5, %v6891_v6  ;;  %8117 = vmatpush3.bf16.msra.mxu0 %v6595_v22  ;;  %8118 = vmatprep.mubr.msk.bf16.mxu0 %vm8411_vm1, %v10580_v33 }
 0x36a   :  { %8404 = vrcp.f32 %v3722_v60  ;;  %v5070_v48 = vpop.f32.mrf.mxu0  ;;  %v5113_v38 = vpop.f32.mrf.mxu1  ;;  %8128 = vmatprep.subr.bf16.mxu0 %v10580_v33 }
 0x36b   :  { %v8399_v30 = vpop.eup %8398  ;;  %v6892_v44 = vpack.c.bf16 %v5113_v38, %v5113_v38 }
 0x36c   :  { %v3851_v50 = vmul.f32 %v8399_v30, %v10034_v23  ;;  %8113 = vmatmul.mubr.msk.bf16.vlgmr.msra.gmra.mxu1 %vm3921_vm4, %v3914_v37  ;;  %v7922_v8 = vpop.f32.mrf.mxu1  ;;  %v7917_v43 = vpop.f32.mrf.mxu0  ;;  %v6687_v23 = vsel %vm3925_vm3, %v203_v13, 0 }
 0x36d   :  { %6957 = vst.msk [vmem:[%s10547_s3 + $0x32] sm:$0x3] %vm6931_vm5, %v6892_v44  ;;  %8123 = vmatpush3.bf16.msra.mxu1 %v6641_v56  ;;  %8124 = vmatprep.mubr.msk.bf16.mxu1 %vm8411_vm1, %v10580_v33 }
 0x36e   :  { %v3725_v3 = vpop.xlane.xlu0 %3724  ;;  %v8401_v12 = vpop.eup %8400  ;;  %v3915_v32 = vpack.c.bf16 %v3851_v50, %v3851_v50  ;;  %8134 = vmatprep.subr.bf16.mxu1 %v10580_v33 }
 0x36f   :  { %8406 = vrcp.f32 %v3725_v3  ;;  %v5116_v27 = vpop.f32.mrf.mxu1  ;;  %v3852_v35 = vmul.f32 %v8401_v12, %v10045_v63 }
 0x370   :  { %v5159_v34 = vpop.f32.mrf.mxu0  ;;  %8119 = vmatmul.mubr.msk.bf16.vlgmr.msra.gmra.mxu0 %vm3921_vm4, %v3915_v32 }
 0x371   :  { %v7923_v54 = vpop.f32.mrf.mxu1  ;;  %v3916_v49 = vpack.c.bf16 %v3852_v35, %v3852_v35  ;;  %v6893_v25 = vpack.c.bf16 %v5159_v34, %v5159_v34  ;;  %v3728_v4 = vpop.xlane.xlu1 %3727  ;;  %8129 = vmatpush3.bf16.msra.mxu0 %v6687_v23  ;;  %8130 = vmatprep.mubr.msk.bf16.mxu0 %vm8411_vm1, %v10580_v33 }
 0x372   :  { %8408 = vrcp.f32 %v3728_v4  ;;  %v7928_v58 = vpop.f32.mrf.mxu0  ;;  %8140 = vmatprep.subr.bf16.mxu0 %v10580_v33 }
 0x373   :  { %v8403_v63 = vpop.eup %8402  ;;  %6958 = vst.msk [vmem:[%s10547_s3 + $0x34] sm:$0x3] %vm6931_vm5, %v6893_v25  ;;  %v5205_v47 = vpop.f32.mrf.mxu1 }
 0x374   :  { %v3853_v61 = vmul.f32 %v8403_v63, %v10065_v52  ;;  %v5162_v45 = vpop.f32.mrf.mxu0  ;;  %v6894_v39 = vpack.c.bf16 %v5205_v47, %v5205_v47  ;;  %8125 = vmatmul.mubr.msk.bf16.vlgmr.msra.gmra.mxu1 %vm3921_vm4, %v3916_v49  ;;  %v6779_v52 = vsel %vm3925_vm3, %v205_v1, 0 }
 0x375   :  { %v7934_v15 = vpop.f32.mrf.mxu1  ;;  %8135 = vmatpush3.bf16.msra.mxu1 %v6733_v19  ;;  %8136 = vmatprep.mubr.msk.bf16.mxu1 %vm8411_vm1, %v10580_v33 }
 0x376   :  { %v3917_v51 = vpack.c.bf16 %v3853_v61, %v3853_v61  ;;  %6959 = vst.msk [vmem:[%s10547_s3 + $0x36] sm:$0x3] %vm6931_vm5, %v6894_v39  ;;  %v7929_v41 = vpop.f32.mrf.mxu0  ;;  %8146 = vmatprep.subr.bf16.mxu1 %v10580_v33 }
 0x377   :  { %v8405_v53 = vpop.eup %8404  ;;  %v5208_v57 = vpop.f32.mrf.mxu1 }
 0x378   :  { %v3854_v28 = vmul.f32 %v8405_v53, %v10079_v2  ;;  %v5251_v9 = vpop.f32.mrf.mxu0  ;;  %8131 = vmatmul.mubr.msk.bf16.vlgmr.msra.gmra.mxu0 %vm3921_vm4, %v3917_v51 }
 0x379   :  { %v6895_v17 = vpack.c.bf16 %v5251_v9, %v5251_v9  ;;  %v7935_v59 = vpop.f32.mrf.mxu1  ;;  %8141 = vmatpush3.bf16.msra.mxu0 %v6779_v52  ;;  %8142 = vmatprep.mubr.msk.bf16.mxu0 %vm8411_vm1, %v10580_v33 }
 0x37a   :  { %v3918_v5 = vpack.c.bf16 %v3854_v28, %v3854_v28  ;;  %v7940_v14 = vpop.f32.mrf.mxu0 }
 0x37b   :  { %6960 = vst.msk [vmem:[%s10547_s3 + $0x38] sm:$0x3] %vm6931_vm5, %v6895_v17  ;;  %v5297_v2 = vpop.f32.mrf.mxu1 }
 0x37c   :  { %v8407_v18 = vpop.eup %8406  ;;  %v5254_v26 = vpop.f32.mrf.mxu0  ;;  %v6896_v16 = vpack.c.bf16 %v5297_v2, %v5297_v2  ;;  %8137 = vmatmul.mubr.msk.bf16.vlgmr.msra.gmra.mxu1 %vm3921_vm4, %v3918_v5 }
 0x37d   :  { %v3855_v62 = vmul.f32 %v8407_v18, %v10099_v24  ;;  %v7946_v11 = vpop.f32.mrf.mxu1  ;;  %8147 = vmatpush3.bf16.msra.mxu1 %v6825_v29  ;;  %8148 = vmatprep.mubr.msk.bf16.mxu1 %vm8411_vm1, %v10580_v33 }
 0x37e   :  { %6961 = vst.msk [vmem:[%s10547_s3 + $0x3a] sm:$0x3] %vm6931_vm5, %v6896_v16  ;;  %v7941_v10 = vpop.f32.mrf.mxu0 }
 0x37f   :  { %v3919_v7 = vpack.c.bf16 %v3855_v62, %v3855_v62  ;;  %v8409_v40 = vpop.eup %8408  ;;  %v5300_v31 = vpop.f32.mrf.mxu1 }
 0x380   :  { %v3856_v24 = vmul.f32 %v8409_v40, %v10113_v42  ;;  %v5343_v55 = vpop.f32.mrf.mxu0 }
 0x381   :  { %8143 = vmatmul.mubr.msk.bf16.vlgmr.msra.gmra.mxu0 %vm3921_vm4, %v3919_v7  ;;  %v6897_v22 = vpack.c.bf16 %v5343_v55, %v5343_v55  ;;  %v7947_v0 = vpop.f32.mrf.mxu1 }
 0x382   :  { %v3920_v6 = vpack.c.bf16 %v3856_v24, %v3856_v24  ;;  %v7952_v36 = vpop.f32.mrf.mxu0 }
 0x383   :  { %6962 = vst.msk [vmem:[%s10547_s3 + $0x3c] sm:$0x3] %vm6931_vm5, %v6897_v22  ;;  %v5389_v33 = vpop.f32.mrf.mxu1 }
 0x384   :  { %v5346_v60 = vpop.f32.mrf.mxu0  ;;  %v6898_v46 = vpack.c.bf16 %v5389_v33, %v5389_v33  ;;  %8149 = vmatmul.mubr.msk.bf16.vlgmr.msra.gmra.mxu1 %vm3921_vm4, %v3920_v6 }
 0x385   :  { %v7958_v37 = vpop.f32.mrf.mxu1 }
 0x386   :  { %6963 = vst.msk [vmem:[%s10547_s3 + $0x3e] sm:$0x3] %vm6931_vm5, %v6898_v46  ;;  %v7953_v42 = vpop.f32.mrf.mxu0 }
 0x387   :  { %v5392_v48 = vpop.f32.mrf.mxu1 }
 0x388   :  { %v5435_v38 = vpop.f32.mrf.mxu0 }
 0x389   :  { %v6899_v56 = vpack.c.bf16 %v5435_v38, %v5435_v38  ;;  %v7959_v30 = vpop.f32.mrf.mxu1 }
 0x38a   :  { %v7964_v44 = vpop.f32.mrf.mxu0 }
 0x38b   :  { %6964 = vst.msk [vmem:[%s10547_s3 + $0x40] sm:$0x3] %vm6931_vm5, %v6899_v56  ;;  %v5481_v13 = vpop.f32.mrf.mxu1 }
 0x38c   :  { %v5438_v50 = vpop.f32.mrf.mxu0  ;;  %v6900_v8 = vpack.c.bf16 %v5481_v13, %v5481_v13 }
 0x38d   :  { %v7970_v43 = vpop.f32.mrf.mxu1 }
 0x38e   :  { %6965 = vst.msk [vmem:[%s10547_s3 + $0x42] sm:$0x3] %vm6931_vm5, %v6900_v8  ;;  %v7965_v3 = vpop.f32.mrf.mxu0 }
 0x38f   :  { %v5484_v12 = vpop.f32.mrf.mxu1 }
 0x390   :  { %v5527_v32 = vpop.f32.mrf.mxu0 }
 0x391   :  { %v6901_v27 = vpack.c.bf16 %v5527_v32, %v5527_v32  ;;  %v7971_v23 = vpop.f32.mrf.mxu1 }
 0x392   :  { %v7976_v35 = vpop.f32.mrf.mxu0 }
 0x393   :  { %6966 = vst.msk [vmem:[%s10547_s3 + $0x44] sm:$0x3] %vm6931_vm5, %v6901_v27  ;;  %v5573_v21 = vpop.f32.mrf.mxu1 }
 0x394   :  { %v5530_v34 = vpop.f32.mrf.mxu0  ;;  %v6902_v54 = vpack.c.bf16 %v5573_v21, %v5573_v21 }
 0x395   :  { %v7982_v49 = vpop.f32.mrf.mxu1 }
 0x396   :  { %6967 = vst.msk [vmem:[%s10547_s3 + $0x46] sm:$0x3] %vm6931_vm5, %v6902_v54  ;;  %v7977_v25 = vpop.f32.mrf.mxu0 }
 0x397   :  { %v5576_v4 = vpop.f32.mrf.mxu1 }
 0x398   :  { %v5619_v58 = vpop.f32.mrf.mxu0 }
 0x399   :  { %v6903_v19 = vpack.c.bf16 %v5619_v58, %v5619_v58  ;;  %v7983_v63 = vpop.f32.mrf.mxu1 }
 0x39a   :  { %v7988_v47 = vpop.f32.mrf.mxu0 }
 0x39b   :  { %6968 = vst.msk [vmem:[%s10547_s3 + $0x48] sm:$0x3] %vm6931_vm5, %v6903_v19  ;;  %v5665_v1 = vpop.f32.mrf.mxu1 }
 0x39c   :  { %v5622_v61 = vpop.f32.mrf.mxu0  ;;  %v6904_v45 = vpack.c.bf16 %v5665_v1, %v5665_v1 }
 0x39d   :  { %v7994_v39 = vpop.f32.mrf.mxu1 }
 0x39e   :  { %6969 = vst.msk [vmem:[%s10547_s3 + $0x4a] sm:$0x3] %vm6931_vm5, %v6904_v45  ;;  %v7989_v15 = vpop.f32.mrf.mxu0 }
 0x39f   :  { %v5668_v53 = vpop.f32.mrf.mxu1 }
 0x3a0   :  { %v5711_v51 = vpop.f32.mrf.mxu0 }
 0x3a1   :  { %v6905_v41 = vpack.c.bf16 %v5711_v51, %v5711_v51  ;;  %v7995_v52 = vpop.f32.mrf.mxu1 }
 0x3a2   :  { %v8000_v28 = vpop.f32.mrf.mxu0 }
 0x3a3   :  { %6970 = vst.msk [vmem:[%s10547_s3 + $0x4c] sm:$0x3] %vm6931_vm5, %v6905_v41 }
 0x3a4   :  { %v5757_v57 = vpop.f32.mrf.mxu1  ;;  %v5714_v20 = vpop.f32.mrf.mxu0 }
 0x3a5   :  { %v6906_v9 = vpack.c.bf16 %v5757_v57, %v5757_v57 }
 0x3a6   :  { %v8006_v5 = vpop.f32.mrf.mxu1  ;;  %v8001_v17 = vpop.f32.mrf.mxu0 }
 0x3a7   :  { %6971 = vst.msk [vmem:[%s10547_s3 + $0x4e] sm:$0x3] %vm6931_vm5, %v6906_v9 }
 0x3a8   :  { %v5760_v59 = vpop.f32.mrf.mxu1 }
 0x3a9   :  { %v5803_v14 = vpop.f32.mrf.mxu0 }
 0x3aa   :  { %v6907_v29 = vpack.c.bf16 %v5803_v14, %v5803_v14  ;;  %v8007_v18 = vpop.f32.mrf.mxu1 }
 0x3ab   :  { %v8012_v2 = vpop.f32.mrf.mxu0 }
 0x3ac   :  { %6972 = vst.msk [vmem:[%s10547_s3 + $0x50] sm:$0x3] %vm6931_vm5, %v6907_v29  ;;  %v5849_v62 = vpop.f32.mrf.mxu1 }
 0x3ad   :  { %v5806_v26 = vpop.f32.mrf.mxu0  ;;  %v6908_v16 = vpack.c.bf16 %v5849_v62, %v5849_v62 }
 0x3ae   :  { %v8018_v11 = vpop.f32.mrf.mxu1 }
 0x3af   :  { %6973 = vst.msk [vmem:[%s10547_s3 + $0x52] sm:$0x3] %vm6931_vm5, %v6908_v16  ;;  %v8013_v7 = vpop.f32.mrf.mxu0 }
 0x3b0   :  { %v5852_v10 = vpop.f32.mrf.mxu1 }
 0x3b1   :  { %v5895_v40 = vpop.f32.mrf.mxu0 }
 0x3b2   :  { %v6909_v31 = vpack.c.bf16 %v5895_v40, %v5895_v40  ;;  %v8019_v24 = vpop.f32.mrf.mxu1 }
 0x3b3   :  { %v8024_v55 = vpop.f32.mrf.mxu0 }
 0x3b4   :  { %6974 = vst.msk [vmem:[%s10547_s3 + $0x54] sm:$0x3] %vm6931_vm5, %v6909_v31  ;;  %v5941_v22 = vpop.f32.mrf.mxu1 }
 0x3b5   :  { %v5898_v0 = vpop.f32.mrf.mxu0  ;;  %v6910_v6 = vpack.c.bf16 %v5941_v22, %v5941_v22 }
 0x3b6   :  { %v8030_v36 = vpop.f32.mrf.mxu1 }
 0x3b7   :  { %6975 = vst.msk [vmem:[%s10547_s3 + $0x56] sm:$0x3] %vm6931_vm5, %v6910_v6  ;;  %v8025_v33 = vpop.f32.mrf.mxu0 }
 0x3b8   :  { %v5944_v60 = vpop.f32.mrf.mxu1 }
 0x3b9   :  { %v5987_v46 = vpop.f32.mrf.mxu0 }
 0x3ba   :  { %v6911_v37 = vpack.c.bf16 %v5987_v46, %v5987_v46  ;;  %v8031_v42 = vpop.f32.mrf.mxu1 }
 0x3bb   :  { %v8036_v48 = vpop.f32.mrf.mxu0 }
 0x3bc   :  { %6976 = vst.msk [vmem:[%s10547_s3 + $0x58] sm:$0x3] %vm6931_vm5, %v6911_v37  ;;  %v6033_v38 = vpop.f32.mrf.mxu1 }
 0x3bd   :  { %v5990_v56 = vpop.f32.mrf.mxu0  ;;  %v6912_v30 = vpack.c.bf16 %v6033_v38, %v6033_v38 }
 0x3be   :  { %v8042_v44 = vpop.f32.mrf.mxu1 }
 0x3bf   :  { %6977 = vst.msk [vmem:[%s10547_s3 + $0x5a] sm:$0x3] %vm6931_vm5, %v6912_v30  ;;  %v8037_v13 = vpop.f32.mrf.mxu0 }
 0x3c0   :  { %v6036_v50 = vpop.f32.mrf.mxu1 }
 0x3c1   :  { %v6079_v8 = vpop.f32.mrf.mxu0 }
 0x3c2   :  { %v6913_v43 = vpack.c.bf16 %v6079_v8, %v6079_v8  ;;  %v8043_v3 = vpop.f32.mrf.mxu1 }
 0x3c3   :  { %v8048_v12 = vpop.f32.mrf.mxu0 }
 0x3c4   :  { %6978 = vst.msk [vmem:[%s10547_s3 + $0x5c] sm:$0x3] %vm6931_vm5, %v6913_v43  ;;  %v6125_v32 = vpop.f32.mrf.mxu1 }
 0x3c5   :  { %v6082_v27 = vpop.f32.mrf.mxu0  ;;  %v6914_v23 = vpack.c.bf16 %v6125_v32, %v6125_v32 }
 0x3c6   :  { %v8054_v35 = vpop.f32.mrf.mxu1 }
 0x3c7   :  { %6979 = vst.msk [vmem:[%s10547_s3 + $0x5e] sm:$0x3] %vm6931_vm5, %v6914_v23  ;;  %v8049_v21 = vpop.f32.mrf.mxu0 }
 0x3c8   :  { %v6128_v34 = vpop.f32.mrf.mxu1 }
 0x3ca   :  { %v8055_v54 = vpop.f32.mrf.mxu1 }
 0x408   :  { %v6171_v49 = vpop.f32.mrf.mxu0 }
 0x409   :  { %v6915_v25 = vpack.c.bf16 %v6171_v49, %v6171_v49 }
 0x40a   :  { %v8060_v4 = vpop.f32.mrf.mxu0 }
 0x40b   :  { %6980 = vst.msk [vmem:[%s10547_s3 + $0x60] sm:$0x3] %vm6931_vm5, %v6915_v25  ;;  %v6217_v58 = vpop.f32.mrf.mxu1 }
 0x40c   :  { %v6174_v19 = vpop.f32.mrf.mxu0  ;;  %v6916_v63 = vpack.c.bf16 %v6217_v58, %v6217_v58 }
 0x40d   :  { %v8066_v47 = vpop.f32.mrf.mxu1 }
 0x40e   :  { %6981 = vst.msk [vmem:[%s10547_s3 + $0x62] sm:$0x3] %vm6931_vm5, %v6916_v63  ;;  %v8061_v1 = vpop.f32.mrf.mxu0 }
 0x40f   :  { %v6220_v61 = vpop.f32.mrf.mxu1 }
 0x410   :  { %v6263_v45 = vpop.f32.mrf.mxu0 }
 0x411   :  { %v6917_v39 = vpack.c.bf16 %v6263_v45, %v6263_v45  ;;  %v8067_v15 = vpop.f32.mrf.mxu1 }
 0x412   :  { %v8072_v53 = vpop.f32.mrf.mxu0 }
 0x413   :  { %6982 = vst.msk [vmem:[%s10547_s3 + $0x64] sm:$0x3] %vm6931_vm5, %v6917_v39  ;;  %v6309_v51 = vpop.f32.mrf.mxu1 }
 0x414   :  { %v6266_v41 = vpop.f32.mrf.mxu0  ;;  %v6918_v52 = vpack.c.bf16 %v6309_v51, %v6309_v51 }
 0x415   :  { %v8078_v28 = vpop.f32.mrf.mxu1 }
 0x416   :  { %6983 = vst.msk [vmem:[%s10547_s3 + $0x66] sm:$0x3] %vm6931_vm5, %v6918_v52  ;;  %v8073_v57 = vpop.f32.mrf.mxu0 }
 0x417   :  { %v6312_v20 = vpop.f32.mrf.mxu1 }
 0x418   :  { %v6355_v9 = vpop.f32.mrf.mxu0 }
 0x419   :  { %v6919_v5 = vpack.c.bf16 %v6355_v9, %v6355_v9  ;;  %v8079_v17 = vpop.f32.mrf.mxu1 }
 0x41a   :  { %v8084_v59 = vpop.f32.mrf.mxu0 }
 0x41b   :  { %6984 = vst.msk [vmem:[%s10547_s3 + $0x68] sm:$0x3] %vm6931_vm5, %v6919_v5  ;;  %v6401_v14 = vpop.f32.mrf.mxu1 }
 0x41c   :  { %v6358_v29 = vpop.f32.mrf.mxu0  ;;  %v6920_v18 = vpack.c.bf16 %v6401_v14, %v6401_v14 }
 0x41d   :  { %v8090_v2 = vpop.f32.mrf.mxu1 }
 0x41e   :  { %6985 = vst.msk [vmem:[%s10547_s3 + $0x6a] sm:$0x3] %vm6931_vm5, %v6920_v18  ;;  %v8085_v62 = vpop.f32.mrf.mxu0 }
 0x41f   :  { %v6404_v26 = vpop.f32.mrf.mxu1 }
 0x420   :  { %v6447_v16 = vpop.f32.mrf.mxu0 }
 0x421   :  { %v6921_v11 = vpack.c.bf16 %v6447_v16, %v6447_v16  ;;  %v8091_v7 = vpop.f32.mrf.mxu1 }
 0x422   :  { %v8096_v10 = vpop.f32.mrf.mxu0 }
 0x423   :  { %6986 = vst.msk [vmem:[%s10547_s3 + $0x6c] sm:$0x3] %vm6931_vm5, %v6921_v11 }
 0x424   :  { %v6450_v40 = vpop.f32.mrf.mxu0  ;;  %v6493_v31 = vpop.f32.mrf.mxu1 }
 0x425   :  { %v6922_v24 = vpack.c.bf16 %v6493_v31, %v6493_v31 }
 0x426   :  { %v8097_v55 = vpop.f32.mrf.mxu0  ;;  %v8102_v22 = vpop.f32.mrf.mxu1 }
 0x427   :  { %6987 = vst.msk [vmem:[%s10547_s3 + $0x6e] sm:$0x3] %vm6931_vm5, %v6922_v24 }
 0x428   :  { %v6496_v0 = vpop.f32.mrf.mxu1  ;;  %v6539_v6 = vpop.f32.mrf.mxu0 }
 0x429   :  { %v6923_v36 = vpack.c.bf16 %v6539_v6, %v6539_v6 }
 0x42a   :  { %v8103_v33 = vpop.f32.mrf.mxu1  ;;  %v8108_v60 = vpop.f32.mrf.mxu0 }
 0x42b   :  { %6988 = vst.msk [vmem:[%s10547_s3 + $0x70] sm:$0x3] %vm6931_vm5, %v6923_v36 }
 0x42c   :  { %v6542_v46 = vpop.f32.mrf.mxu0  ;;  %v6585_v37 = vpop.f32.mrf.mxu1 }
 0x42d   :  { %v6924_v42 = vpack.c.bf16 %v6585_v37, %v6585_v37 }
 0x42e   :  { %v8109_v48 = vpop.f32.mrf.mxu0  ;;  %v8114_v38 = vpop.f32.mrf.mxu1 }
 0x42f   :  { %6989 = vst.msk [vmem:[%s10547_s3 + $0x72] sm:$0x3] %vm6931_vm5, %v6924_v42 }
 0x430   :  { %v6588_v56 = vpop.f32.mrf.mxu1  ;;  %v6631_v30 = vpop.f32.mrf.mxu0 }
 0x431   :  { %v6925_v44 = vpack.c.bf16 %v6631_v30, %v6631_v30 }
 0x432   :  { %v8115_v13 = vpop.f32.mrf.mxu1  ;;  %v8120_v50 = vpop.f32.mrf.mxu0 }
 0x433   :  { %6990 = vst.msk [vmem:[%s10547_s3 + $0x74] sm:$0x3] %vm6931_vm5, %v6925_v44 }
 0x434   :  { %v6634_v8 = vpop.f32.mrf.mxu0  ;;  %v6677_v43 = vpop.f32.mrf.mxu1 }
 0x435   :  { %v6926_v3 = vpack.c.bf16 %v6677_v43, %v6677_v43 }
 0x436   :  { %v8121_v12 = vpop.f32.mrf.mxu0  ;;  %v8126_v32 = vpop.f32.mrf.mxu1 }
 0x437   :  { %6991 = vst.msk [vmem:[%s10547_s3 + $0x76] sm:$0x3] %vm6931_vm5, %v6926_v3 }
 0x438   :  { %v6680_v27 = vpop.f32.mrf.mxu1  ;;  %v6723_v23 = vpop.f32.mrf.mxu0 }
 0x439   :  { %v6927_v35 = vpack.c.bf16 %v6723_v23, %v6723_v23 }
 0x43a   :  { %v8127_v21 = vpop.f32.mrf.mxu1  ;;  %v8132_v34 = vpop.f32.mrf.mxu0 }
 0x43b   :  { %6992 = vst.msk [vmem:[%s10547_s3 + $0x78] sm:$0x3] %vm6931_vm5, %v6927_v35 }
 0x43c   :  { %v6726_v54 = vpop.f32.mrf.mxu0  ;;  %v6769_v49 = vpop.f32.mrf.mxu1 }
 0x43d   :  { %v6928_v25 = vpack.c.bf16 %v6769_v49, %v6769_v49 }
 0x43e   :  { %v8133_v4 = vpop.f32.mrf.mxu0  ;;  %v8138_v58 = vpop.f32.mrf.mxu1 }
 0x43f   :  { %6993 = vst.msk [vmem:[%s10547_s3 + $0x7a] sm:$0x3] %vm6931_vm5, %v6928_v25 }
 0x440   :  { %v6772_v19 = vpop.f32.mrf.mxu1 }
 0x441   :  { %v6815_v63 = vpop.f32.mrf.mxu0 }
 0x442   :  { %v6929_v47 = vpack.c.bf16 %v6815_v63, %v6815_v63  ;;  %v8139_v1 = vpop.f32.mrf.mxu1 }
 0x443   :  { %v8144_v61 = vpop.f32.mrf.mxu0 }
 0x444   :  { %6994 = vst.msk [vmem:[%s10547_s3 + $0x7c] sm:$0x3] %vm6931_vm5, %v6929_v47  ;;  %v6861_v39 = vpop.f32.mrf.mxu1 }
 0x445   :  { %v6818_v45 = vpop.f32.mrf.mxu0  ;;  %v6930_v15 = vpack.c.bf16 %v6861_v39, %v6861_v39 }
 0x446   :  { %v8150_v51 = vpop.f32.mrf.mxu1 }
 0x447   :  { %v8145_v53 = vpop.f32.mrf.mxu0  ;;  %6995 = vst.msk [vmem:[%s10547_s3 + $0x7e] sm:$0x3] %vm6931_vm5, %v6930_v15 }
 0x448   :  { %v6864_v41 = vpop.f32.mrf.mxu1 }
 0x44a   :  { %v8151_v52 = vpop.f32.mrf.mxu1 }

</bundles_post_ra>
